<compile_context>
chip_gen: v6e
topology: v6e:2x2x1
jax: 0.10.0
libtpu: 0.0.40
codegen_flags: <defaults>
</compile_context>

<pallas_src>
import functools
import numpy as np
import jax
import jax.numpy as jnp
from jax.experimental import pallas as pl
from jax.experimental.pallas import tpu as pltpu

PRED_LEN = 6      # self.pred_len in the reference
N_STEPS = 4       # the reference forward unrolls exactly 4 recurrent steps


# ------------------------------ helpers -------------------------------------

def _vspec():
    return pl.BlockSpec(memory_space=pltpu.MemorySpace.VMEM)


def _layer_norm(x, g, b, eps):
    mu = jnp.mean(x, axis=-1, keepdims=True)
    var = jnp.mean(jnp.square(x - mu), axis=-1, keepdims=True)
    return (x - mu) * jax.lax.rsqrt(var + eps) * g + b


def make_pos_encoding(max_len, d_model):
    position = np.arange(max_len, dtype=np.float32)[:, None]
    div_term = np.exp(np.arange(0, d_model, 2, dtype=np.float32) *
                      (-np.log(10000.0) / d_model))
    pe = np.zeros((max_len, d_model), dtype=np.float32)
    pe[:, 0::2] = np.sin(position * div_term)
    pe[:, 1::2] = np.cos(position * div_term)
    return pe


class _Packer:
    """Packs many tiny 2-D f32 weights into one slab (rows padded to multiples of 8)."""

    def __init__(self):
        self._parts = []
        self._row = 0
        self._width = 0

    def add(self, arr):
        arr = np.asarray(arr, np.float32)
        assert arr.ndim == 2
        h, w = arr.shape
        self._width = max(self._width, w)
        off = (self._row, h, w)
        self._parts.append((self._row, arr))
        self._row += ((h + 7) // 8) * 8
        return off

    def finalize(self):
        slab = np.zeros((max(8, self._row), self._width), np.float32)
        for r, arr in self._parts:
            slab[r:r + arr.shape[0], :arr.shape[1]] = arr
        return jnp.asarray(slab)


# ----------------------- single fused Pallas kernel -------------------------

def _tv_fused_kernel(x_ref, tgt_ref, slab_ref, out_ref, *, steps_idx, B, in_seq,
                     hidden, window_size, ln_eps):
    """All 4 recurrent steps of TVarchitecture, fully resident in VMEM.

    x_ref   : (B, in_seq, Din) f32   -- the model `input`
    tgt_ref : (B, 24, Din)     f32   -- target, pre-transposed to batch-major
    slab_ref: (R, 64)          f32   -- packed weights (static row offsets in steps_idx)
    out_ref : (N_STEPS*B*6, out_dim) -- hsa of every step, b-major inside each step
    """
    f32 = jnp.float32
    n_w = len(window_size)
    dg = hidden // n_w
    H = hidden

    def load(off):                      # static slice of the packed weight slab
        r, h, w = off
        return slab_ref[r:r + h, 0:w]

    x_in = x_ref[...]                   # loaded once, reused by every step's concat
    tgt = tgt_ref[...]

    mask_cache = {}

    def win_mask(L):                    # built in-kernel from iota, cached per L
        if L not in mask_cache:
            ii = jax.lax.broadcasted_iota(jnp.int32, (L, L), 0)
            jj = jax.lax.broadcasted_iota(jnp.int32, (L, L), 1)
            diff = jnp.abs(ii - jj).astype(f32)
            mask_cache[L] = jnp.where(jj < ii, f32(1e18), diff)
        return mask_cache[L]

    # step 0 input: x_input flattened to (B*in_seq, Din)
    x_flat = jnp.concatenate([x_in[b] for b in range(B)], axis=0)
    step_outs = []

    for s, idx in enumerate(steps_idx):
        L = in_seq if s == 0 else in_seq + 2 * PRED_LEN
        mask = win_mask(L)
        scale = 1.0 / float(np.sqrt(L))   # reference divides scores by sqrt(seq_len)

        # ---- Transformer: enc_input_fc + (positional encoding + bias) -------
        pe_bias = load(idx['pe_bias'])                                   # (L, Dv)
        e = (jnp.dot(x_flat, load(idx['W_enc_in']), preferred_element_type=f32)
             + jnp.concatenate([pe_bias] * B, axis=0))                   # (B*L, Dv)
        # TODO(synk): Dropout is stochastic only in training; inference-mode identity here.

        # ---- encoder layers --------------------------------------------------
        for lidx in idx['layers']:
            W_qq4 = load(lidx['W_qq4']); b_qq4 = load(lidx['b_qq4'])
            W_off = load(lidx['W_offlin2']); b_lin2 = load(lidx['b_lin2'])
            W_fc = load(lidx['W_fc'])
            W_fc2 = load(lidx['W_fc2']); b_fc2 = load(lidx['b_fc2'])
            W_fc1 = load(lidx['W_fc1']); b_fc1 = load(lidx['b_fc1'])
            ln1_g = load(lidx['ln1_g']); ln1_b = load(lidx['ln1_b'])
            ln2_g = load(lidx['ln2_g']); ln2_b = load(lidx['ln2_b'])

            # One matmul produces [q | q@W_qkv] (columns: q, q_attn, k, v).
            qc = jnp.dot(e, W_qq4, preferred_element_type=f32) + b_qq4   # (B*L, 4H)

            # learnedvector: sigmoid(_linear2(offset_predictor(relu(q)))) * L  (EUP path)
            lo = jnp.dot(jnp.maximum(qc[:, 0:H], 0.0), W_off,
                         preferred_element_type=f32) + b_lin2            # (B*L, 1)
            dx_base = pl.reciprocal(1.0 + jnp.exp(-lo), approx=True) * float(L)

            a_parts = []
            for b in range(B):                       # attention is per batch element
                r0 = b * L
                dxb = dx_base[r0:r0 + L, :]
                acc = None
                for g, ws in enumerate(window_size):
                    qg = qc[r0:r0 + L, 1 * H + g * dg:1 * H + (g + 1) * dg]
                    kg = qc[r0:r0 + L, 2 * H + g * dg:2 * H + (g + 1) * dg]
                    vg = qc[r0:r0 + L, 3 * H + g * dg:3 * H + (g + 1) * dg]
                    sc = jax.lax.dot_general(qg, kg, (((1,), (1,)), ((), ())),
                                             preferred_element_type=f32) * scale
                    dx = dxb + float(ws)
                    # deformableAttn == masked_fill(attn, win_mask > dx, -1e18) + attn:
                    # unmasked logits are intentionally doubled by the reference.
                    sc = jnp.where(mask > dx, f32(-1e18), sc) + sc
                    p = jnp.exp(sc - jnp.max(sc, axis=-1, keepdims=True))
                    og = jnp.dot(p, vg, preferred_element_type=f32)          # (L, dg)
                    og = og * pl.reciprocal(jnp.sum(p, axis=-1, keepdims=True),
                                            approx=True)                     # softmax norm
                    # concat over groups then @W_fc == sum of per-group partials
                    contrib = jnp.dot(og, W_fc[g * dg:(g + 1) * dg, :],
                                      preferred_element_type=f32)            # (L, Demb)
                    acc = contrib if acc is None else acc + contrib
                a_parts.append(acc)
            a = jnp.concatenate(a_parts, axis=0)                              # (B*L, Demb)

            x1 = _layer_norm(e + a, ln1_g, ln1_b, ln_eps)
            h = jnp.dot(x1, W_fc2, preferred_element_type=f32) + b_fc2
            h = jnp.dot(jnp.maximum(h, 0.0), W_fc1,
                        preferred_element_type=f32) + b_fc1                   # fc1(relu(fc2(x)))
            e = _layer_norm(x1 + h, ln2_g, ln2_b, ln_eps)

        # ---- output heads (transpose-free, contract the L axis directly) ----
        W_out = load(idx['W_out']); b_out = load(idx['b_out'])
        W_out1 = load(idx['W_out1']); b_out1 = load(idx['b_out1'])
        h1 = jnp.concatenate(
            [jnp.dot(W_out, e[b * L:(b + 1) * L, :], preferred_element_type=f32) + b_out
             for b in range(B)], axis=0)                                      # (B*6, Demb)
        hsa = jnp.dot(h1, W_out1, preferred_element_type=f32) + b_out1        # (B*6, out)
        step_outs.append(hsa)

        # ---- next_cell_input = concat([x_input, hsa, target slice]) in VMEM --
        if s + 1 < N_STEPS:
            nxt = []
            for b in range(B):
                nxt.append(x_in[b])
                nxt.append(hsa[b * PRED_LEN:(b + 1) * PRED_LEN, :])
                nxt.append(tgt[b, s * PRED_LEN:(s + 1) * PRED_LEN, :])
            x_flat = jnp.concatenate(nxt, axis=0)          # (B*(in_seq+12), Din)

    # one dense store of every step's predictions
    out_ref[...] = jnp.concatenate(step_outs, axis=0)       # (N_STEPS*B*6, out)


# ----------------------------- wrapper / forward ------------------------------

def make_forward(steps_idx, *, B, in_seq_length, input_dim, output_dim, hidden_size,
                 window_size, out_seq_length, ln_eps=1e-5):
    assert out_seq_length == N_STEPS * PRED_LEN
    assert hidden_size % len(window_size) == 0
    assert input_dim == output_dim, "recurrent concat requires input_dim == output_dim"

    kernel = functools.partial(
        _tv_fused_kernel, steps_idx=steps_idx, B=B, in_seq=in_seq_length,
        hidden=hidden_size, window_size=tuple(window_size), ln_eps=ln_eps)

    call = pl.pallas_call(
        kernel,
        out_shape=jax.ShapeDtypeStruct((N_STEPS * B * PRED_LEN, output_dim), jnp.float32),
        in_specs=[_vspec(), _vspec(), _vspec()],
        out_specs=_vspec(),
    )

    def forward(slab, x_input, target):
        x_input = x_input.astype(jnp.float32)
        tgt_btd = jnp.transpose(target.astype(jnp.float32), (1, 0, 2))   # (B, 24, Din)
        out = call(x_input, tgt_btd, slab)                               # (4*B*6, out)
        out = out.reshape(N_STEPS, B, PRED_LEN, output_dim)
        return jnp.transpose(out, (0, 2, 1, 3)).reshape(out_seq_length, B, output_dim)

    return forward


# ----------------------------- parameter init --------------------------------

def init_model(key, *, input_dim, output_dim, dim_val, dim_attn, hidden_size,
               embedding_size, learneddim, in_seq_length, n_encoder_layers):
    assert dim_attn == hidden_size, "qkv(query(x)) requires dim_attn == hidden_size"
    kh = [key]

    def nxt():
        kh[0], sub = jax.random.split(kh[0])
        return sub

    def mat(din, dout):
        return np.asarray(jax.random.normal(nxt(), (din, dout), jnp.float32)) * 0.1

    def row(d):
        return mat(1, d)

    pe = make_pos_encoding(in_seq_length + 2 * PRED_LEN, dim_val)
    packer = _Packer()
    steps_idx = []
    for i in range(N_STEPS):       # the reference forward only ever uses modules [0:4]
        L = in_seq_length if i == 0 else in_seq_length + 2 * PRED_LEN
        W_enc_in = mat(input_dim, dim_val)
        b_enc_in = row(dim_val)
        idx = {
            'W_enc_in': packer.add(W_enc_in),
            'pe_bias': packer.add(pe[:L] + b_enc_in),      # pos-enc + bias folded
        }
        layers = []
        for _ in range(n_encoder_layers):
            W_q = mat(dim_val, dim_attn)                   # Query projection, no bias
            W_qkv = mat(hidden_size, 3 * hidden_size)
            b_qkv = row(3 * hidden_size)
            W_off = mat(hidden_size, learneddim)           # offset_predictor, no bias
            W_lin2 = mat(learneddim, 1)
            b_lin2 = row(1)
            W_fc = mat(hidden_size, embedding_size)        # MHA output proj, no bias
            W_fc1 = mat(dim_val, dim_val); b_fc1 = row(dim_val)
            W_fc2 = mat(dim_val, dim_val); b_fc2 = row(dim_val)
            # Fold Query into qkv and fuse both matmuls into one RHS: [W_q | W_q@W_qkv]
            W_qq4 = np.concatenate([W_q, W_q @ W_qkv], axis=1)              # (Dv, 4H)
            b_qq4 = np.concatenate([np.zeros((1, dim_attn), np.float32), b_qkv], axis=1)
            layers.append({
                'W_qq4': packer.add(W_qq4),
                'b_qq4': packer.add(b_qq4),
                'W_offlin2': packer.add(W_off @ W_lin2),   # fold, no nonlinearity between
                'b_lin2': packer.add(b_lin2),
                'W_fc': packer.add(W_fc),
                'W_fc2': packer.add(W_fc2), 'b_fc2': packer.add(b_fc2),
                'W_fc1': packer.add(W_fc1), 'b_fc1': packer.add(b_fc1),
                'ln1_g': packer.add(np.ones((1, dim_val), np.float32)),
                'ln1_b': packer.add(np.zeros((1, dim_val), np.float32)),
                'ln2_g': packer.add(np.ones((1, dim_val), np.float32)),
                'ln2_b': packer.add(np.zeros((1, dim_val), np.float32)),
            })
        idx['layers'] = tuple(layers)
        idx['W_out'] = packer.add(mat(PRED_LEN, L))        # torch Linear layout (out, in)
        idx['b_out'] = packer.add(mat(PRED_LEN, 1))
        idx['W_out1'] = packer.add(mat(embedding_size, output_dim))
        idx['b_out1'] = packer.add(row(output_dim))
        steps_idx.append(idx)
    return packer.finalize(), tuple(steps_idx)


# --------------------------------- main ---------------------------------------

if __name__ == "__main__":
    B = 2
    input_dim = 7            # forced by the recurrent concat with (B, 6, 7) predictions
    output_dim = 7
    in_seq_length = 8
    out_seq_length = 24      # 4 unrolled steps * pred_len(6)
    n_encoder_layers = 1
    window_size = (2, 4)     # hidden_size must be divisible by len(window_size)
    learneddim = 8
    hidden_size = 16
    embedding_size = 16
    dim_val = embedding_size
    dim_attn = hidden_size

    key = jax.random.PRNGKey(0)
    kp, kx, kt = jax.random.split(key, 3)
    slab, steps_idx = init_model(
        kp, input_dim=input_dim, output_dim=output_dim, dim_val=dim_val,
        dim_attn=dim_attn, hidden_size=hidden_size, embedding_size=embedding_size,
        learneddim=learneddim, in_seq_length=in_seq_length,
        n_encoder_layers=n_encoder_layers)

    x_input = jax.random.normal(kx, (B, in_seq_length, input_dim), jnp.float32)
    target = jax.random.normal(kt, (out_seq_length, B, input_dim), jnp.float32)
    # input_emb / target_emb are unused by the reference forward -> not passed.

    fwd = jax.jit(make_forward(
        steps_idx, B=B, in_seq_length=in_seq_length, input_dim=input_dim,
        output_dim=output_dim, hidden_size=hidden_size, window_size=window_size,
        out_seq_length=out_seq_length))

    out = jax.block_until_ready(fwd(slab, x_input, target))
    assert out.shape == (out_seq_length, B, output_dim)
    assert bool(jnp.all(jnp.isfinite(out)))
    print("KERNEL_OK")
</pallas_src>

<mosaic_0001>
module attributes {stable_mosaic.version = 11 : i64} {
  func.func @_tv_fused_kernel(%arg0: memref<2x8x7xf32, #tpu.memory_space<vmem>>, %arg1: memref<2x24x7xf32, #tpu.memory_space<vmem>>, %arg2: memref<848x64xf32, #tpu.memory_space<vmem>>, %arg3: memref<48x7xf32, #tpu.memory_space<vmem>>) attributes {dimension_semantics = [], scalar_prefetch = 0 : i64, scratch_operands = 0 : i64, tpu.core_type = #tpu.core_type<tc>} {
    %c0 = arith.constant 0 : index
    %c0_0 = arith.constant 0 : index
    %c0_1 = arith.constant 0 : index
    %0 = vector.load %arg0[%c0, %c0_0, %c0_1] : memref<2x8x7xf32, #tpu.memory_space<vmem>>, vector<2x8x7xf32>
    %c0_2 = arith.constant 0 : index
    %c0_3 = arith.constant 0 : index
    %c0_4 = arith.constant 0 : index
    %1 = vector.load %arg1[%c0_2, %c0_3, %c0_4] : memref<2x24x7xf32, #tpu.memory_space<vmem>>, vector<2x24x7xf32>
    %2 = vector.extract_strided_slice %0 {offsets = [0, 0, 0], sizes = [1, 8, 7], strides = [1, 1, 1]} : vector<2x8x7xf32> to vector<1x8x7xf32>
    %3 = vector.shape_cast %2 : vector<1x8x7xf32> to vector<8x7xf32>
    %4 = vector.extract_strided_slice %0 {offsets = [1, 0, 0], sizes = [1, 8, 7], strides = [1, 1, 1]} : vector<2x8x7xf32> to vector<1x8x7xf32>
    %5 = vector.shape_cast %4 : vector<1x8x7xf32> to vector<8x7xf32>
    %6 = tpu.concatenate %3, %5 in 0 : vector<8x7xf32>, vector<8x7xf32> -> vector<16x7xf32>
    %7 = tpu.iota {dimensions = array<i32: 0>} : vector<8x8xi32>
    %8 = tpu.iota {dimensions = array<i32: 1>} : vector<8x8xi32>
    %9 = arith.subi %7, %8 : vector<8x8xi32>
    %10 = math.absi %9 : vector<8x8xi32>
    %11 = arith.sitofp %10 : vector<8x8xi32> to vector<8x8xf32>
    %12 = arith.cmpi slt, %8, %7 : vector<8x8xi32>
    %cst = arith.constant 9.99999984E+17 : f32
    %13 = vector.broadcast %cst : f32 to vector<8x8xf32>
    %14 = arith.select %12, %13, %11 : vector<8x8xi1>, vector<8x8xf32>
    %c8 = arith.constant 8 : index
    %c0_5 = arith.constant 0 : index
    %15 = vector.load %arg2[%c8, %c0_5] : memref<848x64xf32, #tpu.memory_space<vmem>>, vector<8x16xf32>
    %c0_6 = arith.constant 0 : index
    %c0_7 = arith.constant 0 : index
    %16 = vector.load %arg2[%c0_6, %c0_7] : memref<848x64xf32, #tpu.memory_space<vmem>>, vector<7x16xf32>
    %cst_8 = arith.constant dense<0.000000e+00> : vector<16x16xf32>
    %17 = tpu.matmul %6, %16, %cst_8 {dimension_numbers = #tpu.dot_dimension_numbers<[1], [0], [0], [1], [0, 0, 1, 1], [], []>} : vector<16x7xf32>, vector<7x16xf32>, vector<16x16xf32> -> vector<16x16xf32>
    %18 = tpu.concatenate %15, %15 in 0 : vector<8x16xf32>, vector<8x16xf32> -> vector<16x16xf32>
    %19 = arith.addf %17, %18 : vector<16x16xf32>
    %c16 = arith.constant 16 : index
    %c0_9 = arith.constant 0 : index
    %20 = vector.load %arg2[%c16, %c0_9] : memref<848x64xf32, #tpu.memory_space<vmem>>, vector<16x64xf32>
    %c32 = arith.constant 32 : index
    %c0_10 = arith.constant 0 : index
    %21 = vector.load %arg2[%c32, %c0_10] : memref<848x64xf32, #tpu.memory_space<vmem>>, vector<1x64xf32>
    %c40 = arith.constant 40 : index
    %c0_11 = arith.constant 0 : index
    %22 = vector.load %arg2[%c40, %c0_11] : memref<848x64xf32, #tpu.memory_space<vmem>>, vector<16x1xf32>
    %c56 = arith.constant 56 : index
    %c0_12 = arith.constant 0 : index
    %23 = vector.load %arg2[%c56, %c0_12] : memref<848x64xf32, #tpu.memory_space<vmem>>, vector<1x1xf32>
    %c64 = arith.constant 64 : index
    %c0_13 = arith.constant 0 : index
    %24 = vector.load %arg2[%c64, %c0_13] : memref<848x64xf32, #tpu.memory_space<vmem>>, vector<16x16xf32>
    %c80 = arith.constant 80 : index
    %c0_14 = arith.constant 0 : index
    %25 = vector.load %arg2[%c80, %c0_14] : memref<848x64xf32, #tpu.memory_space<vmem>>, vector<16x16xf32>
    %c96 = arith.constant 96 : index
    %c0_15 = arith.constant 0 : index
    %26 = vector.load %arg2[%c96, %c0_15] : memref<848x64xf32, #tpu.memory_space<vmem>>, vector<1x16xf32>
    %c104 = arith.constant 104 : index
    %c0_16 = arith.constant 0 : index
    %27 = vector.load %arg2[%c104, %c0_16] : memref<848x64xf32, #tpu.memory_space<vmem>>, vector<16x16xf32>
    %c120 = arith.constant 120 : index
    %c0_17 = arith.constant 0 : index
    %28 = vector.load %arg2[%c120, %c0_17] : memref<848x64xf32, #tpu.memory_space<vmem>>, vector<1x16xf32>
    %c128 = arith.constant 128 : index
    %c0_18 = arith.constant 0 : index
    %29 = vector.load %arg2[%c128, %c0_18] : memref<848x64xf32, #tpu.memory_space<vmem>>, vector<1x16xf32>
    %c136 = arith.constant 136 : index
    %c0_19 = arith.constant 0 : index
    %30 = vector.load %arg2[%c136, %c0_19] : memref<848x64xf32, #tpu.memory_space<vmem>>, vector<1x16xf32>
    %c144 = arith.constant 144 : index
    %c0_20 = arith.constant 0 : index
    %31 = vector.load %arg2[%c144, %c0_20] : memref<848x64xf32, #tpu.memory_space<vmem>>, vector<1x16xf32>
    %c152 = arith.constant 152 : index
    %c0_21 = arith.constant 0 : index
    %32 = vector.load %arg2[%c152, %c0_21] : memref<848x64xf32, #tpu.memory_space<vmem>>, vector<1x16xf32>
    %cst_22 = arith.constant dense<0.000000e+00> : vector<16x64xf32>
    %33 = tpu.matmul %19, %20, %cst_22 {dimension_numbers = #tpu.dot_dimension_numbers<[1], [0], [0], [1], [0, 0, 1, 1], [], []>} : vector<16x16xf32>, vector<16x64xf32>, vector<16x64xf32> -> vector<16x64xf32>
    %34 = vector.broadcast %21 : vector<1x64xf32> to vector<16x64xf32>
    %35 = arith.addf %33, %34 : vector<16x64xf32>
    %36 = vector.extract_strided_slice %35 {offsets = [0, 0], sizes = [16, 16], strides = [1, 1]} : vector<16x64xf32> to vector<16x16xf32>
    %cst_23 = arith.constant 0.000000e+00 : f32
    %37 = vector.broadcast %cst_23 : f32 to vector<16x16xf32>
    %38 = arith.maximumf %36, %37 : vector<16x16xf32>
    %cst_24 = arith.constant dense<0.000000e+00> : vector<16x1xf32>
    %39 = tpu.matmul %38, %22, %cst_24 {dimension_numbers = #tpu.dot_dimension_numbers<[1], [0], [0], [1], [0, 0, 1, 1], [], []>} : vector<16x16xf32>, vector<16x1xf32>, vector<16x1xf32> -> vector<16x1xf32>
    %40 = vector.broadcast %23 : vector<1x1xf32> to vector<16x1xf32>
    %41 = arith.addf %39, %40 : vector<16x1xf32>
    %cst_25 = arith.constant 0.000000e+00 : f32
    %42 = vector.broadcast %cst_25 : f32 to vector<16x1xf32>
    %43 = arith.subf %42, %41 : vector<16x1xf32>
    %44 = math.exp %43 : vector<16x1xf32>
    %cst_26 = arith.constant 1.000000e+00 : f32
    %45 = vector.broadcast %cst_26 : f32 to vector<16x1xf32>
    %46 = arith.addf %45, %44 : vector<16x1xf32>
    %47 = tpu.reciprocal %46 {approx = true} : vector<16x1xf32> -> vector<16x1xf32>
    %cst_27 = arith.constant 8.000000e+00 : f32
    %48 = vector.broadcast %cst_27 : f32 to vector<16x1xf32>
    %49 = arith.mulf %47, %48 : vector<16x1xf32>
    %50 = vector.extract_strided_slice %49 {offsets = [0, 0], sizes = [8, 1], strides = [1, 1]} : vector<16x1xf32> to vector<8x1xf32>
    %51 = vector.extract_strided_slice %35 {offsets = [0, 16], sizes = [8, 8], strides = [1, 1]} : vector<16x64xf32> to vector<8x8xf32>
    %52 = vector.extract_strided_slice %35 {offsets = [0, 32], sizes = [8, 8], strides = [1, 1]} : vector<16x64xf32> to vector<8x8xf32>
    %53 = vector.extract_strided_slice %35 {offsets = [0, 48], sizes = [8, 8], strides = [1, 1]} : vector<16x64xf32> to vector<8x8xf32>
    %cst_28 = arith.constant dense<0.000000e+00> : vector<8x8xf32>
    %54 = tpu.matmul %51, %52, %cst_28 {dimension_numbers = #tpu.dot_dimension_numbers<[1], [1], [0], [0], [0, 0, 1, 0], [], []>} : vector<8x8xf32>, vector<8x8xf32>, vector<8x8xf32> -> vector<8x8xf32>
    %cst_29 = arith.constant 0.353553385 : f32
    %55 = vector.broadcast %cst_29 : f32 to vector<8x8xf32>
    %56 = arith.mulf %54, %55 : vector<8x8xf32>
    %cst_30 = arith.constant 2.000000e+00 : f32
    %57 = vector.broadcast %cst_30 : f32 to vector<8x1xf32>
    %58 = arith.addf %50, %57 : vector<8x1xf32>
    %59 = vector.broadcast %58 : vector<8x1xf32> to vector<8x8xf32>
    %60 = arith.cmpf ogt, %14, %59 : vector<8x8xf32>
    %cst_31 = arith.constant -9.99999984E+17 : f32
    %61 = vector.broadcast %cst_31 : f32 to vector<8x8xf32>
    %62 = arith.select %60, %61, %56 : vector<8x8xi1>, vector<8x8xf32>
    %63 = arith.addf %62, %56 : vector<8x8xf32>
    %cst_32 = arith.constant dense<0xFF800000> : vector<8xf32>
    %64 = vector.multi_reduction <maximumf>, %63, %cst_32 [1] : vector<8x8xf32> to vector<8xf32>
    %65 = vector.shape_cast %64 : vector<8xf32> to vector<8x1xf32>
    %66 = vector.broadcast %65 : vector<8x1xf32> to vector<8x8xf32>
    %67 = arith.subf %63, %66 : vector<8x8xf32>
    %68 = math.exp %67 : vector<8x8xf32>
    %cst_33 = arith.constant dense<0.000000e+00> : vector<8x8xf32>
    %69 = tpu.matmul %68, %53, %cst_33 {dimension_numbers = #tpu.dot_dimension_numbers<[1], [0], [0], [1], [0, 0, 1, 1], [], []>} : vector<8x8xf32>, vector<8x8xf32>, vector<8x8xf32> -> vector<8x8xf32>
    %cst_34 = arith.constant dense<0.000000e+00> : vector<8xf32>
    %70 = vector.multi_reduction <add>, %68, %cst_34 [1] : vector<8x8xf32> to vector<8xf32>
    %71 = vector.shape_cast %70 : vector<8xf32> to vector<8x1xf32>
    %72 = tpu.reciprocal %71 {approx = true} : vector<8x1xf32> -> vector<8x1xf32>
    %73 = vector.broadcast %72 : vector<8x1xf32> to vector<8x8xf32>
    %74 = arith.mulf %69, %73 : vector<8x8xf32>
    %75 = vector.extract_strided_slice %24 {offsets = [0, 0], sizes = [8, 16], strides = [1, 1]} : vector<16x16xf32> to vector<8x16xf32>
    %cst_35 = arith.constant dense<0.000000e+00> : vector<8x16xf32>
    %76 = tpu.matmul %74, %75, %cst_35 {dimension_numbers = #tpu.dot_dimension_numbers<[1], [0], [0], [1], [0, 0, 1, 1], [], []>} : vector<8x8xf32>, vector<8x16xf32>, vector<8x16xf32> -> vector<8x16xf32>
    %77 = vector.extract_strided_slice %35 {offsets = [0, 24], sizes = [8, 8], strides = [1, 1]} : vector<16x64xf32> to vector<8x8xf32>
    %78 = vector.extract_strided_slice %35 {offsets = [0, 40], sizes = [8, 8], strides = [1, 1]} : vector<16x64xf32> to vector<8x8xf32>
    %79 = vector.extract_strided_slice %35 {offsets = [0, 56], sizes = [8, 8], strides = [1, 1]} : vector<16x64xf32> to vector<8x8xf32>
    %cst_36 = arith.constant dense<0.000000e+00> : vector<8x8xf32>
    %80 = tpu.matmul %77, %78, %cst_36 {dimension_numbers = #tpu.dot_dimension_numbers<[1], [1], [0], [0], [0, 0, 1, 0], [], []>} : vector<8x8xf32>, vector<8x8xf32>, vector<8x8xf32> -> vector<8x8xf32>
    %cst_37 = arith.constant 0.353553385 : f32
    %81 = vector.broadcast %cst_37 : f32 to vector<8x8xf32>
    %82 = arith.mulf %80, %81 : vector<8x8xf32>
    %cst_38 = arith.constant 4.000000e+00 : f32
    %83 = vector.broadcast %cst_38 : f32 to vector<8x1xf32>
    %84 = arith.addf %50, %83 : vector<8x1xf32>
    %85 = vector.broadcast %84 : vector<8x1xf32> to vector<8x8xf32>
    %86 = arith.cmpf ogt, %14, %85 : vector<8x8xf32>
    %cst_39 = arith.constant -9.99999984E+17 : f32
    %87 = vector.broadcast %cst_39 : f32 to vector<8x8xf32>
    %88 = arith.select %86, %87, %82 : vector<8x8xi1>, vector<8x8xf32>
    %89 = arith.addf %88, %82 : vector<8x8xf32>
    %cst_40 = arith.constant dense<0xFF800000> : vector<8xf32>
    %90 = vector.multi_reduction <maximumf>, %89, %cst_40 [1] : vector<8x8xf32> to vector<8xf32>
    %91 = vector.shape_cast %90 : vector<8xf32> to vector<8x1xf32>
    %92 = vector.broadcast %91 : vector<8x1xf32> to vector<8x8xf32>
    %93 = arith.subf %89, %92 : vector<8x8xf32>
    %94 = math.exp %93 : vector<8x8xf32>
    %cst_41 = arith.constant dense<0.000000e+00> : vector<8x8xf32>
    %95 = tpu.matmul %94, %79, %cst_41 {dimension_numbers = #tpu.dot_dimension_numbers<[1], [0], [0], [1], [0, 0, 1, 1], [], []>} : vector<8x8xf32>, vector<8x8xf32>, vector<8x8xf32> -> vector<8x8xf32>
    %cst_42 = arith.constant dense<0.000000e+00> : vector<8xf32>
    %96 = vector.multi_reduction <add>, %94, %cst_42 [1] : vector<8x8xf32> to vector<8xf32>
    %97 = vector.shape_cast %96 : vector<8xf32> to vector<8x1xf32>
    %98 = tpu.reciprocal %97 {approx = true} : vector<8x1xf32> -> vector<8x1xf32>
    %99 = vector.broadcast %98 : vector<8x1xf32> to vector<8x8xf32>
    %100 = arith.mulf %95, %99 : vector<8x8xf32>
    %101 = vector.extract_strided_slice %24 {offsets = [8, 0], sizes = [8, 16], strides = [1, 1]} : vector<16x16xf32> to vector<8x16xf32>
    %cst_43 = arith.constant dense<0.000000e+00> : vector<8x16xf32>
    %102 = tpu.matmul %100, %101, %cst_43 {dimension_numbers = #tpu.dot_dimension_numbers<[1], [0], [0], [1], [0, 0, 1, 1], [], []>} : vector<8x8xf32>, vector<8x16xf32>, vector<8x16xf32> -> vector<8x16xf32>
    %103 = arith.addf %76, %102 : vector<8x16xf32>
    %104 = vector.extract_strided_slice %49 {offsets = [8, 0], sizes = [8, 1], strides = [1, 1]} : vector<16x1xf32> to vector<8x1xf32>
    %105 = vector.extract_strided_slice %35 {offsets = [8, 16], sizes = [8, 8], strides = [1, 1]} : vector<16x64xf32> to vector<8x8xf32>
    %106 = vector.extract_strided_slice %35 {offsets = [8, 32], sizes = [8, 8], strides = [1, 1]} : vector<16x64xf32> to vector<8x8xf32>
    %107 = vector.extract_strided_slice %35 {offsets = [8, 48], sizes = [8, 8], strides = [1, 1]} : vector<16x64xf32> to vector<8x8xf32>
    %cst_44 = arith.constant dense<0.000000e+00> : vector<8x8xf32>
    %108 = tpu.matmul %105, %106, %cst_44 {dimension_numbers = #tpu.dot_dimension_numbers<[1], [1], [0], [0], [0, 0, 1, 0], [], []>} : vector<8x8xf32>, vector<8x8xf32>, vector<8x8xf32> -> vector<8x8xf32>
    %cst_45 = arith.constant 0.353553385 : f32
    %109 = vector.broadcast %cst_45 : f32 to vector<8x8xf32>
    %110 = arith.mulf %108, %109 : vector<8x8xf32>
    %cst_46 = arith.constant 2.000000e+00 : f32
    %111 = vector.broadcast %cst_46 : f32 to vector<8x1xf32>
    %112 = arith.addf %104, %111 : vector<8x1xf32>
    %113 = vector.broadcast %112 : vector<8x1xf32> to vector<8x8xf32>
    %114 = arith.cmpf ogt, %14, %113 : vector<8x8xf32>
    %cst_47 = arith.constant -9.99999984E+17 : f32
    %115 = vector.broadcast %cst_47 : f32 to vector<8x8xf32>
    %116 = arith.select %114, %115, %110 : vector<8x8xi1>, vector<8x8xf32>
    %117 = arith.addf %116, %110 : vector<8x8xf32>
    %cst_48 = arith.constant dense<0xFF800000> : vector<8xf32>
    %118 = vector.multi_reduction <maximumf>, %117, %cst_48 [1] : vector<8x8xf32> to vector<8xf32>
    %119 = vector.shape_cast %118 : vector<8xf32> to vector<8x1xf32>
    %120 = vector.broadcast %119 : vector<8x1xf32> to vector<8x8xf32>
    %121 = arith.subf %117, %120 : vector<8x8xf32>
    %122 = math.exp %121 : vector<8x8xf32>
    %cst_49 = arith.constant dense<0.000000e+00> : vector<8x8xf32>
    %123 = tpu.matmul %122, %107, %cst_49 {dimension_numbers = #tpu.dot_dimension_numbers<[1], [0], [0], [1], [0, 0, 1, 1], [], []>} : vector<8x8xf32>, vector<8x8xf32>, vector<8x8xf32> -> vector<8x8xf32>
    %cst_50 = arith.constant dense<0.000000e+00> : vector<8xf32>
    %124 = vector.multi_reduction <add>, %122, %cst_50 [1] : vector<8x8xf32> to vector<8xf32>
    %125 = vector.shape_cast %124 : vector<8xf32> to vector<8x1xf32>
    %126 = tpu.reciprocal %125 {approx = true} : vector<8x1xf32> -> vector<8x1xf32>
    %127 = vector.broadcast %126 : vector<8x1xf32> to vector<8x8xf32>
    %128 = arith.mulf %123, %127 : vector<8x8xf32>
    %129 = vector.extract_strided_slice %24 {offsets = [0, 0], sizes = [8, 16], strides = [1, 1]} : vector<16x16xf32> to vector<8x16xf32>
    %cst_51 = arith.constant dense<0.000000e+00> : vector<8x16xf32>
    %130 = tpu.matmul %128, %129, %cst_51 {dimension_numbers = #tpu.dot_dimension_numbers<[1], [0], [0], [1], [0, 0, 1, 1], [], []>} : vector<8x8xf32>, vector<8x16xf32>, vector<8x16xf32> -> vector<8x16xf32>
    %131 = vector.extract_strided_slice %35 {offsets = [8, 24], sizes = [8, 8], strides = [1, 1]} : vector<16x64xf32> to vector<8x8xf32>
    %132 = vector.extract_strided_slice %35 {offsets = [8, 40], sizes = [8, 8], strides = [1, 1]} : vector<16x64xf32> to vector<8x8xf32>
    %133 = vector.extract_strided_slice %35 {offsets = [8, 56], sizes = [8, 8], strides = [1, 1]} : vector<16x64xf32> to vector<8x8xf32>
    %cst_52 = arith.constant dense<0.000000e+00> : vector<8x8xf32>
    %134 = tpu.matmul %131, %132, %cst_52 {dimension_numbers = #tpu.dot_dimension_numbers<[1], [1], [0], [0], [0, 0, 1, 0], [], []>} : vector<8x8xf32>, vector<8x8xf32>, vector<8x8xf32> -> vector<8x8xf32>
    %cst_53 = arith.constant 0.353553385 : f32
    %135 = vector.broadcast %cst_53 : f32 to vector<8x8xf32>
    %136 = arith.mulf %134, %135 : vector<8x8xf32>
    %cst_54 = arith.constant 4.000000e+00 : f32
    %137 = vector.broadcast %cst_54 : f32 to vector<8x1xf32>
    %138 = arith.addf %104, %137 : vector<8x1xf32>
    %139 = vector.broadcast %138 : vector<8x1xf32> to vector<8x8xf32>
    %140 = arith.cmpf ogt, %14, %139 : vector<8x8xf32>
    %cst_55 = arith.constant -9.99999984E+17 : f32
    %141 = vector.broadcast %cst_55 : f32 to vector<8x8xf32>
    %142 = arith.select %140, %141, %136 : vector<8x8xi1>, vector<8x8xf32>
    %143 = arith.addf %142, %136 : vector<8x8xf32>
    %cst_56 = arith.constant dense<0xFF800000> : vector<8xf32>
    %144 = vector.multi_reduction <maximumf>, %143, %cst_56 [1] : vector<8x8xf32> to vector<8xf32>
    %145 = vector.shape_cast %144 : vector<8xf32> to vector<8x1xf32>
    %146 = vector.broadcast %145 : vector<8x1xf32> to vector<8x8xf32>
    %147 = arith.subf %143, %146 : vector<8x8xf32>
    %148 = math.exp %147 : vector<8x8xf32>
    %cst_57 = arith.constant dense<0.000000e+00> : vector<8x8xf32>
    %149 = tpu.matmul %148, %133, %cst_57 {dimension_numbers = #tpu.dot_dimension_numbers<[1], [0], [0], [1], [0, 0, 1, 1], [], []>} : vector<8x8xf32>, vector<8x8xf32>, vector<8x8xf32> -> vector<8x8xf32>
    %cst_58 = arith.constant dense<0.000000e+00> : vector<8xf32>
    %150 = vector.multi_reduction <add>, %148, %cst_58 [1] : vector<8x8xf32> to vector<8xf32>
    %151 = vector.shape_cast %150 : vector<8xf32> to vector<8x1xf32>
    %152 = tpu.reciprocal %151 {approx = true} : vector<8x1xf32> -> vector<8x1xf32>
    %153 = vector.broadcast %152 : vector<8x1xf32> to vector<8x8xf32>
    %154 = arith.mulf %149, %153 : vector<8x8xf32>
    %155 = vector.extract_strided_slice %24 {offsets = [8, 0], sizes = [8, 16], strides = [1, 1]} : vector<16x16xf32> to vector<8x16xf32>
    %cst_59 = arith.constant dense<0.000000e+00> : vector<8x16xf32>
    %156 = tpu.matmul %154, %155, %cst_59 {dimension_numbers = #tpu.dot_dimension_numbers<[1], [0], [0], [1], [0, 0, 1, 1], [], []>} : vector<8x8xf32>, vector<8x16xf32>, vector<8x16xf32> -> vector<8x16xf32>
    %157 = arith.addf %130, %156 : vector<8x16xf32>
    %158 = tpu.concatenate %103, %157 in 0 : vector<8x16xf32>, vector<8x16xf32> -> vector<16x16xf32>
    %159 = arith.addf %19, %158 : vector<16x16xf32>
    %cst_60 = arith.constant dense<0.000000e+00> : vector<16xf32>
    %160 = vector.multi_reduction <add>, %159, %cst_60 [1] : vector<16x16xf32> to vector<16xf32>
    %161 = vector.shape_cast %160 : vector<16xf32> to vector<16x1xf32>
    %cst_61 = arith.constant 1.600000e+01 : f32
    %162 = vector.broadcast %cst_61 : f32 to vector<16x1xf32>
    %163 = arith.divf %161, %162 : vector<16x1xf32>
    %164 = vector.broadcast %163 : vector<16x1xf32> to vector<16x16xf32>
    %165 = arith.subf %159, %164 : vector<16x16xf32>
    %166 = arith.mulf %165, %165 : vector<16x16xf32>
    %cst_62 = arith.constant dense<0.000000e+00> : vector<16xf32>
    %167 = vector.multi_reduction <add>, %166, %cst_62 [1] : vector<16x16xf32> to vector<16xf32>
    %168 = vector.shape_cast %167 : vector<16xf32> to vector<16x1xf32>
    %cst_63 = arith.constant 1.600000e+01 : f32
    %169 = vector.broadcast %cst_63 : f32 to vector<16x1xf32>
    %170 = arith.divf %168, %169 : vector<16x1xf32>
    %171 = vector.broadcast %163 : vector<16x1xf32> to vector<16x16xf32>
    %172 = arith.subf %159, %171 : vector<16x16xf32>
    %cst_64 = arith.constant 9.99999974E-6 : f32
    %173 = vector.broadcast %cst_64 : f32 to vector<16x1xf32>
    %174 = arith.addf %170, %173 : vector<16x1xf32>
    %175 = math.rsqrt %174 : vector<16x1xf32>
    %176 = vector.broadcast %175 : vector<16x1xf32> to vector<16x16xf32>
    %177 = arith.mulf %172, %176 : vector<16x16xf32>
    %178 = vector.broadcast %29 : vector<1x16xf32> to vector<16x16xf32>
    %179 = arith.mulf %177, %178 : vector<16x16xf32>
    %180 = vector.broadcast %30 : vector<1x16xf32> to vector<16x16xf32>
    %181 = arith.addf %179, %180 : vector<16x16xf32>
    %cst_65 = arith.constant dense<0.000000e+00> : vector<16x16xf32>
    %182 = tpu.matmul %181, %25, %cst_65 {dimension_numbers = #tpu.dot_dimension_numbers<[1], [0], [0], [1], [0, 0, 1, 1], [], []>} : vector<16x16xf32>, vector<16x16xf32>, vector<16x16xf32> -> vector<16x16xf32>
    %183 = vector.broadcast %26 : vector<1x16xf32> to vector<16x16xf32>
    %184 = arith.addf %182, %183 : vector<16x16xf32>
    %cst_66 = arith.constant 0.000000e+00 : f32
    %185 = vector.broadcast %cst_66 : f32 to vector<16x16xf32>
    %186 = arith.maximumf %184, %185 : vector<16x16xf32>
    %cst_67 = arith.constant dense<0.000000e+00> : vector<16x16xf32>
    %187 = tpu.matmul %186, %27, %cst_67 {dimension_numbers = #tpu.dot_dimension_numbers<[1], [0], [0], [1], [0, 0, 1, 1], [], []>} : vector<16x16xf32>, vector<16x16xf32>, vector<16x16xf32> -> vector<16x16xf32>
    %188 = vector.broadcast %28 : vector<1x16xf32> to vector<16x16xf32>
    %189 = arith.addf %187, %188 : vector<16x16xf32>
    %190 = arith.addf %181, %189 : vector<16x16xf32>
    %cst_68 = arith.constant dense<0.000000e+00> : vector<16xf32>
    %191 = vector.multi_reduction <add>, %190, %cst_68 [1] : vector<16x16xf32> to vector<16xf32>
    %192 = vector.shape_cast %191 : vector<16xf32> to vector<16x1xf32>
    %cst_69 = arith.constant 1.600000e+01 : f32
    %193 = vector.broadcast %cst_69 : f32 to vector<16x1xf32>
    %194 = arith.divf %192, %193 : vector<16x1xf32>
    %195 = vector.broadcast %194 : vector<16x1xf32> to vector<16x16xf32>
    %196 = arith.subf %190, %195 : vector<16x16xf32>
    %197 = arith.mulf %196, %196 : vector<16x16xf32>
    %cst_70 = arith.constant dense<0.000000e+00> : vector<16xf32>
    %198 = vector.multi_reduction <add>, %197, %cst_70 [1] : vector<16x16xf32> to vector<16xf32>
    %199 = vector.shape_cast %198 : vector<16xf32> to vector<16x1xf32>
    %cst_71 = arith.constant 1.600000e+01 : f32
    %200 = vector.broadcast %cst_71 : f32 to vector<16x1xf32>
    %201 = arith.divf %199, %200 : vector<16x1xf32>
    %202 = vector.broadcast %194 : vector<16x1xf32> to vector<16x16xf32>
    %203 = arith.subf %190, %202 : vector<16x16xf32>
    %cst_72 = arith.constant 9.99999974E-6 : f32
    %204 = vector.broadcast %cst_72 : f32 to vector<16x1xf32>
    %205 = arith.addf %201, %204 : vector<16x1xf32>
    %206 = math.rsqrt %205 : vector<16x1xf32>
    %207 = vector.broadcast %206 : vector<16x1xf32> to vector<16x16xf32>
    %208 = arith.mulf %203, %207 : vector<16x16xf32>
    %209 = vector.broadcast %31 : vector<1x16xf32> to vector<16x16xf32>
    %210 = arith.mulf %208, %209 : vector<16x16xf32>
    %211 = vector.broadcast %32 : vector<1x16xf32> to vector<16x16xf32>
    %212 = arith.addf %210, %211 : vector<16x16xf32>
    %c160 = arith.constant 160 : index
    %c0_73 = arith.constant 0 : index
    %213 = vector.load %arg2[%c160, %c0_73] : memref<848x64xf32, #tpu.memory_space<vmem>>, vector<6x8xf32>
    %c168 = arith.constant 168 : index
    %c0_74 = arith.constant 0 : index
    %214 = vector.load %arg2[%c168, %c0_74] : memref<848x64xf32, #tpu.memory_space<vmem>>, vector<6x1xf32>
    %c176 = arith.constant 176 : index
    %c0_75 = arith.constant 0 : index
    %215 = vector.load %arg2[%c176, %c0_75] : memref<848x64xf32, #tpu.memory_space<vmem>>, vector<16x7xf32>
    %c192 = arith.constant 192 : index
    %c0_76 = arith.constant 0 : index
    %216 = vector.load %arg2[%c192, %c0_76] : memref<848x64xf32, #tpu.memory_space<vmem>>, vector<1x7xf32>
    %217 = vector.extract_strided_slice %212 {offsets = [0, 0], sizes = [8, 16], strides = [1, 1]} : vector<16x16xf32> to vector<8x16xf32>
    %cst_77 = arith.constant dense<0.000000e+00> : vector<6x16xf32>
    %218 = tpu.matmul %213, %217, %cst_77 {dimension_numbers = #tpu.dot_dimension_numbers<[1], [0], [0], [1], [0, 0, 1, 1], [], []>} : vector<6x8xf32>, vector<8x16xf32>, vector<6x16xf32> -> vector<6x16xf32>
    %219 = vector.broadcast %214 : vector<6x1xf32> to vector<6x16xf32>
    %220 = arith.addf %218, %219 : vector<6x16xf32>
    %221 = vector.extract_strided_slice %212 {offsets = [8, 0], sizes = [8, 16], strides = [1, 1]} : vector<16x16xf32> to vector<8x16xf32>
    %cst_78 = arith.constant dense<0.000000e+00> : vector<6x16xf32>
    %222 = tpu.matmul %213, %221, %cst_78 {dimension_numbers = #tpu.dot_dimension_numbers<[1], [0], [0], [1], [0, 0, 1, 1], [], []>} : vector<6x8xf32>, vector<8x16xf32>, vector<6x16xf32> -> vector<6x16xf32>
    %223 = vector.broadcast %214 : vector<6x1xf32> to vector<6x16xf32>
    %224 = arith.addf %222, %223 : vector<6x16xf32>
    %225 = tpu.concatenate %220, %224 in 0 : vector<6x16xf32>, vector<6x16xf32> -> vector<12x16xf32>
    %cst_79 = arith.constant dense<0.000000e+00> : vector<12x7xf32>
    %226 = tpu.matmul %225, %215, %cst_79 {dimension_numbers = #tpu.dot_dimension_numbers<[1], [0], [0], [1], [0, 0, 1, 1], [], []>} : vector<12x16xf32>, vector<16x7xf32>, vector<12x7xf32> -> vector<12x7xf32>
    %227 = vector.broadcast %216 : vector<1x7xf32> to vector<12x7xf32>
    %228 = arith.addf %226, %227 : vector<12x7xf32>
    %229 = vector.extract_strided_slice %0 {offsets = [0, 0, 0], sizes = [1, 8, 7], strides = [1, 1, 1]} : vector<2x8x7xf32> to vector<1x8x7xf32>
    %230 = vector.shape_cast %229 : vector<1x8x7xf32> to vector<8x7xf32>
    %231 = vector.extract_strided_slice %228 {offsets = [0, 0], sizes = [6, 7], strides = [1, 1]} : vector<12x7xf32> to vector<6x7xf32>
    %232 = vector.extract_strided_slice %1 {offsets = [0, 0, 0], sizes = [1, 6, 7], strides = [1, 1, 1]} : vector<2x24x7xf32> to vector<1x6x7xf32>
    %233 = vector.shape_cast %232 : vector<1x6x7xf32> to vector<6x7xf32>
    %234 = vector.extract_strided_slice %0 {offsets = [1, 0, 0], sizes = [1, 8, 7], strides = [1, 1, 1]} : vector<2x8x7xf32> to vector<1x8x7xf32>
    %235 = vector.shape_cast %234 : vector<1x8x7xf32> to vector<8x7xf32>
    %236 = vector.extract_strided_slice %228 {offsets = [6, 0], sizes = [6, 7], strides = [1, 1]} : vector<12x7xf32> to vector<6x7xf32>
    %237 = vector.extract_strided_slice %1 {offsets = [1, 0, 0], sizes = [1, 6, 7], strides = [1, 1, 1]} : vector<2x24x7xf32> to vector<1x6x7xf32>
    %238 = vector.shape_cast %237 : vector<1x6x7xf32> to vector<6x7xf32>
    %239 = tpu.concatenate %230, %231, %233, %235, %236, %238 in 0 : vector<8x7xf32>, vector<6x7xf32>, vector<6x7xf32>, vector<8x7xf32>, vector<6x7xf32>, vector<6x7xf32> -> vector<40x7xf32>
    %240 = tpu.iota {dimensions = array<i32: 0>} : vector<20x20xi32>
    %241 = tpu.iota {dimensions = array<i32: 1>} : vector<20x20xi32>
    %242 = arith.subi %240, %241 : vector<20x20xi32>
    %243 = math.absi %242 : vector<20x20xi32>
    %244 = arith.sitofp %243 : vector<20x20xi32> to vector<20x20xf32>
    %245 = arith.cmpi slt, %241, %240 : vector<20x20xi32>
    %cst_80 = arith.constant 9.99999984E+17 : f32
    %246 = vector.broadcast %cst_80 : f32 to vector<20x20xf32>
    %247 = arith.select %245, %246, %244 : vector<20x20xi1>, vector<20x20xf32>
    %c208 = arith.constant 208 : index
    %c0_81 = arith.constant 0 : index
    %248 = vector.load %arg2[%c208, %c0_81] : memref<848x64xf32, #tpu.memory_space<vmem>>, vector<20x16xf32>
    %c200 = arith.constant 200 : index
    %c0_82 = arith.constant 0 : index
    %249 = vector.load %arg2[%c200, %c0_82] : memref<848x64xf32, #tpu.memory_space<vmem>>, vector<7x16xf32>
    %cst_83 = arith.constant dense<0.000000e+00> : vector<40x16xf32>
    %250 = tpu.matmul %239, %249, %cst_83 {dimension_numbers = #tpu.dot_dimension_numbers<[1], [0], [0], [1], [0, 0, 1, 1], [], []>} : vector<40x7xf32>, vector<7x16xf32>, vector<40x16xf32> -> vector<40x16xf32>
    %251 = tpu.concatenate %248, %248 in 0 : vector<20x16xf32>, vector<20x16xf32> -> vector<40x16xf32>
    %252 = arith.addf %250, %251 : vector<40x16xf32>
    %c232 = arith.constant 232 : index
    %c0_84 = arith.constant 0 : index
    %253 = vector.load %arg2[%c232, %c0_84] : memref<848x64xf32, #tpu.memory_space<vmem>>, vector<16x64xf32>
    %c248 = arith.constant 248 : index
    %c0_85 = arith.constant 0 : index
    %254 = vector.load %arg2[%c248, %c0_85] : memref<848x64xf32, #tpu.memory_space<vmem>>, vector<1x64xf32>
    %c256 = arith.constant 256 : index
    %c0_86 = arith.constant 0 : index
    %255 = vector.load %arg2[%c256, %c0_86] : memref<848x64xf32, #tpu.memory_space<vmem>>, vector<16x1xf32>
    %c272 = arith.constant 272 : index
    %c0_87 = arith.constant 0 : index
    %256 = vector.load %arg2[%c272, %c0_87] : memref<848x64xf32, #tpu.memory_space<vmem>>, vector<1x1xf32>
    %c280 = arith.constant 280 : index
    %c0_88 = arith.constant 0 : index
    %257 = vector.load %arg2[%c280, %c0_88] : memref<848x64xf32, #tpu.memory_space<vmem>>, vector<16x16xf32>
    %c296 = arith.constant 296 : index
    %c0_89 = arith.constant 0 : index
    %258 = vector.load %arg2[%c296, %c0_89] : memref<848x64xf32, #tpu.memory_space<vmem>>, vector<16x16xf32>
    %c312 = arith.constant 312 : index
    %c0_90 = arith.constant 0 : index
    %259 = vector.load %arg2[%c312, %c0_90] : memref<848x64xf32, #tpu.memory_space<vmem>>, vector<1x16xf32>
    %c320 = arith.constant 320 : index
    %c0_91 = arith.constant 0 : index
    %260 = vector.load %arg2[%c320, %c0_91] : memref<848x64xf32, #tpu.memory_space<vmem>>, vector<16x16xf32>
    %c336 = arith.constant 336 : index
    %c0_92 = arith.constant 0 : index
    %261 = vector.load %arg2[%c336, %c0_92] : memref<848x64xf32, #tpu.memory_space<vmem>>, vector<1x16xf32>
    %c344 = arith.constant 344 : index
    %c0_93 = arith.constant 0 : index
    %262 = vector.load %arg2[%c344, %c0_93] : memref<848x64xf32, #tpu.memory_space<vmem>>, vector<1x16xf32>
    %c352 = arith.constant 352 : index
    %c0_94 = arith.constant 0 : index
    %263 = vector.load %arg2[%c352, %c0_94] : memref<848x64xf32, #tpu.memory_space<vmem>>, vector<1x16xf32>
    %c360 = arith.constant 360 : index
    %c0_95 = arith.constant 0 : index
    %264 = vector.load %arg2[%c360, %c0_95] : memref<848x64xf32, #tpu.memory_space<vmem>>, vector<1x16xf32>
    %c368 = arith.constant 368 : index
    %c0_96 = arith.constant 0 : index
    %265 = vector.load %arg2[%c368, %c0_96] : memref<848x64xf32, #tpu.memory_space<vmem>>, vector<1x16xf32>
    %cst_97 = arith.constant dense<0.000000e+00> : vector<40x64xf32>
    %266 = tpu.matmul %252, %253, %cst_97 {dimension_numbers = #tpu.dot_dimension_numbers<[1], [0], [0], [1], [0, 0, 1, 1], [], []>} : vector<40x16xf32>, vector<16x64xf32>, vector<40x64xf32> -> vector<40x64xf32>
    %267 = vector.broadcast %254 : vector<1x64xf32> to vector<40x64xf32>
    %268 = arith.addf %266, %267 : vector<40x64xf32>
    %269 = vector.extract_strided_slice %268 {offsets = [0, 0], sizes = [40, 16], strides = [1, 1]} : vector<40x64xf32> to vector<40x16xf32>
    %cst_98 = arith.constant 0.000000e+00 : f32
    %270 = vector.broadcast %cst_98 : f32 to vector<40x16xf32>
    %271 = arith.maximumf %269, %270 : vector<40x16xf32>
    %cst_99 = arith.constant dense<0.000000e+00> : vector<40x1xf32>
    %272 = tpu.matmul %271, %255, %cst_99 {dimension_numbers = #tpu.dot_dimension_numbers<[1], [0], [0], [1], [0, 0, 1, 1], [], []>} : vector<40x16xf32>, vector<16x1xf32>, vector<40x1xf32> -> vector<40x1xf32>
    %273 = vector.broadcast %256 : vector<1x1xf32> to vector<40x1xf32>
    %274 = arith.addf %272, %273 : vector<40x1xf32>
    %cst_100 = arith.constant 0.000000e+00 : f32
    %275 = vector.broadcast %cst_100 : f32 to vector<40x1xf32>
    %276 = arith.subf %275, %274 : vector<40x1xf32>
    %277 = math.exp %276 : vector<40x1xf32>
    %cst_101 = arith.constant 1.000000e+00 : f32
    %278 = vector.broadcast %cst_101 : f32 to vector<40x1xf32>
    %279 = arith.addf %278, %277 : vector<40x1xf32>
    %280 = tpu.reciprocal %279 {approx = true} : vector<40x1xf32> -> vector<40x1xf32>
    %cst_102 = arith.constant 2.000000e+01 : f32
    %281 = vector.broadcast %cst_102 : f32 to vector<40x1xf32>
    %282 = arith.mulf %280, %281 : vector<40x1xf32>
    %283 = vector.extract_strided_slice %282 {offsets = [0, 0], sizes = [20, 1], strides = [1, 1]} : vector<40x1xf32> to vector<20x1xf32>
    %284 = vector.extract_strided_slice %268 {offsets = [0, 16], sizes = [20, 8], strides = [1, 1]} : vector<40x64xf32> to vector<20x8xf32>
    %285 = vector.extract_strided_slice %268 {offsets = [0, 32], sizes = [20, 8], strides = [1, 1]} : vector<40x64xf32> to vector<20x8xf32>
    %286 = vector.extract_strided_slice %268 {offsets = [0, 48], sizes = [20, 8], strides = [1, 1]} : vector<40x64xf32> to vector<20x8xf32>
    %cst_103 = arith.constant dense<0.000000e+00> : vector<20x20xf32>
    %287 = tpu.matmul %284, %285, %cst_103 {dimension_numbers = #tpu.dot_dimension_numbers<[1], [1], [0], [0], [0, 0, 1, 0], [], []>} : vector<20x8xf32>, vector<20x8xf32>, vector<20x20xf32> -> vector<20x20xf32>
    %cst_104 = arith.constant 0.223606795 : f32
    %288 = vector.broadcast %cst_104 : f32 to vector<20x20xf32>
    %289 = arith.mulf %287, %288 : vector<20x20xf32>
    %cst_105 = arith.constant 2.000000e+00 : f32
    %290 = vector.broadcast %cst_105 : f32 to vector<20x1xf32>
    %291 = arith.addf %283, %290 : vector<20x1xf32>
    %292 = vector.broadcast %291 : vector<20x1xf32> to vector<20x20xf32>
    %293 = arith.cmpf ogt, %247, %292 : vector<20x20xf32>
    %cst_106 = arith.constant -9.99999984E+17 : f32
    %294 = vector.broadcast %cst_106 : f32 to vector<20x20xf32>
    %295 = arith.select %293, %294, %289 : vector<20x20xi1>, vector<20x20xf32>
    %296 = arith.addf %295, %289 : vector<20x20xf32>
    %cst_107 = arith.constant dense<0xFF800000> : vector<20xf32>
    %297 = vector.multi_reduction <maximumf>, %296, %cst_107 [1] : vector<20x20xf32> to vector<20xf32>
    %298 = vector.shape_cast %297 : vector<20xf32> to vector<20x1xf32>
    %299 = vector.broadcast %298 : vector<20x1xf32> to vector<20x20xf32>
    %300 = arith.subf %296, %299 : vector<20x20xf32>
    %301 = math.exp %300 : vector<20x20xf32>
    %cst_108 = arith.constant dense<0.000000e+00> : vector<20x8xf32>
    %302 = tpu.matmul %301, %286, %cst_108 {dimension_numbers = #tpu.dot_dimension_numbers<[1], [0], [0], [1], [0, 0, 1, 1], [], []>} : vector<20x20xf32>, vector<20x8xf32>, vector<20x8xf32> -> vector<20x8xf32>
    %cst_109 = arith.constant dense<0.000000e+00> : vector<20xf32>
    %303 = vector.multi_reduction <add>, %301, %cst_109 [1] : vector<20x20xf32> to vector<20xf32>
    %304 = vector.shape_cast %303 : vector<20xf32> to vector<20x1xf32>
    %305 = tpu.reciprocal %304 {approx = true} : vector<20x1xf32> -> vector<20x1xf32>
    %306 = vector.broadcast %305 : vector<20x1xf32> to vector<20x8xf32>
    %307 = arith.mulf %302, %306 : vector<20x8xf32>
    %308 = vector.extract_strided_slice %257 {offsets = [0, 0], sizes = [8, 16], strides = [1, 1]} : vector<16x16xf32> to vector<8x16xf32>
    %cst_110 = arith.constant dense<0.000000e+00> : vector<20x16xf32>
    %309 = tpu.matmul %307, %308, %cst_110 {dimension_numbers = #tpu.dot_dimension_numbers<[1], [0], [0], [1], [0, 0, 1, 1], [], []>} : vector<20x8xf32>, vector<8x16xf32>, vector<20x16xf32> -> vector<20x16xf32>
    %310 = vector.extract_strided_slice %268 {offsets = [0, 24], sizes = [20, 8], strides = [1, 1]} : vector<40x64xf32> to vector<20x8xf32>
    %311 = vector.extract_strided_slice %268 {offsets = [0, 40], sizes = [20, 8], strides = [1, 1]} : vector<40x64xf32> to vector<20x8xf32>
    %312 = vector.extract_strided_slice %268 {offsets = [0, 56], sizes = [20, 8], strides = [1, 1]} : vector<40x64xf32> to vector<20x8xf32>
    %cst_111 = arith.constant dense<0.000000e+00> : vector<20x20xf32>
    %313 = tpu.matmul %310, %311, %cst_111 {dimension_numbers = #tpu.dot_dimension_numbers<[1], [1], [0], [0], [0, 0, 1, 0], [], []>} : vector<20x8xf32>, vector<20x8xf32>, vector<20x20xf32> -> vector<20x20xf32>
    %cst_112 = arith.constant 0.223606795 : f32
    %314 = vector.broadcast %cst_112 : f32 to vector<20x20xf32>
    %315 = arith.mulf %313, %314 : vector<20x20xf32>
    %cst_113 = arith.constant 4.000000e+00 : f32
    %316 = vector.broadcast %cst_113 : f32 to vector<20x1xf32>
    %317 = arith.addf %283, %316 : vector<20x1xf32>
    %318 = vector.broadcast %317 : vector<20x1xf32> to vector<20x20xf32>
    %319 = arith.cmpf ogt, %247, %318 : vector<20x20xf32>
    %cst_114 = arith.constant -9.99999984E+17 : f32
    %320 = vector.broadcast %cst_114 : f32 to vector<20x20xf32>
    %321 = arith.select %319, %320, %315 : vector<20x20xi1>, vector<20x20xf32>
    %322 = arith.addf %321, %315 : vector<20x20xf32>
    %cst_115 = arith.constant dense<0xFF800000> : vector<20xf32>
    %323 = vector.multi_reduction <maximumf>, %322, %cst_115 [1] : vector<20x20xf32> to vector<20xf32>
    %324 = vector.shape_cast %323 : vector<20xf32> to vector<20x1xf32>
    %325 = vector.broadcast %324 : vector<20x1xf32> to vector<20x20xf32>
    %326 = arith.subf %322, %325 : vector<20x20xf32>
    %327 = math.exp %326 : vector<20x20xf32>
    %cst_116 = arith.constant dense<0.000000e+00> : vector<20x8xf32>
    %328 = tpu.matmul %327, %312, %cst_116 {dimension_numbers = #tpu.dot_dimension_numbers<[1], [0], [0], [1], [0, 0, 1, 1], [], []>} : vector<20x20xf32>, vector<20x8xf32>, vector<20x8xf32> -> vector<20x8xf32>
    %cst_117 = arith.constant dense<0.000000e+00> : vector<20xf32>
    %329 = vector.multi_reduction <add>, %327, %cst_117 [1] : vector<20x20xf32> to vector<20xf32>
    %330 = vector.shape_cast %329 : vector<20xf32> to vector<20x1xf32>
    %331 = tpu.reciprocal %330 {approx = true} : vector<20x1xf32> -> vector<20x1xf32>
    %332 = vector.broadcast %331 : vector<20x1xf32> to vector<20x8xf32>
    %333 = arith.mulf %328, %332 : vector<20x8xf32>
    %334 = vector.extract_strided_slice %257 {offsets = [8, 0], sizes = [8, 16], strides = [1, 1]} : vector<16x16xf32> to vector<8x16xf32>
    %cst_118 = arith.constant dense<0.000000e+00> : vector<20x16xf32>
    %335 = tpu.matmul %333, %334, %cst_118 {dimension_numbers = #tpu.dot_dimension_numbers<[1], [0], [0], [1], [0, 0, 1, 1], [], []>} : vector<20x8xf32>, vector<8x16xf32>, vector<20x16xf32> -> vector<20x16xf32>
    %336 = arith.addf %309, %335 : vector<20x16xf32>
    %337 = vector.extract_strided_slice %282 {offsets = [20, 0], sizes = [20, 1], strides = [1, 1]} : vector<40x1xf32> to vector<20x1xf32>
    %338 = vector.extract_strided_slice %268 {offsets = [20, 16], sizes = [20, 8], strides = [1, 1]} : vector<40x64xf32> to vector<20x8xf32>
    %339 = vector.extract_strided_slice %268 {offsets = [20, 32], sizes = [20, 8], strides = [1, 1]} : vector<40x64xf32> to vector<20x8xf32>
    %340 = vector.extract_strided_slice %268 {offsets = [20, 48], sizes = [20, 8], strides = [1, 1]} : vector<40x64xf32> to vector<20x8xf32>
    %cst_119 = arith.constant dense<0.000000e+00> : vector<20x20xf32>
    %341 = tpu.matmul %338, %339, %cst_119 {dimension_numbers = #tpu.dot_dimension_numbers<[1], [1], [0], [0], [0, 0, 1, 0], [], []>} : vector<20x8xf32>, vector<20x8xf32>, vector<20x20xf32> -> vector<20x20xf32>
    %cst_120 = arith.constant 0.223606795 : f32
    %342 = vector.broadcast %cst_120 : f32 to vector<20x20xf32>
    %343 = arith.mulf %341, %342 : vector<20x20xf32>
    %cst_121 = arith.constant 2.000000e+00 : f32
    %344 = vector.broadcast %cst_121 : f32 to vector<20x1xf32>
    %345 = arith.addf %337, %344 : vector<20x1xf32>
    %346 = vector.broadcast %345 : vector<20x1xf32> to vector<20x20xf32>
    %347 = arith.cmpf ogt, %247, %346 : vector<20x20xf32>
    %cst_122 = arith.constant -9.99999984E+17 : f32
    %348 = vector.broadcast %cst_122 : f32 to vector<20x20xf32>
    %349 = arith.select %347, %348, %343 : vector<20x20xi1>, vector<20x20xf32>
    %350 = arith.addf %349, %343 : vector<20x20xf32>
    %cst_123 = arith.constant dense<0xFF800000> : vector<20xf32>
    %351 = vector.multi_reduction <maximumf>, %350, %cst_123 [1] : vector<20x20xf32> to vector<20xf32>
    %352 = vector.shape_cast %351 : vector<20xf32> to vector<20x1xf32>
    %353 = vector.broadcast %352 : vector<20x1xf32> to vector<20x20xf32>
    %354 = arith.subf %350, %353 : vector<20x20xf32>
    %355 = math.exp %354 : vector<20x20xf32>
    %cst_124 = arith.constant dense<0.000000e+00> : vector<20x8xf32>
    %356 = tpu.matmul %355, %340, %cst_124 {dimension_numbers = #tpu.dot_dimension_numbers<[1], [0], [0], [1], [0, 0, 1, 1], [], []>} : vector<20x20xf32>, vector<20x8xf32>, vector<20x8xf32> -> vector<20x8xf32>
    %cst_125 = arith.constant dense<0.000000e+00> : vector<20xf32>
    %357 = vector.multi_reduction <add>, %355, %cst_125 [1] : vector<20x20xf32> to vector<20xf32>
    %358 = vector.shape_cast %357 : vector<20xf32> to vector<20x1xf32>
    %359 = tpu.reciprocal %358 {approx = true} : vector<20x1xf32> -> vector<20x1xf32>
    %360 = vector.broadcast %359 : vector<20x1xf32> to vector<20x8xf32>
    %361 = arith.mulf %356, %360 : vector<20x8xf32>
    %362 = vector.extract_strided_slice %257 {offsets = [0, 0], sizes = [8, 16], strides = [1, 1]} : vector<16x16xf32> to vector<8x16xf32>
    %cst_126 = arith.constant dense<0.000000e+00> : vector<20x16xf32>
    %363 = tpu.matmul %361, %362, %cst_126 {dimension_numbers = #tpu.dot_dimension_numbers<[1], [0], [0], [1], [0, 0, 1, 1], [], []>} : vector<20x8xf32>, vector<8x16xf32>, vector<20x16xf32> -> vector<20x16xf32>
    %364 = vector.extract_strided_slice %268 {offsets = [20, 24], sizes = [20, 8], strides = [1, 1]} : vector<40x64xf32> to vector<20x8xf32>
    %365 = vector.extract_strided_slice %268 {offsets = [20, 40], sizes = [20, 8], strides = [1, 1]} : vector<40x64xf32> to vector<20x8xf32>
    %366 = vector.extract_strided_slice %268 {offsets = [20, 56], sizes = [20, 8], strides = [1, 1]} : vector<40x64xf32> to vector<20x8xf32>
    %cst_127 = arith.constant dense<0.000000e+00> : vector<20x20xf32>
    %367 = tpu.matmul %364, %365, %cst_127 {dimension_numbers = #tpu.dot_dimension_numbers<[1], [1], [0], [0], [0, 0, 1, 0], [], []>} : vector<20x8xf32>, vector<20x8xf32>, vector<20x20xf32> -> vector<20x20xf32>
    %cst_128 = arith.constant 0.223606795 : f32
    %368 = vector.broadcast %cst_128 : f32 to vector<20x20xf32>
    %369 = arith.mulf %367, %368 : vector<20x20xf32>
    %cst_129 = arith.constant 4.000000e+00 : f32
    %370 = vector.broadcast %cst_129 : f32 to vector<20x1xf32>
    %371 = arith.addf %337, %370 : vector<20x1xf32>
    %372 = vector.broadcast %371 : vector<20x1xf32> to vector<20x20xf32>
    %373 = arith.cmpf ogt, %247, %372 : vector<20x20xf32>
    %cst_130 = arith.constant -9.99999984E+17 : f32
    %374 = vector.broadcast %cst_130 : f32 to vector<20x20xf32>
    %375 = arith.select %373, %374, %369 : vector<20x20xi1>, vector<20x20xf32>
    %376 = arith.addf %375, %369 : vector<20x20xf32>
    %cst_131 = arith.constant dense<0xFF800000> : vector<20xf32>
    %377 = vector.multi_reduction <maximumf>, %376, %cst_131 [1] : vector<20x20xf32> to vector<20xf32>
    %378 = vector.shape_cast %377 : vector<20xf32> to vector<20x1xf32>
    %379 = vector.broadcast %378 : vector<20x1xf32> to vector<20x20xf32>
    %380 = arith.subf %376, %379 : vector<20x20xf32>
    %381 = math.exp %380 : vector<20x20xf32>
    %cst_132 = arith.constant dense<0.000000e+00> : vector<20x8xf32>
    %382 = tpu.matmul %381, %366, %cst_132 {dimension_numbers = #tpu.dot_dimension_numbers<[1], [0], [0], [1], [0, 0, 1, 1], [], []>} : vector<20x20xf32>, vector<20x8xf32>, vector<20x8xf32> -> vector<20x8xf32>
    %cst_133 = arith.constant dense<0.000000e+00> : vector<20xf32>
    %383 = vector.multi_reduction <add>, %381, %cst_133 [1] : vector<20x20xf32> to vector<20xf32>
    %384 = vector.shape_cast %383 : vector<20xf32> to vector<20x1xf32>
    %385 = tpu.reciprocal %384 {approx = true} : vector<20x1xf32> -> vector<20x1xf32>
    %386 = vector.broadcast %385 : vector<20x1xf32> to vector<20x8xf32>
    %387 = arith.mulf %382, %386 : vector<20x8xf32>
    %388 = vector.extract_strided_slice %257 {offsets = [8, 0], sizes = [8, 16], strides = [1, 1]} : vector<16x16xf32> to vector<8x16xf32>
    %cst_134 = arith.constant dense<0.000000e+00> : vector<20x16xf32>
    %389 = tpu.matmul %387, %388, %cst_134 {dimension_numbers = #tpu.dot_dimension_numbers<[1], [0], [0], [1], [0, 0, 1, 1], [], []>} : vector<20x8xf32>, vector<8x16xf32>, vector<20x16xf32> -> vector<20x16xf32>
    %390 = arith.addf %363, %389 : vector<20x16xf32>
    %391 = tpu.concatenate %336, %390 in 0 : vector<20x16xf32>, vector<20x16xf32> -> vector<40x16xf32>
    %392 = arith.addf %252, %391 : vector<40x16xf32>
    %cst_135 = arith.constant dense<0.000000e+00> : vector<40xf32>
    %393 = vector.multi_reduction <add>, %392, %cst_135 [1] : vector<40x16xf32> to vector<40xf32>
    %394 = vector.shape_cast %393 : vector<40xf32> to vector<40x1xf32>
    %cst_136 = arith.constant 1.600000e+01 : f32
    %395 = vector.broadcast %cst_136 : f32 to vector<40x1xf32>
    %396 = arith.divf %394, %395 : vector<40x1xf32>
    %397 = vector.broadcast %396 : vector<40x1xf32> to vector<40x16xf32>
    %398 = arith.subf %392, %397 : vector<40x16xf32>
    %399 = arith.mulf %398, %398 : vector<40x16xf32>
    %cst_137 = arith.constant dense<0.000000e+00> : vector<40xf32>
    %400 = vector.multi_reduction <add>, %399, %cst_137 [1] : vector<40x16xf32> to vector<40xf32>
    %401 = vector.shape_cast %400 : vector<40xf32> to vector<40x1xf32>
    %cst_138 = arith.constant 1.600000e+01 : f32
    %402 = vector.broadcast %cst_138 : f32 to vector<40x1xf32>
    %403 = arith.divf %401, %402 : vector<40x1xf32>
    %404 = vector.broadcast %396 : vector<40x1xf32> to vector<40x16xf32>
    %405 = arith.subf %392, %404 : vector<40x16xf32>
    %cst_139 = arith.constant 9.99999974E-6 : f32
    %406 = vector.broadcast %cst_139 : f32 to vector<40x1xf32>
    %407 = arith.addf %403, %406 : vector<40x1xf32>
    %408 = math.rsqrt %407 : vector<40x1xf32>
    %409 = vector.broadcast %408 : vector<40x1xf32> to vector<40x16xf32>
    %410 = arith.mulf %405, %409 : vector<40x16xf32>
    %411 = vector.broadcast %262 : vector<1x16xf32> to vector<40x16xf32>
    %412 = arith.mulf %410, %411 : vector<40x16xf32>
    %413 = vector.broadcast %263 : vector<1x16xf32> to vector<40x16xf32>
    %414 = arith.addf %412, %413 : vector<40x16xf32>
    %cst_140 = arith.constant dense<0.000000e+00> : vector<40x16xf32>
    %415 = tpu.matmul %414, %258, %cst_140 {dimension_numbers = #tpu.dot_dimension_numbers<[1], [0], [0], [1], [0, 0, 1, 1], [], []>} : vector<40x16xf32>, vector<16x16xf32>, vector<40x16xf32> -> vector<40x16xf32>
    %416 = vector.broadcast %259 : vector<1x16xf32> to vector<40x16xf32>
    %417 = arith.addf %415, %416 : vector<40x16xf32>
    %cst_141 = arith.constant 0.000000e+00 : f32
    %418 = vector.broadcast %cst_141 : f32 to vector<40x16xf32>
    %419 = arith.maximumf %417, %418 : vector<40x16xf32>
    %cst_142 = arith.constant dense<0.000000e+00> : vector<40x16xf32>
    %420 = tpu.matmul %419, %260, %cst_142 {dimension_numbers = #tpu.dot_dimension_numbers<[1], [0], [0], [1], [0, 0, 1, 1], [], []>} : vector<40x16xf32>, vector<16x16xf32>, vector<40x16xf32> -> vector<40x16xf32>
    %421 = vector.broadcast %261 : vector<1x16xf32> to vector<40x16xf32>
    %422 = arith.addf %420, %421 : vector<40x16xf32>
    %423 = arith.addf %414, %422 : vector<40x16xf32>
    %cst_143 = arith.constant dense<0.000000e+00> : vector<40xf32>
    %424 = vector.multi_reduction <add>, %423, %cst_143 [1] : vector<40x16xf32> to vector<40xf32>
    %425 = vector.shape_cast %424 : vector<40xf32> to vector<40x1xf32>
    %cst_144 = arith.constant 1.600000e+01 : f32
    %426 = vector.broadcast %cst_144 : f32 to vector<40x1xf32>
    %427 = arith.divf %425, %426 : vector<40x1xf32>
    %428 = vector.broadcast %427 : vector<40x1xf32> to vector<40x16xf32>
    %429 = arith.subf %423, %428 : vector<40x16xf32>
    %430 = arith.mulf %429, %429 : vector<40x16xf32>
    %cst_145 = arith.constant dense<0.000000e+00> : vector<40xf32>
    %431 = vector.multi_reduction <add>, %430, %cst_145 [1] : vector<40x16xf32> to vector<40xf32>
    %432 = vector.shape_cast %431 : vector<40xf32> to vector<40x1xf32>
    %cst_146 = arith.constant 1.600000e+01 : f32
    %433 = vector.broadcast %cst_146 : f32 to vector<40x1xf32>
    %434 = arith.divf %432, %433 : vector<40x1xf32>
    %435 = vector.broadcast %427 : vector<40x1xf32> to vector<40x16xf32>
    %436 = arith.subf %423, %435 : vector<40x16xf32>
    %cst_147 = arith.constant 9.99999974E-6 : f32
    %437 = vector.broadcast %cst_147 : f32 to vector<40x1xf32>
    %438 = arith.addf %434, %437 : vector<40x1xf32>
    %439 = math.rsqrt %438 : vector<40x1xf32>
    %440 = vector.broadcast %439 : vector<40x1xf32> to vector<40x16xf32>
    %441 = arith.mulf %436, %440 : vector<40x16xf32>
    %442 = vector.broadcast %264 : vector<1x16xf32> to vector<40x16xf32>
    %443 = arith.mulf %441, %442 : vector<40x16xf32>
    %444 = vector.broadcast %265 : vector<1x16xf32> to vector<40x16xf32>
    %445 = arith.addf %443, %444 : vector<40x16xf32>
    %c376 = arith.constant 376 : index
    %c0_148 = arith.constant 0 : index
    %446 = vector.load %arg2[%c376, %c0_148] : memref<848x64xf32, #tpu.memory_space<vmem>>, vector<6x20xf32>
    %c384 = arith.constant 384 : index
    %c0_149 = arith.constant 0 : index
    %447 = vector.load %arg2[%c384, %c0_149] : memref<848x64xf32, #tpu.memory_space<vmem>>, vector<6x1xf32>
    %c392 = arith.constant 392 : index
    %c0_150 = arith.constant 0 : index
    %448 = vector.load %arg2[%c392, %c0_150] : memref<848x64xf32, #tpu.memory_space<vmem>>, vector<16x7xf32>
    %c408 = arith.constant 408 : index
    %c0_151 = arith.constant 0 : index
    %449 = vector.load %arg2[%c408, %c0_151] : memref<848x64xf32, #tpu.memory_space<vmem>>, vector<1x7xf32>
    %450 = vector.extract_strided_slice %445 {offsets = [0, 0], sizes = [20, 16], strides = [1, 1]} : vector<40x16xf32> to vector<20x16xf32>
    %cst_152 = arith.constant dense<0.000000e+00> : vector<6x16xf32>
    %451 = tpu.matmul %446, %450, %cst_152 {dimension_numbers = #tpu.dot_dimension_numbers<[1], [0], [0], [1], [0, 0, 1, 1], [], []>} : vector<6x20xf32>, vector<20x16xf32>, vector<6x16xf32> -> vector<6x16xf32>
    %452 = vector.broadcast %447 : vector<6x1xf32> to vector<6x16xf32>
    %453 = arith.addf %451, %452 : vector<6x16xf32>
    %454 = vector.extract_strided_slice %445 {offsets = [20, 0], sizes = [20, 16], strides = [1, 1]} : vector<40x16xf32> to vector<20x16xf32>
    %cst_153 = arith.constant dense<0.000000e+00> : vector<6x16xf32>
    %455 = tpu.matmul %446, %454, %cst_153 {dimension_numbers = #tpu.dot_dimension_numbers<[1], [0], [0], [1], [0, 0, 1, 1], [], []>} : vector<6x20xf32>, vector<20x16xf32>, vector<6x16xf32> -> vector<6x16xf32>
    %456 = vector.broadcast %447 : vector<6x1xf32> to vector<6x16xf32>
    %457 = arith.addf %455, %456 : vector<6x16xf32>
    %458 = tpu.concatenate %453, %457 in 0 : vector<6x16xf32>, vector<6x16xf32> -> vector<12x16xf32>
    %cst_154 = arith.constant dense<0.000000e+00> : vector<12x7xf32>
    %459 = tpu.matmul %458, %448, %cst_154 {dimension_numbers = #tpu.dot_dimension_numbers<[1], [0], [0], [1], [0, 0, 1, 1], [], []>} : vector<12x16xf32>, vector<16x7xf32>, vector<12x7xf32> -> vector<12x7xf32>
    %460 = vector.broadcast %449 : vector<1x7xf32> to vector<12x7xf32>
    %461 = arith.addf %459, %460 : vector<12x7xf32>
    %462 = vector.extract_strided_slice %0 {offsets = [0, 0, 0], sizes = [1, 8, 7], strides = [1, 1, 1]} : vector<2x8x7xf32> to vector<1x8x7xf32>
    %463 = vector.shape_cast %462 : vector<1x8x7xf32> to vector<8x7xf32>
    %464 = vector.extract_strided_slice %461 {offsets = [0, 0], sizes = [6, 7], strides = [1, 1]} : vector<12x7xf32> to vector<6x7xf32>
    %465 = vector.extract_strided_slice %1 {offsets = [0, 6, 0], sizes = [1, 6, 7], strides = [1, 1, 1]} : vector<2x24x7xf32> to vector<1x6x7xf32>
    %466 = vector.shape_cast %465 : vector<1x6x7xf32> to vector<6x7xf32>
    %467 = vector.extract_strided_slice %0 {offsets = [1, 0, 0], sizes = [1, 8, 7], strides = [1, 1, 1]} : vector<2x8x7xf32> to vector<1x8x7xf32>
    %468 = vector.shape_cast %467 : vector<1x8x7xf32> to vector<8x7xf32>
    %469 = vector.extract_strided_slice %461 {offsets = [6, 0], sizes = [6, 7], strides = [1, 1]} : vector<12x7xf32> to vector<6x7xf32>
    %470 = vector.extract_strided_slice %1 {offsets = [1, 6, 0], sizes = [1, 6, 7], strides = [1, 1, 1]} : vector<2x24x7xf32> to vector<1x6x7xf32>
    %471 = vector.shape_cast %470 : vector<1x6x7xf32> to vector<6x7xf32>
    %472 = tpu.concatenate %463, %464, %466, %468, %469, %471 in 0 : vector<8x7xf32>, vector<6x7xf32>, vector<6x7xf32>, vector<8x7xf32>, vector<6x7xf32>, vector<6x7xf32> -> vector<40x7xf32>
    %c424 = arith.constant 424 : index
    %c0_155 = arith.constant 0 : index
    %473 = vector.load %arg2[%c424, %c0_155] : memref<848x64xf32, #tpu.memory_space<vmem>>, vector<20x16xf32>
    %c416 = arith.constant 416 : index
    %c0_156 = arith.constant 0 : index
    %474 = vector.load %arg2[%c416, %c0_156] : memref<848x64xf32, #tpu.memory_space<vmem>>, vector<7x16xf32>
    %cst_157 = arith.constant dense<0.000000e+00> : vector<40x16xf32>
    %475 = tpu.matmul %472, %474, %cst_157 {dimension_numbers = #tpu.dot_dimension_numbers<[1], [0], [0], [1], [0, 0, 1, 1], [], []>} : vector<40x7xf32>, vector<7x16xf32>, vector<40x16xf32> -> vector<40x16xf32>
    %476 = tpu.concatenate %473, %473 in 0 : vector<20x16xf32>, vector<20x16xf32> -> vector<40x16xf32>
    %477 = arith.addf %475, %476 : vector<40x16xf32>
    %c448 = arith.constant 448 : index
    %c0_158 = arith.constant 0 : index
    %478 = vector.load %arg2[%c448, %c0_158] : memref<848x64xf32, #tpu.memory_space<vmem>>, vector<16x64xf32>
    %c464 = arith.constant 464 : index
    %c0_159 = arith.constant 0 : index
    %479 = vector.load %arg2[%c464, %c0_159] : memref<848x64xf32, #tpu.memory_space<vmem>>, vector<1x64xf32>
    %c472 = arith.constant 472 : index
    %c0_160 = arith.constant 0 : index
    %480 = vector.load %arg2[%c472, %c0_160] : memref<848x64xf32, #tpu.memory_space<vmem>>, vector<16x1xf32>
    %c488 = arith.constant 488 : index
    %c0_161 = arith.constant 0 : index
    %481 = vector.load %arg2[%c488, %c0_161] : memref<848x64xf32, #tpu.memory_space<vmem>>, vector<1x1xf32>
    %c496 = arith.constant 496 : index
    %c0_162 = arith.constant 0 : index
    %482 = vector.load %arg2[%c496, %c0_162] : memref<848x64xf32, #tpu.memory_space<vmem>>, vector<16x16xf32>
    %c512 = arith.constant 512 : index
    %c0_163 = arith.constant 0 : index
    %483 = vector.load %arg2[%c512, %c0_163] : memref<848x64xf32, #tpu.memory_space<vmem>>, vector<16x16xf32>
    %c528 = arith.constant 528 : index
    %c0_164 = arith.constant 0 : index
    %484 = vector.load %arg2[%c528, %c0_164] : memref<848x64xf32, #tpu.memory_space<vmem>>, vector<1x16xf32>
    %c536 = arith.constant 536 : index
    %c0_165 = arith.constant 0 : index
    %485 = vector.load %arg2[%c536, %c0_165] : memref<848x64xf32, #tpu.memory_space<vmem>>, vector<16x16xf32>
    %c552 = arith.constant 552 : index
    %c0_166 = arith.constant 0 : index
    %486 = vector.load %arg2[%c552, %c0_166] : memref<848x64xf32, #tpu.memory_space<vmem>>, vector<1x16xf32>
    %c560 = arith.constant 560 : index
    %c0_167 = arith.constant 0 : index
    %487 = vector.load %arg2[%c560, %c0_167] : memref<848x64xf32, #tpu.memory_space<vmem>>, vector<1x16xf32>
    %c568 = arith.constant 568 : index
    %c0_168 = arith.constant 0 : index
    %488 = vector.load %arg2[%c568, %c0_168] : memref<848x64xf32, #tpu.memory_space<vmem>>, vector<1x16xf32>
    %c576 = arith.constant 576 : index
    %c0_169 = arith.constant 0 : index
    %489 = vector.load %arg2[%c576, %c0_169] : memref<848x64xf32, #tpu.memory_space<vmem>>, vector<1x16xf32>
    %c584 = arith.constant 584 : index
    %c0_170 = arith.constant 0 : index
    %490 = vector.load %arg2[%c584, %c0_170] : memref<848x64xf32, #tpu.memory_space<vmem>>, vector<1x16xf32>
    %cst_171 = arith.constant dense<0.000000e+00> : vector<40x64xf32>
    %491 = tpu.matmul %477, %478, %cst_171 {dimension_numbers = #tpu.dot_dimension_numbers<[1], [0], [0], [1], [0, 0, 1, 1], [], []>} : vector<40x16xf32>, vector<16x64xf32>, vector<40x64xf32> -> vector<40x64xf32>
    %492 = vector.broadcast %479 : vector<1x64xf32> to vector<40x64xf32>
    %493 = arith.addf %491, %492 : vector<40x64xf32>
    %494 = vector.extract_strided_slice %493 {offsets = [0, 0], sizes = [40, 16], strides = [1, 1]} : vector<40x64xf32> to vector<40x16xf32>
    %cst_172 = arith.constant 0.000000e+00 : f32
    %495 = vector.broadcast %cst_172 : f32 to vector<40x16xf32>
    %496 = arith.maximumf %494, %495 : vector<40x16xf32>
    %cst_173 = arith.constant dense<0.000000e+00> : vector<40x1xf32>
    %497 = tpu.matmul %496, %480, %cst_173 {dimension_numbers = #tpu.dot_dimension_numbers<[1], [0], [0], [1], [0, 0, 1, 1], [], []>} : vector<40x16xf32>, vector<16x1xf32>, vector<40x1xf32> -> vector<40x1xf32>
    %498 = vector.broadcast %481 : vector<1x1xf32> to vector<40x1xf32>
    %499 = arith.addf %497, %498 : vector<40x1xf32>
    %cst_174 = arith.constant 0.000000e+00 : f32
    %500 = vector.broadcast %cst_174 : f32 to vector<40x1xf32>
    %501 = arith.subf %500, %499 : vector<40x1xf32>
    %502 = math.exp %501 : vector<40x1xf32>
    %cst_175 = arith.constant 1.000000e+00 : f32
    %503 = vector.broadcast %cst_175 : f32 to vector<40x1xf32>
    %504 = arith.addf %503, %502 : vector<40x1xf32>
    %505 = tpu.reciprocal %504 {approx = true} : vector<40x1xf32> -> vector<40x1xf32>
    %cst_176 = arith.constant 2.000000e+01 : f32
    %506 = vector.broadcast %cst_176 : f32 to vector<40x1xf32>
    %507 = arith.mulf %505, %506 : vector<40x1xf32>
    %508 = vector.extract_strided_slice %507 {offsets = [0, 0], sizes = [20, 1], strides = [1, 1]} : vector<40x1xf32> to vector<20x1xf32>
    %509 = vector.extract_strided_slice %493 {offsets = [0, 16], sizes = [20, 8], strides = [1, 1]} : vector<40x64xf32> to vector<20x8xf32>
    %510 = vector.extract_strided_slice %493 {offsets = [0, 32], sizes = [20, 8], strides = [1, 1]} : vector<40x64xf32> to vector<20x8xf32>
    %511 = vector.extract_strided_slice %493 {offsets = [0, 48], sizes = [20, 8], strides = [1, 1]} : vector<40x64xf32> to vector<20x8xf32>
    %cst_177 = arith.constant dense<0.000000e+00> : vector<20x20xf32>
    %512 = tpu.matmul %509, %510, %cst_177 {dimension_numbers = #tpu.dot_dimension_numbers<[1], [1], [0], [0], [0, 0, 1, 0], [], []>} : vector<20x8xf32>, vector<20x8xf32>, vector<20x20xf32> -> vector<20x20xf32>
    %cst_178 = arith.constant 0.223606795 : f32
    %513 = vector.broadcast %cst_178 : f32 to vector<20x20xf32>
    %514 = arith.mulf %512, %513 : vector<20x20xf32>
    %cst_179 = arith.constant 2.000000e+00 : f32
    %515 = vector.broadcast %cst_179 : f32 to vector<20x1xf32>
    %516 = arith.addf %508, %515 : vector<20x1xf32>
    %517 = vector.broadcast %516 : vector<20x1xf32> to vector<20x20xf32>
    %518 = arith.cmpf ogt, %247, %517 : vector<20x20xf32>
    %cst_180 = arith.constant -9.99999984E+17 : f32
    %519 = vector.broadcast %cst_180 : f32 to vector<20x20xf32>
    %520 = arith.select %518, %519, %514 : vector<20x20xi1>, vector<20x20xf32>
    %521 = arith.addf %520, %514 : vector<20x20xf32>
    %cst_181 = arith.constant dense<0xFF800000> : vector<20xf32>
    %522 = vector.multi_reduction <maximumf>, %521, %cst_181 [1] : vector<20x20xf32> to vector<20xf32>
    %523 = vector.shape_cast %522 : vector<20xf32> to vector<20x1xf32>
    %524 = vector.broadcast %523 : vector<20x1xf32> to vector<20x20xf32>
    %525 = arith.subf %521, %524 : vector<20x20xf32>
    %526 = math.exp %525 : vector<20x20xf32>
    %cst_182 = arith.constant dense<0.000000e+00> : vector<20x8xf32>
    %527 = tpu.matmul %526, %511, %cst_182 {dimension_numbers = #tpu.dot_dimension_numbers<[1], [0], [0], [1], [0, 0, 1, 1], [], []>} : vector<20x20xf32>, vector<20x8xf32>, vector<20x8xf32> -> vector<20x8xf32>
    %cst_183 = arith.constant dense<0.000000e+00> : vector<20xf32>
    %528 = vector.multi_reduction <add>, %526, %cst_183 [1] : vector<20x20xf32> to vector<20xf32>
    %529 = vector.shape_cast %528 : vector<20xf32> to vector<20x1xf32>
    %530 = tpu.reciprocal %529 {approx = true} : vector<20x1xf32> -> vector<20x1xf32>
    %531 = vector.broadcast %530 : vector<20x1xf32> to vector<20x8xf32>
    %532 = arith.mulf %527, %531 : vector<20x8xf32>
    %533 = vector.extract_strided_slice %482 {offsets = [0, 0], sizes = [8, 16], strides = [1, 1]} : vector<16x16xf32> to vector<8x16xf32>
    %cst_184 = arith.constant dense<0.000000e+00> : vector<20x16xf32>
    %534 = tpu.matmul %532, %533, %cst_184 {dimension_numbers = #tpu.dot_dimension_numbers<[1], [0], [0], [1], [0, 0, 1, 1], [], []>} : vector<20x8xf32>, vector<8x16xf32>, vector<20x16xf32> -> vector<20x16xf32>
    %535 = vector.extract_strided_slice %493 {offsets = [0, 24], sizes = [20, 8], strides = [1, 1]} : vector<40x64xf32> to vector<20x8xf32>
    %536 = vector.extract_strided_slice %493 {offsets = [0, 40], sizes = [20, 8], strides = [1, 1]} : vector<40x64xf32> to vector<20x8xf32>
    %537 = vector.extract_strided_slice %493 {offsets = [0, 56], sizes = [20, 8], strides = [1, 1]} : vector<40x64xf32> to vector<20x8xf32>
    %cst_185 = arith.constant dense<0.000000e+00> : vector<20x20xf32>
    %538 = tpu.matmul %535, %536, %cst_185 {dimension_numbers = #tpu.dot_dimension_numbers<[1], [1], [0], [0], [0, 0, 1, 0], [], []>} : vector<20x8xf32>, vector<20x8xf32>, vector<20x20xf32> -> vector<20x20xf32>
    %cst_186 = arith.constant 0.223606795 : f32
    %539 = vector.broadcast %cst_186 : f32 to vector<20x20xf32>
    %540 = arith.mulf %538, %539 : vector<20x20xf32>
    %cst_187 = arith.constant 4.000000e+00 : f32
    %541 = vector.broadcast %cst_187 : f32 to vector<20x1xf32>
    %542 = arith.addf %508, %541 : vector<20x1xf32>
    %543 = vector.broadcast %542 : vector<20x1xf32> to vector<20x20xf32>
    %544 = arith.cmpf ogt, %247, %543 : vector<20x20xf32>
    %cst_188 = arith.constant -9.99999984E+17 : f32
    %545 = vector.broadcast %cst_188 : f32 to vector<20x20xf32>
    %546 = arith.select %544, %545, %540 : vector<20x20xi1>, vector<20x20xf32>
    %547 = arith.addf %546, %540 : vector<20x20xf32>
    %cst_189 = arith.constant dense<0xFF800000> : vector<20xf32>
    %548 = vector.multi_reduction <maximumf>, %547, %cst_189 [1] : vector<20x20xf32> to vector<20xf32>
    %549 = vector.shape_cast %548 : vector<20xf32> to vector<20x1xf32>
    %550 = vector.broadcast %549 : vector<20x1xf32> to vector<20x20xf32>
    %551 = arith.subf %547, %550 : vector<20x20xf32>
    %552 = math.exp %551 : vector<20x20xf32>
    %cst_190 = arith.constant dense<0.000000e+00> : vector<20x8xf32>
    %553 = tpu.matmul %552, %537, %cst_190 {dimension_numbers = #tpu.dot_dimension_numbers<[1], [0], [0], [1], [0, 0, 1, 1], [], []>} : vector<20x20xf32>, vector<20x8xf32>, vector<20x8xf32> -> vector<20x8xf32>
    %cst_191 = arith.constant dense<0.000000e+00> : vector<20xf32>
    %554 = vector.multi_reduction <add>, %552, %cst_191 [1] : vector<20x20xf32> to vector<20xf32>
    %555 = vector.shape_cast %554 : vector<20xf32> to vector<20x1xf32>
    %556 = tpu.reciprocal %555 {approx = true} : vector<20x1xf32> -> vector<20x1xf32>
    %557 = vector.broadcast %556 : vector<20x1xf32> to vector<20x8xf32>
    %558 = arith.mulf %553, %557 : vector<20x8xf32>
    %559 = vector.extract_strided_slice %482 {offsets = [8, 0], sizes = [8, 16], strides = [1, 1]} : vector<16x16xf32> to vector<8x16xf32>
    %cst_192 = arith.constant dense<0.000000e+00> : vector<20x16xf32>
    %560 = tpu.matmul %558, %559, %cst_192 {dimension_numbers = #tpu.dot_dimension_numbers<[1], [0], [0], [1], [0, 0, 1, 1], [], []>} : vector<20x8xf32>, vector<8x16xf32>, vector<20x16xf32> -> vector<20x16xf32>
    %561 = arith.addf %534, %560 : vector<20x16xf32>
    %562 = vector.extract_strided_slice %507 {offsets = [20, 0], sizes = [20, 1], strides = [1, 1]} : vector<40x1xf32> to vector<20x1xf32>
    %563 = vector.extract_strided_slice %493 {offsets = [20, 16], sizes = [20, 8], strides = [1, 1]} : vector<40x64xf32> to vector<20x8xf32>
    %564 = vector.extract_strided_slice %493 {offsets = [20, 32], sizes = [20, 8], strides = [1, 1]} : vector<40x64xf32> to vector<20x8xf32>
    %565 = vector.extract_strided_slice %493 {offsets = [20, 48], sizes = [20, 8], strides = [1, 1]} : vector<40x64xf32> to vector<20x8xf32>
    %cst_193 = arith.constant dense<0.000000e+00> : vector<20x20xf32>
    %566 = tpu.matmul %563, %564, %cst_193 {dimension_numbers = #tpu.dot_dimension_numbers<[1], [1], [0], [0], [0, 0, 1, 0], [], []>} : vector<20x8xf32>, vector<20x8xf32>, vector<20x20xf32> -> vector<20x20xf32>
    %cst_194 = arith.constant 0.223606795 : f32
    %567 = vector.broadcast %cst_194 : f32 to vector<20x20xf32>
    %568 = arith.mulf %566, %567 : vector<20x20xf32>
    %cst_195 = arith.constant 2.000000e+00 : f32
    %569 = vector.broadcast %cst_195 : f32 to vector<20x1xf32>
    %570 = arith.addf %562, %569 : vector<20x1xf32>
    %571 = vector.broadcast %570 : vector<20x1xf32> to vector<20x20xf32>
    %572 = arith.cmpf ogt, %247, %571 : vector<20x20xf32>
    %cst_196 = arith.constant -9.99999984E+17 : f32
    %573 = vector.broadcast %cst_196 : f32 to vector<20x20xf32>
    %574 = arith.select %572, %573, %568 : vector<20x20xi1>, vector<20x20xf32>
    %575 = arith.addf %574, %568 : vector<20x20xf32>
    %cst_197 = arith.constant dense<0xFF800000> : vector<20xf32>
    %576 = vector.multi_reduction <maximumf>, %575, %cst_197 [1] : vector<20x20xf32> to vector<20xf32>
    %577 = vector.shape_cast %576 : vector<20xf32> to vector<20x1xf32>
    %578 = vector.broadcast %577 : vector<20x1xf32> to vector<20x20xf32>
    %579 = arith.subf %575, %578 : vector<20x20xf32>
    %580 = math.exp %579 : vector<20x20xf32>
    %cst_198 = arith.constant dense<0.000000e+00> : vector<20x8xf32>
    %581 = tpu.matmul %580, %565, %cst_198 {dimension_numbers = #tpu.dot_dimension_numbers<[1], [0], [0], [1], [0, 0, 1, 1], [], []>} : vector<20x20xf32>, vector<20x8xf32>, vector<20x8xf32> -> vector<20x8xf32>
    %cst_199 = arith.constant dense<0.000000e+00> : vector<20xf32>
    %582 = vector.multi_reduction <add>, %580, %cst_199 [1] : vector<20x20xf32> to vector<20xf32>
    %583 = vector.shape_cast %582 : vector<20xf32> to vector<20x1xf32>
    %584 = tpu.reciprocal %583 {approx = true} : vector<20x1xf32> -> vector<20x1xf32>
    %585 = vector.broadcast %584 : vector<20x1xf32> to vector<20x8xf32>
    %586 = arith.mulf %581, %585 : vector<20x8xf32>
    %587 = vector.extract_strided_slice %482 {offsets = [0, 0], sizes = [8, 16], strides = [1, 1]} : vector<16x16xf32> to vector<8x16xf32>
    %cst_200 = arith.constant dense<0.000000e+00> : vector<20x16xf32>
    %588 = tpu.matmul %586, %587, %cst_200 {dimension_numbers = #tpu.dot_dimension_numbers<[1], [0], [0], [1], [0, 0, 1, 1], [], []>} : vector<20x8xf32>, vector<8x16xf32>, vector<20x16xf32> -> vector<20x16xf32>
    %589 = vector.extract_strided_slice %493 {offsets = [20, 24], sizes = [20, 8], strides = [1, 1]} : vector<40x64xf32> to vector<20x8xf32>
    %590 = vector.extract_strided_slice %493 {offsets = [20, 40], sizes = [20, 8], strides = [1, 1]} : vector<40x64xf32> to vector<20x8xf32>
    %591 = vector.extract_strided_slice %493 {offsets = [20, 56], sizes = [20, 8], strides = [1, 1]} : vector<40x64xf32> to vector<20x8xf32>
    %cst_201 = arith.constant dense<0.000000e+00> : vector<20x20xf32>
    %592 = tpu.matmul %589, %590, %cst_201 {dimension_numbers = #tpu.dot_dimension_numbers<[1], [1], [0], [0], [0, 0, 1, 0], [], []>} : vector<20x8xf32>, vector<20x8xf32>, vector<20x20xf32> -> vector<20x20xf32>
    %cst_202 = arith.constant 0.223606795 : f32
    %593 = vector.broadcast %cst_202 : f32 to vector<20x20xf32>
    %594 = arith.mulf %592, %593 : vector<20x20xf32>
    %cst_203 = arith.constant 4.000000e+00 : f32
    %595 = vector.broadcast %cst_203 : f32 to vector<20x1xf32>
    %596 = arith.addf %562, %595 : vector<20x1xf32>
    %597 = vector.broadcast %596 : vector<20x1xf32> to vector<20x20xf32>
    %598 = arith.cmpf ogt, %247, %597 : vector<20x20xf32>
    %cst_204 = arith.constant -9.99999984E+17 : f32
    %599 = vector.broadcast %cst_204 : f32 to vector<20x20xf32>
    %600 = arith.select %598, %599, %594 : vector<20x20xi1>, vector<20x20xf32>
    %601 = arith.addf %600, %594 : vector<20x20xf32>
    %cst_205 = arith.constant dense<0xFF800000> : vector<20xf32>
    %602 = vector.multi_reduction <maximumf>, %601, %cst_205 [1] : vector<20x20xf32> to vector<20xf32>
    %603 = vector.shape_cast %602 : vector<20xf32> to vector<20x1xf32>
    %604 = vector.broadcast %603 : vector<20x1xf32> to vector<20x20xf32>
    %605 = arith.subf %601, %604 : vector<20x20xf32>
    %606 = math.exp %605 : vector<20x20xf32>
    %cst_206 = arith.constant dense<0.000000e+00> : vector<20x8xf32>
    %607 = tpu.matmul %606, %591, %cst_206 {dimension_numbers = #tpu.dot_dimension_numbers<[1], [0], [0], [1], [0, 0, 1, 1], [], []>} : vector<20x20xf32>, vector<20x8xf32>, vector<20x8xf32> -> vector<20x8xf32>
    %cst_207 = arith.constant dense<0.000000e+00> : vector<20xf32>
    %608 = vector.multi_reduction <add>, %606, %cst_207 [1] : vector<20x20xf32> to vector<20xf32>
    %609 = vector.shape_cast %608 : vector<20xf32> to vector<20x1xf32>
    %610 = tpu.reciprocal %609 {approx = true} : vector<20x1xf32> -> vector<20x1xf32>
    %611 = vector.broadcast %610 : vector<20x1xf32> to vector<20x8xf32>
    %612 = arith.mulf %607, %611 : vector<20x8xf32>
    %613 = vector.extract_strided_slice %482 {offsets = [8, 0], sizes = [8, 16], strides = [1, 1]} : vector<16x16xf32> to vector<8x16xf32>
    %cst_208 = arith.constant dense<0.000000e+00> : vector<20x16xf32>
    %614 = tpu.matmul %612, %613, %cst_208 {dimension_numbers = #tpu.dot_dimension_numbers<[1], [0], [0], [1], [0, 0, 1, 1], [], []>} : vector<20x8xf32>, vector<8x16xf32>, vector<20x16xf32> -> vector<20x16xf32>
    %615 = arith.addf %588, %614 : vector<20x16xf32>
    %616 = tpu.concatenate %561, %615 in 0 : vector<20x16xf32>, vector<20x16xf32> -> vector<40x16xf32>
    %617 = arith.addf %477, %616 : vector<40x16xf32>
    %cst_209 = arith.constant dense<0.000000e+00> : vector<40xf32>
    %618 = vector.multi_reduction <add>, %617, %cst_209 [1] : vector<40x16xf32> to vector<40xf32>
    %619 = vector.shape_cast %618 : vector<40xf32> to vector<40x1xf32>
    %cst_210 = arith.constant 1.600000e+01 : f32
    %620 = vector.broadcast %cst_210 : f32 to vector<40x1xf32>
    %621 = arith.divf %619, %620 : vector<40x1xf32>
    %622 = vector.broadcast %621 : vector<40x1xf32> to vector<40x16xf32>
    %623 = arith.subf %617, %622 : vector<40x16xf32>
    %624 = arith.mulf %623, %623 : vector<40x16xf32>
    %cst_211 = arith.constant dense<0.000000e+00> : vector<40xf32>
    %625 = vector.multi_reduction <add>, %624, %cst_211 [1] : vector<40x16xf32> to vector<40xf32>
    %626 = vector.shape_cast %625 : vector<40xf32> to vector<40x1xf32>
    %cst_212 = arith.constant 1.600000e+01 : f32
    %627 = vector.broadcast %cst_212 : f32 to vector<40x1xf32>
    %628 = arith.divf %626, %627 : vector<40x1xf32>
    %629 = vector.broadcast %621 : vector<40x1xf32> to vector<40x16xf32>
    %630 = arith.subf %617, %629 : vector<40x16xf32>
    %cst_213 = arith.constant 9.99999974E-6 : f32
    %631 = vector.broadcast %cst_213 : f32 to vector<40x1xf32>
    %632 = arith.addf %628, %631 : vector<40x1xf32>
    %633 = math.rsqrt %632 : vector<40x1xf32>
    %634 = vector.broadcast %633 : vector<40x1xf32> to vector<40x16xf32>
    %635 = arith.mulf %630, %634 : vector<40x16xf32>
    %636 = vector.broadcast %487 : vector<1x16xf32> to vector<40x16xf32>
    %637 = arith.mulf %635, %636 : vector<40x16xf32>
    %638 = vector.broadcast %488 : vector<1x16xf32> to vector<40x16xf32>
    %639 = arith.addf %637, %638 : vector<40x16xf32>
    %cst_214 = arith.constant dense<0.000000e+00> : vector<40x16xf32>
    %640 = tpu.matmul %639, %483, %cst_214 {dimension_numbers = #tpu.dot_dimension_numbers<[1], [0], [0], [1], [0, 0, 1, 1], [], []>} : vector<40x16xf32>, vector<16x16xf32>, vector<40x16xf32> -> vector<40x16xf32>
    %641 = vector.broadcast %484 : vector<1x16xf32> to vector<40x16xf32>
    %642 = arith.addf %640, %641 : vector<40x16xf32>
    %cst_215 = arith.constant 0.000000e+00 : f32
    %643 = vector.broadcast %cst_215 : f32 to vector<40x16xf32>
    %644 = arith.maximumf %642, %643 : vector<40x16xf32>
    %cst_216 = arith.constant dense<0.000000e+00> : vector<40x16xf32>
    %645 = tpu.matmul %644, %485, %cst_216 {dimension_numbers = #tpu.dot_dimension_numbers<[1], [0], [0], [1], [0, 0, 1, 1], [], []>} : vector<40x16xf32>, vector<16x16xf32>, vector<40x16xf32> -> vector<40x16xf32>
    %646 = vector.broadcast %486 : vector<1x16xf32> to vector<40x16xf32>
    %647 = arith.addf %645, %646 : vector<40x16xf32>
    %648 = arith.addf %639, %647 : vector<40x16xf32>
    %cst_217 = arith.constant dense<0.000000e+00> : vector<40xf32>
    %649 = vector.multi_reduction <add>, %648, %cst_217 [1] : vector<40x16xf32> to vector<40xf32>
    %650 = vector.shape_cast %649 : vector<40xf32> to vector<40x1xf32>
    %cst_218 = arith.constant 1.600000e+01 : f32
    %651 = vector.broadcast %cst_218 : f32 to vector<40x1xf32>
    %652 = arith.divf %650, %651 : vector<40x1xf32>
    %653 = vector.broadcast %652 : vector<40x1xf32> to vector<40x16xf32>
    %654 = arith.subf %648, %653 : vector<40x16xf32>
    %655 = arith.mulf %654, %654 : vector<40x16xf32>
    %cst_219 = arith.constant dense<0.000000e+00> : vector<40xf32>
    %656 = vector.multi_reduction <add>, %655, %cst_219 [1] : vector<40x16xf32> to vector<40xf32>
    %657 = vector.shape_cast %656 : vector<40xf32> to vector<40x1xf32>
    %cst_220 = arith.constant 1.600000e+01 : f32
    %658 = vector.broadcast %cst_220 : f32 to vector<40x1xf32>
    %659 = arith.divf %657, %658 : vector<40x1xf32>
    %660 = vector.broadcast %652 : vector<40x1xf32> to vector<40x16xf32>
    %661 = arith.subf %648, %660 : vector<40x16xf32>
    %cst_221 = arith.constant 9.99999974E-6 : f32
    %662 = vector.broadcast %cst_221 : f32 to vector<40x1xf32>
    %663 = arith.addf %659, %662 : vector<40x1xf32>
    %664 = math.rsqrt %663 : vector<40x1xf32>
    %665 = vector.broadcast %664 : vector<40x1xf32> to vector<40x16xf32>
    %666 = arith.mulf %661, %665 : vector<40x16xf32>
    %667 = vector.broadcast %489 : vector<1x16xf32> to vector<40x16xf32>
    %668 = arith.mulf %666, %667 : vector<40x16xf32>
    %669 = vector.broadcast %490 : vector<1x16xf32> to vector<40x16xf32>
    %670 = arith.addf %668, %669 : vector<40x16xf32>
    %c592 = arith.constant 592 : index
    %c0_222 = arith.constant 0 : index
    %671 = vector.load %arg2[%c592, %c0_222] : memref<848x64xf32, #tpu.memory_space<vmem>>, vector<6x20xf32>
    %c600 = arith.constant 600 : index
    %c0_223 = arith.constant 0 : index
    %672 = vector.load %arg2[%c600, %c0_223] : memref<848x64xf32, #tpu.memory_space<vmem>>, vector<6x1xf32>
    %c608 = arith.constant 608 : index
    %c0_224 = arith.constant 0 : index
    %673 = vector.load %arg2[%c608, %c0_224] : memref<848x64xf32, #tpu.memory_space<vmem>>, vector<16x7xf32>
    %c624 = arith.constant 624 : index
    %c0_225 = arith.constant 0 : index
    %674 = vector.load %arg2[%c624, %c0_225] : memref<848x64xf32, #tpu.memory_space<vmem>>, vector<1x7xf32>
    %675 = vector.extract_strided_slice %670 {offsets = [0, 0], sizes = [20, 16], strides = [1, 1]} : vector<40x16xf32> to vector<20x16xf32>
    %cst_226 = arith.constant dense<0.000000e+00> : vector<6x16xf32>
    %676 = tpu.matmul %671, %675, %cst_226 {dimension_numbers = #tpu.dot_dimension_numbers<[1], [0], [0], [1], [0, 0, 1, 1], [], []>} : vector<6x20xf32>, vector<20x16xf32>, vector<6x16xf32> -> vector<6x16xf32>
    %677 = vector.broadcast %672 : vector<6x1xf32> to vector<6x16xf32>
    %678 = arith.addf %676, %677 : vector<6x16xf32>
    %679 = vector.extract_strided_slice %670 {offsets = [20, 0], sizes = [20, 16], strides = [1, 1]} : vector<40x16xf32> to vector<20x16xf32>
    %cst_227 = arith.constant dense<0.000000e+00> : vector<6x16xf32>
    %680 = tpu.matmul %671, %679, %cst_227 {dimension_numbers = #tpu.dot_dimension_numbers<[1], [0], [0], [1], [0, 0, 1, 1], [], []>} : vector<6x20xf32>, vector<20x16xf32>, vector<6x16xf32> -> vector<6x16xf32>
    %681 = vector.broadcast %672 : vector<6x1xf32> to vector<6x16xf32>
    %682 = arith.addf %680, %681 : vector<6x16xf32>
    %683 = tpu.concatenate %678, %682 in 0 : vector<6x16xf32>, vector<6x16xf32> -> vector<12x16xf32>
    %cst_228 = arith.constant dense<0.000000e+00> : vector<12x7xf32>
    %684 = tpu.matmul %683, %673, %cst_228 {dimension_numbers = #tpu.dot_dimension_numbers<[1], [0], [0], [1], [0, 0, 1, 1], [], []>} : vector<12x16xf32>, vector<16x7xf32>, vector<12x7xf32> -> vector<12x7xf32>
    %685 = vector.broadcast %674 : vector<1x7xf32> to vector<12x7xf32>
    %686 = arith.addf %684, %685 : vector<12x7xf32>
    %687 = vector.extract_strided_slice %0 {offsets = [0, 0, 0], sizes = [1, 8, 7], strides = [1, 1, 1]} : vector<2x8x7xf32> to vector<1x8x7xf32>
    %688 = vector.shape_cast %687 : vector<1x8x7xf32> to vector<8x7xf32>
    %689 = vector.extract_strided_slice %686 {offsets = [0, 0], sizes = [6, 7], strides = [1, 1]} : vector<12x7xf32> to vector<6x7xf32>
    %690 = vector.extract_strided_slice %1 {offsets = [0, 12, 0], sizes = [1, 6, 7], strides = [1, 1, 1]} : vector<2x24x7xf32> to vector<1x6x7xf32>
    %691 = vector.shape_cast %690 : vector<1x6x7xf32> to vector<6x7xf32>
    %692 = vector.extract_strided_slice %0 {offsets = [1, 0, 0], sizes = [1, 8, 7], strides = [1, 1, 1]} : vector<2x8x7xf32> to vector<1x8x7xf32>
    %693 = vector.shape_cast %692 : vector<1x8x7xf32> to vector<8x7xf32>
    %694 = vector.extract_strided_slice %686 {offsets = [6, 0], sizes = [6, 7], strides = [1, 1]} : vector<12x7xf32> to vector<6x7xf32>
    %695 = vector.extract_strided_slice %1 {offsets = [1, 12, 0], sizes = [1, 6, 7], strides = [1, 1, 1]} : vector<2x24x7xf32> to vector<1x6x7xf32>
    %696 = vector.shape_cast %695 : vector<1x6x7xf32> to vector<6x7xf32>
    %697 = tpu.concatenate %688, %689, %691, %693, %694, %696 in 0 : vector<8x7xf32>, vector<6x7xf32>, vector<6x7xf32>, vector<8x7xf32>, vector<6x7xf32>, vector<6x7xf32> -> vector<40x7xf32>
    %c640 = arith.constant 640 : index
    %c0_229 = arith.constant 0 : index
    %698 = vector.load %arg2[%c640, %c0_229] : memref<848x64xf32, #tpu.memory_space<vmem>>, vector<20x16xf32>
    %c632 = arith.constant 632 : index
    %c0_230 = arith.constant 0 : index
    %699 = vector.load %arg2[%c632, %c0_230] : memref<848x64xf32, #tpu.memory_space<vmem>>, vector<7x16xf32>
    %cst_231 = arith.constant dense<0.000000e+00> : vector<40x16xf32>
    %700 = tpu.matmul %697, %699, %cst_231 {dimension_numbers = #tpu.dot_dimension_numbers<[1], [0], [0], [1], [0, 0, 1, 1], [], []>} : vector<40x7xf32>, vector<7x16xf32>, vector<40x16xf32> -> vector<40x16xf32>
    %701 = tpu.concatenate %698, %698 in 0 : vector<20x16xf32>, vector<20x16xf32> -> vector<40x16xf32>
    %702 = arith.addf %700, %701 : vector<40x16xf32>
    %c664 = arith.constant 664 : index
    %c0_232 = arith.constant 0 : index
    %703 = vector.load %arg2[%c664, %c0_232] : memref<848x64xf32, #tpu.memory_space<vmem>>, vector<16x64xf32>
    %c680 = arith.constant 680 : index
    %c0_233 = arith.constant 0 : index
    %704 = vector.load %arg2[%c680, %c0_233] : memref<848x64xf32, #tpu.memory_space<vmem>>, vector<1x64xf32>
    %c688 = arith.constant 688 : index
    %c0_234 = arith.constant 0 : index
    %705 = vector.load %arg2[%c688, %c0_234] : memref<848x64xf32, #tpu.memory_space<vmem>>, vector<16x1xf32>
    %c704 = arith.constant 704 : index
    %c0_235 = arith.constant 0 : index
    %706 = vector.load %arg2[%c704, %c0_235] : memref<848x64xf32, #tpu.memory_space<vmem>>, vector<1x1xf32>
    %c712 = arith.constant 712 : index
    %c0_236 = arith.constant 0 : index
    %707 = vector.load %arg2[%c712, %c0_236] : memref<848x64xf32, #tpu.memory_space<vmem>>, vector<16x16xf32>
    %c728 = arith.constant 728 : index
    %c0_237 = arith.constant 0 : index
    %708 = vector.load %arg2[%c728, %c0_237] : memref<848x64xf32, #tpu.memory_space<vmem>>, vector<16x16xf32>
    %c744 = arith.constant 744 : index
    %c0_238 = arith.constant 0 : index
    %709 = vector.load %arg2[%c744, %c0_238] : memref<848x64xf32, #tpu.memory_space<vmem>>, vector<1x16xf32>
    %c752 = arith.constant 752 : index
    %c0_239 = arith.constant 0 : index
    %710 = vector.load %arg2[%c752, %c0_239] : memref<848x64xf32, #tpu.memory_space<vmem>>, vector<16x16xf32>
    %c768 = arith.constant 768 : index
    %c0_240 = arith.constant 0 : index
    %711 = vector.load %arg2[%c768, %c0_240] : memref<848x64xf32, #tpu.memory_space<vmem>>, vector<1x16xf32>
    %c776 = arith.constant 776 : index
    %c0_241 = arith.constant 0 : index
    %712 = vector.load %arg2[%c776, %c0_241] : memref<848x64xf32, #tpu.memory_space<vmem>>, vector<1x16xf32>
    %c784 = arith.constant 784 : index
    %c0_242 = arith.constant 0 : index
    %713 = vector.load %arg2[%c784, %c0_242] : memref<848x64xf32, #tpu.memory_space<vmem>>, vector<1x16xf32>
    %c792 = arith.constant 792 : index
    %c0_243 = arith.constant 0 : index
    %714 = vector.load %arg2[%c792, %c0_243] : memref<848x64xf32, #tpu.memory_space<vmem>>, vector<1x16xf32>
    %c800 = arith.constant 800 : index
    %c0_244 = arith.constant 0 : index
    %715 = vector.load %arg2[%c800, %c0_244] : memref<848x64xf32, #tpu.memory_space<vmem>>, vector<1x16xf32>
    %cst_245 = arith.constant dense<0.000000e+00> : vector<40x64xf32>
    %716 = tpu.matmul %702, %703, %cst_245 {dimension_numbers = #tpu.dot_dimension_numbers<[1], [0], [0], [1], [0, 0, 1, 1], [], []>} : vector<40x16xf32>, vector<16x64xf32>, vector<40x64xf32> -> vector<40x64xf32>
    %717 = vector.broadcast %704 : vector<1x64xf32> to vector<40x64xf32>
    %718 = arith.addf %716, %717 : vector<40x64xf32>
    %719 = vector.extract_strided_slice %718 {offsets = [0, 0], sizes = [40, 16], strides = [1, 1]} : vector<40x64xf32> to vector<40x16xf32>
    %cst_246 = arith.constant 0.000000e+00 : f32
    %720 = vector.broadcast %cst_246 : f32 to vector<40x16xf32>
    %721 = arith.maximumf %719, %720 : vector<40x16xf32>
    %cst_247 = arith.constant dense<0.000000e+00> : vector<40x1xf32>
    %722 = tpu.matmul %721, %705, %cst_247 {dimension_numbers = #tpu.dot_dimension_numbers<[1], [0], [0], [1], [0, 0, 1, 1], [], []>} : vector<40x16xf32>, vector<16x1xf32>, vector<40x1xf32> -> vector<40x1xf32>
    %723 = vector.broadcast %706 : vector<1x1xf32> to vector<40x1xf32>
    %724 = arith.addf %722, %723 : vector<40x1xf32>
    %cst_248 = arith.constant 0.000000e+00 : f32
    %725 = vector.broadcast %cst_248 : f32 to vector<40x1xf32>
    %726 = arith.subf %725, %724 : vector<40x1xf32>
    %727 = math.exp %726 : vector<40x1xf32>
    %cst_249 = arith.constant 1.000000e+00 : f32
    %728 = vector.broadcast %cst_249 : f32 to vector<40x1xf32>
    %729 = arith.addf %728, %727 : vector<40x1xf32>
    %730 = tpu.reciprocal %729 {approx = true} : vector<40x1xf32> -> vector<40x1xf32>
    %cst_250 = arith.constant 2.000000e+01 : f32
    %731 = vector.broadcast %cst_250 : f32 to vector<40x1xf32>
    %732 = arith.mulf %730, %731 : vector<40x1xf32>
    %733 = vector.extract_strided_slice %732 {offsets = [0, 0], sizes = [20, 1], strides = [1, 1]} : vector<40x1xf32> to vector<20x1xf32>
    %734 = vector.extract_strided_slice %718 {offsets = [0, 16], sizes = [20, 8], strides = [1, 1]} : vector<40x64xf32> to vector<20x8xf32>
    %735 = vector.extract_strided_slice %718 {offsets = [0, 32], sizes = [20, 8], strides = [1, 1]} : vector<40x64xf32> to vector<20x8xf32>
    %736 = vector.extract_strided_slice %718 {offsets = [0, 48], sizes = [20, 8], strides = [1, 1]} : vector<40x64xf32> to vector<20x8xf32>
    %cst_251 = arith.constant dense<0.000000e+00> : vector<20x20xf32>
    %737 = tpu.matmul %734, %735, %cst_251 {dimension_numbers = #tpu.dot_dimension_numbers<[1], [1], [0], [0], [0, 0, 1, 0], [], []>} : vector<20x8xf32>, vector<20x8xf32>, vector<20x20xf32> -> vector<20x20xf32>
    %cst_252 = arith.constant 0.223606795 : f32
    %738 = vector.broadcast %cst_252 : f32 to vector<20x20xf32>
    %739 = arith.mulf %737, %738 : vector<20x20xf32>
    %cst_253 = arith.constant 2.000000e+00 : f32
    %740 = vector.broadcast %cst_253 : f32 to vector<20x1xf32>
    %741 = arith.addf %733, %740 : vector<20x1xf32>
    %742 = vector.broadcast %741 : vector<20x1xf32> to vector<20x20xf32>
    %743 = arith.cmpf ogt, %247, %742 : vector<20x20xf32>
    %cst_254 = arith.constant -9.99999984E+17 : f32
    %744 = vector.broadcast %cst_254 : f32 to vector<20x20xf32>
    %745 = arith.select %743, %744, %739 : vector<20x20xi1>, vector<20x20xf32>
    %746 = arith.addf %745, %739 : vector<20x20xf32>
    %cst_255 = arith.constant dense<0xFF800000> : vector<20xf32>
    %747 = vector.multi_reduction <maximumf>, %746, %cst_255 [1] : vector<20x20xf32> to vector<20xf32>
    %748 = vector.shape_cast %747 : vector<20xf32> to vector<20x1xf32>
    %749 = vector.broadcast %748 : vector<20x1xf32> to vector<20x20xf32>
    %750 = arith.subf %746, %749 : vector<20x20xf32>
    %751 = math.exp %750 : vector<20x20xf32>
    %cst_256 = arith.constant dense<0.000000e+00> : vector<20x8xf32>
    %752 = tpu.matmul %751, %736, %cst_256 {dimension_numbers = #tpu.dot_dimension_numbers<[1], [0], [0], [1], [0, 0, 1, 1], [], []>} : vector<20x20xf32>, vector<20x8xf32>, vector<20x8xf32> -> vector<20x8xf32>
    %cst_257 = arith.constant dense<0.000000e+00> : vector<20xf32>
    %753 = vector.multi_reduction <add>, %751, %cst_257 [1] : vector<20x20xf32> to vector<20xf32>
    %754 = vector.shape_cast %753 : vector<20xf32> to vector<20x1xf32>
    %755 = tpu.reciprocal %754 {approx = true} : vector<20x1xf32> -> vector<20x1xf32>
    %756 = vector.broadcast %755 : vector<20x1xf32> to vector<20x8xf32>
    %757 = arith.mulf %752, %756 : vector<20x8xf32>
    %758 = vector.extract_strided_slice %707 {offsets = [0, 0], sizes = [8, 16], strides = [1, 1]} : vector<16x16xf32> to vector<8x16xf32>
    %cst_258 = arith.constant dense<0.000000e+00> : vector<20x16xf32>
    %759 = tpu.matmul %757, %758, %cst_258 {dimension_numbers = #tpu.dot_dimension_numbers<[1], [0], [0], [1], [0, 0, 1, 1], [], []>} : vector<20x8xf32>, vector<8x16xf32>, vector<20x16xf32> -> vector<20x16xf32>
    %760 = vector.extract_strided_slice %718 {offsets = [0, 24], sizes = [20, 8], strides = [1, 1]} : vector<40x64xf32> to vector<20x8xf32>
    %761 = vector.extract_strided_slice %718 {offsets = [0, 40], sizes = [20, 8], strides = [1, 1]} : vector<40x64xf32> to vector<20x8xf32>
    %762 = vector.extract_strided_slice %718 {offsets = [0, 56], sizes = [20, 8], strides = [1, 1]} : vector<40x64xf32> to vector<20x8xf32>
    %cst_259 = arith.constant dense<0.000000e+00> : vector<20x20xf32>
    %763 = tpu.matmul %760, %761, %cst_259 {dimension_numbers = #tpu.dot_dimension_numbers<[1], [1], [0], [0], [0, 0, 1, 0], [], []>} : vector<20x8xf32>, vector<20x8xf32>, vector<20x20xf32> -> vector<20x20xf32>
    %cst_260 = arith.constant 0.223606795 : f32
    %764 = vector.broadcast %cst_260 : f32 to vector<20x20xf32>
    %765 = arith.mulf %763, %764 : vector<20x20xf32>
    %cst_261 = arith.constant 4.000000e+00 : f32
    %766 = vector.broadcast %cst_261 : f32 to vector<20x1xf32>
    %767 = arith.addf %733, %766 : vector<20x1xf32>
    %768 = vector.broadcast %767 : vector<20x1xf32> to vector<20x20xf32>
    %769 = arith.cmpf ogt, %247, %768 : vector<20x20xf32>
    %cst_262 = arith.constant -9.99999984E+17 : f32
    %770 = vector.broadcast %cst_262 : f32 to vector<20x20xf32>
    %771 = arith.select %769, %770, %765 : vector<20x20xi1>, vector<20x20xf32>
    %772 = arith.addf %771, %765 : vector<20x20xf32>
    %cst_263 = arith.constant dense<0xFF800000> : vector<20xf32>
    %773 = vector.multi_reduction <maximumf>, %772, %cst_263 [1] : vector<20x20xf32> to vector<20xf32>
    %774 = vector.shape_cast %773 : vector<20xf32> to vector<20x1xf32>
    %775 = vector.broadcast %774 : vector<20x1xf32> to vector<20x20xf32>
    %776 = arith.subf %772, %775 : vector<20x20xf32>
    %777 = math.exp %776 : vector<20x20xf32>
    %cst_264 = arith.constant dense<0.000000e+00> : vector<20x8xf32>
    %778 = tpu.matmul %777, %762, %cst_264 {dimension_numbers = #tpu.dot_dimension_numbers<[1], [0], [0], [1], [0, 0, 1, 1], [], []>} : vector<20x20xf32>, vector<20x8xf32>, vector<20x8xf32> -> vector<20x8xf32>
    %cst_265 = arith.constant dense<0.000000e+00> : vector<20xf32>
    %779 = vector.multi_reduction <add>, %777, %cst_265 [1] : vector<20x20xf32> to vector<20xf32>
    %780 = vector.shape_cast %779 : vector<20xf32> to vector<20x1xf32>
    %781 = tpu.reciprocal %780 {approx = true} : vector<20x1xf32> -> vector<20x1xf32>
    %782 = vector.broadcast %781 : vector<20x1xf32> to vector<20x8xf32>
    %783 = arith.mulf %778, %782 : vector<20x8xf32>
    %784 = vector.extract_strided_slice %707 {offsets = [8, 0], sizes = [8, 16], strides = [1, 1]} : vector<16x16xf32> to vector<8x16xf32>
    %cst_266 = arith.constant dense<0.000000e+00> : vector<20x16xf32>
    %785 = tpu.matmul %783, %784, %cst_266 {dimension_numbers = #tpu.dot_dimension_numbers<[1], [0], [0], [1], [0, 0, 1, 1], [], []>} : vector<20x8xf32>, vector<8x16xf32>, vector<20x16xf32> -> vector<20x16xf32>
    %786 = arith.addf %759, %785 : vector<20x16xf32>
    %787 = vector.extract_strided_slice %732 {offsets = [20, 0], sizes = [20, 1], strides = [1, 1]} : vector<40x1xf32> to vector<20x1xf32>
    %788 = vector.extract_strided_slice %718 {offsets = [20, 16], sizes = [20, 8], strides = [1, 1]} : vector<40x64xf32> to vector<20x8xf32>
    %789 = vector.extract_strided_slice %718 {offsets = [20, 32], sizes = [20, 8], strides = [1, 1]} : vector<40x64xf32> to vector<20x8xf32>
    %790 = vector.extract_strided_slice %718 {offsets = [20, 48], sizes = [20, 8], strides = [1, 1]} : vector<40x64xf32> to vector<20x8xf32>
    %cst_267 = arith.constant dense<0.000000e+00> : vector<20x20xf32>
    %791 = tpu.matmul %788, %789, %cst_267 {dimension_numbers = #tpu.dot_dimension_numbers<[1], [1], [0], [0], [0, 0, 1, 0], [], []>} : vector<20x8xf32>, vector<20x8xf32>, vector<20x20xf32> -> vector<20x20xf32>
    %cst_268 = arith.constant 0.223606795 : f32
    %792 = vector.broadcast %cst_268 : f32 to vector<20x20xf32>
    %793 = arith.mulf %791, %792 : vector<20x20xf32>
    %cst_269 = arith.constant 2.000000e+00 : f32
    %794 = vector.broadcast %cst_269 : f32 to vector<20x1xf32>
    %795 = arith.addf %787, %794 : vector<20x1xf32>
    %796 = vector.broadcast %795 : vector<20x1xf32> to vector<20x20xf32>
    %797 = arith.cmpf ogt, %247, %796 : vector<20x20xf32>
    %cst_270 = arith.constant -9.99999984E+17 : f32
    %798 = vector.broadcast %cst_270 : f32 to vector<20x20xf32>
    %799 = arith.select %797, %798, %793 : vector<20x20xi1>, vector<20x20xf32>
    %800 = arith.addf %799, %793 : vector<20x20xf32>
    %cst_271 = arith.constant dense<0xFF800000> : vector<20xf32>
    %801 = vector.multi_reduction <maximumf>, %800, %cst_271 [1] : vector<20x20xf32> to vector<20xf32>
    %802 = vector.shape_cast %801 : vector<20xf32> to vector<20x1xf32>
    %803 = vector.broadcast %802 : vector<20x1xf32> to vector<20x20xf32>
    %804 = arith.subf %800, %803 : vector<20x20xf32>
    %805 = math.exp %804 : vector<20x20xf32>
    %cst_272 = arith.constant dense<0.000000e+00> : vector<20x8xf32>
    %806 = tpu.matmul %805, %790, %cst_272 {dimension_numbers = #tpu.dot_dimension_numbers<[1], [0], [0], [1], [0, 0, 1, 1], [], []>} : vector<20x20xf32>, vector<20x8xf32>, vector<20x8xf32> -> vector<20x8xf32>
    %cst_273 = arith.constant dense<0.000000e+00> : vector<20xf32>
    %807 = vector.multi_reduction <add>, %805, %cst_273 [1] : vector<20x20xf32> to vector<20xf32>
    %808 = vector.shape_cast %807 : vector<20xf32> to vector<20x1xf32>
    %809 = tpu.reciprocal %808 {approx = true} : vector<20x1xf32> -> vector<20x1xf32>
    %810 = vector.broadcast %809 : vector<20x1xf32> to vector<20x8xf32>
    %811 = arith.mulf %806, %810 : vector<20x8xf32>
    %812 = vector.extract_strided_slice %707 {offsets = [0, 0], sizes = [8, 16], strides = [1, 1]} : vector<16x16xf32> to vector<8x16xf32>
    %cst_274 = arith.constant dense<0.000000e+00> : vector<20x16xf32>
    %813 = tpu.matmul %811, %812, %cst_274 {dimension_numbers = #tpu.dot_dimension_numbers<[1], [0], [0], [1], [0, 0, 1, 1], [], []>} : vector<20x8xf32>, vector<8x16xf32>, vector<20x16xf32> -> vector<20x16xf32>
    %814 = vector.extract_strided_slice %718 {offsets = [20, 24], sizes = [20, 8], strides = [1, 1]} : vector<40x64xf32> to vector<20x8xf32>
    %815 = vector.extract_strided_slice %718 {offsets = [20, 40], sizes = [20, 8], strides = [1, 1]} : vector<40x64xf32> to vector<20x8xf32>
    %816 = vector.extract_strided_slice %718 {offsets = [20, 56], sizes = [20, 8], strides = [1, 1]} : vector<40x64xf32> to vector<20x8xf32>
    %cst_275 = arith.constant dense<0.000000e+00> : vector<20x20xf32>
    %817 = tpu.matmul %814, %815, %cst_275 {dimension_numbers = #tpu.dot_dimension_numbers<[1], [1], [0], [0], [0, 0, 1, 0], [], []>} : vector<20x8xf32>, vector<20x8xf32>, vector<20x20xf32> -> vector<20x20xf32>
    %cst_276 = arith.constant 0.223606795 : f32
    %818 = vector.broadcast %cst_276 : f32 to vector<20x20xf32>
    %819 = arith.mulf %817, %818 : vector<20x20xf32>
    %cst_277 = arith.constant 4.000000e+00 : f32
    %820 = vector.broadcast %cst_277 : f32 to vector<20x1xf32>
    %821 = arith.addf %787, %820 : vector<20x1xf32>
    %822 = vector.broadcast %821 : vector<20x1xf32> to vector<20x20xf32>
    %823 = arith.cmpf ogt, %247, %822 : vector<20x20xf32>
    %cst_278 = arith.constant -9.99999984E+17 : f32
    %824 = vector.broadcast %cst_278 : f32 to vector<20x20xf32>
    %825 = arith.select %823, %824, %819 : vector<20x20xi1>, vector<20x20xf32>
    %826 = arith.addf %825, %819 : vector<20x20xf32>
    %cst_279 = arith.constant dense<0xFF800000> : vector<20xf32>
    %827 = vector.multi_reduction <maximumf>, %826, %cst_279 [1] : vector<20x20xf32> to vector<20xf32>
    %828 = vector.shape_cast %827 : vector<20xf32> to vector<20x1xf32>
    %829 = vector.broadcast %828 : vector<20x1xf32> to vector<20x20xf32>
    %830 = arith.subf %826, %829 : vector<20x20xf32>
    %831 = math.exp %830 : vector<20x20xf32>
    %cst_280 = arith.constant dense<0.000000e+00> : vector<20x8xf32>
    %832 = tpu.matmul %831, %816, %cst_280 {dimension_numbers = #tpu.dot_dimension_numbers<[1], [0], [0], [1], [0, 0, 1, 1], [], []>} : vector<20x20xf32>, vector<20x8xf32>, vector<20x8xf32> -> vector<20x8xf32>
    %cst_281 = arith.constant dense<0.000000e+00> : vector<20xf32>
    %833 = vector.multi_reduction <add>, %831, %cst_281 [1] : vector<20x20xf32> to vector<20xf32>
    %834 = vector.shape_cast %833 : vector<20xf32> to vector<20x1xf32>
    %835 = tpu.reciprocal %834 {approx = true} : vector<20x1xf32> -> vector<20x1xf32>
    %836 = vector.broadcast %835 : vector<20x1xf32> to vector<20x8xf32>
    %837 = arith.mulf %832, %836 : vector<20x8xf32>
    %838 = vector.extract_strided_slice %707 {offsets = [8, 0], sizes = [8, 16], strides = [1, 1]} : vector<16x16xf32> to vector<8x16xf32>
    %cst_282 = arith.constant dense<0.000000e+00> : vector<20x16xf32>
    %839 = tpu.matmul %837, %838, %cst_282 {dimension_numbers = #tpu.dot_dimension_numbers<[1], [0], [0], [1], [0, 0, 1, 1], [], []>} : vector<20x8xf32>, vector<8x16xf32>, vector<20x16xf32> -> vector<20x16xf32>
    %840 = arith.addf %813, %839 : vector<20x16xf32>
    %841 = tpu.concatenate %786, %840 in 0 : vector<20x16xf32>, vector<20x16xf32> -> vector<40x16xf32>
    %842 = arith.addf %702, %841 : vector<40x16xf32>
    %cst_283 = arith.constant dense<0.000000e+00> : vector<40xf32>
    %843 = vector.multi_reduction <add>, %842, %cst_283 [1] : vector<40x16xf32> to vector<40xf32>
    %844 = vector.shape_cast %843 : vector<40xf32> to vector<40x1xf32>
    %cst_284 = arith.constant 1.600000e+01 : f32
    %845 = vector.broadcast %cst_284 : f32 to vector<40x1xf32>
    %846 = arith.divf %844, %845 : vector<40x1xf32>
    %847 = vector.broadcast %846 : vector<40x1xf32> to vector<40x16xf32>
    %848 = arith.subf %842, %847 : vector<40x16xf32>
    %849 = arith.mulf %848, %848 : vector<40x16xf32>
    %cst_285 = arith.constant dense<0.000000e+00> : vector<40xf32>
    %850 = vector.multi_reduction <add>, %849, %cst_285 [1] : vector<40x16xf32> to vector<40xf32>
    %851 = vector.shape_cast %850 : vector<40xf32> to vector<40x1xf32>
    %cst_286 = arith.constant 1.600000e+01 : f32
    %852 = vector.broadcast %cst_286 : f32 to vector<40x1xf32>
    %853 = arith.divf %851, %852 : vector<40x1xf32>
    %854 = vector.broadcast %846 : vector<40x1xf32> to vector<40x16xf32>
    %855 = arith.subf %842, %854 : vector<40x16xf32>
    %cst_287 = arith.constant 9.99999974E-6 : f32
    %856 = vector.broadcast %cst_287 : f32 to vector<40x1xf32>
    %857 = arith.addf %853, %856 : vector<40x1xf32>
    %858 = math.rsqrt %857 : vector<40x1xf32>
    %859 = vector.broadcast %858 : vector<40x1xf32> to vector<40x16xf32>
    %860 = arith.mulf %855, %859 : vector<40x16xf32>
    %861 = vector.broadcast %712 : vector<1x16xf32> to vector<40x16xf32>
    %862 = arith.mulf %860, %861 : vector<40x16xf32>
    %863 = vector.broadcast %713 : vector<1x16xf32> to vector<40x16xf32>
    %864 = arith.addf %862, %863 : vector<40x16xf32>
    %cst_288 = arith.constant dense<0.000000e+00> : vector<40x16xf32>
    %865 = tpu.matmul %864, %708, %cst_288 {dimension_numbers = #tpu.dot_dimension_numbers<[1], [0], [0], [1], [0, 0, 1, 1], [], []>} : vector<40x16xf32>, vector<16x16xf32>, vector<40x16xf32> -> vector<40x16xf32>
    %866 = vector.broadcast %709 : vector<1x16xf32> to vector<40x16xf32>
    %867 = arith.addf %865, %866 : vector<40x16xf32>
    %cst_289 = arith.constant 0.000000e+00 : f32
    %868 = vector.broadcast %cst_289 : f32 to vector<40x16xf32>
    %869 = arith.maximumf %867, %868 : vector<40x16xf32>
    %cst_290 = arith.constant dense<0.000000e+00> : vector<40x16xf32>
    %870 = tpu.matmul %869, %710, %cst_290 {dimension_numbers = #tpu.dot_dimension_numbers<[1], [0], [0], [1], [0, 0, 1, 1], [], []>} : vector<40x16xf32>, vector<16x16xf32>, vector<40x16xf32> -> vector<40x16xf32>
    %871 = vector.broadcast %711 : vector<1x16xf32> to vector<40x16xf32>
    %872 = arith.addf %870, %871 : vector<40x16xf32>
    %873 = arith.addf %864, %872 : vector<40x16xf32>
    %cst_291 = arith.constant dense<0.000000e+00> : vector<40xf32>
    %874 = vector.multi_reduction <add>, %873, %cst_291 [1] : vector<40x16xf32> to vector<40xf32>
    %875 = vector.shape_cast %874 : vector<40xf32> to vector<40x1xf32>
    %cst_292 = arith.constant 1.600000e+01 : f32
    %876 = vector.broadcast %cst_292 : f32 to vector<40x1xf32>
    %877 = arith.divf %875, %876 : vector<40x1xf32>
    %878 = vector.broadcast %877 : vector<40x1xf32> to vector<40x16xf32>
    %879 = arith.subf %873, %878 : vector<40x16xf32>
    %880 = arith.mulf %879, %879 : vector<40x16xf32>
    %cst_293 = arith.constant dense<0.000000e+00> : vector<40xf32>
    %881 = vector.multi_reduction <add>, %880, %cst_293 [1] : vector<40x16xf32> to vector<40xf32>
    %882 = vector.shape_cast %881 : vector<40xf32> to vector<40x1xf32>
    %cst_294 = arith.constant 1.600000e+01 : f32
    %883 = vector.broadcast %cst_294 : f32 to vector<40x1xf32>
    %884 = arith.divf %882, %883 : vector<40x1xf32>
    %885 = vector.broadcast %877 : vector<40x1xf32> to vector<40x16xf32>
    %886 = arith.subf %873, %885 : vector<40x16xf32>
    %cst_295 = arith.constant 9.99999974E-6 : f32
    %887 = vector.broadcast %cst_295 : f32 to vector<40x1xf32>
    %888 = arith.addf %884, %887 : vector<40x1xf32>
    %889 = math.rsqrt %888 : vector<40x1xf32>
    %890 = vector.broadcast %889 : vector<40x1xf32> to vector<40x16xf32>
    %891 = arith.mulf %886, %890 : vector<40x16xf32>
    %892 = vector.broadcast %714 : vector<1x16xf32> to vector<40x16xf32>
    %893 = arith.mulf %891, %892 : vector<40x16xf32>
    %894 = vector.broadcast %715 : vector<1x16xf32> to vector<40x16xf32>
    %895 = arith.addf %893, %894 : vector<40x16xf32>
    %c808 = arith.constant 808 : index
    %c0_296 = arith.constant 0 : index
    %896 = vector.load %arg2[%c808, %c0_296] : memref<848x64xf32, #tpu.memory_space<vmem>>, vector<6x20xf32>
    %c816 = arith.constant 816 : index
    %c0_297 = arith.constant 0 : index
    %897 = vector.load %arg2[%c816, %c0_297] : memref<848x64xf32, #tpu.memory_space<vmem>>, vector<6x1xf32>
    %c824 = arith.constant 824 : index
    %c0_298 = arith.constant 0 : index
    %898 = vector.load %arg2[%c824, %c0_298] : memref<848x64xf32, #tpu.memory_space<vmem>>, vector<16x7xf32>
    %c840 = arith.constant 840 : index
    %c0_299 = arith.constant 0 : index
    %899 = vector.load %arg2[%c840, %c0_299] : memref<848x64xf32, #tpu.memory_space<vmem>>, vector<1x7xf32>
    %900 = vector.extract_strided_slice %895 {offsets = [0, 0], sizes = [20, 16], strides = [1, 1]} : vector<40x16xf32> to vector<20x16xf32>
    %cst_300 = arith.constant dense<0.000000e+00> : vector<6x16xf32>
    %901 = tpu.matmul %896, %900, %cst_300 {dimension_numbers = #tpu.dot_dimension_numbers<[1], [0], [0], [1], [0, 0, 1, 1], [], []>} : vector<6x20xf32>, vector<20x16xf32>, vector<6x16xf32> -> vector<6x16xf32>
    %902 = vector.broadcast %897 : vector<6x1xf32> to vector<6x16xf32>
    %903 = arith.addf %901, %902 : vector<6x16xf32>
    %904 = vector.extract_strided_slice %895 {offsets = [20, 0], sizes = [20, 16], strides = [1, 1]} : vector<40x16xf32> to vector<20x16xf32>
    %cst_301 = arith.constant dense<0.000000e+00> : vector<6x16xf32>
    %905 = tpu.matmul %896, %904, %cst_301 {dimension_numbers = #tpu.dot_dimension_numbers<[1], [0], [0], [1], [0, 0, 1, 1], [], []>} : vector<6x20xf32>, vector<20x16xf32>, vector<6x16xf32> -> vector<6x16xf32>
    %906 = vector.broadcast %897 : vector<6x1xf32> to vector<6x16xf32>
    %907 = arith.addf %905, %906 : vector<6x16xf32>
    %908 = tpu.concatenate %903, %907 in 0 : vector<6x16xf32>, vector<6x16xf32> -> vector<12x16xf32>
    %cst_302 = arith.constant dense<0.000000e+00> : vector<12x7xf32>
    %909 = tpu.matmul %908, %898, %cst_302 {dimension_numbers = #tpu.dot_dimension_numbers<[1], [0], [0], [1], [0, 0, 1, 1], [], []>} : vector<12x16xf32>, vector<16x7xf32>, vector<12x7xf32> -> vector<12x7xf32>
    %910 = vector.broadcast %899 : vector<1x7xf32> to vector<12x7xf32>
    %911 = arith.addf %909, %910 : vector<12x7xf32>
    %912 = tpu.concatenate %228, %461, %686, %911 in 0 : vector<12x7xf32>, vector<12x7xf32>, vector<12x7xf32>, vector<12x7xf32> -> vector<48x7xf32>
    %c0_303 = arith.constant 0 : index
    %c0_304 = arith.constant 0 : index
    %913 = vector.load %arg3[%c0_303, %c0_304] : memref<48x7xf32, #tpu.memory_space<vmem>>, vector<48x7xf32>
    tpu.vector_store %arg3[%c0_303, %c0_304], %912 {strides = array<i32>} : memref<48x7xf32, #tpu.memory_space<vmem>>, vector<48x7xf32>,
    return
  }
}

</mosaic_0001>

<bundles_post_ra>
// kernel: forward.1
= control target key start
LH: loop header
LB: loop body
LE: loop exit
PB: predicated region body
PF: predicated region fallthrough
CT: control target
= control target key end

     0   :  { %vm42_vm0 = vcmask 1046528   ;;  %vm35_vm1 = vcmask 56320   ;;  %vm143_vm2 = vcmask 130048   ;;  %v11352_v12 = vmov 0.0   ;;  %s11354_s30 = smov 88   ;;  %s11355_s4 = smov 96   ;;  %s13612_s2 = inlined_call_operand.vmem [shape: f32[848,64], index: 2, kind: input, shape index: {}]   ;;  %s13613_s0 = inlined_call_operand.vmem [shape: f32[2,8,7], index: 0, kind: input, shape index: {}]   ;;  %s13614_s1 = inlined_call_operand.vmem [shape: f32[2,24,7], index: 1, kind: input, shape index: {}]   ;;  %s13615_s3 = inlined_call_operand.vmem [shape: f32[48,7], index: 3, kind: output, shape index: {}]  }
   0x1   :  { %v34_v0 = vld [vmem:[%s13612_s2] sm:$0x7f]  ;;  %v11392_v2 = vld [vmem:[%s13613_s0 + $0x8] sm:$0xff]  ;;  %v122_v3 = vld [vmem:[%s13612_s2 + $0x18] sm:$0xff]  ;;  %vm11353_vm3 = vmmov 0   ;;  %s11356_s5 = smov 104   ;;  %v22_v42 = vlaneseq }
   0x2   :  { %v11387_v1 = vld [vmem:[%s13613_s0] sm:$0xff]  ;;  %10083 = vmatprep.subr.msk.mxu0 %vm42_vm0, %v34_v0  ;;  %10088 = vmatprep.subr.mxu1 %v122_v3  ;;  %v121_v4 = vld [vmem:[%s13612_s2 + $0x10] sm:$0xff]  ;;  %v33_v6 = vld [vmem:[%s13612_s2 + $0x8] sm:$0xff]  ;;  %s11357_s6 = smov 112   ;;  %v11358_v20 = vmov 0   ;;  %vm329_vm4 = vcmask 64512  }
   0x3   :  { %10085 = vmatprep.mubr.msk.f32.mxu0 %vm35_vm1, %v11387_v1  ;;  %10084 = vmatpush3.msk.msra.mxu0 %vm42_vm0, %v34_v0  ;;  %v125_v10 = vld [vmem:[%s13612_s2 + $0x30] sm:$0xff]  ;;  %v124_v11 = vld [vmem:[%s13612_s2 + $0x28] sm:$0xff]  ;;  %v9384_v13 = vld [vmem:[%s13612_s2 + $0x20] ss:$0 sm:$0xff]  ;;  %v11461_v43 = vshrl.u32 %v22_v42, 7  ;;  %v11463_v44 = vand.u32 127, %v22_v42 }
   0x4   :  { %10086 = vmatmul.mubr.msk.f32.vlgmr.msra.gmra.mxu0 %vm35_vm1, %v11392_v2  ;;  %10089 = vmatpush3.msra.mxu1 %v122_v3  ;;  %v9387_v25 = vld [vmem:[%s13612_s2 + $0x38] ss:$0 sm:$0xff]  ;;  %s11359_s9 = smov 72   ;;  %s11360_s10 = smov 80   ;;  %vm1728_vm10 = vcmask 1045504   ;;  %vm1830_vm11 = vcmask 1043456  }
   0x5   :  { %10090 = vmatprep.subr.mxu1 %v121_v4  ;;  %10095 = vmatprep.subr.mxu0 %v125_v10  ;;  %v26_v45 = vsub.s32 %v11461_v43, %v11463_v44  ;;  %vm31_vm5 = vcmp.lt.s32.totalorder %v11463_v44, %v11461_v43  ;;  %vm1833_vm12 = vcmask 1041408   ;;  %vm2380_vm14 = vcmask 162816  }
   0x6   :  { %10091 = vmatpush3.msra.mxu1 %v121_v4  ;;  %10096 = vmatpush3.msra.mxu0 %v125_v10 }
   0x7   :  { %10097 = vmatprep.subr.mxu0 %v124_v11  ;;  %10102 = vmatprep.subr.mxu1 %v11352_v12  ;;  %v28_v46 = vsub.s32 0, %v26_v45 }
   0x8   :  { %10098 = vmatpush3.msra.mxu0 %v124_v11  ;;  %11049 = vset.pattern.permute.xlu1 %v11358_v20 }
   0x9   :  { %10107 = vmatprep.subr.mxu0 %v11352_v12  ;;  %11048 = vset.pattern.permute.xlu0 %v11358_v20  ;;  %v9380_v47 = vmin.u32 %v28_v46, %v26_v45 }
   0xb   :  { %v30_v48 = vcvt.s32.f32 %v9380_v47 }
   0xd   :  { %v11469_v50 = vsel %vm31_vm5, 1e+18, %v30_v48 }
  0xc4   :  { %v10087_v5 = vpop.f32.mrf.mxu0 }
  0xc5   :  { %v11411_v9 = vadd.f32 %v10087_v5, %v33_v6 }
  0xc6   :  { %v112_v7 = vpop.f32.mrf.mxu0 }
  0xc7   :  { %v11409_v8 = vadd.f32 %v112_v7, %v33_v6 }
  0xc9   :  { %10092 = vmatprep.mubr.msk.f32.mxu1 %vm143_vm2, %v11409_v8 }
  0xca   :  { %10093 = vmatmul.mubr.msk.f32.vlgmr.msra.gmra.mxu1 %vm143_vm2, %v11411_v9 }
  0xcb   :  { %10104 = vmatprep.mubr.msk.f32.mxu1 %vm11353_vm3, %v11352_v12 }
 0x18a   :  { %v10094_v14 = vpop.f32.mrf.mxu1 }
 0x18b   :  { %v11430_v15 = vadd.f32 %v10094_v14, %v9384_v13 }
 0x18c   :  { %v216_v16 = vpop.f32.mrf.mxu1 }
 0x18d   :  { %v11432_v17 = vadd.f32 %v9384_v13, %v216_v16  ;;  %v226_v19 = vmax.f32 %v11430_v15, 0.0 }
 0x18f   :  { %503 = vrot.lane.b32.xlu1 %v11432_v17, %s11354_s30  ;;  %327 = vrot.lane.b32.xlu0 %v11432_v17, %s11355_s4  ;;  %v225_v18 = vmax.f32 %v11432_v17, 0.0 }
 0x191   :  { %10099 = vmatprep.mubr.msk.f32.mxu0 %vm143_vm2, %v225_v18 }
 0x192   :  { %10100 = vmatmul.mubr.msk.f32.vlgmr.msra.gmra.mxu0 %vm143_vm2, %v226_v19 }
 0x193   :  { %501 = vrot.lane.b32.xlu1 %v11432_v17, %s11356_s5  ;;  %325 = vrot.lane.b32.xlu0 %v11432_v17, %s11357_s6 }
 0x194   :  { %10109 = vmatprep.mubr.msk.f32.mxu0 %vm11353_vm3, %v11352_v12 }
 0x201   :  { %v328_v21 = vpop.permute.xlu0 %327  ;;  %v504_v22 = vpop.permute.xlu1 %503 }
 0x202   :  { %10103 = vmatpush3.xpose.msk.msra.mxu1 %vm329_vm4, %v328_v21 }
 0x203   :  { %10112 = vmatprep.subr.mxu1 %v11352_v12 }
 0x205   :  { %v326_v23 = vpop.permute.xlu0 %325  ;;  %v502_v24 = vpop.permute.xlu1 %501 }
 0x206   :  { %10105 = vmatmul.mubr.msk.f32.vlgmr.msra.gmra.mxu1 %vm329_vm4, %v326_v23  ;;  %v128_v23 = vld [vmem:[%s13612_s2 + $0x48] sm:$0xff] }
 0x207   :  { %10113 = vmatpush3.xpose.msk.msra.mxu1 %vm329_vm4, %v504_v22  ;;  %10114 = vmatprep.mubr.msk.f32.mxu1 %vm11353_vm3, %v11352_v12  ;;  %v11502_v22 = vld [vmem:[%s13612_s2 + $0x40] sm:$0xff] }
 0x208   :  { %10122 = vmatprep.subr.mxu1 %v11352_v12 }
 0x20a   :  { %10115 = vmatmul.mubr.msk.f32.vlgmr.msra.gmra.mxu1 %vm329_vm4, %v502_v24 }
 0x20b   :  { %10124 = vmatprep.mubr.msk.f32.mxu1 %vm11353_vm3, %v11352_v12  ;;  %10123 = vmatpush3.msra.mxu1 %v128_v23 }
 0x20c   :  { %10132 = vmatprep.subr.mxu1 %v11352_v12 }
 0x252   :  { %v10101_v26 = vpop.f32.mrf.mxu0 }
 0x253   :  { %v309_v27 = vadd.f32 %v10101_v26, %v9387_v25 }
 0x254   :  { %v303_v28 = vpop.f32.mrf.mxu0 }
 0x255   :  { %v304_v29 = vadd.f32 %v9387_v25, %v303_v28  ;;  %v313_v49 = vsub.f32 0.0, %v309_v27 }
 0x257   :  { %v312_v30 = vsub.f32 0.0, %v304_v29  ;;  %v316_v55 = vmul.f32 1.442695, %v313_v49 }
 0x259   :  { %v314_v31 = vmul.f32 1.442695, %v312_v30 }
 0x25b   :  { %11050 = vpow2.f32 %v314_v31 }
 0x268   :  { %v11051_v32 = vpop.eup %11050 }
 0x269   :  { %v318_v33 = vadd.f32 1.0, %v11051_v32 }
 0x26b   :  { %11052 = vrcp.f32 %v318_v33 }
 0x26c   :  { %11054 = vpow2.f32 %v316_v55 }
 0x278   :  { %v11053_v34 = vpop.eup %11052 }
 0x279   :  { %v322_v35 = vmul.f32 8.0, %v11053_v34  ;;  %v11055_v62 = vpop.eup %11054 }
 0x27a   :  { %v319_v63 = vadd.f32 1.0, %v11055_v62 }
 0x27b   :  { %v580_v36 = vadd.f32 4.0, %v322_v35  ;;  %v405_v37 = vadd.f32 2.0, %v322_v35 }
 0x27c   :  { %11056 = vrcp.f32 %v319_v63 }
 0x27d   :  { %583 = vperm.xlu1 %11049, %v580_v36   ;;  %408 = vperm.xlu0 %11048, %v405_v37  }
 0x289   :  { %v11057_v0 = vpop.eup %11056 }
 0x28a   :  { %v323_v3 = vmul.f32 8.0, %v11057_v0 }
 0x28c   :  { %v902_v4 = vadd.f32 2.0, %v323_v3  ;;  %v1077_v5 = vadd.f32 4.0, %v323_v3 }
 0x2c6   :  { %v400_v38 = vpop.f32.mrf.mxu1 }
 0x2c7   :  { %v404_v51 = vmul.f32 0.35355338, %v400_v38 }
 0x2c8   :  { %v10106_v39 = vpop.f32.mrf.mxu1 }
 0x2ca   :  { %v575_v40 = vpop.f32.mrf.mxu1 }
 0x2cb   :  { %v579_v52 = vmul.f32 0.35355338, %v575_v40 }
 0x2cc   :  { %v10116_v41 = vpop.f32.mrf.mxu1 }
 0x2f8   :  { %v584_v53 = vpop.permute.xlu1 %583  ;;  %v409_v54 = vpop.permute.xlu0 %408 }
 0x2f9   :  { %vm586_vm6 = vcmp.gt.f32.partialorder %v11469_v50, %v584_v53  ;;  %vm411_vm7 = vcmp.gt.f32.partialorder %v11469_v50, %v409_v54 }
 0x2fa   :  { %v587_v56 = vsel %vm586_vm6, -1e+18, %v579_v52  ;;  %v412_v57 = vsel %vm411_vm7, -1e+18, %v404_v51 }
 0x2fb   :  { %v588_v58 = vadd.f32 %v587_v56, %v579_v52  ;;  %v413_v59 = vadd.f32 %v412_v57, %v404_v51 }
 0x2fd   :  { %v589_v60 = vsel %vm329_vm4, %v588_v58, -inf  ;;  %v414_v61 = vsel %vm329_vm4, %v413_v59, -inf }
 0x2fe   :  { %590 = vmax.xlane.f32.xlu0 %v589_v60  ;;  %415 = vmax.xlane.f32.xlu1 %v414_v61 }
 0x30f   :  { %595 = vrot.lane.b32.xlu1 %v11432_v17, %s11359_s9 }
 0x314   :  { %420 = vrot.lane.b32.xlu0 %v11432_v17, %s11360_s10 }
 0x318   :  { %825 = vrot.lane.b32.xlu0 %v11430_v15, %s11355_s4 }
 0x31c   :  { %823 = vrot.lane.b32.xlu0 %v11430_v15, %s11357_s6 }
 0x320   :  { %1000 = vrot.lane.b32.xlu0 %v11430_v15, %s11354_s30 }
 0x324   :  { %998 = vrot.lane.b32.xlu0 %v11430_v15, %s11356_s5 }
 0x328   :  { %905 = vperm.xlu0 %11048, %v902_v4  }
 0x32c   :  { %1080 = vperm.xlu0 %11048, %v1077_v5  }
 0x387   :  { %v416_v6 = vpop.xlane.xlu1 %415  ;;  %v591_v7 = vpop.xlane.xlu0 %590 }
 0x388   :  { %v417_v10 = vsub.f32 %v413_v59, %v416_v6  ;;  %v592_v11 = vsub.f32 %v588_v58, %v591_v7 }
 0x38a   :  { %v418_v13 = vmul.f32 1.442695, %v417_v10  ;;  %v593_v14 = vmul.f32 1.442695, %v592_v11 }
 0x38b   :  { %v421_v16 = vpop.permute.xlu0 %420  ;;  %v596_v19 = vpop.permute.xlu1 %595 }
 0x38c   :  { %11058 = vpow2.f32 %v418_v13  ;;  %10108 = vmatpush3.msra.mxu0 %v421_v16 }
 0x38d   :  { %11060 = vpow2.f32 %v593_v14  ;;  %10117 = vmatprep.subr.mxu0 %v11352_v12 }
 0x38f   :  { %v826_v24 = vpop.permute.xlu0 %825 }
 0x393   :  { %v824_v25 = vpop.permute.xlu0 %823 }
 0x397   :  { %v1001_v26 = vpop.permute.xlu0 %1000 }
 0x399   :  { %v11059_v17 = vpop.eup %11058 }
 0x39a   :  { %v11061_v18 = vpop.eup %11060  ;;  %10110 = vmatmul.mubr.msk.f32.vlgmr.msra.gmra.mxu0 %vm329_vm4, %v11059_v17  ;;  %v496_v20 = vsel %vm329_vm4, %v11059_v17, 0.0 }
 0x39b   :  { %10118 = vmatpush3.msra.mxu0 %v596_v19  ;;  %497 = vadd.xlane.f32.xlu0 %v496_v20  ;;  %v671_v21 = vsel %vm329_vm4, %v11061_v18, 0.0  ;;  %v999_v27 = vpop.permute.xlu0 %998 }
 0x39c   :  { %672 = vadd.xlane.f32.xlu1 %v671_v21  ;;  %10119 = vmatprep.mubr.msk.f32.mxu0 %vm11353_vm3, %v11352_v12 }
 0x39d   :  { %10127 = vmatprep.subr.mxu0 %v11352_v12 }
 0x39e   :  { %10120 = vmatmul.mubr.msk.f32.vlgmr.msra.gmra.mxu0 %vm329_vm4, %v11061_v18 }
 0x39f   :  { %10129 = vmatprep.mubr.msk.f32.mxu0 %vm11353_vm3, %v11352_v12  ;;  %10128 = vmatpush3.msra.mxu0 %v11502_v22 }
 0x3a0   :  { %10137 = vmatprep.subr.mxu0 %v11352_v12 }
 0x3a3   :  { %v906_v28 = vpop.permute.xlu0 %905 }
 0x3a4   :  { %vm908_vm8 = vcmp.gt.f32.partialorder %v11469_v50, %v906_v28 }
 0x3a7   :  { %v1081_v29 = vpop.permute.xlu0 %1080 }
 0x3a8   :  { %vm1083_vm9 = vcmp.gt.f32.partialorder %v11469_v50, %v1081_v29 }
 0x3b1   :  { %1092 = vrot.lane.b32.xlu0 %v11430_v15, %s11359_s9 }
 0x424   :  { %v498_v30 = vpop.xlane.xlu0 %497 }
 0x425   :  { %11062 = vrcp.f32 %v498_v30  ;;  %v673_v31 = vpop.xlane.xlu1 %672 }
 0x426   :  { %11064 = vrcp.f32 %v673_v31 }
 0x428   :  { %v1093_v6 = vpop.permute.xlu0 %1092 }
 0x432   :  { %v11063_v32 = vpop.eup %11062 }
 0x433   :  { %v11065_v36 = vpop.eup %11064 }
 0x45a   :  { %v492_v33 = vpop.f32.mrf.mxu0 }
 0x45b   :  { %v500_v34 = vmul.f32 %v11063_v32, %v492_v33 }
 0x45c   :  { %v10111_v35 = vpop.f32.mrf.mxu0 }
 0x45d   :  { %10130 = vmatmul.mubr.msk.f32.vlgmr.msra.gmra.mxu0 %vm329_vm4, %v500_v34 }
 0x45e   :  { %v667_v37 = vpop.f32.mrf.mxu0  ;;  %10139 = vmatprep.mubr.msk.f32.mxu0 %vm11353_vm3, %v11352_v12 }
 0x45f   :  { %v675_v38 = vmul.f32 %v11065_v36, %v667_v37 }
 0x460   :  { %v10121_v39 = vpop.f32.mrf.mxu0 }
 0x461   :  { %10125 = vmatmul.mubr.msk.f32.vlgmr.msra.gmra.mxu1 %vm329_vm4, %v675_v38 }
 0x462   :  { %10133 = vmatpush3.xpose.msk.msra.mxu1 %vm329_vm4, %v826_v24  ;;  %10134 = vmatprep.mubr.msk.f32.mxu1 %vm11353_vm3, %v11352_v12 }
 0x463   :  { %10142 = vmatprep.subr.mxu1 %v11352_v12 }
 0x465   :  { %10135 = vmatmul.mubr.msk.f32.vlgmr.msra.gmra.mxu1 %vm329_vm4, %v824_v25 }
 0x466   :  { %10143 = vmatpush3.xpose.msk.msra.mxu1 %vm329_vm4, %v1001_v26  ;;  %10144 = vmatprep.mubr.msk.f32.mxu1 %vm11353_vm3, %v11352_v12 }
 0x467   :  { %10152 = vmatprep.subr.mxu1 %v11352_v12 }
 0x469   :  { %10145 = vmatmul.mubr.msk.f32.vlgmr.msra.gmra.mxu1 %vm329_vm4, %v999_v27 }
 0x46a   :  { %10153 = vmatpush3.msra.mxu1 %v128_v23  ;;  %10154 = vmatprep.mubr.msk.f32.mxu1 %vm11353_vm3, %v11352_v12 }
 0x51d   :  { %v818_v40 = vpop.f32.mrf.mxu0 }
 0x51f   :  { %v10131_v41 = vpop.f32.mrf.mxu0 }
 0x521   :  { %v745_v42 = vpop.f32.mrf.mxu1 }
 0x522   :  { %v819_v45 = vadd.f32 %v818_v40, %v745_v42 }
 0x523   :  { %v10126_v46 = vpop.f32.mrf.mxu1 }
 0x525   :  { %v897_v47 = vpop.f32.mrf.mxu1 }
 0x526   :  { %v901_v48 = vmul.f32 0.35355338, %v897_v47  ;;  %v130_v47 = vld [vmem:[%s13612_s2 + $0x58] sm:$0xff] }
 0x527   :  { %v10136_v49 = vpop.f32.mrf.mxu1  ;;  %10162 = vmatprep.subr.mxu1 %v130_v47 }
 0x528   :  { %v909_v51 = vsel %vm908_vm8, -1e+18, %v901_v48 }
 0x529   :  { %v1072_v52 = vpop.f32.mrf.mxu1  ;;  %v910_v53 = vadd.f32 %v909_v51, %v901_v48  ;;  %v129_v48 = vld [vmem:[%s13612_s2 + $0x50] sm:$0xff]  ;;  %v9407_v51 = vld [vmem:[%s13612_s2 + $0x88] ss:$0 sm:$0xff] }
 0x52a   :  { %v1076_v54 = vmul.f32 0.35355338, %v1072_v52 }
 0x52b   :  { %v10146_v55 = vpop.f32.mrf.mxu1  ;;  %v911_v56 = vsel %vm329_vm4, %v910_v53, -inf }
 0x52c   :  { %v1084_v57 = vsel %vm1083_vm9, -1e+18, %v1076_v54  ;;  %912 = vmax.xlane.f32.xlu1 %v911_v56 }
 0x52d   :  { %v1085_v58 = vadd.f32 %v1084_v57, %v1076_v54 }
 0x52f   :  { %v1086_v59 = vsel %vm329_vm4, %v1085_v58, -inf }
 0x530   :  { %1087 = vmax.xlane.f32.xlu1 %v1086_v59 }
 0x541   :  { %917 = vrot.lane.b32.xlu1 %v11430_v15, %s11360_s10  ;;  %v1319_v15 = vadd.f32 %v819_v45, %v11409_v8 }
 0x543   :  { %v1321_v13 = vsel %vm143_vm2, %v1319_v15, 0.0 }
 0x5b5   :  { %v913_v60 = vpop.xlane.xlu1 %912 }
 0x5b6   :  { %v914_v61 = vsub.f32 %v910_v53, %v913_v60 }
 0x5b8   :  { %v915_v62 = vmul.f32 1.442695, %v914_v61  ;;  %v133_v61 = vld [vmem:[%s13612_s2 + $0x70] sm:$0xff] }
 0x5b9   :  { %v1088_v63 = vpop.xlane.xlu1 %1087 }
 0x5ba   :  { %11066 = vpow2.f32 %v915_v62  ;;  %v1089_v0 = vsub.f32 %v1085_v58, %v1088_v63  ;;  %v132_v62 = vld [vmem:[%s13612_s2 + $0x68] sm:$0xff]  ;;  %v9408_v63 = vld [vmem:[%s13612_s2 + $0x60] ss:$0 sm:$0xff] }
 0x5bc   :  { %v1090_v3 = vmul.f32 1.442695, %v1089_v0 }
 0x5bd   :  { %v918_v4 = vpop.permute.xlu1 %917 }
 0x5be   :  { %11068 = vpow2.f32 %v1090_v3  ;;  %10138 = vmatpush3.msra.mxu0 %v918_v4 }
 0x5bf   :  { %10147 = vmatprep.subr.mxu0 %v11352_v12 }
 0x5c7   :  { %v11067_v5 = vpop.eup %11066 }
 0x5c8   :  { %10140 = vmatmul.mubr.msk.f32.vlgmr.msra.gmra.mxu0 %vm329_vm4, %v11067_v5  ;;  %v993_v7 = vsel %vm329_vm4, %v11067_v5, 0.0 }
 0x5c9   :  { %10148 = vmatpush3.msra.mxu0 %v1093_v6  ;;  %994 = vadd.xlane.f32.xlu1 %v993_v7 }
 0x5ca   :  { %10149 = vmatprep.mubr.msk.f32.mxu0 %vm11353_vm3, %v11352_v12  ;;  %10157 = vmatprep.subr.mxu0 %v11352_v12 }
 0x5cb   :  { %v11069_v10 = vpop.eup %11068 }
 0x5cc   :  { %10150 = vmatmul.mubr.msk.f32.vlgmr.msra.gmra.mxu0 %vm329_vm4, %v11069_v10  ;;  %v1168_v11 = vsel %vm329_vm4, %v11069_v10, 0.0 }
 0x5cd   :  { %1169 = vadd.xlane.f32.xlu0 %v1168_v11  ;;  %1322 = vadd.xlane.f32.xlu1 %v1321_v13 }
 0x5ce   :  { %10158 = vmatpush3.msra.mxu0 %v11502_v22  ;;  %10159 = vmatprep.mubr.msk.f32.mxu0 %vm11353_vm3, %v11352_v12 }
 0x5cf   :  { %10169 = vmatprep.subr.mxu0 %v133_v61 }
 0x652   :  { %v995_v8 = vpop.xlane.xlu1 %994 }
 0x653   :  { %11070 = vrcp.f32 %v995_v8 }
 0x656   :  { %v1170_v14 = vpop.xlane.xlu0 %1169  ;;  %v1323_v22 = vpop.xlane.xlu1 %1322 }
 0x657   :  { %11072 = vrcp.f32 %v1170_v14  ;;  %v1328_v26 = vmul.f32 0.0625, %v1323_v22 }
 0x659   :  { %v1330_v29 = vsub.f32 %v1319_v15, %v1328_v26  ;;  %v9411_v15 = vld [vmem:[%s13612_s2 + $0x78] ss:$0 sm:$0xff] }
 0x65b   :  { %v1332_v34 = vmul.f32 %v1330_v29, %v1330_v29 }
 0x65d   :  { %v1334_v35 = vsel %vm143_vm2, %v1332_v34, 0.0 }
 0x660   :  { %v11071_v16 = vpop.eup %11070 }
 0x664   :  { %v11073_v20 = vpop.eup %11072 }
 0x688   :  { %v989_v17 = vpop.f32.mrf.mxu0 }
 0x689   :  { %v997_v18 = vmul.f32 %v11071_v16, %v989_v17 }
 0x68a   :  { %v10141_v19 = vpop.f32.mrf.mxu0 }
 0x68b   :  { %10160 = vmatmul.mubr.msk.f32.vlgmr.msra.gmra.mxu0 %vm329_vm4, %v997_v18 }
 0x68c   :  { %v1164_v21 = vpop.f32.mrf.mxu0  ;;  %10170 = vmatpush3.msra.mxu0 %v133_v61 }
 0x68d   :  { %v1172_v23 = vmul.f32 %v11073_v20, %v1164_v21  ;;  %10171 = vmatprep.subr.mxu0 %v132_v62 }
 0x68e   :  { %v10151_v24 = vpop.f32.mrf.mxu0  ;;  %10172 = vmatpush3.msra.mxu0 %v132_v62  ;;  %v1973_v62 = vld [vmem:[%s13612_s2 + $0xf0] sm:$0xff] }
 0x68f   :  { %10155 = vmatmul.mubr.msk.f32.vlgmr.msra.gmra.mxu1 %vm329_vm4, %v1172_v23  ;;  %10181 = vmatprep.subr.mxu0 %v11352_v12 }
 0x690   :  { %10163 = vmatpush3.msra.mxu1 %v130_v47  ;;  %v1854_v47 = vld [vmem:[%s13612_s2 + $0xc8] sm:$0x7f] }
 0x691   :  { %10164 = vmatprep.subr.mxu1 %v129_v48 }
 0x692   :  { %10165 = vmatpush3.msra.mxu1 %v129_v48 }
 0x693   :  { %10176 = vmatprep.subr.mxu1 %v11352_v12 }
 0x74b   :  { %v1315_v25 = vpop.f32.mrf.mxu0 }
 0x74d   :  { %v10161_v27 = vpop.f32.mrf.mxu0 }
 0x74f   :  { %v1242_v28 = vpop.f32.mrf.mxu1 }
 0x750   :  { %v1316_v30 = vadd.f32 %v1315_v25, %v1242_v28 }
 0x751   :  { %v10156_v31 = vpop.f32.mrf.mxu1 }
 0x752   :  { %v1320_v32 = vadd.f32 %v1316_v30, %v11411_v9  ;;  %v9406_v9 = vld [vmem:[%s13612_s2 + $0x80] ss:$0 sm:$0xff] }
 0x754   :  { %v1324_v33 = vsel %vm143_vm2, %v1320_v32, 0.0 }
 0x755   :  { %1325 = vadd.xlane.f32.xlu1 %v1324_v33 }
 0x759   :  { %1335 = vadd.xlane.f32.xlu1 %v1334_v35 }
 0x7de   :  { %v1326_v36 = vpop.xlane.xlu1 %1325 }
 0x7df   :  { %v1329_v37 = vmul.f32 0.0625, %v1326_v36 }
 0x7e1   :  { %v1331_v38 = vsub.f32 %v1320_v32, %v1329_v37  ;;  %v9414_v37 = vld [vmem:[%s13612_s2 + $0x90] ss:$0 sm:$0xff] }
 0x7e2   :  { %v1336_v39 = vpop.xlane.xlu1 %1335 }
 0x7e3   :  { %v1340_v40 = vmul.f32 0.0625, %v1336_v39  ;;  %v1333_v41 = vmul.f32 %v1331_v38, %v1331_v38 }
 0x7e5   :  { %v1342_v42 = vadd.f32 1e-05, %v1340_v40  ;;  %v1337_v45 = vsel %vm143_vm2, %v1333_v41, 0.0  ;;  %v9415_v40 = vld [vmem:[%s13612_s2 + $0x98] ss:$0 sm:$0xff] }
 0x7e6   :  { %1338 = vadd.xlane.f32.xlu1 %v1337_v45 }
 0x7e7   :  { %11074 = vrsqrt.f32 %v1342_v42 }
 0x7f4   :  { %v11075_v46 = vpop.eup %11074 }
 0x7f5   :  { %v1346_v49 = vmul.f32 %v11075_v46, %v1330_v29  ;;  %v1573_v29 = vld [vmem:[%s13612_s2 + $0xa8] sm:$0x3f]  ;;  %v1572_v46 = vld [vmem:[%s13612_s2 + $0xa0] sm:$0x3f] }
 0x7f7   :  { %v1352_v52 = vmul.f32 %v9406_v9, %v1346_v49  ;;  %v1575_v49 = vld [vmem:[%s13612_s2 + $0xb8] sm:$0xff] }
 0x7f9   :  { %v1358_v53 = vadd.f32 %v9407_v51, %v1352_v52 }
 0x7fb   :  { %10166 = vmatprep.mubr.msk.f32.mxu1 %vm143_vm2, %v1358_v53 }
 0x86f   :  { %v1339_v54 = vpop.xlane.xlu1 %1338 }
 0x870   :  { %v1341_v55 = vmul.f32 0.0625, %v1339_v54 }
 0x872   :  { %v1343_v56 = vadd.f32 1e-05, %v1341_v55 }
 0x874   :  { %11076 = vrsqrt.f32 %v1343_v56 }
 0x881   :  { %v11077_v57 = vpop.eup %11076 }
 0x882   :  { %v1347_v58 = vmul.f32 %v11077_v57, %v1331_v38 }
 0x884   :  { %v1353_v59 = vmul.f32 %v9406_v9, %v1347_v58 }
 0x886   :  { %v1359_v60 = vadd.f32 %v9407_v51, %v1353_v59  ;;  %v1574_v51 = vld [vmem:[%s13612_s2 + $0xb0] sm:$0xff] }
 0x887   :  { %v11625_v59 = vld [vmem:[%s13612_s2 + $0xd0] sm:$0xff] }
 0x888   :  { %10167 = vmatmul.mubr.msk.f32.vlgmr.msra.gmra.mxu1 %vm143_vm2, %v1359_v60 }
 0x889   :  { %10178 = vmatprep.mubr.msk.f32.mxu1 %vm11353_vm3, %v11352_v12 }
 0x948   :  { %v10168_v0 = vpop.f32.mrf.mxu1 }
 0x949   :  { %v1442_v3 = vadd.f32 %v10168_v0, %v9408_v63 }
 0x94a   :  { %v1436_v4 = vpop.f32.mrf.mxu1 }
 0x94b   :  { %v1437_v5 = vadd.f32 %v9408_v63, %v1436_v4  ;;  %v1446_v7 = vmax.f32 %v1442_v3, 0.0  ;;  %v1972_v3 = vld [vmem:[%s13612_s2 + $0xe8] sm:$0xff] }
 0x94c   :  { %v1976_v4 = vld [vmem:[%s13612_s2 + $0x108] sm:$0xff] }
 0x94d   :  { %v1445_v6 = vmax.f32 %v1437_v5, 0.0  ;;  %v1975_v5 = vld [vmem:[%s13612_s2 + $0x100] sm:$0xff] }
 0x94f   :  { %10173 = vmatprep.mubr.msk.f32.mxu0 %vm143_vm2, %v1445_v6  ;;  %v16_v6 = vld [vmem:[%s13614_s1] sm:$0xff] }
 0x950   :  { %10174 = vmatmul.mubr.msk.f32.vlgmr.msra.gmra.mxu0 %vm143_vm2, %v1446_v7 }
 0x951   :  { %10183 = vmatprep.mubr.msk.f32.mxu0 %vm11353_vm3, %v11352_v12 }
 0xa10   :  { %v10175_v10 = vpop.f32.mrf.mxu0 }
 0xa11   :  { %v1529_v11 = vadd.f32 %v10175_v10, %v9411_v15  ;;  %v1815_v10 = vrot.slane %v16_v6, 2 }
 0xa12   :  { %v1523_v13 = vpop.f32.mrf.mxu0 }
 0xa13   :  { %v1524_v8 = vadd.f32 %v9411_v15, %v1523_v13  ;;  %v1533_v14 = vadd.f32 %v1529_v11, %v1359_v60  ;;  %v9418_v15 = vld [vmem:[%s13612_s2 + $0xc0] ss:$0 sm:$0xff]  ;;  %v11664_v13 = vld [vmem:[%s13612_s2 + $0xf8] ss:$0 sm:$0xff] }
 0xa15   :  { %v1537_v16 = vsel %vm143_vm2, %v1533_v14, 0.0  ;;  %v1532_v17 = vadd.f32 %v1524_v8, %v1358_v53  ;;  %v11667_v8 = vrot.slane %v11392_v2, 4 }
 0xa16   :  { %1538 = vadd.xlane.f32.xlu0 %v1537_v16 }
 0xa17   :  { %v1534_v18 = vsel %vm143_vm2, %v1532_v17, 0.0 }
 0xa18   :  { %1535 = vadd.xlane.f32.xlu1 %v1534_v18 }
 0xa9f   :  { %v1539_v19 = vpop.xlane.xlu0 %1538 }
 0xaa0   :  { %v1541_v20 = vmul.f32 0.0625, %v1539_v19 }
 0xaa1   :  { %v1536_v21 = vpop.xlane.xlu1 %1535 }
 0xaa2   :  { %v1543_v23 = vsub.f32 %v1533_v14, %v1541_v20  ;;  %v1540_v24 = vmul.f32 0.0625, %v1536_v21  ;;  %v1831_v21 = vsel %vm1830_vm11, %v1815_v10, %v11667_v8 }
 0xaa4   :  { %v1542_v22 = vsub.f32 %v1532_v17, %v1540_v24  ;;  %v1545_v25 = vmul.f32 %v1543_v23, %v1543_v23 }
 0xaa6   :  { %v1549_v26 = vsel %vm143_vm2, %v1545_v25, 0.0  ;;  %v1544_v27 = vmul.f32 %v1542_v22, %v1542_v22 }
 0xaa7   :  { %1550 = vadd.xlane.f32.xlu0 %v1549_v26 }
 0xaa8   :  { %v1546_v28 = vsel %vm143_vm2, %v1544_v27, 0.0 }
 0xaa9   :  { %1547 = vadd.xlane.f32.xlu1 %v1546_v28 }
 0xabd   :  { %1579 = vperm.xlu0 %11048, %v1573_v29   ;;  %v1858_v29 = vrot.slane %v11625_v59, 4 }
 0xb30   :  { %v1551_v30 = vpop.xlane.xlu0 %1550 }
 0xb31   :  { %v1553_v31 = vmul.f32 0.0625, %v1551_v30  ;;  %v1852_v30 = vld [vmem:[%s13612_s2 + $0xd8] sm:$0xff] }
 0xb32   :  { %v1548_v32 = vpop.xlane.xlu1 %1547 }
 0xb33   :  { %v1555_v33 = vadd.f32 1e-05, %v1553_v31  ;;  %v1552_v34 = vmul.f32 0.0625, %v1548_v32  ;;  %v1853_v31 = vld [vmem:[%s13612_s2 + $0xe0] sm:$0xf] }
 0xb35   :  { %11078 = vrsqrt.f32 %v1555_v33  ;;  %v1554_v35 = vadd.f32 1e-05, %v1552_v34  ;;  %v1859_v34 = vrot.slane %v1852_v30, 4 }
 0xb37   :  { %11080 = vrsqrt.f32 %v1554_v35 }
 0xb38   :  { %v1580_v52 = vpop.permute.xlu0 %1579 }
 0xb42   :  { %v11079_v36 = vpop.eup %11078 }
 0xb43   :  { %v1559_v38 = vmul.f32 %v11079_v36, %v1543_v23  ;;  %v1866_v36 = vsel %vm1830_vm11, %v1853_v31, %v1858_v29 }
 0xb44   :  { %v11081_v39 = vpop.eup %11080 }
 0xb45   :  { %v1565_v41 = vmul.f32 %v9414_v37, %v1559_v38  ;;  %v1558_v42 = vmul.f32 %v11081_v39, %v1542_v22  ;;  %v19_v22 = vld [vmem:[%s13614_s1 + $0x18] sm:$0xff]  ;;  %v1861_v39 = vrot.slane %v1853_v31, 4 }
 0xb46   :  { %v1827_v26 = vrot.slane %v19_v22, 6 }
 0xb47   :  { %v1571_v45 = vadd.f32 %v9415_v40, %v1565_v41  ;;  %v1564_v9 = vmul.f32 %v9414_v37, %v1558_v42  ;;  %v1860_v41 = vsel %vm1830_vm11, %v1858_v29, %v1859_v34 }
 0xb49   :  { %10182 = vmatpush3.msra.mxu0 %v1571_v45  ;;  %v1570_v48 = vadd.f32 %v9415_v40, %v1564_v9  ;;  %v1862_v9 = vsel %vm1830_vm11, %v1859_v34, %v1861_v39 }
 0xb4a   :  { %10184 = vmatmul.mubr.msk.f32.vlgmr.msra.gmra.mxu0 %vm329_vm4, %v1572_v46  ;;  %10193 = vmatprep.subr.mxu0 %v11352_v12 }
 0xb4b   :  { %10177 = vmatpush3.msra.mxu1 %v1570_v48  ;;  %10194 = vmatpush3.msk.msra.mxu0 %vm42_vm0, %v1854_v47 }
 0xb4c   :  { %10179 = vmatmul.mubr.msk.f32.vlgmr.msra.gmra.mxu1 %vm329_vm4, %v1572_v46  ;;  %10195 = vmatprep.mubr.msk.f32.mxu0 %vm11353_vm3, %v11352_v12 }
 0xb4d   :  { %10229 = vmatprep.subr.mxu0 %v11352_v12  ;;  %10186 = vmatprep.subr.mxu1 %v1575_v49 }
 0xb4e   :  { %10196 = vmatmul.mubr.msk.f32.vlgmr.msra.gmra.mxu0 %vm35_vm1, %v11387_v1  ;;  %10187 = vmatpush3.msra.mxu1 %v1575_v49 }
 0xb4f   :  { %10198 = vmatprep.mubr.msk.f32.mxu0 %vm11353_vm3, %v11352_v12  ;;  %10188 = vmatprep.subr.mxu1 %v1574_v51 }
 0xb50   :  { %10189 = vmatpush3.msra.mxu1 %v1574_v51  ;;  %10230 = vmatpush3.msra.mxu0 %v1976_v4 }
 0xb51   :  { %10210 = vmatprep.subr.mxu1 %v11352_v12  ;;  %10231 = vmatprep.subr.mxu0 %v11352_v12 }
 0xb52   :  { %10232 = vmatpush3.msra.mxu0 %v1975_v5 }
 0xb53   :  { %10278 = vmatprep.subr.mxu0 %v11352_v12 }
 0xc0a   :  { %v1721_v53 = vpop.f32.mrf.mxu0 }
 0xc0b   :  { %v1722_v1 = vadd.f32 %v1721_v53, %v1580_v52  ;;  %v11744_v53 = vld [vmem:[%s13612_s2 + $0x110] ss:$0 sm:$0xff] }
 0xc0c   :  { %v1651_v54 = vpop.f32.mrf.mxu1  ;;  %v10185_v55 = vpop.f32.mrf.mxu0 }
 0xc0d   :  { %v1726_v56 = vrot.slane %v1722_v1, 2  ;;  %v1652_v57 = vadd.f32 %v1651_v54, %v1580_v52 }
 0xc0e   :  { %v10180_v58 = vpop.f32.mrf.mxu1  ;;  %v1948_v60 = vpop.f32.mrf.mxu0 }
 0xc0f   :  { %v1729_v61 = vsel %vm1728_vm10, %v1652_v57, %v1726_v56  ;;  %v11634_v0 = vadd.f32 %v1948_v60, %v11625_v59 }
 0xc10   :  { %10190 = vmatprep.mubr.msk.f32.mxu1 %vm143_vm2, %v1729_v61  ;;  %v10197_v63 = vpop.f32.mrf.mxu0 }
 0xc11   :  { %10191 = vmatmul.mubr.msk.f32.vlgmr.msra.gmra.mxu1 %vm143_vm2, %v1726_v56 }
 0xc12   :  { %10211 = vmatpush3.msra.mxu1 %v1973_v62  ;;  %10214 = vmatprep.mubr.msk.f32.mxu1 %vm11353_vm3, %v11352_v12 }
 0xc13   :  { %10212 = vmatprep.subr.mxu1 %v11352_v12 }
 0xc14   :  { %10213 = vmatpush3.msra.mxu1 %v1972_v3 }
 0xc15   :  { %10215 = vmatmul.mubr.msk.f32.vlgmr.msra.gmra.mxu1 %vm143_vm2, %v11634_v0  ;;  %10248 = vmatprep.subr.mxu1 %v11352_v12 }
 0xc16   :  { %10217 = vmatprep.mubr.msk.f32.mxu1 %vm11353_vm3, %v11352_v12 }
 0xcd1   :  { %v10192_v7 = vpop.f32.mrf.mxu1 }
 0xcd2   :  { %v11669_v16 = vadd.f32 %v10192_v7, %v9418_v15 }
 0xcd3   :  { %v1805_v11 = vpop.f32.mrf.mxu1 }
 0xcd4   :  { %v1806_v14 = vadd.f32 %v9418_v15, %v1805_v11  ;;  %v1822_v23 = vrot.slane %v11669_v16, 2 }
 0xcd5   :  { %v2075_v17 = vpop.f32.mrf.mxu1 }
 0xcd6   :  { %9370 = vst.msk [vmem:[%s13615_s3] sm:$0xff] %vm35_vm1, %v1806_v14  ;;  %v1829_v18 = vsel %vm1728_vm10, %v1806_v14, %v1815_v10  ;;  %v11677_v19 = vadd.f32 %v11664_v13, %v2075_v17  ;;  %v1821_v20 = vrot.slane %v1806_v14, 2  ;;  %v1834_v27 = vsel %vm1833_vm12, %v1822_v23, %v1827_v26 }
 0xcd7   :  { %10199 = vmatmul.mubr.msk.f32.gmra.mxu0 %vm35_vm1, %v1829_v18  ;;  %v10216_v2 = vpop.f32.mrf.mxu1 }
 0xcd8   :  { %10201 = vmatprep.mubr.msk.f32.mxu0 %vm11353_vm3, %v11352_v12  ;;  %2252 = vrot.lane.b32.xlu0 %v11677_v19, %s11355_s4  ;;  %v1823_v24 = vsel %vm1728_vm10, %v1821_v20, %v1822_v23  ;;  %v2099_v28 = vmax.f32 %v11677_v19, 0.0 }
 0xcd9   :  { %v1832_v25 = vsel %vm1830_vm11, %v11667_v8, %v1823_v24 }
 0xcdb   :  { %10202 = vmatmul.mubr.msk.f32.gmra.mxu0 %vm35_vm1, %v1831_v21 }
 0xcdc   :  { %10204 = vmatprep.mubr.msk.f32.mxu0 %vm11353_vm3, %v11352_v12 }
 0xcdf   :  { %10205 = vmatmul.mubr.msk.f32.gmra.mxu0 %vm35_vm1, %v1832_v25 }
 0xce0   :  { %10207 = vmatprep.mubr.msk.f32.mxu0 %vm11353_vm3, %v11352_v12 }
 0xce3   :  { %10208 = vmatmul.mubr.msk.f32.gmra.mxu0 %vm35_vm1, %v1834_v27 }
 0xce4   :  { %10233 = vmatprep.mubr.msk.f32.mxu0 %vm11353_vm3, %v11352_v12 }
 0xce7   :  { %10234 = vmatmul.mubr.msk.f32.vlgmr.msra.gmra.mxu0 %vm143_vm2, %v2099_v28 }
 0xce8   :  { %10236 = vmatprep.mubr.msk.f32.mxu0 %vm11353_vm3, %v11352_v12 }
 0xd4a   :  { %v2253_v2 = vpop.permute.xlu0 %2252 }
 0xd97   :  { %v1953_v32 = vpop.f32.mrf.mxu0 }
 0xd98   :  { %v11714_v33 = vadd.f32 %v1953_v32, %v1852_v30 }
 0xd99   :  { %v10200_v35 = vpop.f32.mrf.mxu0 }
 0xd9a   :  { %10218 = vmatmul.mubr.msk.f32.gmra.mxu1 %vm143_vm2, %v11714_v33 }
 0xd9b   :  { %v1958_v37 = vpop.f32.mrf.mxu0  ;;  %10220 = vmatprep.mubr.msk.f32.mxu1 %vm11353_vm3, %v11352_v12 }
 0xd9c   :  { %v11721_v38 = vadd.f32 %v1958_v37, %v1866_v36 }
 0xd9d   :  { %v10203_v40 = vpop.f32.mrf.mxu0 }
 0xd9e   :  { %10221 = vmatmul.mubr.msk.f32.gmra.mxu1 %vm143_vm2, %v11721_v38 }
 0xd9f   :  { %v1963_v42 = vpop.f32.mrf.mxu0  ;;  %10223 = vmatprep.mubr.msk.f32.mxu1 %vm11353_vm3, %v11352_v12 }
 0xda0   :  { %v11728_v45 = vadd.f32 %v1963_v42, %v1860_v41 }
 0xda1   :  { %v10206_v46 = vpop.f32.mrf.mxu0 }
 0xda2   :  { %10224 = vmatmul.mubr.msk.f32.gmra.mxu1 %vm143_vm2, %v11728_v45 }
 0xda3   :  { %v1968_v47 = vpop.f32.mrf.mxu0  ;;  %10226 = vmatprep.mubr.msk.f32.mxu1 %vm11353_vm3, %v11352_v12 }
 0xda4   :  { %v11735_v48 = vadd.f32 %v1968_v47, %v1862_v9 }
 0xda5   :  { %v10209_v49 = vpop.f32.mrf.mxu0 }
 0xda6   :  { %10227 = vmatmul.mubr.msk.f32.gmra.mxu1 %vm143_vm2, %v11735_v48 }
 0xda7   :  { %v2189_v51 = vpop.f32.mrf.mxu0  ;;  %10254 = vmatprep.mubr.msk.f32.mxu1 %vm11353_vm3, %v11352_v12 }
 0xda8   :  { %v2190_v1 = vadd.f32 %v11744_v53, %v2189_v51 }
 0xda9   :  { %v10235_v52 = vpop.f32.mrf.mxu0 }
 0xdaa   :  { %v2213_v54 = vsub.f32 0.0, %v2190_v1 }
 0xdac   :  { %v2218_v55 = vmul.f32 1.442695, %v2213_v54 }
 0xdae   :  { %11082 = vpow2.f32 %v2218_v55 }
 0xdbb   :  { %v11083_v56 = vpop.eup %11082 }
 0xdbc   :  { %v2228_v57 = vadd.f32 1.0, %v11083_v56 }
 0xdbe   :  { %11084 = vrcp.f32 %v2228_v57 }
 0xdcb   :  { %v11085_v10 = vpop.eup %11084 }
 0xdcc   :  { %v11784_v20 = vmul.f32 20.0, %v11085_v10 }
 0xe5a   :  { %v2080_v58 = vpop.f32.mrf.mxu1 }
 0xe5b   :  { %v11748_v59 = vadd.f32 %v11664_v13, %v2080_v58 }
 0xe5c   :  { %v10219_v60 = vpop.f32.mrf.mxu1 }
 0xe5d   :  { %v2100_v61 = vmax.f32 %v11748_v59, 0.0 }
 0xe5e   :  { %v2085_v62 = vpop.f32.mrf.mxu1 }
 0xe5f   :  { %v11752_v63 = vadd.f32 %v11664_v13, %v2085_v62  ;;  %10237 = vmatmul.mubr.msk.f32.gmra.mxu0 %vm143_vm2, %v2100_v61  ;;  %v2621_v62 = vadd.f32 4.0, %v11784_v20 }
 0xe60   :  { %v10222_v3 = vpop.f32.mrf.mxu1  ;;  %10239 = vmatprep.mubr.msk.f32.mxu0 %vm11353_vm3, %v11352_v12 }
 0xe61   :  { %2524 = vrot.lane.b32.xlu0 %v11752_v63, %s11354_s30  ;;  %2256 = vrot.lane.b32.xlu1 %v11752_v63, %s11355_s4  ;;  %v2101_v4 = vmax.f32 %v11752_v63, 0.0 }
 0xe62   :  { %v2090_v5 = vpop.f32.mrf.mxu1 }
 0xe63   :  { %v11763_v6 = vadd.f32 %v11664_v13, %v2090_v5  ;;  %10240 = vmatmul.mubr.msk.f32.gmra.mxu0 %vm143_vm2, %v2101_v4 }
 0xe64   :  { %v10225_v7 = vpop.f32.mrf.mxu1  ;;  %10242 = vmatprep.mubr.msk.f32.mxu0 %vm11353_vm3, %v11352_v12 }
 0xe65   :  { %v2102_v15 = vmax.f32 %v11763_v6, 0.0  ;;  %2522 = vrot.lane.b32.xlu0 %v11748_v59, %s11354_s30  ;;  %2254 = vrot.lane.b32.xlu1 %v11748_v59, %s11355_s4 }
 0xe66   :  { %v2095_v11 = vpop.f32.mrf.mxu1 }
 0xe67   :  { %v11774_v14 = vadd.f32 %v11664_v13, %v2095_v11  ;;  %10243 = vmatmul.mubr.msk.f32.gmra.mxu0 %vm143_vm2, %v2102_v15  ;;  %v2353_v13 = vadd.f32 2.0, %v11784_v20 }
 0xe68   :  { %v10228_v17 = vpop.f32.mrf.mxu1  ;;  %10245 = vmatprep.mubr.msk.f32.mxu0 %vm11353_vm3, %v11352_v12 }
 0xe69   :  { %v2103_v18 = vmax.f32 %v11774_v14, 0.0  ;;  %2520 = vrot.lane.b32.xlu0 %v11677_v19, %s11354_s30  ;;  %2246 = vrot.lane.b32.xlu1 %v11677_v19, %s11357_s6 }
 0xe6b   :  { %10246 = vmatmul.mubr.msk.f32.gmra.mxu0 %vm143_vm2, %v2103_v18 }
 0xe6c   :  { %10284 = vmatprep.mubr.msk.f32.mxu0 %vm11353_vm3, %v11352_v12 }
 0xe6d   :  { %2516 = vrot.lane.b32.xlu0 %v11748_v59, %s11356_s5  ;;  %2248 = vrot.lane.b32.xlu1 %v11748_v59, %s11357_s6 }
 0xe71   :  { %2250 = vrot.lane.b32.xlu1 %v11752_v63, %s11357_s6  ;;  %2358 = vperm.xlu0 %11048, %v2353_v13  }
 0xe75   :  { %2514 = vrot.lane.b32.xlu1 %v11677_v19, %s11356_s5 }
 0xe79   :  { %2518 = vrot.lane.b32.xlu1 %v11752_v63, %s11356_s5 }
 0xed3   :  { %v2525_v21 = vpop.permute.xlu0 %2524  ;;  %v2257_v23 = vpop.permute.xlu1 %2256 }
 0xed4   :  { %10249 = vmatpush3.xpose.msk.msra.mxu1 %vm329_vm4, %v2257_v23  ;;  %10279 = vmatpush3.xpose.msk.msra.mxu0 %vm329_vm4, %v2525_v21 }
 0xed5   :  { %10250 = vmatprep.subr.mxu1 %v11352_v12  ;;  %10280 = vmatprep.subr.mxu0 %v11352_v12 }
 0xed7   :  { %v2523_v24 = vpop.permute.xlu0 %2522  ;;  %v2255_v22 = vpop.permute.xlu1 %2254 }
 0xed8   :  { %10251 = vmatpush3.xpose.msk.msra.mxu1 %vm329_vm4, %v2255_v22  ;;  %10281 = vmatpush3.xpose.msk.msra.mxu0 %vm329_vm4, %v2523_v24 }
 0xed9   :  { %10252 = vmatprep.subr.mxu1 %v11352_v12  ;;  %10282 = vmatprep.subr.mxu0 %v11352_v12 }
 0xedb   :  { %v2521_v25 = vpop.permute.xlu0 %2520  ;;  %v2247_v26 = vpop.permute.xlu1 %2246 }
 0xedc   :  { %10253 = vmatpush3.xpose.msk.msra.mxu1 %vm329_vm4, %v2253_v2  ;;  %10283 = vmatpush3.xpose.msk.msra.mxu0 %vm329_vm4, %v2521_v25 }
 0xedd   :  { %10263 = vmatprep.subr.mxu1 %v11352_v12  ;;  %10308 = vmatprep.subr.mxu0 %v11352_v12 }
 0xedf   :  { %v2249_v27 = vpop.permute.xlu1 %2248  ;;  %10255 = vmatmul.mubr.msk.f32.vlgmr.msra.gmra.mxu1 %vm329_vm4, %v2247_v26  ;;  %v2517_v30 = vpop.permute.xlu0 %2516  ;;  %v1835_v26 = vadd.s32 8, %v11461_v43 }
 0xee0   :  { %10257 = vmatprep.mubr.msk.f32.mxu1 %vm11353_vm3, %v11352_v12 }
 0xee1   :  { %vm1847_vm15 = vcmp.lt.s32.totalorder %v11463_v44, %v1835_v26 }
 0xee3   :  { %v2251_v28 = vpop.permute.xlu1 %2250  ;;  %10258 = vmatmul.mubr.msk.f32.gmra.mxu1 %vm329_vm4, %v2249_v27 }
 0xee4   :  { %10260 = vmatprep.mubr.msk.f32.mxu1 %vm11353_vm3, %v11352_v12 }
 0xee7   :  { %v2515_v29 = vpop.permute.xlu1 %2514  ;;  %10261 = vmatmul.mubr.msk.f32.gmra.mxu1 %vm329_vm4, %v2251_v28 }
 0xee8   :  { %10285 = vmatmul.mubr.msk.f32.vlgmr.msra.gmra.mxu0 %vm329_vm4, %v2515_v29  ;;  %10269 = vmatprep.mubr.msk.f32.mxu1 %vm11353_vm3, %v11352_v12  ;;  %v1837_v29 = vsub.s32 %v1835_v26, %v11463_v44 }
 0xee9   :  { %10287 = vmatprep.mubr.msk.f32.mxu0 %vm11353_vm3, %v11352_v12 }
 0xeeb   :  { %v2519_v31 = vpop.permute.xlu1 %2518 }
 0xeec   :  { %10288 = vmatmul.mubr.msk.f32.gmra.mxu0 %vm329_vm4, %v2517_v30  ;;  %v2359_v7 = vpop.permute.xlu0 %2358  ;;  %v1836_v30 = vadd.s32 16, %v11461_v43 }
 0xeed   :  { %10290 = vmatprep.mubr.msk.f32.mxu0 %vm11353_vm3, %v11352_v12  ;;  %vm2371_vm13 = vcmp.gt.f32.partialorder %v11469_v50, %v2359_v7 }
 0xeee   :  { %vm1848_vm5 = vcmp.lt.s32.totalorder %v11463_v44, %v1836_v30 }
 0xef0   :  { %10291 = vmatmul.mubr.msk.f32.gmra.mxu0 %vm329_vm4, %v2519_v31 }
 0xef1   :  { %10310 = vmatprep.mubr.msk.f32.mxu0 %vm11353_vm3, %v11352_v12 }
 0xf1f   :  { %v2194_v32 = vpop.f32.mrf.mxu0 }
 0xf20   :  { %v2195_v34 = vadd.f32 %v11744_v53, %v2194_v32  ;;  %v1840_v32 = vsub.s32 0, %v1837_v29 }
 0xf21   :  { %v10238_v35 = vpop.f32.mrf.mxu0 }
 0xf22   :  { %v2214_v36 = vsub.f32 0.0, %v2195_v34  ;;  %v1838_v34 = vsub.s32 %v1836_v30, %v11463_v44  ;;  %v9421_v35 = vmin.u32 %v1840_v32, %v1837_v29 }
 0xf23   :  { %v2199_v37 = vpop.f32.mrf.mxu0 }
 0xf24   :  { %v2220_v39 = vmul.f32 1.442695, %v2214_v36  ;;  %v2200_v40 = vadd.f32 %v11744_v53, %v2199_v37  ;;  %v1843_v36 = vsub.s32 0, %v1838_v34  ;;  %v1845_v37 = vcvt.s32.f32 %v9421_v35 }
 0xf25   :  { %v10241_v41 = vpop.f32.mrf.mxu0 }
 0xf26   :  { %11086 = vpow2.f32 %v2220_v39  ;;  %v2215_v42 = vsub.f32 0.0, %v2200_v40  ;;  %v9422_v39 = vmin.u32 %v1843_v36, %v1838_v34  ;;  %v11855_v40 = vsel %vm1847_vm15, 1e+18, %v1845_v37 }
 0xf27   :  { %v11832_v46 = vpop.f32.mrf.mxu0  ;;  %vm2387_vm15 = vcmask 158720  }
 0xf28   :  { %v2222_v9 = vmul.f32 1.442695, %v2215_v42  ;;  %v1846_v41 = vcvt.s32.f32 %v9422_v39 }
 0xf29   :  { %v10244_v47 = vpop.f32.mrf.mxu0 }
 0xf2a   :  { %11088 = vpow2.f32 %v2222_v9  ;;  %v11859_v47 = vsel %vm1848_vm5, 1e+18, %v1846_v41 }
 0xf2b   :  { %v11834_v49 = vpop.f32.mrf.mxu0 }
 0xf2d   :  { %v10247_v51 = vpop.f32.mrf.mxu0 }
 0xf33   :  { %v11087_v52 = vpop.eup %11086 }
 0xf34   :  { %v2229_v1 = vadd.f32 1.0, %v11087_v52 }
 0xf36   :  { %11090 = vrcp.f32 %v2229_v1 }
 0xf37   :  { %v11089_v54 = vpop.eup %11088 }
 0xf38   :  { %v2230_v55 = vadd.f32 1.0, %v11089_v54 }
 0xf3a   :  { %11092 = vrcp.f32 %v2230_v55 }
 0xf43   :  { %v11091_v56 = vpop.eup %11090 }
 0xf44   :  { %v2239_v57 = vmul.f32 20.0, %v11091_v56 }
 0xf46   :  { %v2354_v58 = vadd.f32 2.0, %v2239_v57  ;;  %v2622_v5 = vadd.f32 4.0, %v2239_v57 }
 0xf47   :  { %v11093_v60 = vpop.eup %11092 }
 0xf48   :  { %2363 = vperm.xlu1 %11049, %v2354_v58   ;;  %v2240_v61 = vmul.f32 20.0, %v11093_v60 }
 0xf4a   :  { %v2355_v3 = vadd.f32 2.0, %v2240_v61  ;;  %v2623_v4 = vadd.f32 4.0, %v2240_v61 }
 0xf4c   :  { %2626 = vperm.xlu1 %11049, %v2621_v62   ;;  %2368 = vperm.xlu0 %11048, %v2355_v3  }
 0xf50   :  { %2636 = vperm.xlu1 %11049, %v2623_v4   ;;  %2631 = vperm.xlu0 %11048, %v2622_v5  }
 0xf54   :  { %2404 = vrot.lane.b32.xlu1 %v11752_v63, %s11360_s10  ;;  %2402 = vrot.lane.b32.xlu0 %v11748_v59, %s11360_s10 }
 0xf58   :  { %2400 = vrot.lane.b32.xlu1 %v11677_v19, %s11360_s10 }
 0xf5c   :  { %2670 = vrot.lane.b32.xlu1 %v11752_v63, %s11359_s9 }
 0xf9f   :  { %v2336_v15 = vpop.f32.mrf.mxu1 }
 0xfa0   :  { %v2350_v10 = vmul.f32 0.2236068, %v2336_v15 }
 0xfa1   :  { %v10256_v11 = vpop.f32.mrf.mxu1 }
 0xfa2   :  { %v2374_v17 = vsel %vm2371_vm13, -1e+18, %v2350_v10 }
 0xfa3   :  { %v2341_v18 = vpop.f32.mrf.mxu1  ;;  %v11846_v20 = vadd.f32 %v2374_v17, %v2350_v10 }
 0xfa4   :  { %v2351_v42 = vmul.f32 0.2236068, %v2341_v18 }
 0xfa5   :  { %v10259_v13 = vpop.f32.mrf.mxu1  ;;  %v2381_v2 = vsel %vm2380_vm14, %v11846_v20, -inf }
 0xfa6   :  { %2382 = vmax.xlane.f32.xlu0 %v2381_v2 }
 0xfa7   :  { %v2346_v21 = vpop.f32.mrf.mxu1 }
 0xfa8   :  { %v2604_v23 = vpop.f32.mrf.mxu0  ;;  %v2352_v52 = vmul.f32 0.2236068, %v2346_v21 }
 0xfa9   :  { %v10262_v24 = vpop.f32.mrf.mxu1  ;;  %v2618_v1 = vmul.f32 0.2236068, %v2604_v23 }
 0xfaa   :  { %v10286_v22 = vpop.f32.mrf.mxu0 }
 0xfac   :  { %v2609_v25 = vpop.f32.mrf.mxu0 }
 0xfad   :  { %v2619_v60 = vmul.f32 0.2236068, %v2609_v25 }
 0xfae   :  { %v10289_v27 = vpop.f32.mrf.mxu0 }
 0xfb0   :  { %v2614_v28 = vpop.f32.mrf.mxu0 }
 0xfb1   :  { %v2620_v61 = vmul.f32 0.2236068, %v2614_v28 }
 0xfb2   :  { %v10292_v31 = vpop.f32.mrf.mxu0 }
 0xfc3   :  { %v2364_v9 = vpop.permute.xlu1 %2363 }
 0xfc4   :  { %vm2372_vm6 = vcmp.gt.f32.partialorder %v11855_v40, %v2364_v9  ;;  %v2205_v9 = vadd.f32 %v11744_v53, %v11832_v46 }
 0xfc5   :  { %v2375_v43 = vsel %vm2372_vm6, -1e+18, %v2351_v42 }
 0xfc6   :  { %v2378_v51 = vadd.f32 %v2375_v43, %v2351_v42 }
 0xfc7   :  { %v2627_v54 = vpop.permute.xlu1 %2626  ;;  %v11861_v55 = vpop.permute.xlu0 %2368 }
 0xfc8   :  { %vm2639_vm7 = vcmp.gt.f32.partialorder %v11469_v50, %v2627_v54  ;;  %vm2373_vm8 = vcmp.gt.f32.partialorder %v11859_v47, %v11861_v55  ;;  %v2384_v44 = vsel %vm2380_vm14, %v2378_v51, -inf }
 0xfc9   :  { %v2642_v56 = vsel %vm2639_vm7, -1e+18, %v2618_v1  ;;  %2385 = vmax.xlane.f32.xlu1 %v2384_v44  ;;  %v2376_v57 = vsel %vm2373_vm8, -1e+18, %v2352_v52 }
 0xfca   :  { %v2645_v58 = vadd.f32 %v2642_v56, %v2618_v1  ;;  %v2379_v5 = vadd.f32 %v2376_v57, %v2352_v52  ;;  %v2216_v1 = vsub.f32 0.0, %v2205_v9  ;;  %v2210_v56 = vadd.f32 %v11744_v53, %v11834_v49 }
 0xfcb   :  { %v11867_v62 = vpop.permute.xlu1 %2636  ;;  %v2632_v3 = vpop.permute.xlu0 %2631 }
 0xfcc   :  { %vm2641_vm9 = vcmp.gt.f32.partialorder %v11859_v47, %v11867_v62  ;;  %vm2640_vm13 = vcmp.gt.f32.partialorder %v11855_v40, %v2632_v3  ;;  %v2648_v4 = vsel %vm2380_vm14, %v2645_v58, -inf  ;;  %v2388_v17 = vsel %vm2387_vm15, %v2379_v5, -inf }
 0xfcd   :  { %v2643_v7 = vsel %vm2640_vm13, -1e+18, %v2619_v60  ;;  %2649 = vmax.xlane.f32.xlu0 %v2648_v4  ;;  %v2644_v15 = vsel %vm2641_vm9, -1e+18, %v2620_v61  ;;  %v2224_v44 = vmul.f32 1.442695, %v2216_v1 }
 0xfce   :  { %v2646_v10 = vadd.f32 %v2643_v7, %v2619_v60  ;;  %v2647_v13 = vadd.f32 %v2644_v15, %v2620_v61  ;;  %v2217_v60 = vsub.f32 0.0, %v2210_v56  ;;  %v2961_v7 = vrot.slane %v11763_v6, 4 }
 0xfcf   :  { %v2405_v11 = vpop.permute.xlu1 %2404  ;;  %v2403_v2 = vpop.permute.xlu0 %2402 }
 0xfd0   :  { %10264 = vmatpush3.msk.msra.mxu1 %vm1830_vm11, %v2405_v11  ;;  %v2651_v18 = vsel %vm2380_vm14, %v2646_v10, -inf  ;;  %v2654_v23 = vsel %vm2387_vm15, %v2647_v13, -inf  ;;  %v2226_v49 = vmul.f32 1.442695, %v2217_v60 }
 0xfd1   :  { %10265 = vmatprep.subr.mxu1 %v11352_v12  ;;  %2389 = vmax.xlane.f32.xlu0 %v2388_v17 }
 0xfd2   :  { %2652 = vmax.xlane.f32.xlu1 %v2651_v18  ;;  %10266 = vmatpush3.msra.mxu1 %v2403_v2 }
 0xfd3   :  { %v2401_v21 = vpop.permute.xlu1 %2400  ;;  %10267 = vmatprep.subr.mxu1 %v11352_v12 }
 0xfd4   :  { %10268 = vmatpush3.msra.mxu1 %v2401_v21 }
 0xfd5   :  { %2655 = vmax.xlane.f32.xlu0 %v2654_v23  ;;  %10293 = vmatprep.subr.mxu1 %v11352_v12 }
 0xfd7   :  { %v2671_v27 = vpop.permute.xlu1 %2670 }
 0xfe3   :  { %2666 = vrot.lane.b32.xlu1 %v11677_v19, %s11359_s9 }
 0xfeb   :  { %2668 = vrot.lane.b32.xlu0 %v11748_v59, %s11359_s9 }
0x102f   :  { %v2383_v24 = vpop.xlane.xlu0 %2382 }
0x1030   :  { %v2391_v22 = vsub.f32 %v11846_v20, %v2383_v24 }
0x1032   :  { %v2394_v25 = vmul.f32 1.442695, %v2391_v22 }
0x1034   :  { %11094 = vpow2.f32 %v2394_v25  ;;  %v11955_v25 = vld [vmem:[%s13612_s2 + $0x120] sm:$0xff] }
0x1035   :  { %10309 = vmatpush3.msra.mxu0 %v11955_v25 }
0x1036   :  { %10330 = vmatprep.subr.mxu0 %v11352_v12 }
0x1041   :  { %v11885_v26 = vpop.eup %11094 }
0x1042   :  { %10270 = vmatmul.mubr.msk.f32.vlgmr.msra.gmra.mxu1 %vm2380_vm14, %v11885_v26 }
0x1043   :  { %10294 = vmatpush3.msk.msra.mxu1 %vm1830_vm11, %v2671_v27  ;;  %10272 = vmatprep.mubr.msk.f32.mxu1 %vm11353_vm3, %v11352_v12  ;;  %v2499_v27 = vsel %vm2380_vm14, %v11885_v26, 0.0 }
0x1044   :  { %10295 = vmatprep.subr.mxu1 %v11352_v12 }
0x1052   :  { %v2386_v19 = vpop.xlane.xlu1 %2385 }
0x1053   :  { %v2392_v59 = vsub.f32 %v2378_v51, %v2386_v19 }
0x1055   :  { %v2396_v28 = vmul.f32 1.442695, %v2392_v59  ;;  %v11969_v59 = vld [vmem:[%s13612_s2 + $0x118] sm:$0xff] }
0x1056   :  { %v2650_v29 = vpop.xlane.xlu0 %2649 }
0x1057   :  { %11096 = vpow2.f32 %v2396_v28  ;;  %v2657_v20 = vsub.f32 %v2645_v58, %v2650_v29 }
0x1059   :  { %v2660_v30 = vmul.f32 1.442695, %v2657_v20 }
0x105a   :  { %v2390_v31 = vpop.xlane.xlu0 %2389 }
0x105b   :  { %11098 = vpow2.f32 %v2660_v30  ;;  %v2393_v32 = vsub.f32 %v2379_v5, %v2390_v31  ;;  %v2653_v34 = vpop.xlane.xlu1 %2652  ;;  %v2963_v5 = vrot.slane %v11774_v14, 4 }
0x105c   :  { %v2658_v35 = vsub.f32 %v2646_v10, %v2653_v34  ;;  %v2960_v10 = vrot.slane %v11752_v63, 4 }
0x105d   :  { %v2398_v36 = vmul.f32 1.442695, %v2393_v32  ;;  %v11927_v11 = vsel %vm1830_vm11, %v2961_v7, %v2963_v5 }
0x105e   :  { %v2662_v37 = vmul.f32 1.442695, %v2658_v35  ;;  %v2656_v39 = vpop.xlane.xlu0 %2655  ;;  %v11932_v18 = vsel %vm1830_vm11, %v2960_v10, %v2961_v7 }
0x105f   :  { %11100 = vpow2.f32 %v2398_v36  ;;  %v2659_v41 = vsub.f32 %v2647_v13, %v2656_v39  ;;  %v2667_v52 = vpop.permute.xlu1 %2666 }
0x1060   :  { %11102 = vpow2.f32 %v2662_v37 }
0x1061   :  { %v2664_v42 = vmul.f32 1.442695, %v2659_v41 }
0x1062   :  { %v2669_v43 = vpop.permute.xlu0 %2668 }
0x1063   :  { %11104 = vpow2.f32 %v2664_v42  ;;  %10296 = vmatpush3.msra.mxu1 %v2669_v43 }
0x1064   :  { %v11895_v51 = vpop.eup %11096  ;;  %10297 = vmatprep.subr.mxu1 %v11352_v12  ;;  %11106 = vpow2.f32 %v2224_v44 }
0x1065   :  { %10273 = vmatmul.mubr.msk.f32.gmra.mxu1 %vm2380_vm14, %v11895_v51  ;;  %11108 = vpow2.f32 %v2226_v49  ;;  %v2502_v19 = vsel %vm2380_vm14, %v11895_v51, 0.0 }
0x1066   :  { %10298 = vmatpush3.msra.mxu1 %v2667_v52  ;;  %10275 = vmatprep.mubr.msk.f32.mxu1 %vm11353_vm3, %v11352_v12 }
0x1067   :  { %10319 = vmatprep.subr.mxu1 %v11352_v12 }
0x1068   :  { %v11099_v54 = vpop.eup %11098 }
0x1069   :  { %v2765_v46 = vsel %vm2380_vm14, %v11099_v54, 0.0 }
0x106a   :  { %2766 = vadd.xlane.f32.xlu0 %v2765_v46 }
0x106c   :  { %v11906_v57 = vpop.eup %11100 }
0x106d   :  { %v11103_v58 = vpop.eup %11102  ;;  %10276 = vmatmul.mubr.msk.f32.gmra.mxu1 %vm2380_vm14, %v11906_v57  ;;  %v2505_v26 = vsel %vm2387_vm15, %v11906_v57, 0.0 }
0x106e   :  { %v2768_v61 = vsel %vm2380_vm14, %v11103_v58, 0.0  ;;  %10299 = vmatprep.mubr.msk.f32.mxu1 %vm11353_vm3, %v11352_v12 }
0x106f   :  { %2769 = vadd.xlane.f32.xlu1 %v2768_v61 }
0x1070   :  { %v11105_v3 = vpop.eup %11104 }
0x1071   :  { %10300 = vmatmul.mubr.msk.f32.vlgmr.msra.gmra.mxu1 %vm2380_vm14, %v11099_v54  ;;  %v2771_v53 = vsel %vm2387_vm15, %v11105_v3, 0.0  ;;  %v11107_v4 = vpop.eup %11106 }
0x1072   :  { %2772 = vadd.xlane.f32.xlu0 %v2771_v53  ;;  %10302 = vmatprep.mubr.msk.f32.mxu1 %vm11353_vm3, %v11352_v12  ;;  %v2231_v15 = vadd.f32 1.0, %v11107_v4  ;;  %v11109_v17 = vpop.eup %11108 }
0x1073   :  { %v2232_v14 = vadd.f32 1.0, %v11109_v17  ;;  %10320 = vmatpush3.msra.mxu1 %v11969_v59 }
0x1074   :  { %11110 = vrcp.f32 %v2231_v15  ;;  %10345 = vmatprep.subr.mxu1 %v11352_v12 }
0x1075   :  { %10303 = vmatmul.mubr.msk.f32.gmra.mxu1 %vm2380_vm14, %v11103_v58  ;;  %11112 = vrcp.f32 %v2232_v14 }
0x1076   :  { %10305 = vmatprep.mubr.msk.f32.mxu1 %vm11353_vm3, %v11352_v12 }
0x1079   :  { %10306 = vmatmul.mubr.msk.f32.gmra.mxu1 %vm2380_vm14, %v11105_v3 }
0x107a   :  { %10321 = vmatprep.mubr.msk.f32.mxu1 %vm11353_vm3, %v11352_v12 }
0x1080   :  { %2973 = vrot.lane.b32.xlu1 %v11927_v11, %s11355_s4 }
0x1081   :  { %v11111_v63 = vpop.eup %11110 }
0x1082   :  { %v2241_v6 = vmul.f32 20.0, %v11111_v63  ;;  %v11113_v2 = vpop.eup %11112 }
0x1083   :  { %v2242_v23 = vmul.f32 20.0, %v11113_v2 }
0x1084   :  { %2971 = vrot.lane.b32.xlu1 %v11932_v18, %s11355_s4  ;;  %v3072_v13 = vadd.f32 2.0, %v2241_v6  ;;  %v3338_v21 = vadd.f32 4.0, %v2241_v6 }
0x1085   :  { %v3073_v24 = vadd.f32 2.0, %v2242_v23  ;;  %v3339_v22 = vadd.f32 4.0, %v2242_v23 }
0x1088   :  { %3241 = vrot.lane.b32.xlu1 %v2963_v5, %s11354_s30  ;;  %2975 = vrot.lane.b32.xlu0 %v2963_v5, %s11355_s4 }
0x108c   :  { %3239 = vrot.lane.b32.xlu1 %v11927_v11, %s11354_s30  ;;  %2965 = vrot.lane.b32.xlu0 %v11932_v18, %s11357_s6 }
0x1090   :  { %3237 = vrot.lane.b32.xlu1 %v11932_v18, %s11354_s30  ;;  %2967 = vrot.lane.b32.xlu0 %v11927_v11, %s11357_s6 }
0x1094   :  { %3233 = vrot.lane.b32.xlu1 %v11927_v11, %s11356_s5  ;;  %2969 = vrot.lane.b32.xlu0 %v2963_v5, %s11357_s6 }
0x1098   :  { %3076 = vperm.xlu1 %11049, %v3072_v13   ;;  %3231 = vrot.lane.b32.xlu0 %v11932_v18, %s11356_s5 }
0x109c   :  { %3342 = vperm.xlu1 %11049, %v3338_v21   ;;  %3235 = vrot.lane.b32.xlu0 %v2963_v5, %s11356_s5 }
0x10a0   :  { %3080 = vperm.xlu0 %11048, %v3073_v24  }
0x10a4   :  { %3346 = vperm.xlu0 %11048, %v3339_v22  }
0x10c0   :  { %2500 = vadd.xlane.f32.xlu1 %v2499_v27 }
0x10c3   :  { %2503 = vadd.xlane.f32.xlu0 %v2502_v19 }
0x10d1   :  { %3121 = vrot.lane.b32.xlu1 %v2963_v5, %s11360_s10 }
0x10d5   :  { %3117 = vrot.lane.b32.xlu1 %v11932_v18, %s11360_s10 }
0x10d9   :  { %3387 = vrot.lane.b32.xlu1 %v2963_v5, %s11359_s9  ;;  %3119 = vrot.lane.b32.xlu0 %v11927_v11, %s11360_s10 }
0x10f3   :  { %v2767_v30 = vpop.xlane.xlu0 %2766 }
0x10f4   :  { %11114 = vrcp.f32 %v2767_v30 }
0x10f8   :  { %2506 = vadd.xlane.f32.xlu0 %v2505_v26  ;;  %v2770_v20 = vpop.xlane.xlu1 %2769 }
0x10f9   :  { %11116 = vrcp.f32 %v2770_v20 }
0x10fb   :  { %v2773_v31 = vpop.xlane.xlu0 %2772 }
0x10fc   :  { %v2974_v32 = vpop.permute.xlu1 %2973  ;;  %11118 = vrcp.f32 %v2773_v31 }
0x10ff   :  { %v2976_v34 = vpop.permute.xlu0 %2975 }
0x1100   :  { %v2972_v35 = vpop.permute.xlu1 %2971 }
0x1101   :  { %v11115_v52 = vpop.eup %11114 }
0x1102   :  { %v11978_v28 = vpop.f32.mrf.mxu1 }
0x1103   :  { %v2966_v37 = vpop.permute.xlu0 %2965 }
0x1104   :  { %v10271_v29 = vpop.f32.mrf.mxu1  ;;  %v3242_v39 = vpop.permute.xlu1 %3241 }
0x1106   :  { %v11117_v57 = vpop.eup %11116 }
0x1107   :  { %v2968_v42 = vpop.permute.xlu0 %2967 }
0x1108   :  { %v3240_v9 = vpop.permute.xlu1 %3239 }
0x1109   :  { %v11119_v53 = vpop.eup %11118 }
0x110b   :  { %v2970_v54 = vpop.permute.xlu0 %2969 }
0x110c   :  { %v3238_v44 = vpop.permute.xlu1 %3237 }
0x110f   :  { %v3232_v3 = vpop.permute.xlu0 %3231 }
0x1110   :  { %v3234_v49 = vpop.permute.xlu1 %3233 }
0x1113   :  { %v3236_v15 = vpop.permute.xlu0 %3235 }
0x1114   :  { %v11999_v10 = vpop.permute.xlu1 %3076 }
0x1118   :  { %v12009_v14 = vpop.permute.xlu1 %3342 }
0x111b   :  { %v12005_v17 = vpop.permute.xlu0 %3080 }
0x111f   :  { %v12015_v63 = vpop.permute.xlu0 %3346 }
0x1125   :  { %v11980_v36 = vpop.f32.mrf.mxu1 }
0x1127   :  { %v10274_v41 = vpop.f32.mrf.mxu1 }
0x112d   :  { %v11982_v43 = vpop.f32.mrf.mxu1 }
0x112f   :  { %v10277_v51 = vpop.f32.mrf.mxu1 }
0x1131   :  { %v2751_v1 = vpop.f32.mrf.mxu1 }
0x1132   :  { %v2777_v46 = vmul.f32 %v11115_v52, %v2751_v1 }
0x1133   :  { %v10301_v56 = vpop.f32.mrf.mxu1 }
0x1134   :  { %10311 = vmatmul.mubr.msk.f32.vlgmr.msra.gmra.mxu0 %vm329_vm4, %v2777_v46 }
0x1135   :  { %10331 = vmatpush3.xpose.msk.msra.mxu0 %vm329_vm4, %v2976_v34  ;;  %v2756_v58 = vpop.f32.mrf.mxu1  ;;  %10313 = vmatprep.mubr.msk.f32.mxu0 %vm11353_vm3, %v11352_v12 }
0x1136   :  { %v2778_v60 = vmul.f32 %v11117_v57, %v2756_v58  ;;  %10332 = vmatprep.subr.mxu0 %v11352_v12 }
0x1137   :  { %v10304_v61 = vpop.f32.mrf.mxu1 }
0x1138   :  { %10314 = vmatmul.mubr.msk.f32.gmra.mxu0 %vm329_vm4, %v2778_v60  ;;  %v3348_v60 = vrot.slane %v11867_v62, 4 }
0x1139   :  { %10333 = vmatpush3.xpose.msk.msra.mxu0 %vm329_vm4, %v2974_v32  ;;  %v2761_v4 = vpop.f32.mrf.mxu1  ;;  %10316 = vmatprep.mubr.msk.f32.mxu0 %vm11353_vm3, %v11352_v12  ;;  %v3083_v32 = vrot.slane %v11999_v10, 4 }
0x113a   :  { %v2779_v5 = vmul.f32 %v11119_v53, %v2761_v4  ;;  %10334 = vmatprep.subr.mxu0 %v11352_v12 }
0x113b   :  { %v10307_v7 = vpop.f32.mrf.mxu1 }
0x113c   :  { %10317 = vmatmul.mubr.msk.f32.gmra.mxu0 %vm329_vm4, %v2779_v5 }
0x113d   :  { %10335 = vmatpush3.xpose.msk.msra.mxu0 %vm329_vm4, %v2972_v35  ;;  %10336 = vmatprep.mubr.msk.f32.mxu0 %vm11353_vm3, %v11352_v12  ;;  %v3082_v35 = vrot.slane %v11861_v55, 4 }
0x113e   :  { %10360 = vmatprep.subr.mxu0 %v11352_v12 }
0x1140   :  { %10337 = vmatmul.mubr.msk.f32.vlgmr.msra.gmra.mxu0 %vm329_vm4, %v2966_v37  ;;  %v3085_v37 = vrot.slane %v12005_v17, 4 }
0x1141   :  { %10361 = vmatpush3.xpose.msk.msra.mxu0 %vm329_vm4, %v3242_v39  ;;  %10339 = vmatprep.mubr.msk.f32.mxu0 %vm11353_vm3, %v11352_v12  ;;  %v3084_v39 = vsel %vm1830_vm11, %v3082_v35, %v3083_v32 }
0x1142   :  { %10362 = vmatprep.subr.mxu0 %v11352_v12  ;;  %vm3090_vm5 = vcmp.gt.f32.partialorder %v11469_v50, %v3084_v39  ;;  %v3086_v51 = vsel %vm1830_vm11, %v3083_v32, %v3085_v37  ;;  %vm3092_vm7 = vcmp.gt.f32.partialorder %v11859_v47, %v3085_v37 }
0x1143   :  { %vm3091_vm6 = vcmp.gt.f32.partialorder %v11855_v40, %v3086_v51 }
0x1144   :  { %10340 = vmatmul.mubr.msk.f32.gmra.mxu0 %vm329_vm4, %v2968_v42 }
0x1145   :  { %10363 = vmatpush3.xpose.msk.msra.mxu0 %vm329_vm4, %v3240_v9  ;;  %10342 = vmatprep.mubr.msk.f32.mxu0 %vm11353_vm3, %v11352_v12 }
0x1146   :  { %10364 = vmatprep.subr.mxu0 %v11352_v12 }
0x1148   :  { %10343 = vmatmul.mubr.msk.f32.gmra.mxu0 %vm329_vm4, %v2970_v54 }
0x1149   :  { %v2501_v6 = vpop.xlane.xlu1 %2500  ;;  %10365 = vmatpush3.xpose.msk.msra.mxu0 %vm329_vm4, %v3238_v44  ;;  %10366 = vmatprep.mubr.msk.f32.mxu0 %vm11353_vm3, %v11352_v12  ;;  %v3349_v44 = vrot.slane %v12009_v14, 4 }
0x114a   :  { %11120 = vrcp.f32 %v2501_v6  ;;  %10390 = vmatprep.subr.mxu0 %v11352_v12 }
0x114b   :  { %v3350_v5 = vsel %vm1830_vm11, %v3348_v60, %v3349_v44 }
0x114c   :  { %10367 = vmatmul.mubr.msk.f32.vlgmr.msra.gmra.mxu0 %vm329_vm4, %v3232_v3  ;;  %v2504_v13 = vpop.xlane.xlu0 %2503  ;;  %vm3356_vm8 = vcmp.gt.f32.partialorder %v11469_v50, %v3350_v5 }
0x114d   :  { %11122 = vrcp.f32 %v2504_v13  ;;  %10369 = vmatprep.mubr.msk.f32.mxu0 %vm11353_vm3, %v11352_v12  ;;  %10391 = vmatpush3.msra.mxu0 %v11955_v25  ;;  %v3122_v23 = vpop.permute.xlu1 %3121 }
0x114e   :  { %10412 = vmatprep.subr.mxu0 %v11352_v12 }
0x1150   :  { %10370 = vmatmul.mubr.msk.f32.gmra.mxu0 %vm329_vm4, %v3234_v49  ;;  %v3120_v25 = vpop.permute.xlu0 %3119  ;;  %v3351_v49 = vrot.slane %v12015_v63, 4 }
0x1151   :  { %10372 = vmatprep.mubr.msk.f32.mxu0 %vm11353_vm3, %v11352_v12  ;;  %v3118_v27 = vpop.permute.xlu1 %3117 }
0x1152   :  { %v3352_v6 = vsel %vm1830_vm11, %v3349_v44, %v3351_v49  ;;  %vm3358_vm13 = vcmp.gt.f32.partialorder %v11859_v47, %v3351_v49 }
0x1153   :  { %vm3357_vm9 = vcmp.gt.f32.partialorder %v11855_v40, %v3352_v6 }
0x1154   :  { %10373 = vmatmul.mubr.msk.f32.gmra.mxu0 %vm329_vm4, %v3236_v15 }
0x1155   :  { %10392 = vmatprep.mubr.msk.f32.mxu0 %vm11353_vm3, %v11352_v12 }
0x1157   :  { %v11121_v2 = vpop.eup %11120 }
0x1158   :  { %v2511_v21 = vmul.f32 %v11121_v2, %v11978_v28 }
0x115a   :  { %v11123_v24 = vpop.eup %11122  ;;  %10322 = vmatmul.mubr.msk.f32.vlgmr.msra.gmra.mxu1 %vm329_vm4, %v2511_v21 }
0x115b   :  { %10346 = vmatpush3.msk.msra.mxu1 %vm1830_vm11, %v3122_v23  ;;  %10324 = vmatprep.mubr.msk.f32.mxu1 %vm11353_vm3, %v11352_v12  ;;  %v2512_v22 = vmul.f32 %v11123_v24, %v11980_v36 }
0x115c   :  { %10347 = vmatprep.subr.mxu1 %v11352_v12 }
0x115d   :  { %10348 = vmatpush3.msra.mxu1 %v3120_v25 }
0x115e   :  { %10349 = vmatprep.subr.mxu1 %v11352_v12  ;;  %10325 = vmatmul.mubr.msk.f32.gmra.mxu1 %vm329_vm4, %v2512_v22 }
0x115f   :  { %10350 = vmatpush3.msra.mxu1 %v3118_v27  ;;  %10327 = vmatprep.mubr.msk.f32.mxu1 %vm11353_vm3, %v11352_v12 }
0x1160   :  { %10375 = vmatprep.subr.mxu1 %v11352_v12 }
0x1181   :  { %v2507_v19 = vpop.xlane.xlu0 %2506 }
0x1182   :  { %11124 = vrcp.f32 %v2507_v19 }
0x118f   :  { %v11125_v26 = vpop.eup %11124 }
0x1190   :  { %v2513_v28 = vmul.f32 %v11125_v26, %v11982_v43 }
0x1192   :  { %10328 = vmatmul.mubr.msk.f32.gmra.mxu1 %vm329_vm4, %v2513_v28 }
0x1193   :  { %10351 = vmatprep.mubr.msk.f32.mxu1 %vm11353_vm3, %v11352_v12 }
0x11f4   :  { %v12049_v29 = vpop.f32.mrf.mxu0 }
0x11f6   :  { %v10312_v20 = vpop.f32.mrf.mxu0 }
0x11f8   :  { %v12051_v30 = vpop.f32.mrf.mxu0 }
0x11fa   :  { %v10315_v31 = vpop.f32.mrf.mxu0 }
0x11fc   :  { %v12054_v34 = vpop.f32.mrf.mxu0 }
0x11fe   :  { %v10318_v36 = vpop.f32.mrf.mxu0 }
0x1200   :  { %v3055_v41 = vpop.f32.mrf.mxu0 }
0x1201   :  { %v3069_v42 = vmul.f32 0.2236068, %v3055_v41 }
0x1202   :  { %v10338_v9 = vpop.f32.mrf.mxu0 }
0x1203   :  { %v3093_v43 = vsel %vm3090_vm5, -1e+18, %v3069_v42 }
0x1204   :  { %v3060_v52 = vpop.f32.mrf.mxu0  ;;  %v3096_v1 = vadd.f32 %v3093_v43, %v3069_v42  ;;  %v3388_v43 = vpop.permute.xlu1 %3387 }
0x1205   :  { %v3070_v54 = vmul.f32 0.2236068, %v3060_v52 }
0x1206   :  { %v10341_v46 = vpop.f32.mrf.mxu0  ;;  %v3099_v55 = vsel %vm2380_vm14, %v3096_v1, -inf }
0x1207   :  { %v3094_v56 = vsel %vm3091_vm6, -1e+18, %v3070_v54  ;;  %3100 = vmax.xlane.f32.xlu1 %v3099_v55 }
0x1208   :  { %v3065_v57 = vpop.f32.mrf.mxu0  ;;  %v3097_v58 = vadd.f32 %v3094_v56, %v3070_v54 }
0x1209   :  { %v3071_v61 = vmul.f32 0.2236068, %v3065_v57 }
0x120a   :  { %v10344_v3 = vpop.f32.mrf.mxu0  ;;  %v3102_v53 = vsel %vm2380_vm14, %v3097_v58, -inf }
0x120b   :  { %v3095_v4 = vsel %vm3092_vm7, -1e+18, %v3071_v61  ;;  %3103 = vmax.xlane.f32.xlu0 %v3102_v53 }
0x120c   :  { %v3321_v7 = vpop.f32.mrf.mxu0  ;;  %v3098_v15 = vadd.f32 %v3095_v4, %v3071_v61 }
0x120d   :  { %v3335_v10 = vmul.f32 0.2236068, %v3321_v7 }
0x120e   :  { %v10368_v17 = vpop.f32.mrf.mxu0  ;;  %v3105_v62 = vsel %vm2387_vm15, %v3098_v15, -inf }
0x120f   :  { %v3359_v14 = vsel %vm3356_vm8, -1e+18, %v3335_v10  ;;  %3106 = vmax.xlane.f32.xlu1 %v3105_v62 }
0x1210   :  { %v3326_v13 = vpop.f32.mrf.mxu0  ;;  %v3362_v2 = vadd.f32 %v3359_v14, %v3335_v10 }
0x1211   :  { %v3336_v21 = vmul.f32 0.2236068, %v3326_v13 }
0x1212   :  { %v10371_v63 = vpop.f32.mrf.mxu0  ;;  %v3365_v23 = vsel %vm2380_vm14, %v3362_v2, -inf }
0x1213   :  { %v3360_v24 = vsel %vm3357_vm9, -1e+18, %v3336_v21  ;;  %3366 = vmax.xlane.f32.xlu0 %v3365_v23 }
0x1214   :  { %v3331_v22 = vpop.f32.mrf.mxu0  ;;  %v3363_v25 = vadd.f32 %v3360_v24, %v3336_v21 }
0x1215   :  { %v3337_v27 = vmul.f32 0.2236068, %v3331_v22 }
0x1216   :  { %v10374_v19 = vpop.f32.mrf.mxu0  ;;  %v3368_v26 = vsel %vm2380_vm14, %v3363_v25, -inf }
0x1217   :  { %v3361_v28 = vsel %vm3358_vm13, -1e+18, %v3337_v27  ;;  %3369 = vmax.xlane.f32.xlu1 %v3368_v26 }
0x1218   :  { %v3364_v20 = vadd.f32 %v3361_v28, %v3337_v27 }
0x121a   :  { %v2944_v31 = vpop.f32.mrf.mxu1  ;;  %v3371_v32 = vsel %vm2387_vm15, %v3364_v20, -inf }
0x121b   :  { %v12078_v35 = vadd.f32 %v2944_v31, %v12049_v29  ;;  %3372 = vmax.xlane.f32.xlu0 %v3371_v32 }
0x121c   :  { %v10323_v36 = vpop.f32.mrf.mxu1 }
0x121d   :  { %v12112_v13 = vadd.f32 %v12078_v35, %v11634_v0 }
0x121e   :  { %v2949_v37 = vpop.f32.mrf.mxu1 }
0x121f   :  { %v12081_v39 = vadd.f32 %v2949_v37, %v12051_v30  ;;  %v3692_v0 = vsel %vm143_vm2, %v12112_v13, 0.0 }
0x1220   :  { %v10326_v41 = vpop.f32.mrf.mxu1 }
0x1228   :  { %3383 = vrot.lane.b32.xlu1 %v11932_v18, %s11359_s9 }
0x1231   :  { %3385 = vrot.lane.b32.xlu0 %v11927_v11, %s11359_s9 }
0x1252   :  { %v12087_v42 = vpop.f32.mrf.mxu1 }
0x1254   :  { %v10329_v9 = vpop.f32.mrf.mxu1 }
0x1290   :  { %v3101_v51 = vpop.xlane.xlu1 %3100 }
0x1291   :  { %v3108_v29 = vsub.f32 %v3096_v1, %v3101_v51 }
0x1293   :  { %v3111_v52 = vmul.f32 1.442695, %v3108_v29 }
0x1294   :  { %v3104_v54 = vpop.xlane.xlu0 %3103 }
0x1295   :  { %11126 = vpow2.f32 %v3111_v52  ;;  %v3109_v46 = vsub.f32 %v3097_v58, %v3104_v54 }
0x1297   :  { %v3113_v55 = vmul.f32 1.442695, %v3109_v46 }
0x1298   :  { %v3107_v30 = vpop.xlane.xlu1 %3106 }
0x1299   :  { %11128 = vpow2.f32 %v3113_v55  ;;  %v3110_v44 = vsub.f32 %v3098_v15, %v3107_v30 }
0x129b   :  { %v3115_v56 = vmul.f32 1.442695, %v3110_v44 }
0x129c   :  { %v3367_v57 = vpop.xlane.xlu0 %3366 }
0x129d   :  { %11130 = vpow2.f32 %v3115_v56  ;;  %v3374_v18 = vsub.f32 %v3362_v2, %v3367_v57 }
0x129f   :  { %v3377_v60 = vmul.f32 1.442695, %v3374_v18 }
0x12a0   :  { %v3370_v11 = vpop.xlane.xlu1 %3369 }
0x12a1   :  { %11132 = vpow2.f32 %v3377_v60  ;;  %v3375_v61 = vsub.f32 %v3363_v25, %v3370_v11 }
0x12a2   :  { %v11127_v3 = vpop.eup %11126 }
0x12a3   :  { %v3379_v53 = vmul.f32 1.442695, %v3375_v61  ;;  %10352 = vmatmul.mubr.msk.f32.vlgmr.msra.gmra.mxu1 %vm2380_vm14, %v11127_v3  ;;  %v3216_v1 = vsel %vm2380_vm14, %v11127_v3, 0.0 }
0x12a4   :  { %10376 = vmatpush3.msk.msra.mxu1 %vm1830_vm11, %v3388_v43  ;;  %3217 = vadd.xlane.f32.xlu0 %v3216_v1  ;;  %v3373_v58 = vpop.xlane.xlu0 %3372  ;;  %v3384_v17 = vpop.permute.xlu1 %3383 }
0x12a5   :  { %11134 = vpow2.f32 %v3379_v53  ;;  %v3376_v49 = vsub.f32 %v3364_v20, %v3373_v58  ;;  %10354 = vmatprep.mubr.msk.f32.mxu1 %vm11353_vm3, %v11352_v12  ;;  %10377 = vmatprep.subr.mxu1 %v11352_v12 }
0x12a6   :  { %v11129_v4 = vpop.eup %11128 }
0x12a7   :  { %v3381_v5 = vmul.f32 1.442695, %v3376_v49  ;;  %10355 = vmatmul.mubr.msk.f32.gmra.mxu1 %vm2380_vm14, %v11129_v4  ;;  %v3219_v7 = vsel %vm2380_vm14, %v11129_v4, 0.0 }
0x12a8   :  { %3220 = vadd.xlane.f32.xlu0 %v3219_v7  ;;  %v3386_v15 = vpop.permute.xlu0 %3385  ;;  %10357 = vmatprep.mubr.msk.f32.mxu1 %vm11353_vm3, %v11352_v12 }
0x12a9   :  { %11136 = vpow2.f32 %v3381_v5  ;;  %10378 = vmatpush3.msra.mxu1 %v3386_v15 }
0x12aa   :  { %v11131_v10 = vpop.eup %11130  ;;  %10379 = vmatprep.subr.mxu1 %v11352_v12 }
0x12ab   :  { %10358 = vmatmul.mubr.msk.f32.gmra.mxu1 %vm2380_vm14, %v11131_v10  ;;  %v3222_v2 = vsel %vm2387_vm15, %v11131_v10, 0.0  ;;  %v2955_v10 = vadd.f32 %v12087_v42, %v12054_v34 }
0x12ac   :  { %10380 = vmatpush3.msra.mxu1 %v3384_v17  ;;  %10381 = vmatprep.mubr.msk.f32.mxu1 %vm11353_vm3, %v11352_v12 }
0x12ad   :  { %10401 = vmatprep.subr.mxu1 %v11352_v12 }
0x12ae   :  { %v11133_v62 = vpop.eup %11132 }
0x12af   :  { %10382 = vmatmul.mubr.msk.f32.vlgmr.msra.gmra.mxu1 %vm2380_vm14, %v11133_v62  ;;  %v3482_v14 = vsel %vm2380_vm14, %v11133_v62, 0.0 }
0x12b0   :  { %3483 = vadd.xlane.f32.xlu1 %v3482_v14  ;;  %10384 = vmatprep.mubr.msk.f32.mxu1 %vm11353_vm3, %v11352_v12 }
0x12b1   :  { %10402 = vmatpush3.msra.mxu1 %v11969_v59  ;;  %v12121_v59 = vadd.f32 %v12081_v39, %v11714_v33 }
0x12b2   :  { %v11135_v6 = vpop.eup %11134  ;;  %10431 = vmatprep.subr.mxu1 %v11352_v12 }
0x12b3   :  { %10385 = vmatmul.mubr.msk.f32.gmra.mxu1 %vm2380_vm14, %v11135_v6  ;;  %v3485_v21 = vsel %vm2380_vm14, %v11135_v6, 0.0  ;;  %v3695_v24 = vsel %vm143_vm2, %v12121_v59, 0.0 }
0x12b4   :  { %3223 = vadd.xlane.f32.xlu1 %v3222_v2  ;;  %3486 = vadd.xlane.f32.xlu0 %v3485_v21 }
0x12b5   :  { %10387 = vmatprep.mubr.msk.f32.mxu1 %vm11353_vm3, %v11352_v12 }
0x12b6   :  { %v11137_v63 = vpop.eup %11136 }
0x12b7   :  { %10388 = vmatmul.mubr.msk.f32.gmra.mxu1 %vm2380_vm14, %v11137_v63  ;;  %v3488_v23 = vsel %vm2387_vm15, %v11137_v63, 0.0 }
0x12b8   :  { %3693 = vadd.xlane.f32.xlu1 %v3692_v0  ;;  %3489 = vadd.xlane.f32.xlu0 %v3488_v23 }
0x12b9   :  { %10403 = vmatprep.mubr.msk.f32.mxu1 %vm11353_vm3, %v11352_v12 }
0x12bc   :  { %3696 = vadd.xlane.f32.xlu0 %v3695_v24 }
0x132d   :  { %v3218_v22 = vpop.xlane.xlu0 %3217 }
0x132e   :  { %11138 = vrcp.f32 %v3218_v22 }
0x1331   :  { %v3221_v33 = vpop.xlane.xlu0 %3220 }
0x1332   :  { %11140 = vrcp.f32 %v3221_v33 }
0x1339   :  { %v3484_v25 = vpop.xlane.xlu1 %3483 }
0x133b   :  { %v11139_v26 = vpop.eup %11138 }
0x133d   :  { %v3224_v27 = vpop.xlane.xlu1 %3223  ;;  %v3487_v19 = vpop.xlane.xlu0 %3486 }
0x133e   :  { %11142 = vrcp.f32 %v3224_v27 }
0x133f   :  { %11144 = vrcp.f32 %v3484_v25  ;;  %v11141_v32 = vpop.eup %11140 }
0x1340   :  { %11146 = vrcp.f32 %v3487_v19 }
0x1341   :  { %v3490_v35 = vpop.xlane.xlu0 %3489  ;;  %v3694_v5 = vpop.xlane.xlu1 %3693 }
0x1342   :  { %11148 = vrcp.f32 %v3490_v35  ;;  %v3707_v62 = vmul.f32 0.0625, %v3694_v5 }
0x1344   :  { %v3712_v24 = vsub.f32 %v12112_v13, %v3707_v62 }
0x1345   :  { %v3697_v6 = vpop.xlane.xlu0 %3696 }
0x1346   :  { %v3708_v22 = vmul.f32 0.0625, %v3697_v6  ;;  %v1983_v6 = vld [vmem:[%s13612_s2 + $0x140] sm:$0xff] }
0x134b   :  { %v11143_v41 = vpop.eup %11142 }
0x134c   :  { %v11145_v29 = vpop.eup %11144 }
0x134d   :  { %v11147_v55 = vpop.eup %11146 }
0x134f   :  { %v11149_v57 = vpop.eup %11148 }
0x1363   :  { %v3202_v28 = vpop.f32.mrf.mxu1 }
0x1364   :  { %v3228_v20 = vmul.f32 %v11139_v26, %v3202_v28  ;;  %v3713_v28 = vsub.f32 %v12121_v59, %v3708_v22  ;;  %v1981_v59 = vld [vmem:[%s13612_s2 + $0x130] sm:$0xff] }
0x1365   :  { %v10353_v31 = vpop.f32.mrf.mxu1 }
0x1366   :  { %10404 = vmatmul.mubr.msk.f32.vlgmr.msra.gmra.mxu1 %vm329_vm4, %v3228_v20 }
0x1367   :  { %v3207_v36 = vpop.f32.mrf.mxu1  ;;  %10406 = vmatprep.mubr.msk.f32.mxu1 %vm11353_vm3, %v11352_v12 }
0x1368   :  { %v3229_v37 = vmul.f32 %v11141_v32, %v3207_v36  ;;  %v3718_v36 = vmul.f32 %v3713_v28, %v3713_v28 }
0x1369   :  { %v10356_v39 = vpop.f32.mrf.mxu1 }
0x136a   :  { %10407 = vmatmul.mubr.msk.f32.gmra.mxu1 %vm329_vm4, %v3229_v37  ;;  %v1980_v37 = vld [vmem:[%s13612_s2 + $0x128] sm:$0xff] }
0x136b   :  { %v3212_v9 = vpop.f32.mrf.mxu1  ;;  %10409 = vmatprep.mubr.msk.f32.mxu1 %vm11353_vm3, %v11352_v12 }
0x136c   :  { %v3230_v43 = vmul.f32 %v11143_v41, %v3212_v9 }
0x136d   :  { %v10359_v51 = vpop.f32.mrf.mxu1 }
0x136e   :  { %10410 = vmatmul.mubr.msk.f32.gmra.mxu1 %vm329_vm4, %v3230_v43 }
0x136f   :  { %v3468_v52 = vpop.f32.mrf.mxu1  ;;  %10435 = vmatprep.mubr.msk.f32.mxu1 %vm11353_vm3, %v11352_v12 }
0x1370   :  { %v3494_v54 = vmul.f32 %v11145_v29, %v3468_v52 }
0x1371   :  { %v10383_v46 = vpop.f32.mrf.mxu1 }
0x1372   :  { %10393 = vmatmul.mubr.msk.f32.vlgmr.msra.gmra.mxu0 %vm329_vm4, %v3494_v54 }
0x1373   :  { %v3473_v30 = vpop.f32.mrf.mxu1  ;;  %10395 = vmatprep.mubr.msk.f32.mxu0 %vm11353_vm3, %v11352_v12  ;;  %10413 = vmatpush3.msra.mxu0 %v1981_v59 }
0x1374   :  { %v3495_v44 = vmul.f32 %v11147_v55, %v3473_v30  ;;  %10414 = vmatprep.subr.mxu0 %v11352_v12 }
0x1375   :  { %v10386_v56 = vpop.f32.mrf.mxu1  ;;  %10415 = vmatpush3.msra.mxu0 %v1980_v37 }
0x1376   :  { %10396 = vmatmul.mubr.msk.f32.gmra.mxu0 %vm329_vm4, %v3495_v44  ;;  %10450 = vmatprep.subr.mxu0 %v11352_v12 }
0x1377   :  { %v3478_v18 = vpop.f32.mrf.mxu1  ;;  %10398 = vmatprep.mubr.msk.f32.mxu0 %vm11353_vm3, %v11352_v12 }
0x1378   :  { %v3496_v60 = vmul.f32 %v11149_v57, %v3478_v18 }
0x1379   :  { %v10389_v11 = vpop.f32.mrf.mxu1 }
0x137a   :  { %10399 = vmatmul.mubr.msk.f32.gmra.mxu0 %vm329_vm4, %v3496_v60 }
0x137b   :  { %10416 = vmatprep.mubr.msk.f32.mxu0 %vm11353_vm3, %v11352_v12 }
0x1426   :  { %v3661_v61 = vpop.f32.mrf.mxu1 }
0x1428   :  { %v10405_v3 = vpop.f32.mrf.mxu1 }
0x142a   :  { %v3666_v53 = vpop.f32.mrf.mxu1 }
0x142c   :  { %v10408_v1 = vpop.f32.mrf.mxu1 }
0x142e   :  { %v3671_v58 = vpop.f32.mrf.mxu1 }
0x1430   :  { %v10411_v49 = vpop.f32.mrf.mxu1 }
0x1432   :  { %v3572_v4 = vpop.f32.mrf.mxu0 }
0x1433   :  { %v3662_v7 = vadd.f32 %v3661_v61, %v3572_v4  ;;  %v9494_v4 = vld [vmem:[%s13612_s2 + $0x160] ss:$0 sm:$0xff] }
0x1434   :  { %v10394_v15 = vpop.f32.mrf.mxu0 }
0x1435   :  { %v3678_v17 = vrot.slane %v3662_v7, 4 }
0x1436   :  { %v3577_v14 = vpop.f32.mrf.mxu0 }
0x1437   :  { %v3667_v2 = vadd.f32 %v3666_v53, %v3577_v14  ;;  %v3686_v21 = vsel %vm1830_vm11, %v2955_v10, %v3678_v17  ;;  %v1984_v14 = vld [vmem:[%s13612_s2 + $0x148] sm:$0xff] }
0x1438   :  { %v10397_v63 = vpop.f32.mrf.mxu0  ;;  %v3689_v0 = vadd.f32 %v3686_v21, %v11721_v38  ;;  %v3717_v38 = vmul.f32 %v3712_v24, %v3712_v24  ;;  %10432 = vmatpush3.msra.mxu1 %v1984_v14 }
0x1439   :  { %v3679_v23 = vrot.slane %v3667_v2, 4  ;;  %10433 = vmatprep.subr.mxu1 %v11352_v12 }
0x143a   :  { %v3582_v25 = vpop.f32.mrf.mxu0  ;;  %v3698_v33 = vsel %vm143_vm2, %v3689_v0, 0.0  ;;  %v3722_v32 = vsel %vm143_vm2, %v3717_v38, 0.0  ;;  %10434 = vmatpush3.msra.mxu1 %v1983_v6 }
0x143b   :  { %v3672_v27 = vadd.f32 %v3671_v58, %v3582_v25  ;;  %3699 = vadd.xlane.f32.xlu1 %v3698_v33  ;;  %v3680_v34 = vsel %vm1830_vm11, %v3678_v17, %v3679_v23  ;;  %v9493_v58 = vld [vmem:[%s13612_s2 + $0x158] ss:$0 sm:$0xff] }
0x143c   :  { %v10400_v42 = vpop.f32.mrf.mxu0  ;;  %v3690_v19 = vadd.f32 %v3680_v34, %v11728_v45  ;;  %v3725_v45 = vsel %vm143_vm2, %v3718_v36, 0.0  ;;  %v9495_v36 = vld [vmem:[%s13612_s2 + $0x138] ss:$0 sm:$0xff] }
0x143d   :  { %v3681_v26 = vrot.slane %v3672_v27, 4 }
0x143e   :  { %v3701_v20 = vsel %vm143_vm2, %v3690_v19, 0.0 }
0x143f   :  { %3702 = vadd.xlane.f32.xlu0 %v3701_v20  ;;  %v3682_v13 = vsel %vm1830_vm11, %v3679_v23, %v3681_v26 }
0x1440   :  { %v3691_v31 = vadd.f32 %v3682_v13, %v11735_v48 }
0x1442   :  { %v3704_v35 = vsel %vm143_vm2, %v3691_v31, 0.0 }
0x1443   :  { %3723 = vadd.xlane.f32.xlu0 %v3722_v32  ;;  %3705 = vadd.xlane.f32.xlu1 %v3704_v35 }
0x1447   :  { %3726 = vadd.xlane.f32.xlu1 %v3725_v45 }
0x14c4   :  { %v3700_v48 = vpop.xlane.xlu1 %3699 }
0x14c5   :  { %v3709_v39 = vmul.f32 0.0625, %v3700_v48 }
0x14c7   :  { %v3714_v41 = vsub.f32 %v3689_v0, %v3709_v39 }
0x14c8   :  { %v3703_v9 = vpop.xlane.xlu0 %3702 }
0x14c9   :  { %v3710_v43 = vmul.f32 0.0625, %v3703_v9  ;;  %v3719_v51 = vmul.f32 %v3714_v41, %v3714_v41 }
0x14cb   :  { %v3715_v29 = vsub.f32 %v3690_v19, %v3710_v43  ;;  %v3728_v52 = vsel %vm143_vm2, %v3719_v51, 0.0 }
0x14cc   :  { %3729 = vadd.xlane.f32.xlu0 %v3728_v52  ;;  %v3724_v54 = vpop.xlane.xlu0 %3723  ;;  %v3706_v46 = vpop.xlane.xlu1 %3705 }
0x14cd   :  { %v3737_v55 = vmul.f32 0.0625, %v3724_v54  ;;  %v3711_v30 = vmul.f32 0.0625, %v3706_v46  ;;  %v3720_v44 = vmul.f32 %v3715_v29, %v3715_v29 }
0x14cf   :  { %v3742_v56 = vadd.f32 1e-05, %v3737_v55  ;;  %v3716_v57 = vsub.f32 %v3691_v31, %v3711_v30  ;;  %v3731_v18 = vsel %vm143_vm2, %v3720_v44, 0.0 }
0x14d0   :  { %3732 = vadd.xlane.f32.xlu1 %v3731_v18  ;;  %v3727_v60 = vpop.xlane.xlu1 %3726 }
0x14d1   :  { %11150 = vrsqrt.f32 %v3742_v56  ;;  %v3738_v11 = vmul.f32 0.0625, %v3727_v60  ;;  %v3721_v61 = vmul.f32 %v3716_v57, %v3716_v57 }
0x14d3   :  { %v3743_v3 = vadd.f32 1e-05, %v3738_v11  ;;  %v3734_v53 = vsel %vm143_vm2, %v3721_v61, 0.0 }
0x14d4   :  { %3735 = vadd.xlane.f32.xlu0 %v3734_v53 }
0x14d5   :  { %11152 = vrsqrt.f32 %v3743_v3  ;;  %v9501_v3 = vld [vmem:[%s13612_s2 + $0x150] ss:$0 sm:$0xff] }
0x14de   :  { %v11151_v1 = vpop.eup %11150 }
0x14df   :  { %v3752_v49 = vmul.f32 %v11151_v1, %v3712_v24 }
0x14e1   :  { %v3761_v5 = vmul.f32 %v9493_v58, %v3752_v49 }
0x14e2   :  { %v11153_v7 = vpop.eup %11152 }
0x14e3   :  { %v12181_v15 = vadd.f32 %v9494_v4, %v3761_v5  ;;  %v3753_v10 = vmul.f32 %v11153_v7, %v3713_v28 }
0x14e5   :  { %10417 = vmatmul.mubr.msk.f32.vlgmr.msra.gmra.mxu0 %vm143_vm2, %v12181_v15  ;;  %v3762_v17 = vmul.f32 %v9493_v58, %v3753_v10 }
0x14e6   :  { %10419 = vmatprep.mubr.msk.f32.mxu0 %vm11353_vm3, %v11352_v12 }
0x14e7   :  { %v12187_v62 = vadd.f32 %v9494_v4, %v3762_v17 }
0x14e9   :  { %10420 = vmatmul.mubr.msk.f32.gmra.mxu0 %vm143_vm2, %v12187_v62 }
0x14ea   :  { %10422 = vmatprep.mubr.msk.f32.mxu0 %vm11353_vm3, %v11352_v12 }
0x1555   :  { %v3730_v2 = vpop.xlane.xlu0 %3729 }
0x1556   :  { %v3739_v21 = vmul.f32 0.0625, %v3730_v2 }
0x1558   :  { %v3744_v63 = vadd.f32 1e-05, %v3739_v21 }
0x1559   :  { %v3733_v0 = vpop.xlane.xlu1 %3732 }
0x155a   :  { %11154 = vrsqrt.f32 %v3744_v63  ;;  %v3740_v23 = vmul.f32 0.0625, %v3733_v0 }
0x155c   :  { %v3745_v24 = vadd.f32 1e-05, %v3740_v23 }
0x155d   :  { %v3736_v22 = vpop.xlane.xlu0 %3735 }
0x155e   :  { %11156 = vrsqrt.f32 %v3745_v24  ;;  %v3741_v25 = vmul.f32 0.0625, %v3736_v22 }
0x1560   :  { %v3746_v33 = vadd.f32 1e-05, %v3741_v25 }
0x1562   :  { %11158 = vrsqrt.f32 %v3746_v33 }
0x1567   :  { %v11155_v27 = vpop.eup %11154 }
0x1568   :  { %v3754_v34 = vmul.f32 %v11155_v27, %v3714_v41 }
0x156a   :  { %v3763_v42 = vmul.f32 %v9493_v58, %v3754_v34 }
0x156b   :  { %v11157_v19 = vpop.eup %11156 }
0x156c   :  { %v3772_v26 = vadd.f32 %v9494_v4, %v3763_v42  ;;  %v3755_v28 = vmul.f32 %v11157_v19, %v3715_v29 }
0x156e   :  { %10423 = vmatmul.mubr.msk.f32.gmra.mxu0 %vm143_vm2, %v3772_v26  ;;  %v3764_v20 = vmul.f32 %v9493_v58, %v3755_v28 }
0x156f   :  { %v11159_v38 = vpop.eup %11158  ;;  %10425 = vmatprep.mubr.msk.f32.mxu0 %vm11353_vm3, %v11352_v12 }
0x1570   :  { %v3773_v13 = vadd.f32 %v9494_v4, %v3764_v20  ;;  %v3756_v31 = vmul.f32 %v11159_v38, %v3716_v57 }
0x1572   :  { %10426 = vmatmul.mubr.msk.f32.gmra.mxu0 %vm143_vm2, %v3773_v13  ;;  %v3765_v32 = vmul.f32 %v9493_v58, %v3756_v31 }
0x1573   :  { %10428 = vmatprep.mubr.msk.f32.mxu0 %vm11353_vm3, %v11352_v12 }
0x1574   :  { %v3774_v35 = vadd.f32 %v9494_v4, %v3765_v32 }
0x1576   :  { %10429 = vmatmul.mubr.msk.f32.gmra.mxu0 %vm143_vm2, %v3774_v35 }
0x1577   :  { %10456 = vmatprep.mubr.msk.f32.mxu0 %vm11353_vm3, %v11352_v12 }
0x15a5   :  { %v3860_v45 = vpop.f32.mrf.mxu0 }
0x15a6   :  { %v3861_v59 = vadd.f32 %v9495_v36, %v3860_v45 }
0x15a7   :  { %v10418_v37 = vpop.f32.mrf.mxu0 }
0x15a8   :  { %v3884_v48 = vmax.f32 %v3861_v59, 0.0 }
0x15a9   :  { %v3865_v39 = vpop.f32.mrf.mxu0 }
0x15aa   :  { %v3866_v41 = vadd.f32 %v9495_v36, %v3865_v39  ;;  %10436 = vmatmul.mubr.msk.f32.vlgmr.msra.gmra.mxu1 %vm143_vm2, %v3884_v48 }
0x15ab   :  { %v10421_v9 = vpop.f32.mrf.mxu0  ;;  %10438 = vmatprep.mubr.msk.f32.mxu1 %vm11353_vm3, %v11352_v12 }
0x15ac   :  { %v3885_v43 = vmax.f32 %v3866_v41, 0.0 }
0x15ae   :  { %10439 = vmatmul.mubr.msk.f32.gmra.mxu1 %vm143_vm2, %v3885_v43 }
0x15af   :  { %10441 = vmatprep.mubr.msk.f32.mxu1 %vm11353_vm3, %v11352_v12 }
0x162e   :  { %v3870_v51 = vpop.f32.mrf.mxu0 }
0x162f   :  { %v3871_v29 = vadd.f32 %v9495_v36, %v3870_v51 }
0x1630   :  { %v10424_v52 = vpop.f32.mrf.mxu0 }
0x1631   :  { %v3886_v54 = vmax.f32 %v3871_v29, 0.0 }
0x1632   :  { %v3875_v46 = vpop.f32.mrf.mxu0 }
0x1633   :  { %v3876_v55 = vadd.f32 %v9495_v36, %v3875_v46  ;;  %10442 = vmatmul.mubr.msk.f32.gmra.mxu1 %vm143_vm2, %v3886_v54 }
0x1634   :  { %v10427_v30 = vpop.f32.mrf.mxu0  ;;  %10444 = vmatprep.mubr.msk.f32.mxu1 %vm11353_vm3, %v11352_v12 }
0x1635   :  { %v3887_v44 = vmax.f32 %v3876_v55, 0.0  ;;  %v4087_v55 = vld [vmem:[%s13612_s2 + $0x180] sm:$0x3f] }
0x1636   :  { %v3880_v56 = vpop.f32.mrf.mxu0 }
0x1637   :  { %v3881_v57 = vadd.f32 %v9495_v36, %v3880_v56  ;;  %10445 = vmatmul.mubr.msk.f32.gmra.mxu1 %vm143_vm2, %v3887_v44 }
0x1638   :  { %v10430_v18 = vpop.f32.mrf.mxu0  ;;  %10447 = vmatprep.mubr.msk.f32.mxu1 %vm11353_vm3, %v11352_v12 }
0x1639   :  { %v3888_v60 = vmax.f32 %v3881_v57, 0.0 }
0x163b   :  { %10448 = vmatmul.mubr.msk.f32.gmra.mxu1 %vm143_vm2, %v3888_v60 }
0x166a   :  { %v3974_v11 = vpop.f32.mrf.mxu1 }
0x166b   :  { %v3975_v7 = vadd.f32 %v9501_v3, %v3974_v11 }
0x166c   :  { %v10437_v61 = vpop.f32.mrf.mxu1 }
0x166d   :  { %v3998_v2 = vadd.f32 %v3975_v7, %v12181_v15 }
0x166e   :  { %v3979_v53 = vpop.f32.mrf.mxu1 }
0x166f   :  { %v3980_v1 = vadd.f32 %v9501_v3, %v3979_v53 }
0x1670   :  { %v10440_v58 = vpop.f32.mrf.mxu1 }
0x1671   :  { %v3999_v49 = vadd.f32 %v3980_v1, %v12187_v62  ;;  %v4003_v62 = vsel %vm143_vm2, %v3998_v2, 0.0 }
0x1673   :  { %v4006_v4 = vsel %vm143_vm2, %v3999_v49, 0.0 }
0x1674   :  { %4007 = vadd.xlane.f32.xlu0 %v4006_v4 }
0x16f3   :  { %v3984_v5 = vpop.f32.mrf.mxu1 }
0x16f4   :  { %v3985_v10 = vadd.f32 %v9501_v3, %v3984_v5 }
0x16f5   :  { %v10443_v17 = vpop.f32.mrf.mxu1 }
0x16f6   :  { %v4000_v14 = vadd.f32 %v3985_v10, %v3772_v26 }
0x16f7   :  { %v3989_v6 = vpop.f32.mrf.mxu1 }
0x16f8   :  { %v3990_v21 = vadd.f32 %v9501_v3, %v3989_v6  ;;  %v4009_v63 = vsel %vm143_vm2, %v4000_v14, 0.0 }
0x16f9   :  { %4010 = vadd.xlane.f32.xlu1 %v4009_v63  ;;  %v10446_v0 = vpop.f32.mrf.mxu1 }
0x16fa   :  { %v4001_v24 = vadd.f32 %v3990_v21, %v3773_v13  ;;  %v9508_v0 = vld [vmem:[%s13612_s2 + $0x170] ss:$0 sm:$0xff] }
0x16fb   :  { %v3994_v23 = vpop.f32.mrf.mxu1 }
0x16fc   :  { %v3995_v22 = vadd.f32 %v9501_v3, %v3994_v23  ;;  %v4012_v19 = vsel %vm143_vm2, %v4001_v24, 0.0 }
0x16fd   :  { %v4008_v25 = vpop.xlane.xlu0 %4007  ;;  %4004 = vadd.xlane.f32.xlu1 %v4003_v62  ;;  %v10449_v33 = vpop.f32.mrf.mxu1 }
0x16fe   :  { %v4002_v27 = vadd.f32 %v3995_v22, %v3774_v35  ;;  %v4019_v34 = vmul.f32 0.0625, %v4008_v25 }
0x1700   :  { %v4024_v42 = vsub.f32 %v3999_v49, %v4019_v34  ;;  %v4015_v15 = vsel %vm143_vm2, %v4002_v27, 0.0  ;;  %v4086_v34 = vld [vmem:[%s13612_s2 + $0x178] sm:$0x3f] }
0x1701   :  { %4013 = vadd.xlane.f32.xlu1 %v4012_v19  ;;  %4016 = vadd.xlane.f32.xlu0 %v4015_v15 }
0x1702   :  { %v4029_v26 = vmul.f32 %v4024_v42, %v4024_v42 }
0x1704   :  { %v4036_v28 = vsel %vm143_vm2, %v4029_v26, 0.0 }
0x1705   :  { %4037 = vadd.xlane.f32.xlu1 %v4036_v28 }
0x1782   :  { %v4011_v20 = vpop.xlane.xlu1 %4010 }
0x1783   :  { %v4020_v38 = vmul.f32 0.0625, %v4011_v20 }
0x1785   :  { %v4025_v13 = vsub.f32 %v4000_v14, %v4020_v38  ;;  %v9507_v14 = vld [vmem:[%s13612_s2 + $0x168] ss:$0 sm:$0xff] }
0x1786   :  { %v4005_v31 = vpop.xlane.xlu1 %4004 }
0x1787   :  { %v4018_v32 = vmul.f32 0.0625, %v4005_v31  ;;  %v4030_v36 = vmul.f32 %v4025_v13, %v4025_v13 }
0x1789   :  { %v4023_v45 = vsub.f32 %v3998_v2, %v4018_v32  ;;  %v4039_v35 = vsel %vm143_vm2, %v4030_v36, 0.0 }
0x178a   :  { %v4014_v59 = vpop.xlane.xlu1 %4013  ;;  %4040 = vadd.xlane.f32.xlu0 %v4039_v35  ;;  %v4017_v37 = vpop.xlane.xlu0 %4016  ;;  %v11346_v35 = vld [vmem:[%s13613_s0] sm:$0xff] }
0x178b   :  { %v4021_v48 = vmul.f32 0.0625, %v4014_v59  ;;  %v4022_v39 = vmul.f32 0.0625, %v4017_v37  ;;  %v4028_v41 = vmul.f32 %v4023_v45, %v4023_v45  ;;  %v4089_v59 = vld [vmem:[%s13612_s2 + $0x190] sm:$0xff]  ;;  %v4088_v37 = vld [vmem:[%s13612_s2 + $0x188] sm:$0xff] }
0x178c   :  { %10468 = vmatprep.subr.mxu1 %v4089_v59 }
0x178d   :  { %v4026_v9 = vsub.f32 %v4001_v24, %v4021_v48  ;;  %v4027_v43 = vsub.f32 %v4002_v27, %v4022_v39  ;;  %v4033_v51 = vsel %vm143_vm2, %v4028_v41, 0.0  ;;  %10469 = vmatpush3.msra.mxu1 %v4089_v59 }
0x178e   :  { %4034 = vadd.xlane.f32.xlu0 %v4033_v51  ;;  %v4038_v30 = vpop.xlane.xlu1 %4037  ;;  %10470 = vmatprep.subr.mxu1 %v4088_v37 }
0x178f   :  { %v4031_v29 = vmul.f32 %v4026_v9, %v4026_v9  ;;  %v4032_v52 = vmul.f32 %v4027_v43, %v4027_v43  ;;  %v4049_v44 = vmul.f32 0.0625, %v4038_v30  ;;  %10471 = vmatpush3.msra.mxu1 %v4088_v37  ;;  %v12302_v30 = vld [vmem:[%s13612_s2 + $0x1a8] sm:$0xff] }
0x1790   :  { %10492 = vmatprep.subr.mxu1 %v11352_v12 }
0x1791   :  { %v4042_v54 = vsel %vm143_vm2, %v4031_v29, 0.0  ;;  %v4045_v46 = vsel %vm143_vm2, %v4032_v52, 0.0  ;;  %v4054_v56 = vadd.f32 1e-05, %v4049_v44 }
0x1792   :  { %4043 = vadd.xlane.f32.xlu0 %v4042_v54  ;;  %4046 = vadd.xlane.f32.xlu1 %v4045_v46  ;;  %v4479_v46 = vld [vmem:[%s13612_s2 + $0x1c8] sm:$0xff] }
0x1793   :  { %11160 = vrsqrt.f32 %v4054_v56 }
0x17a0   :  { %v11161_v7 = vpop.eup %11160 }
0x17a1   :  { %v4064_v10 = vmul.f32 %v11161_v7, %v4024_v42 }
0x17a3   :  { %4093 = vperm.xlu1 %11049, %v4087_v55   ;;  %v4073_v21 = vmul.f32 %v9507_v14, %v4064_v10  ;;  %v4478_v55 = vld [vmem:[%s13612_s2 + $0x1c0] sm:$0xff] }
0x17a5   :  { %v4082_v22 = vadd.f32 %v9508_v0, %v4073_v21 }
0x1813   :  { %v4041_v57 = vpop.xlane.xlu0 %4040 }
0x1814   :  { %v4050_v18 = vmul.f32 0.0625, %v4041_v57 }
0x1816   :  { %v4055_v60 = vadd.f32 1e-05, %v4050_v18  ;;  %v4482_v18 = vld [vmem:[%s13612_s2 + $0x1e0] sm:$0xff] }
0x1817   :  { %v4035_v11 = vpop.xlane.xlu0 %4034 }
0x1818   :  { %11162 = vrsqrt.f32 %v4055_v60  ;;  %v4048_v61 = vmul.f32 0.0625, %v4035_v11  ;;  %v4481_v60 = vld [vmem:[%s13612_s2 + $0x1d8] sm:$0xff] }
0x1819   :  { %v9513_v11 = vld [vmem:[%s13612_s2 + $0x198] ss:$0 sm:$0xff] }
0x181a   :  { %v4053_v3 = vadd.f32 1e-05, %v4048_v61 }
0x181b   :  { %v4047_v53 = vpop.xlane.xlu1 %4046  ;;  %v4044_v1 = vpop.xlane.xlu0 %4043 }
0x181c   :  { %11164 = vrsqrt.f32 %v4053_v3  ;;  %v4052_v58 = vmul.f32 0.0625, %v4047_v53  ;;  %v4051_v49 = vmul.f32 0.0625, %v4044_v1 }
0x181e   :  { %v4057_v4 = vadd.f32 1e-05, %v4052_v58  ;;  %v4056_v5 = vadd.f32 1e-05, %v4051_v49  ;;  %v17_v58 = vld [vmem:[%s13614_s1 + $0x8] sm:$0xff] }
0x181f   :  { %v4094_v41 = vpop.permute.xlu1 %4093 }
0x1820   :  { %11166 = vrsqrt.f32 %v4057_v4 }
0x1821   :  { %11168 = vrsqrt.f32 %v4056_v5  ;;  %v11347_v5 = vld [vmem:[%s13614_s1] sm:$0xff] }
0x1825   :  { %v11163_v17 = vpop.eup %11162 }
0x1826   :  { %v4065_v6 = vmul.f32 %v11163_v17, %v4025_v13 }
0x1828   :  { %v4074_v2 = vmul.f32 %v9507_v14, %v4065_v6  ;;  %v4354_v6 = vsel %vm1830_vm11, %v17_v58, %v11667_v8 }
0x1829   :  { %v11165_v63 = vpop.eup %11164 }
0x182a   :  { %v4083_v23 = vadd.f32 %v9508_v0, %v4074_v2  ;;  %v4063_v24 = vmul.f32 %v11165_v63, %v4023_v45  ;;  %v4360_v45 = vld [vmem:[%s13612_s2 + $0x1a0] sm:$0x7f] }
0x182b   :  { %v20_v2 = vld [vmem:[%s13614_s1 + $0x20] sm:$0xff] }
0x182c   :  { %10451 = vmatpush3.msk.msra.mxu0 %vm1830_vm11, %v4083_v23  ;;  %v4072_v62 = vmul.f32 %v9507_v14, %v4063_v24  ;;  %v4174_v32 = vrot.slane %v4083_v23, 4  ;;  %v4350_v23 = vrot.slane %v20_v2, 4 }
0x182d   :  { %v11167_v25 = vpop.eup %11166  ;;  %10452 = vmatprep.subr.mxu0 %v11352_v12 }
0x182e   :  { %v11169_v33 = vpop.eup %11168  ;;  %10453 = vmatpush3.msra.mxu0 %v4082_v22  ;;  %v4081_v27 = vadd.f32 %v9508_v0, %v4072_v62  ;;  %v4067_v42 = vmul.f32 %v11167_v25, %v4027_v43  ;;  %v12368_v25 = vld [vmem:[%s13612_s2 + $0x1d0] ss:$0 sm:$0xff] }
0x182f   :  { %10454 = vmatprep.subr.mxu0 %v11352_v12  ;;  %v4066_v19 = vmul.f32 %v11169_v33, %v4026_v9 }
0x1830   :  { %10455 = vmatpush3.msra.mxu0 %v4081_v27  ;;  %v4076_v15 = vmul.f32 %v9507_v14, %v4067_v42 }
0x1831   :  { %10457 = vmatmul.mubr.msk.f32.vlgmr.msra.gmra.mxu0 %vm2380_vm14, %v4086_v34  ;;  %10459 = vmatprep.subr.mxu0 %v11352_v12  ;;  %v4075_v26 = vmul.f32 %v9507_v14, %v4066_v19  ;;  %v4364_v19 = vrot.slane %v12302_v30, 4 }
0x1832   :  { %v4085_v28 = vadd.f32 %v9508_v0, %v4076_v15  ;;  %10465 = vmatprep.mubr.msk.f32.mxu0 %vm11353_vm3, %v11352_v12  ;;  %v4358_v15 = vld [vmem:[%s13612_s2 + $0x1b0] sm:$0xff] }
0x1833   :  { %v4084_v20 = vadd.f32 %v9508_v0, %v4075_v26  ;;  %v4359_v26 = vld [vmem:[%s13612_s2 + $0x1b8] sm:$0xf] }
0x1834   :  { %v4177_v38 = vrot.slane %v4085_v28, 4 }
0x1835   :  { %v4175_v13 = vrot.slane %v4084_v20, 4 }
0x1836   :  { %10460 = vmatpush3.msk.msra.mxu0 %vm1830_vm11, %v4177_v38 }
0x1837   :  { %10461 = vmatprep.subr.mxu0 %v11352_v12  ;;  %v4178_v31 = vsel %vm1830_vm11, %v4175_v13, %v4177_v38  ;;  %v4176_v36 = vsel %vm1830_vm11, %v4174_v32, %v4175_v13  ;;  %v4365_v38 = vrot.slane %v4358_v15, 4 }
0x1838   :  { %10462 = vmatpush3.msra.mxu0 %v4178_v31  ;;  %v4372_v31 = vsel %vm1830_vm11, %v4359_v26, %v4364_v19 }
0x1839   :  { %10463 = vmatprep.subr.mxu0 %v11352_v12  ;;  %v4366_v59 = vsel %vm1830_vm11, %v4364_v19, %v4365_v38 }
0x183a   :  { %10464 = vmatpush3.msra.mxu0 %v4176_v36 }
0x183b   :  { %10466 = vmatmul.mubr.msk.f32.vlgmr.msra.gmra.mxu0 %vm2380_vm14, %v4086_v34  ;;  %10475 = vmatprep.subr.mxu0 %v11352_v12 }
0x183c   :  { %10477 = vmatprep.mubr.msk.f32.mxu0 %vm11353_vm3, %v11352_v12  ;;  %10476 = vmatpush3.msk.msra.mxu0 %vm42_vm0, %v4360_v45  ;;  %v4367_v45 = vrot.slane %v4359_v26, 4 }
0x183d   :  { %10511 = vmatprep.subr.mxu0 %v11352_v12 }
0x183f   :  { %10478 = vmatmul.mubr.msk.f32.vlgmr.msra.gmra.mxu0 %vm35_vm1, %v11346_v35 }
0x1840   :  { %10480 = vmatprep.mubr.msk.f32.mxu0 %vm11353_vm3, %v11352_v12  ;;  %10512 = vmatpush3.msra.mxu0 %v4482_v18 }
0x1841   :  { %10513 = vmatprep.subr.mxu0 %v11352_v12 }
0x1842   :  { %10514 = vmatpush3.msra.mxu0 %v4481_v60 }
0x1843   :  { %10560 = vmatprep.subr.mxu0 %v11352_v12 }
0x18f1   :  { %v4168_v48 = vpop.f32.mrf.mxu0 }
0x18f2   :  { %v4169_v29 = vadd.f32 %v4168_v48, %v4094_v41 }
0x18f3   :  { %v10458_v39 = vpop.f32.mrf.mxu0 }
0x18fb   :  { %v4249_v9 = vpop.f32.mrf.mxu0 }
0x18fc   :  { %v4250_v43 = vadd.f32 %v4249_v9, %v4094_v41  ;;  %v4368_v41 = vsel %vm1830_vm11, %v4365_v38, %v4367_v45 }
0x18fd   :  { %v10467_v51 = vpop.f32.mrf.mxu0 }
0x18fe   :  { %v4254_v52 = vrot.slane %v4250_v43, 2 }
0x18ff   :  { %v4454_v44 = vpop.f32.mrf.mxu0 }
0x1900   :  { %v4256_v54 = vsel %vm1728_vm10, %v4169_v29, %v4254_v52  ;;  %v12305_v56 = vadd.f32 %v4454_v44, %v12302_v30 }
0x1901   :  { %10472 = vmatprep.mubr.msk.f32.mxu1 %vm143_vm2, %v4256_v54  ;;  %v10479_v57 = vpop.f32.mrf.mxu0  ;;  %v12414_v54 = vld [vmem:[%s13612_s2 + $0x1e8] ss:$0 sm:$0xff] }
0x1902   :  { %10473 = vmatmul.mubr.msk.f32.vlgmr.msra.gmra.mxu1 %vm143_vm2, %v4254_v52 }
0x1903   :  { %10493 = vmatpush3.msra.mxu1 %v4479_v46  ;;  %10496 = vmatprep.mubr.msk.f32.mxu1 %vm11353_vm3, %v11352_v12 }
0x1904   :  { %10494 = vmatprep.subr.mxu1 %v11352_v12 }
0x1905   :  { %10495 = vmatpush3.msra.mxu1 %v4478_v55 }
0x1906   :  { %10530 = vmatprep.subr.mxu1 %v11352_v12  ;;  %10497 = vmatmul.mubr.msk.f32.vlgmr.msra.gmra.mxu1 %vm143_vm2, %v12305_v56 }
0x1907   :  { %10499 = vmatprep.mubr.msk.f32.mxu1 %vm11353_vm3, %v11352_v12 }
0x19c2   :  { %v10474_v61 = vpop.f32.mrf.mxu1 }
0x19c3   :  { %v4338_v3 = vadd.f32 %v10474_v61, %v9513_v11 }
0x19c4   :  { %v4332_v53 = vpop.f32.mrf.mxu1 }
0x19c5   :  { %v4333_v1 = vadd.f32 %v9513_v11, %v4332_v53  ;;  %v9357_v49 = vrot.slane %v4338_v3, 4  ;;  %v4344_v21 = vrot.slane %v4338_v3, 2 }
0x19c6   :  { %v4581_v33 = vpop.f32.mrf.mxu1 }
0x19c7   :  { %v9356_v4 = vrot.slane %v4333_v1, 4  ;;  %v4353_v7 = vsel %vm1728_vm10, %v4333_v1, %v11347_v5  ;;  %v4343_v10 = vrot.slane %v4333_v1, 2  ;;  %v12371_v27 = vadd.f32 %v12368_v25, %v4581_v33 }
0x19c8   :  { %10481 = vmatmul.mubr.msk.f32.gmra.mxu0 %vm35_vm1, %v4353_v7  ;;  %v10498_v34 = vpop.f32.mrf.mxu1 }
0x19c9   :  { %v9358_v17 = vsel %vm1830_vm11, %v9356_v4, %v9357_v49  ;;  %v9368_v14 = vsel %vm1830_vm11, %v11669_v16, %v9356_v4  ;;  %10483 = vmatprep.mubr.msk.f32.mxu0 %vm11353_vm3, %v11352_v12  ;;  %v11348_v16 = vld [vmem:[%s13614_s1 + $0x18] sm:$0xff]  ;;  %v4345_v0 = vsel %vm1728_vm10, %v4343_v10, %v4344_v21  ;;  %v4605_v42 = vmax.f32 %v12371_v27, 0.0 }
0x19ca   :  { %9371 = vst.msk [vmem:[%s13615_s3 + $0x8] sm:$0xff] %vm35_vm1, %v9368_v14  ;;  %9372 = vst.msk [vmem:[%s13615_s3 + $0x10] sm:$0xff] %vm35_vm1, %v9358_v17  ;;  %v4349_v63 = vrot.slane %v11348_v16, 4  ;;  %v4355_v24 = vsel %vm1830_vm11, %v11667_v8, %v4345_v0 }
0x19cc   :  { %10484 = vmatmul.mubr.msk.f32.gmra.mxu0 %vm35_vm1, %v4354_v6  ;;  %v4351_v22 = vsel %vm1830_vm11, %v4349_v63, %v4350_v23 }
0x19cd   :  { %10486 = vmatprep.mubr.msk.f32.mxu0 %vm11353_vm3, %v11352_v12  ;;  %v4356_v62 = vsel %vm1833_vm12, %v4344_v21, %v4351_v22 }
0x19d0   :  { %10487 = vmatmul.mubr.msk.f32.gmra.mxu0 %vm35_vm1, %v4355_v24 }
0x19d1   :  { %10489 = vmatprep.mubr.msk.f32.mxu0 %vm11353_vm3, %v11352_v12 }
0x19d4   :  { %10490 = vmatmul.mubr.msk.f32.gmra.mxu0 %vm35_vm1, %v4356_v62 }
0x19d5   :  { %10515 = vmatprep.mubr.msk.f32.mxu0 %vm11353_vm3, %v11352_v12 }
0x19d8   :  { %10516 = vmatmul.mubr.msk.f32.vlgmr.msra.gmra.mxu0 %vm143_vm2, %v4605_v42 }
0x19d9   :  { %10518 = vmatprep.mubr.msk.f32.mxu0 %vm11353_vm3, %v11352_v12 }
0x1a88   :  { %v4459_v28 = vpop.f32.mrf.mxu0 }
0x1a89   :  { %v12384_v20 = vadd.f32 %v4459_v28, %v4358_v15 }
0x1a8a   :  { %v10482_v13 = vpop.f32.mrf.mxu0 }
0x1a8b   :  { %10500 = vmatmul.mubr.msk.f32.gmra.mxu1 %vm143_vm2, %v12384_v20 }
0x1a8c   :  { %v4464_v32 = vpop.f32.mrf.mxu0  ;;  %10502 = vmatprep.mubr.msk.f32.mxu1 %vm11353_vm3, %v11352_v12 }
0x1a8d   :  { %v12391_v36 = vadd.f32 %v4464_v32, %v4372_v31 }
0x1a8e   :  { %v10485_v35 = vpop.f32.mrf.mxu0 }
0x1a8f   :  { %10503 = vmatmul.mubr.msk.f32.gmra.mxu1 %vm143_vm2, %v12391_v36 }
0x1a90   :  { %v4469_v37 = vpop.f32.mrf.mxu0  ;;  %10505 = vmatprep.mubr.msk.f32.mxu1 %vm11353_vm3, %v11352_v12 }
0x1a91   :  { %v12398_v48 = vadd.f32 %v4469_v37, %v4366_v59 }
0x1a92   :  { %v10488_v39 = vpop.f32.mrf.mxu0 }
0x1a93   :  { %10506 = vmatmul.mubr.msk.f32.gmra.mxu1 %vm143_vm2, %v12398_v48 }
0x1a94   :  { %v4474_v9 = vpop.f32.mrf.mxu0  ;;  %10508 = vmatprep.mubr.msk.f32.mxu1 %vm11353_vm3, %v11352_v12 }
0x1a95   :  { %v12405_v43 = vadd.f32 %v4474_v9, %v4368_v41 }
0x1a96   :  { %v10491_v51 = vpop.f32.mrf.mxu0 }
0x1a97   :  { %10509 = vmatmul.mubr.msk.f32.gmra.mxu1 %vm143_vm2, %v12405_v43 }
0x1a98   :  { %10536 = vmatprep.mubr.msk.f32.mxu1 %vm11353_vm3, %v11352_v12  ;;  %v4695_v29 = vpop.f32.mrf.mxu0 }
0x1a99   :  { %v4696_v46 = vadd.f32 %v12414_v54, %v4695_v29 }
0x1a9a   :  { %v10517_v52 = vpop.f32.mrf.mxu0 }
0x1a9b   :  { %v4719_v55 = vsub.f32 0.0, %v4696_v46 }
0x1a9d   :  { %v4724_v30 = vmul.f32 1.442695, %v4719_v55 }
0x1a9f   :  { %11170 = vpow2.f32 %v4724_v30 }
0x1aac   :  { %v11171_v44 = vpop.eup %11170 }
0x1aad   :  { %v4734_v57 = vadd.f32 1.0, %v11171_v44 }
0x1aaf   :  { %11172 = vrcp.f32 %v4734_v57 }
0x1abc   :  { %v11173_v2 = vpop.eup %11172 }
0x1abd   :  { %v12463_v21 = vmul.f32 20.0, %v11173_v2 }
0x1abf   :  { %v4859_v16 = vadd.f32 2.0, %v12463_v21 }
0x1b4b   :  { %v4586_v18 = vpop.f32.mrf.mxu1 }
0x1b4c   :  { %v12418_v60 = vadd.f32 %v12368_v25, %v4586_v18 }
0x1b4d   :  { %v10501_v11 = vpop.f32.mrf.mxu1 }
0x1b4e   :  { %4760 = vrot.lane.b32.xlu1 %v12418_v60, %s11355_s4  ;;  %v4606_v61 = vmax.f32 %v12418_v60, 0.0 }
0x1b4f   :  { %v4591_v3 = vpop.f32.mrf.mxu1 }
0x1b50   :  { %v12424_v53 = vadd.f32 %v12368_v25, %v4591_v3  ;;  %10519 = vmatmul.mubr.msk.f32.gmra.mxu0 %vm143_vm2, %v4606_v61  ;;  %v5125_v61 = vadd.f32 4.0, %v12463_v21 }
0x1b51   :  { %v10504_v1 = vpop.f32.mrf.mxu1  ;;  %10521 = vmatprep.mubr.msk.f32.mxu0 %vm11353_vm3, %v11352_v12 }
0x1b52   :  { %4758 = vrot.lane.b32.xlu1 %v12371_v27, %s11355_s4  ;;  %4762 = vrot.lane.b32.xlu0 %v12424_v53, %s11355_s4  ;;  %v4607_v58 = vmax.f32 %v12424_v53, 0.0 }
0x1b53   :  { %v4596_v49 = vpop.f32.mrf.mxu1 }
0x1b54   :  { %v12435_v4 = vadd.f32 %v12368_v25, %v4596_v49  ;;  %10522 = vmatmul.mubr.msk.f32.gmra.mxu0 %vm143_vm2, %v4607_v58 }
0x1b55   :  { %v10507_v5 = vpop.f32.mrf.mxu1  ;;  %10524 = vmatprep.mubr.msk.f32.mxu0 %vm11353_vm3, %v11352_v12 }
0x1b56   :  { %v4608_v7 = vmax.f32 %v12435_v4, 0.0  ;;  %5028 = vrot.lane.b32.xlu1 %v12424_v53, %s11354_s30  ;;  %4752 = vrot.lane.b32.xlu0 %v12371_v27, %s11357_s6 }
0x1b57   :  { %v4601_v10 = vpop.f32.mrf.mxu1 }
0x1b58   :  { %v12446_v17 = vadd.f32 %v12368_v25, %v4601_v10  ;;  %10525 = vmatmul.mubr.msk.f32.gmra.mxu0 %vm143_vm2, %v4608_v7 }
0x1b59   :  { %v10510_v14 = vpop.f32.mrf.mxu1  ;;  %10527 = vmatprep.mubr.msk.f32.mxu0 %vm11353_vm3, %v11352_v12 }
0x1b5a   :  { %v4609_v6 = vmax.f32 %v12446_v17, 0.0  ;;  %5026 = vrot.lane.b32.xlu1 %v12418_v60, %s11354_s30  ;;  %4754 = vrot.lane.b32.xlu0 %v12418_v60, %s11357_s6 }
0x1b5c   :  { %10528 = vmatmul.mubr.msk.f32.gmra.mxu0 %vm143_vm2, %v4609_v6 }
0x1b5d   :  { %10566 = vmatprep.mubr.msk.f32.mxu0 %vm11353_vm3, %v11352_v12 }
0x1b5e   :  { %5024 = vrot.lane.b32.xlu1 %v12371_v27, %s11354_s30  ;;  %4756 = vrot.lane.b32.xlu0 %v12424_v53, %s11357_s6 }
0x1b62   :  { %5020 = vrot.lane.b32.xlu1 %v12418_v60, %s11356_s5  ;;  %5018 = vrot.lane.b32.xlu0 %v12371_v27, %s11356_s5 }
0x1b66   :  { %5022 = vrot.lane.b32.xlu0 %v12424_v53, %s11356_s5  ;;  %4864 = vperm.xlu1 %11049, %v4859_v16  }
0x1bc0   :  { %v4761_v63 = vpop.permute.xlu1 %4760 }
0x1bc4   :  { %v4759_v0 = vpop.permute.xlu1 %4758  ;;  %v4763_v23 = vpop.permute.xlu0 %4762 }
0x1bc5   :  { %10531 = vmatpush3.xpose.msk.msra.mxu1 %vm329_vm4, %v4763_v23 }
0x1bc6   :  { %10532 = vmatprep.subr.mxu1 %v11352_v12 }
0x1bc8   :  { %v5029_v24 = vpop.permute.xlu1 %5028  ;;  %v4753_v22 = vpop.permute.xlu0 %4752 }
0x1bc9   :  { %10533 = vmatpush3.xpose.msk.msra.mxu1 %vm329_vm4, %v4761_v63  ;;  %10561 = vmatpush3.xpose.msk.msra.mxu0 %vm329_vm4, %v5029_v24 }
0x1bca   :  { %10562 = vmatprep.subr.mxu0 %v11352_v12  ;;  %10534 = vmatprep.subr.mxu1 %v11352_v12 }
0x1bcc   :  { %v5027_v62 = vpop.permute.xlu1 %5026  ;;  %v4755_v25 = vpop.permute.xlu0 %4754 }
0x1bcd   :  { %10535 = vmatpush3.xpose.msk.msra.mxu1 %vm329_vm4, %v4759_v0  ;;  %10563 = vmatpush3.xpose.msk.msra.mxu0 %vm329_vm4, %v5027_v62 }
0x1bce   :  { %10564 = vmatprep.subr.mxu0 %v11352_v12  ;;  %10545 = vmatprep.subr.mxu1 %v11352_v12 }
0x1bd0   :  { %v5025_v33 = vpop.permute.xlu1 %5024  ;;  %v4757_v34 = vpop.permute.xlu0 %4756  ;;  %10537 = vmatmul.mubr.msk.f32.vlgmr.msra.gmra.mxu1 %vm329_vm4, %v4753_v22 }
0x1bd1   :  { %10565 = vmatpush3.xpose.msk.msra.mxu0 %vm329_vm4, %v5025_v33  ;;  %10539 = vmatprep.mubr.msk.f32.mxu1 %vm11353_vm3, %v11352_v12 }
0x1bd2   :  { %10590 = vmatprep.subr.mxu0 %v11352_v12 }
0x1bd4   :  { %v5019_v42 = vpop.permute.xlu0 %5018  ;;  %10540 = vmatmul.mubr.msk.f32.gmra.mxu1 %vm329_vm4, %v4755_v25  ;;  %v5021_v19 = vpop.permute.xlu1 %5020 }
0x1bd5   :  { %10567 = vmatmul.mubr.msk.f32.vlgmr.msra.gmra.mxu0 %vm329_vm4, %v5019_v42  ;;  %10542 = vmatprep.mubr.msk.f32.mxu1 %vm11353_vm3, %v11352_v12 }
0x1bd6   :  { %10569 = vmatprep.mubr.msk.f32.mxu0 %vm11353_vm3, %v11352_v12 }
0x1bd8   :  { %10543 = vmatmul.mubr.msk.f32.gmra.mxu1 %vm329_vm4, %v4757_v34  ;;  %v5023_v15 = vpop.permute.xlu0 %5022 }
0x1bd9   :  { %10570 = vmatmul.mubr.msk.f32.gmra.mxu0 %vm329_vm4, %v5021_v19  ;;  %10551 = vmatprep.mubr.msk.f32.mxu1 %vm11353_vm3, %v11352_v12 }
0x1bda   :  { %10572 = vmatprep.mubr.msk.f32.mxu0 %vm11353_vm3, %v11352_v12 }
0x1bdd   :  { %10573 = vmatmul.mubr.msk.f32.gmra.mxu0 %vm329_vm4, %v5023_v15 }
0x1bde   :  { %10592 = vmatprep.mubr.msk.f32.mxu0 %vm11353_vm3, %v11352_v12 }
0x1be1   :  { %v4865_v49 = vpop.permute.xlu1 %4864 }
0x1be2   :  { %vm4877_vm5 = vcmp.gt.f32.partialorder %v11469_v50, %v4865_v49 }
0x1c10   :  { %v4700_v26 = vpop.f32.mrf.mxu0 }
0x1c11   :  { %v4701_v28 = vadd.f32 %v12414_v54, %v4700_v26 }
0x1c12   :  { %v10520_v38 = vpop.f32.mrf.mxu0 }
0x1c13   :  { %v4720_v13 = vsub.f32 0.0, %v4701_v28 }
0x1c14   :  { %v4705_v31 = vpop.f32.mrf.mxu0 }
0x1c15   :  { %v4726_v32 = vmul.f32 1.442695, %v4720_v13  ;;  %v4706_v45 = vadd.f32 %v12414_v54, %v4705_v31 }
0x1c16   :  { %v10523_v35 = vpop.f32.mrf.mxu0 }
0x1c17   :  { %11174 = vpow2.f32 %v4726_v32  ;;  %v4721_v59 = vsub.f32 0.0, %v4706_v45 }
0x1c18   :  { %v12504_v37 = vpop.f32.mrf.mxu0 }
0x1c19   :  { %v4728_v39 = vmul.f32 1.442695, %v4721_v59 }
0x1c1a   :  { %v10526_v41 = vpop.f32.mrf.mxu0 }
0x1c1b   :  { %11176 = vpow2.f32 %v4728_v39 }
0x1c1c   :  { %v12506_v9 = vpop.f32.mrf.mxu0 }
0x1c1e   :  { %v10529_v51 = vpop.f32.mrf.mxu0 }
0x1c24   :  { %v11175_v29 = vpop.eup %11174 }
0x1c25   :  { %v4735_v52 = vadd.f32 1.0, %v11175_v29 }
0x1c27   :  { %11178 = vrcp.f32 %v4735_v52 }
0x1c28   :  { %v11177_v46 = vpop.eup %11176 }
0x1c29   :  { %v4736_v55 = vadd.f32 1.0, %v11177_v46 }
0x1c2b   :  { %11180 = vrcp.f32 %v4736_v55 }
0x1c34   :  { %v11179_v30 = vpop.eup %11178 }
0x1c35   :  { %v4745_v44 = vmul.f32 20.0, %v11179_v30 }
0x1c37   :  { %v4860_v57 = vadd.f32 2.0, %v4745_v44  ;;  %v5126_v58 = vadd.f32 4.0, %v4745_v44 }
0x1c38   :  { %v11181_v18 = vpop.eup %11180 }
0x1c39   :  { %4869 = vperm.xlu0 %11048, %v4860_v57   ;;  %v4746_v11 = vmul.f32 20.0, %v11181_v18 }
0x1c3b   :  { %v4861_v3 = vadd.f32 2.0, %v4746_v11  ;;  %v5127_v1 = vadd.f32 4.0, %v4746_v11 }
0x1c3d   :  { %5130 = vperm.xlu0 %11048, %v5125_v61   ;;  %4874 = vperm.xlu1 %11049, %v4861_v3  }
0x1c41   :  { %5140 = vperm.xlu0 %11048, %v5127_v1   ;;  %5135 = vperm.xlu1 %11049, %v5126_v58   ;;  %v12543_v58 = vrot.slane %v12446_v17, 4 }
0x1c45   :  { %4908 = vrot.lane.b32.xlu0 %v12424_v53, %s11360_s10  ;;  %4906 = vrot.lane.b32.xlu1 %v12418_v60, %s11360_s10 }
0x1c49   :  { %4904 = vrot.lane.b32.xlu1 %v12371_v27, %s11360_s10 }
0x1c90   :  { %v4842_v5 = vpop.f32.mrf.mxu1 }
0x1c91   :  { %v4856_v7 = vmul.f32 0.2236068, %v4842_v5 }
0x1c92   :  { %v10538_v10 = vpop.f32.mrf.mxu1 }
0x1c93   :  { %v4880_v14 = vsel %vm4877_vm5, -1e+18, %v4856_v7 }
0x1c94   :  { %v12516_v6 = vadd.f32 %v4880_v14, %v4856_v7  ;;  %v4847_v2 = vpop.f32.mrf.mxu1 }
0x1c95   :  { %v5108_v21 = vpop.f32.mrf.mxu0  ;;  %v4857_v34 = vmul.f32 0.2236068, %v4847_v2 }
0x1c96   :  { %v10541_v16 = vpop.f32.mrf.mxu1  ;;  %v4886_v63 = vsel %vm2380_vm14, %v12516_v6, -inf  ;;  %v5122_v26 = vmul.f32 0.2236068, %v5108_v21 }
0x1c97   :  { %4887 = vmax.xlane.f32.xlu1 %v4886_v63  ;;  %v10568_v0 = vpop.f32.mrf.mxu0 }
0x1c98   :  { %v4852_v23 = vpop.f32.mrf.mxu1 }
0x1c99   :  { %v5113_v24 = vpop.f32.mrf.mxu0  ;;  %v4858_v45 = vmul.f32 0.2236068, %v4852_v23  ;;  %v4716_v23 = vadd.f32 %v12414_v54, %v12506_v9 }
0x1c9a   :  { %v10544_v22 = vpop.f32.mrf.mxu1  ;;  %v5123_v35 = vmul.f32 0.2236068, %v5113_v24 }
0x1c9b   :  { %v10571_v62 = vpop.f32.mrf.mxu0 }
0x1c9d   :  { %v5118_v25 = vpop.f32.mrf.mxu0 }
0x1c9e   :  { %v5124_v59 = vmul.f32 0.2236068, %v5118_v25 }
0x1c9f   :  { %v10574_v33 = vpop.f32.mrf.mxu0 }
0x1ca0   :  { %v4723_v33 = vsub.f32 0.0, %v4716_v23 }
0x1cb4   :  { %v4870_v42 = vpop.permute.xlu0 %4869 }
0x1cb5   :  { %vm4878_vm6 = vcmp.gt.f32.partialorder %v11855_v40, %v4870_v42 }
0x1cb6   :  { %v4881_v19 = vsel %vm4878_vm6, -1e+18, %v4857_v34 }
0x1cb7   :  { %v4884_v15 = vadd.f32 %v4881_v19, %v4857_v34 }
0x1cb8   :  { %v5131_v28 = vpop.permute.xlu0 %5130  ;;  %v12521_v38 = vpop.permute.xlu1 %4874 }
0x1cb9   :  { %vm5143_vm7 = vcmp.gt.f32.partialorder %v11469_v50, %v5131_v28  ;;  %v4889_v13 = vsel %vm2380_vm14, %v4884_v15, -inf  ;;  %vm4879_vm8 = vcmp.gt.f32.partialorder %v11859_v47, %v12521_v38 }
0x1cba   :  { %v5146_v31 = vsel %vm5143_vm7, -1e+18, %v5122_v26  ;;  %4890 = vmax.xlane.f32.xlu0 %v4889_v13  ;;  %v4882_v29 = vsel %vm4879_vm8, -1e+18, %v4858_v45 }
0x1cbb   :  { %v5149_v32 = vadd.f32 %v5146_v31, %v5122_v26  ;;  %v4885_v61 = vadd.f32 %v4882_v29, %v4858_v45  ;;  %v5464_v29 = vrot.slane %v12424_v53, 4 }
0x1cbc   :  { %v12527_v39 = vpop.permute.xlu0 %5140  ;;  %v5136_v41 = vpop.permute.xlu1 %5135 }
0x1cbd   :  { %vm5145_vm9 = vcmp.gt.f32.partialorder %v11859_v47, %v12527_v39  ;;  %vm5144_vm13 = vcmp.gt.f32.partialorder %v11855_v40, %v5136_v41  ;;  %v5152_v51 = vsel %vm2380_vm14, %v5149_v32, -inf  ;;  %v4892_v1 = vsel %vm2387_vm15, %v4885_v61, -inf }
0x1cbe   :  { %v5148_v52 = vsel %vm5145_vm9, -1e+18, %v5124_v59  ;;  %v5147_v46 = vsel %vm5144_vm13, -1e+18, %v5123_v35  ;;  %5153 = vmax.xlane.f32.xlu1 %v5152_v51  ;;  %v5465_v51 = vrot.slane %v12435_v4, 4 }
0x1cbf   :  { %v5150_v55 = vadd.f32 %v5147_v46, %v5123_v35  ;;  %v5151_v30 = vadd.f32 %v5148_v52, %v5124_v59 }
0x1cc0   :  { %v4909_v44 = vpop.permute.xlu0 %4908  ;;  %v4907_v57 = vpop.permute.xlu1 %4906  ;;  %v12583_v46 = vsel %vm1830_vm11, %v5464_v29, %v5465_v51 }
0x1cc1   :  { %10546 = vmatpush3.msk.msra.mxu1 %vm1830_vm11, %v4909_v44  ;;  %v5155_v18 = vsel %vm2380_vm14, %v5150_v55, -inf  ;;  %v5158_v11 = vsel %vm2387_vm15, %v5151_v30, -inf }
0x1cc2   :  { %10547 = vmatprep.subr.mxu1 %v11352_v12  ;;  %5156 = vmax.xlane.f32.xlu0 %v5155_v18 }
0x1cc3   :  { %5159 = vmax.xlane.f32.xlu1 %v5158_v11  ;;  %10548 = vmatpush3.msra.mxu1 %v4907_v57  ;;  %v4711_v57 = vadd.f32 %v12414_v54, %v12504_v37 }
0x1cc4   :  { %10549 = vmatprep.subr.mxu1 %v11352_v12  ;;  %v4905_v3 = vpop.permute.xlu1 %4904 }
0x1cc5   :  { %10550 = vmatpush3.msra.mxu1 %v4905_v3  ;;  %v4722_v18 = vsub.f32 0.0, %v4711_v57 }
0x1cc6   :  { %4893 = vmax.xlane.f32.xlu0 %v4892_v1  ;;  %10575 = vmatprep.subr.mxu1 %v11352_v12 }
0x1cc7   :  { %v4730_v11 = vmul.f32 1.442695, %v4722_v18 }
0x1cd4   :  { %5172 = vrot.lane.b32.xlu1 %v12418_v60, %s11359_s9 }
0x1cd8   :  { %5479 = vrot.lane.b32.xlu1 %v12543_v58, %s11355_s4 }
0x1cdc   :  { %5174 = vrot.lane.b32.xlu0 %v12424_v53, %s11359_s9  ;;  %v12596_v53 = vsel %vm1830_vm11, %v5465_v51, %v12543_v58 }
0x1ce0   :  { %5170 = vrot.lane.b32.xlu0 %v12371_v27, %s11359_s9 }
0x1d20   :  { %v4888_v49 = vpop.xlane.xlu1 %4887 }
0x1d21   :  { %v4895_v5 = vsub.f32 %v12516_v6, %v4888_v49  ;;  %v12623_v49 = vld [vmem:[%s13612_s2 + $0x1f8] sm:$0xff] }
0x1d22   :  { %10591 = vmatpush3.msra.mxu0 %v12623_v49 }
0x1d23   :  { %v4898_v7 = vmul.f32 1.442695, %v4895_v5  ;;  %10612 = vmatprep.subr.mxu0 %v11352_v12 }
0x1d25   :  { %11182 = vpow2.f32 %v4898_v7 }
0x1d32   :  { %v12552_v10 = vpop.eup %11182 }
0x1d33   :  { %10552 = vmatmul.mubr.msk.f32.vlgmr.msra.gmra.mxu1 %vm2380_vm14, %v12552_v10  ;;  %v5003_v1 = vsel %vm2380_vm14, %v12552_v10, 0.0 }
0x1d34   :  { %10554 = vmatprep.mubr.msk.f32.mxu1 %vm11353_vm3, %v11352_v12 }
0x1d43   :  { %v4891_v60 = vpop.xlane.xlu0 %4890 }
0x1d44   :  { %v4896_v17 = vsub.f32 %v4884_v15, %v4891_v60  ;;  %v4732_v15 = vmul.f32 1.442695, %v4723_v33  ;;  %v12634_v60 = vld [vmem:[%s13612_s2 + $0x1f0] sm:$0xff] }
0x1d46   :  { %v4900_v14 = vmul.f32 1.442695, %v4896_v17 }
0x1d47   :  { %v5154_v2 = vpop.xlane.xlu1 %5153 }
0x1d48   :  { %11184 = vpow2.f32 %v4900_v14  ;;  %v5161_v21 = vsub.f32 %v5149_v32, %v5154_v2 }
0x1d4a   :  { %v5164_v27 = vmul.f32 1.442695, %v5161_v21 }
0x1d4b   :  { %v5157_v16 = vpop.xlane.xlu0 %5156 }
0x1d4c   :  { %11186 = vpow2.f32 %v5164_v27  ;;  %v5162_v6 = vsub.f32 %v5150_v55, %v5157_v16  ;;  %v5160_v63 = vpop.xlane.xlu1 %5159 }
0x1d4d   :  { %v5163_v0 = vsub.f32 %v5151_v30, %v5160_v63 }
0x1d4e   :  { %v5166_v24 = vmul.f32 1.442695, %v5162_v6 }
0x1d4f   :  { %v5168_v22 = vmul.f32 1.442695, %v5163_v0  ;;  %v4894_v62 = vpop.xlane.xlu0 %4893 }
0x1d50   :  { %11188 = vpow2.f32 %v5166_v24  ;;  %v4897_v25 = vsub.f32 %v4885_v61, %v4894_v62  ;;  %v5173_v26 = vpop.permute.xlu1 %5172 }
0x1d51   :  { %11190 = vpow2.f32 %v5168_v22 }
0x1d52   :  { %v4902_v34 = vmul.f32 1.442695, %v4897_v25 }
0x1d53   :  { %v5175_v42 = vpop.permute.xlu0 %5174 }
0x1d54   :  { %11192 = vpow2.f32 %v4902_v34  ;;  %10576 = vmatpush3.msk.msra.mxu1 %vm1830_vm11, %v5175_v42  ;;  %v5480_v21 = vpop.permute.xlu1 %5479 }
0x1d55   :  { %v12561_v19 = vpop.eup %11184  ;;  %10577 = vmatprep.subr.mxu1 %v11352_v12  ;;  %11194 = vpow2.f32 %v4732_v15 }
0x1d56   :  { %10555 = vmatmul.mubr.msk.f32.gmra.mxu1 %vm2380_vm14, %v12561_v19  ;;  %v5006_v54 = vsel %vm2380_vm14, %v12561_v19, 0.0 }
0x1d57   :  { %10578 = vmatpush3.msra.mxu1 %v5173_v26  ;;  %v5171_v9 = vpop.permute.xlu0 %5170  ;;  %10557 = vmatprep.mubr.msk.f32.mxu1 %vm11353_vm3, %v11352_v12 }
0x1d58   :  { %10579 = vmatprep.subr.mxu1 %v11352_v12 }
0x1d59   :  { %v11187_v28 = vpop.eup %11186  ;;  %10580 = vmatpush3.msra.mxu1 %v5171_v9 }
0x1d5a   :  { %v5269_v13 = vsel %vm2380_vm14, %v11187_v28, 0.0  ;;  %10601 = vmatprep.subr.mxu1 %v11352_v12 }
0x1d5b   :  { %5270 = vadd.xlane.f32.xlu1 %v5269_v13 }
0x1d5d   :  { %v11189_v31 = vpop.eup %11188 }
0x1d5e   :  { %v5272_v32 = vsel %vm2380_vm14, %v11189_v31, 0.0  ;;  %v11191_v45 = vpop.eup %11190 }
0x1d5f   :  { %5273 = vadd.xlane.f32.xlu0 %v5272_v32  ;;  %v5275_v59 = vsel %vm2387_vm15, %v11191_v45, 0.0 }
0x1d61   :  { %v11193_v35 = vpop.eup %11192 }
0x1d62   :  { %10558 = vmatmul.mubr.msk.f32.gmra.mxu1 %vm2380_vm14, %v11193_v35  ;;  %v11195_v41 = vpop.eup %11194  ;;  %v5009_v17 = vsel %vm2387_vm15, %v11193_v35, 0.0 }
0x1d63   :  { %5276 = vadd.xlane.f32.xlu0 %v5275_v59  ;;  %10581 = vmatprep.mubr.msk.f32.mxu1 %vm11353_vm3, %v11352_v12  ;;  %v4738_v52 = vadd.f32 1.0, %v11195_v41 }
0x1d65   :  { %11196 = vrcp.f32 %v4738_v52 }
0x1d66   :  { %10582 = vmatmul.mubr.msk.f32.vlgmr.msra.gmra.mxu1 %vm2380_vm14, %v11187_v28  ;;  %11198 = vpow2.f32 %v4730_v11 }
0x1d67   :  { %10584 = vmatprep.mubr.msk.f32.mxu1 %vm11353_vm3, %v11352_v12  ;;  %10602 = vmatpush3.msra.mxu1 %v12634_v60 }
0x1d68   :  { %10627 = vmatprep.subr.mxu1 %v11352_v12 }
0x1d6a   :  { %10585 = vmatmul.mubr.msk.f32.gmra.mxu1 %vm2380_vm14, %v11189_v31 }
0x1d6b   :  { %10587 = vmatprep.mubr.msk.f32.mxu1 %vm11353_vm3, %v11352_v12 }
0x1d6c   :  { %5475 = vrot.lane.b32.xlu1 %v12583_v46, %s11355_s4 }
0x1d6e   :  { %10588 = vmatmul.mubr.msk.f32.gmra.mxu1 %vm2380_vm14, %v11191_v45 }
0x1d6f   :  { %10603 = vmatprep.mubr.msk.f32.mxu1 %vm11353_vm3, %v11352_v12 }
0x1d70   :  { %5469 = vrot.lane.b32.xlu1 %v12583_v46, %s11357_s6 }
0x1d72   :  { %v11197_v4 = vpop.eup %11196 }
0x1d73   :  { %v4748_v55 = vmul.f32 20.0, %v11197_v4  ;;  %v11199_v61 = vpop.eup %11198 }
0x1d74   :  { %5471 = vrot.lane.b32.xlu1 %v12596_v53, %s11357_s6  ;;  %v4737_v3 = vadd.f32 1.0, %v11199_v61 }
0x1d75   :  { %v5577_v30 = vadd.f32 2.0, %v4748_v55  ;;  %v5843_v44 = vadd.f32 4.0, %v4748_v55 }
0x1d76   :  { %11200 = vrcp.f32 %v4737_v3 }
0x1d78   :  { %5473 = vrot.lane.b32.xlu1 %v12543_v58, %s11357_s6 }
0x1d79   :  { %5477 = vrot.lane.b32.xlu0 %v12596_v53, %s11355_s4 }
0x1d7c   :  { %5735 = vrot.lane.b32.xlu1 %v12583_v46, %s11356_s5 }
0x1d7d   :  { %5745 = vrot.lane.b32.xlu0 %v12543_v58, %s11354_s30 }
0x1d80   :  { %5739 = vrot.lane.b32.xlu1 %v12543_v58, %s11356_s5 }
0x1d81   :  { %5743 = vrot.lane.b32.xlu0 %v12596_v53, %s11354_s30 }
0x1d83   :  { %v11201_v37 = vpop.eup %11200 }
0x1d84   :  { %5584 = vperm.xlu1 %11049, %v5577_v30   ;;  %v4747_v5 = vmul.f32 20.0, %v11201_v37 }
0x1d85   :  { %5741 = vrot.lane.b32.xlu0 %v12583_v46, %s11354_s30 }
0x1d86   :  { %v5576_v7 = vadd.f32 2.0, %v4747_v5  ;;  %v5842_v10 = vadd.f32 4.0, %v4747_v5 }
0x1d88   :  { %5850 = vperm.xlu1 %11049, %v5843_v44  }
0x1d89   :  { %5737 = vrot.lane.b32.xlu0 %v12596_v53, %s11356_s5 }
0x1da8   :  { %5004 = vadd.xlane.f32.xlu0 %v5003_v1 }
0x1dac   :  { %5007 = vadd.xlane.f32.xlu1 %v5006_v54 }
0x1dbd   :  { %5623 = vrot.lane.b32.xlu1 %v12596_v53, %s11360_s10 }
0x1dbe   :  { %5580 = vperm.xlu0 %11048, %v5576_v7  }
0x1dc1   :  { %5621 = vrot.lane.b32.xlu1 %v12583_v46, %s11360_s10 }
0x1dc2   :  { %5846 = vperm.xlu0 %11048, %v5842_v10  }
0x1dc6   :  { %5625 = vrot.lane.b32.xlu0 %v12543_v58, %s11360_s10 }
0x1de4   :  { %v5271_v27 = vpop.xlane.xlu1 %5270 }
0x1de5   :  { %5010 = vadd.xlane.f32.xlu0 %v5009_v17  ;;  %11202 = vrcp.f32 %v5271_v27 }
0x1de8   :  { %v5476_v16 = vpop.permute.xlu1 %5475  ;;  %v5274_v6 = vpop.xlane.xlu0 %5273 }
0x1de9   :  { %11204 = vrcp.f32 %v5274_v6 }
0x1dec   :  { %v5470_v63 = vpop.permute.xlu1 %5469  ;;  %v5277_v0 = vpop.xlane.xlu0 %5276 }
0x1ded   :  { %11206 = vrcp.f32 %v5277_v0  ;;  %v5586_v0 = vrot.slane %v12521_v38, 4 }
0x1df0   :  { %v5472_v23 = vpop.permute.xlu1 %5471  ;;  %v5478_v24 = vpop.permute.xlu0 %5477 }
0x1df2   :  { %v11203_v9 = vpop.eup %11202 }
0x1df3   :  { %v12643_v14 = vpop.f32.mrf.mxu1 }
0x1df4   :  { %v5474_v25 = vpop.permute.xlu1 %5473  ;;  %v5746_v33 = vpop.permute.xlu0 %5745 }
0x1df5   :  { %v10553_v2 = vpop.f32.mrf.mxu1 }
0x1df6   :  { %v11205_v45 = vpop.eup %11204 }
0x1df8   :  { %v5736_v34 = vpop.permute.xlu1 %5735  ;;  %v5744_v42 = vpop.permute.xlu0 %5743 }
0x1dfa   :  { %v11207_v52 = vpop.eup %11206 }
0x1dfc   :  { %v12649_v26 = vpop.permute.xlu1 %5739  ;;  %v5742_v13 = vpop.permute.xlu0 %5741 }
0x1e00   :  { %v12655_v59 = vpop.permute.xlu1 %5584  ;;  %v5738_v29 = vpop.permute.xlu0 %5737 }
0x1e04   :  { %v12663_v44 = vpop.permute.xlu1 %5850 }
0x1e16   :  { %v12645_v22 = vpop.f32.mrf.mxu1 }
0x1e18   :  { %v10556_v62 = vpop.f32.mrf.mxu1 }
0x1e19   :  { %v5589_v62 = vrot.slane %v12655_v59, 4 }
0x1e1b   :  { %vm5596_vm9 = vcmp.gt.f32.partialorder %v11859_v47, %v5589_v62 }
0x1e22   :  { %v12647_v19 = vpop.f32.mrf.mxu1 }
0x1e24   :  { %v10559_v15 = vpop.f32.mrf.mxu1 }
0x1e26   :  { %v5255_v28 = vpop.f32.mrf.mxu1 }
0x1e27   :  { %v5281_v31 = vmul.f32 %v11203_v9, %v5255_v28 }
0x1e28   :  { %v10583_v32 = vpop.f32.mrf.mxu1 }
0x1e29   :  { %10593 = vmatmul.mubr.msk.f32.vlgmr.msra.gmra.mxu0 %vm329_vm4, %v5281_v31 }
0x1e2a   :  { %10613 = vmatpush3.xpose.msk.msra.mxu0 %vm329_vm4, %v5480_v21  ;;  %v5260_v35 = vpop.f32.mrf.mxu1  ;;  %10595 = vmatprep.mubr.msk.f32.mxu0 %vm11353_vm3, %v11352_v12 }
0x1e2b   :  { %v5282_v41 = vmul.f32 %v11205_v45, %v5260_v35  ;;  %10614 = vmatprep.subr.mxu0 %v11352_v12  ;;  %v5852_v45 = vrot.slane %v12527_v39, 4  ;;  %v5855_v39 = vrot.slane %v12663_v44, 4 }
0x1e2c   :  { %v10586_v51 = vpop.f32.mrf.mxu1 }
0x1e2d   :  { %10596 = vmatmul.mubr.msk.f32.gmra.mxu0 %vm329_vm4, %v5282_v41  ;;  %vm5862_vm8 = vcmp.gt.f32.partialorder %v11859_v47, %v5855_v39 }
0x1e2e   :  { %10615 = vmatpush3.xpose.msk.msra.mxu0 %vm329_vm4, %v5478_v24  ;;  %v5265_v4 = vpop.f32.mrf.mxu1  ;;  %10598 = vmatprep.mubr.msk.f32.mxu0 %vm11353_vm3, %v11352_v12 }
0x1e2f   :  { %v5283_v55 = vmul.f32 %v11207_v52, %v5265_v4  ;;  %10616 = vmatprep.subr.mxu0 %v11352_v12 }
0x1e30   :  { %v10589_v30 = vpop.f32.mrf.mxu1 }
0x1e31   :  { %v5005_v57 = vpop.xlane.xlu0 %5004  ;;  %10599 = vmatmul.mubr.msk.f32.gmra.mxu0 %vm329_vm4, %v5283_v55 }
0x1e32   :  { %11208 = vrcp.f32 %v5005_v57  ;;  %10617 = vmatpush3.xpose.msk.msra.mxu0 %vm329_vm4, %v5476_v16  ;;  %10618 = vmatprep.mubr.msk.f32.mxu0 %vm11353_vm3, %v11352_v12 }
0x1e33   :  { %10642 = vmatprep.subr.mxu0 %v11352_v12 }
0x1e35   :  { %10619 = vmatmul.mubr.msk.f32.vlgmr.msra.gmra.mxu0 %vm329_vm4, %v5470_v63  ;;  %v5008_v18 = vpop.xlane.xlu1 %5007 }
0x1e36   :  { %10643 = vmatpush3.xpose.msk.msra.mxu0 %vm329_vm4, %v5746_v33  ;;  %11210 = vrcp.f32 %v5008_v18  ;;  %10621 = vmatprep.mubr.msk.f32.mxu0 %vm11353_vm3, %v11352_v12 }
0x1e37   :  { %10644 = vmatprep.subr.mxu0 %v11352_v12 }
0x1e39   :  { %v5581_v11 = vpop.permute.xlu0 %5580  ;;  %10622 = vmatmul.mubr.msk.f32.gmra.mxu0 %vm329_vm4, %v5472_v23  ;;  %v5624_v54 = vpop.permute.xlu1 %5623 }
0x1e3a   :  { %10645 = vmatpush3.xpose.msk.msra.mxu0 %vm329_vm4, %v5744_v42  ;;  %10624 = vmatprep.mubr.msk.f32.mxu0 %vm11353_vm3, %v11352_v12  ;;  %v5587_v6 = vrot.slane %v5581_v11, 4 }
0x1e3b   :  { %10646 = vmatprep.subr.mxu0 %v11352_v12 }
0x1e3c   :  { %v5588_v24 = vsel %vm1830_vm11, %v5586_v0, %v5587_v6  ;;  %v5590_v42 = vsel %vm1830_vm11, %v5587_v6, %v5589_v62 }
0x1e3d   :  { %v12680_v61 = vpop.permute.xlu0 %5846  ;;  %10625 = vmatmul.mubr.msk.f32.gmra.mxu0 %vm329_vm4, %v5474_v25  ;;  %v5622_v10 = vpop.permute.xlu1 %5621  ;;  %vm5594_vm5 = vcmp.gt.f32.partialorder %v11469_v50, %v5588_v24  ;;  %vm5595_vm6 = vcmp.gt.f32.partialorder %v11855_v40, %v5590_v42 }
0x1e3e   :  { %10647 = vmatpush3.xpose.msk.msra.mxu0 %vm329_vm4, %v5742_v13  ;;  %10648 = vmatprep.mubr.msk.f32.mxu0 %vm11353_vm3, %v11352_v12  ;;  %v5853_v28 = vrot.slane %v12680_v61, 4 }
0x1e3f   :  { %v11209_v3 = vpop.eup %11208  ;;  %10672 = vmatprep.subr.mxu0 %v11352_v12 }
0x1e40   :  { %v5015_v1 = vmul.f32 %v11209_v3, %v12643_v14  ;;  %v5854_v41 = vsel %vm1830_vm11, %v5852_v45, %v5853_v28 }
0x1e41   :  { %v5626_v37 = vpop.permute.xlu0 %5625  ;;  %10649 = vmatmul.mubr.msk.f32.vlgmr.msra.gmra.mxu0 %vm329_vm4, %v5736_v34  ;;  %vm5860_vm7 = vcmp.gt.f32.partialorder %v11469_v50, %v5854_v41 }
0x1e42   :  { %10604 = vmatmul.mubr.msk.f32.vlgmr.msra.gmra.mxu1 %vm329_vm4, %v5015_v1  ;;  %10651 = vmatprep.mubr.msk.f32.mxu0 %vm11353_vm3, %v11352_v12 }
0x1e43   :  { %v11211_v5 = vpop.eup %11210  ;;  %10628 = vmatpush3.msk.msra.mxu1 %vm1830_vm11, %v5626_v37  ;;  %10606 = vmatprep.mubr.msk.f32.mxu1 %vm11353_vm3, %v11352_v12 }
0x1e44   :  { %10629 = vmatprep.subr.mxu1 %v11352_v12  ;;  %v5016_v7 = vmul.f32 %v11211_v5, %v12645_v22  ;;  %10673 = vmatpush3.msra.mxu0 %v12623_v49 }
0x1e45   :  { %10630 = vmatpush3.msra.mxu1 %v5624_v54  ;;  %10652 = vmatmul.mubr.msk.f32.gmra.mxu0 %vm329_vm4, %v5738_v29 }
0x1e46   :  { %10631 = vmatprep.subr.mxu1 %v11352_v12  ;;  %10607 = vmatmul.mubr.msk.f32.gmra.mxu1 %vm329_vm4, %v5016_v7 }
0x1e47   :  { %10632 = vmatpush3.msra.mxu1 %v5622_v10  ;;  %10654 = vmatprep.mubr.msk.f32.mxu0 %vm11353_vm3, %v11352_v12 }
0x1e48   :  { %10609 = vmatprep.mubr.msk.f32.mxu1 %vm11353_vm3, %v11352_v12  ;;  %10657 = vmatprep.subr.mxu1 %v11352_v12 }
0x1e49   :  { %10655 = vmatmul.mubr.msk.f32.gmra.mxu0 %vm329_vm4, %v12649_v26  ;;  %10694 = vmatprep.subr.mxu0 %v11352_v12 }
0x1e4a   :  { %10674 = vmatprep.mubr.msk.f32.mxu0 %vm11353_vm3, %v11352_v12 }
0x1e6e   :  { %v5011_v49 = vpop.xlane.xlu0 %5010 }
0x1e6f   :  { %11212 = vrcp.f32 %v5011_v49 }
0x1e7c   :  { %v11213_v17 = vpop.eup %11212 }
0x1e7d   :  { %v5017_v14 = vmul.f32 %v11213_v17, %v12647_v19 }
0x1e7f   :  { %10610 = vmatmul.mubr.msk.f32.gmra.mxu1 %vm329_vm4, %v5017_v14 }
0x1e80   :  { %10633 = vmatprep.mubr.msk.f32.mxu1 %vm11353_vm3, %v11352_v12 }
0x1ee9   :  { %v5359_v2 = vpop.f32.mrf.mxu0 }
0x1eeb   :  { %v10594_v21 = vpop.f32.mrf.mxu0 }
0x1eed   :  { %v5364_v27 = vpop.f32.mrf.mxu0 }
0x1eef   :  { %v10597_v16 = vpop.f32.mrf.mxu0 }
0x1ef1   :  { %v12715_v63 = vpop.f32.mrf.mxu0 }
0x1ef3   :  { %v10600_v23 = vpop.f32.mrf.mxu0 }
0x1ef5   :  { %v5559_v22 = vpop.f32.mrf.mxu0 }
0x1ef6   :  { %v5573_v25 = vmul.f32 0.2236068, %v5559_v22 }
0x1ef7   :  { %v10620_v33 = vpop.f32.mrf.mxu0 }
0x1ef8   :  { %v5597_v34 = vsel %vm5594_vm5, -1e+18, %v5573_v25 }
0x1ef9   :  { %v5600_v19 = vadd.f32 %v5597_v34, %v5573_v25  ;;  %v5564_v15 = vpop.f32.mrf.mxu0 }
0x1efa   :  { %v5574_v26 = vmul.f32 0.2236068, %v5564_v15 }
0x1efb   :  { %v10623_v9 = vpop.f32.mrf.mxu0  ;;  %v5603_v38 = vsel %vm2380_vm14, %v5600_v19, -inf }
0x1efc   :  { %v5598_v13 = vsel %vm5595_vm6, -1e+18, %v5574_v26  ;;  %5604 = vmax.xlane.f32.xlu0 %v5603_v38 }
0x1efd   :  { %v5601_v31 = vadd.f32 %v5598_v13, %v5574_v26  ;;  %v5569_v32 = vpop.f32.mrf.mxu0 }
0x1efe   :  { %v5575_v44 = vmul.f32 0.2236068, %v5569_v32 }
0x1eff   :  { %v10626_v35 = vpop.f32.mrf.mxu0  ;;  %v5606_v59 = vsel %vm2380_vm14, %v5601_v31, -inf }
0x1f00   :  { %5607 = vmax.xlane.f32.xlu1 %v5606_v59 }
0x1f01   :  { %v5825_v51 = vpop.f32.mrf.mxu0 }
0x1f02   :  { %v5839_v29 = vmul.f32 0.2236068, %v5825_v51  ;;  %v5448_v52 = vpop.f32.mrf.mxu1 }
0x1f03   :  { %v12729_v4 = vadd.f32 %v5448_v52, %v5359_v2  ;;  %v10650_v55 = vpop.f32.mrf.mxu0  ;;  %v5599_v2 = vsel %vm5596_vm9, -1e+18, %v5575_v44 }
0x1f04   :  { %v5863_v30 = vsel %vm5860_vm7, -1e+18, %v5839_v29  ;;  %v10605_v57 = vpop.f32.mrf.mxu1  ;;  %v5602_v16 = vadd.f32 %v5599_v2, %v5575_v44 }
0x1f05   :  { %v5866_v18 = vadd.f32 %v5863_v30, %v5839_v29  ;;  %v5830_v11 = vpop.f32.mrf.mxu0 }
0x1f06   :  { %v5453_v61 = vpop.f32.mrf.mxu1  ;;  %v5840_v21 = vmul.f32 0.2236068, %v5830_v11  ;;  %v5609_v23 = vsel %vm2387_vm15, %v5602_v16, -inf }
0x1f07   :  { %v12732_v3 = vadd.f32 %v5453_v61, %v5364_v27  ;;  %v10653_v1 = vpop.f32.mrf.mxu0  ;;  %v5869_v54 = vsel %vm2380_vm14, %v5866_v18, -inf  ;;  %v5856_v27 = vsel %vm1830_vm11, %v5853_v28, %v5855_v39  ;;  %v12765_v61 = vadd.f32 %v12729_v4, %v12305_v56 }
0x1f08   :  { %v10608_v37 = vpop.f32.mrf.mxu1  ;;  %5870 = vmax.xlane.f32.xlu1 %v5869_v54  ;;  %vm5861_vm13 = vcmp.gt.f32.partialorder %v11855_v40, %v5856_v27 }
0x1f09   :  { %v5835_v5 = vpop.f32.mrf.mxu0  ;;  %v5864_v6 = vsel %vm5861_vm13, -1e+18, %v5840_v21  ;;  %v6196_v54 = vsel %vm143_vm2, %v12765_v61, 0.0  ;;  %v12781_v56 = vadd.f32 %v12732_v3, %v12384_v20 }
0x1f0a   :  { %v5841_v7 = vmul.f32 0.2236068, %v5835_v5  ;;  %v5867_v0 = vadd.f32 %v5864_v6, %v5840_v21 }
0x1f0b   :  { %v10656_v10 = vpop.f32.mrf.mxu0 }
0x1f0c   :  { %v5865_v49 = vsel %vm5862_vm8, -1e+18, %v5841_v7 }
0x1f0d   :  { %v5868_v17 = vadd.f32 %v5865_v49, %v5841_v7  ;;  %v6199_v7 = vsel %vm143_vm2, %v12781_v56, 0.0 }
0x1f0f   :  { %v5875_v14 = vsel %vm2387_vm15, %v5868_v17, -inf }
0x1f10   :  { %5876 = vmax.xlane.f32.xlu1 %v5875_v14 }
0x1f12   :  { %5891 = vrot.lane.b32.xlu0 %v12543_v58, %s11359_s9  ;;  %v5872_v58 = vsel %vm2380_vm14, %v5867_v0, -inf }
0x1f21   :  { %5889 = vrot.lane.b32.xlu1 %v12596_v53, %s11359_s9 }
0x1f31   :  { %5610 = vmax.xlane.f32.xlu0 %v5609_v23 }
0x1f35   :  { %5873 = vmax.xlane.f32.xlu0 %v5872_v58 }
0x1f3f   :  { %v12746_v24 = vpop.f32.mrf.mxu1 }
0x1f41   :  { %v10611_v53 = vpop.f32.mrf.mxu1 }
0x1f4b   :  { %5887 = vrot.lane.b32.xlu0 %v12583_v46, %s11359_s9 }
0x1f85   :  { %v5605_v22 = vpop.xlane.xlu0 %5604 }
0x1f86   :  { %v5612_v62 = vsub.f32 %v5600_v19, %v5605_v22 }
0x1f88   :  { %v5615_v25 = vmul.f32 1.442695, %v5612_v62 }
0x1f89   :  { %v5608_v33 = vpop.xlane.xlu1 %5607  ;;  %v5892_v28 = vpop.permute.xlu0 %5891 }
0x1f8a   :  { %11214 = vpow2.f32 %v5615_v25  ;;  %v5613_v34 = vsub.f32 %v5601_v31, %v5608_v33 }
0x1f8c   :  { %v5617_v42 = vmul.f32 1.442695, %v5613_v34 }
0x1f8e   :  { %11216 = vpow2.f32 %v5617_v42 }
0x1f91   :  { %v5871_v15 = vpop.xlane.xlu1 %5870 }
0x1f92   :  { %v5878_v26 = vsub.f32 %v5866_v18, %v5871_v15 }
0x1f94   :  { %v5881_v9 = vmul.f32 1.442695, %v5878_v26 }
0x1f96   :  { %11218 = vpow2.f32 %v5881_v9 }
0x1f97   :  { %v11215_v38 = vpop.eup %11214 }
0x1f98   :  { %10634 = vmatmul.mubr.msk.f32.vlgmr.msra.gmra.mxu1 %vm2380_vm14, %v11215_v38  ;;  %v5720_v13 = vsel %vm2380_vm14, %v11215_v38, 0.0 }
0x1f99   :  { %10658 = vmatpush3.msk.msra.mxu1 %vm1830_vm11, %v5892_v28  ;;  %5721 = vadd.xlane.f32.xlu1 %v5720_v13  ;;  %v5877_v46 = vpop.xlane.xlu1 %5876 }
0x1f9a   :  { %10636 = vmatprep.mubr.msk.f32.mxu1 %vm11353_vm3, %v11352_v12  ;;  %10659 = vmatprep.subr.mxu1 %v11352_v12  ;;  %v5880_v51 = vsub.f32 %v5868_v17, %v5877_v46 }
0x1f9b   :  { %v11217_v19 = vpop.eup %11216 }
0x1f9c   :  { %10637 = vmatmul.mubr.msk.f32.gmra.mxu1 %vm2380_vm14, %v11217_v19  ;;  %v5723_v35 = vsel %vm2380_vm14, %v11217_v19, 0.0  ;;  %v5885_v30 = vmul.f32 1.442695, %v5880_v51 }
0x1f9d   :  { %v5890_v31 = vpop.permute.xlu1 %5889  ;;  %10639 = vmatprep.mubr.msk.f32.mxu1 %vm11353_vm3, %v11352_v12 }
0x1f9e   :  { %10660 = vmatpush3.msra.mxu1 %v5890_v31 }
0x1f9f   :  { %10661 = vmatprep.subr.mxu1 %v11352_v12 }
0x1fa3   :  { %v11219_v32 = vpop.eup %11218 }
0x1fa4   :  { %v5986_v45 = vsel %vm2380_vm14, %v11219_v32, 0.0 }
0x1fa5   :  { %5987 = vadd.xlane.f32.xlu0 %v5986_v45 }
0x1fa9   :  { %5724 = vadd.xlane.f32.xlu0 %v5723_v35 }
0x1fba   :  { %v5611_v59 = vpop.xlane.xlu0 %5610 }
0x1fbb   :  { %v5614_v41 = vsub.f32 %v5602_v16, %v5611_v59 }
0x1fbd   :  { %v5619_v29 = vmul.f32 1.442695, %v5614_v41 }
0x1fbe   :  { %v5874_v52 = vpop.xlane.xlu0 %5873 }
0x1fbf   :  { %11220 = vpow2.f32 %v5619_v29  ;;  %v5879_v55 = vsub.f32 %v5867_v0, %v5874_v52 }
0x1fc1   :  { %v5883_v57 = vmul.f32 1.442695, %v5879_v55  ;;  %v5459_v55 = vadd.f32 %v12746_v24, %v12715_v63 }
0x1fc2   :  { %v5888_v18 = vpop.permute.xlu0 %5887 }
0x1fc3   :  { %11222 = vpow2.f32 %v5883_v57  ;;  %10662 = vmatpush3.msra.mxu1 %v5888_v18 }
0x1fc4   :  { %10683 = vmatprep.subr.mxu1 %v11352_v12  ;;  %11224 = vpow2.f32 %v5885_v30 }
0x1fcc   :  { %v11221_v11 = vpop.eup %11220 }
0x1fcd   :  { %10640 = vmatmul.mubr.msk.f32.gmra.mxu1 %vm2380_vm14, %v11221_v11  ;;  %v5726_v39 = vsel %vm2387_vm15, %v11221_v11, 0.0 }
0x1fce   :  { %5727 = vadd.xlane.f32.xlu0 %v5726_v39  ;;  %10663 = vmatprep.mubr.msk.f32.mxu1 %vm11353_vm3, %v11352_v12 }
0x1fd0   :  { %v11223_v1 = vpop.eup %11222 }
0x1fd1   :  { %10664 = vmatmul.mubr.msk.f32.vlgmr.msra.gmra.mxu1 %vm2380_vm14, %v11219_v32  ;;  %v5989_v37 = vsel %vm2380_vm14, %v11223_v1, 0.0  ;;  %v11225_v5 = vpop.eup %11224 }
0x1fd2   :  { %6197 = vadd.xlane.f32.xlu0 %v6196_v54  ;;  %5990 = vadd.xlane.f32.xlu1 %v5989_v37  ;;  %v5992_v4 = vsel %vm2387_vm15, %v11225_v5, 0.0 }
0x1fd3   :  { %10666 = vmatprep.mubr.msk.f32.mxu1 %vm11353_vm3, %v11352_v12  ;;  %10684 = vmatpush3.msra.mxu1 %v12634_v60 }
0x1fd4   :  { %10713 = vmatprep.subr.mxu1 %v11352_v12 }
0x1fd5   :  { %10667 = vmatmul.mubr.msk.f32.gmra.mxu1 %vm2380_vm14, %v11223_v1 }
0x1fd6   :  { %5993 = vadd.xlane.f32.xlu1 %v5992_v4  ;;  %10669 = vmatprep.mubr.msk.f32.mxu1 %vm11353_vm3, %v11352_v12 }
0x1fd9   :  { %10670 = vmatmul.mubr.msk.f32.gmra.mxu1 %vm2380_vm14, %v11225_v5 }
0x1fda   :  { %6200 = vadd.xlane.f32.xlu1 %v6199_v7  ;;  %10685 = vmatprep.mubr.msk.f32.mxu1 %vm11353_vm3, %v11352_v12 }
0x2022   :  { %v5722_v20 = vpop.xlane.xlu1 %5721 }
0x2023   :  { %11226 = vrcp.f32 %v5722_v20 }
0x202e   :  { %v5988_v60 = vpop.xlane.xlu0 %5987 }
0x2030   :  { %v11227_v10 = vpop.eup %11226 }
0x2032   :  { %v5725_v3 = vpop.xlane.xlu0 %5724 }
0x2033   :  { %11228 = vrcp.f32 %v5725_v3 }
0x2040   :  { %v11229_v44 = vpop.eup %11228 }
0x2057   :  { %v5728_v16 = vpop.xlane.xlu0 %5727 }
0x2058   :  { %v5706_v49 = vpop.f32.mrf.mxu1  ;;  %11230 = vrcp.f32 %v5728_v16  ;;  %v4486_v16 = vld [vmem:[%s13612_s2 + $0x200] sm:$0xff] }
0x2059   :  { %v5732_v17 = vmul.f32 %v11227_v10, %v5706_v49  ;;  %11232 = vrcp.f32 %v5988_v60 }
0x205a   :  { %v10635_v14 = vpop.f32.mrf.mxu1 }
0x205b   :  { %10686 = vmatmul.mubr.msk.f32.vlgmr.msra.gmra.mxu1 %vm329_vm4, %v5732_v17  ;;  %v5991_v6 = vpop.xlane.xlu1 %5990  ;;  %v6198_v51 = vpop.xlane.xlu0 %6197 }
0x205c   :  { %v5711_v2 = vpop.f32.mrf.mxu1  ;;  %10688 = vmatprep.mubr.msk.f32.mxu1 %vm11353_vm3, %v11352_v12  ;;  %11234 = vrcp.f32 %v5991_v6  ;;  %v6211_v57 = vmul.f32 0.0625, %v6198_v51 }
0x205d   :  { %v5733_v21 = vmul.f32 %v11229_v44, %v5711_v2 }
0x205e   :  { %v10638_v27 = vpop.f32.mrf.mxu1  ;;  %v6216_v4 = vsub.f32 %v12765_v61, %v6211_v57  ;;  %v4490_v57 = vld [vmem:[%s13612_s2 + $0x220] sm:$0xff] }
0x205f   :  { %10689 = vmatmul.mubr.msk.f32.gmra.mxu1 %vm329_vm4, %v5733_v21  ;;  %v5994_v0 = vpop.xlane.xlu1 %5993 }
0x2060   :  { %10691 = vmatprep.mubr.msk.f32.mxu1 %vm11353_vm3, %v11352_v12  ;;  %11236 = vrcp.f32 %v5994_v0  ;;  %10714 = vmatpush3.msra.mxu1 %v4490_v57 }
0x2061   :  { %10715 = vmatprep.subr.mxu1 %v11352_v12 }
0x2063   :  { %v6201_v11 = vpop.xlane.xlu1 %6200 }
0x2064   :  { %v6212_v7 = vmul.f32 0.0625, %v6201_v11 }
0x2065   :  { %v11231_v23 = vpop.eup %11230 }
0x2066   :  { %v11233_v62 = vpop.eup %11232  ;;  %v6217_v17 = vsub.f32 %v12781_v56, %v6212_v7  ;;  %v4487_v56 = vld [vmem:[%s13612_s2 + $0x208] sm:$0xff] }
0x2068   :  { %v6222_v27 = vmul.f32 %v6217_v17, %v6217_v17 }
0x2069   :  { %v11235_v42 = vpop.eup %11234 }
0x206d   :  { %v11237_v38 = vpop.eup %11236 }
0x208d   :  { %v5716_v58 = vpop.f32.mrf.mxu1 }
0x208e   :  { %v5734_v53 = vmul.f32 %v11231_v23, %v5716_v58 }
0x208f   :  { %v10641_v22 = vpop.f32.mrf.mxu1 }
0x2090   :  { %10692 = vmatmul.mubr.msk.f32.gmra.mxu1 %vm329_vm4, %v5734_v53 }
0x2091   :  { %v5972_v25 = vpop.f32.mrf.mxu1  ;;  %10717 = vmatprep.mubr.msk.f32.mxu1 %vm11353_vm3, %v11352_v12 }
0x2092   :  { %v5998_v33 = vmul.f32 %v11233_v62, %v5972_v25 }
0x2093   :  { %v10665_v34 = vpop.f32.mrf.mxu1 }
0x2094   :  { %10675 = vmatmul.mubr.msk.f32.vlgmr.msra.gmra.mxu0 %vm329_vm4, %v5998_v33 }
0x2095   :  { %v5977_v15 = vpop.f32.mrf.mxu1  ;;  %10677 = vmatprep.mubr.msk.f32.mxu0 %vm11353_vm3, %v11352_v12  ;;  %10695 = vmatpush3.msra.mxu0 %v4487_v56 }
0x2096   :  { %v5999_v26 = vmul.f32 %v11235_v42, %v5977_v15  ;;  %10696 = vmatprep.subr.mxu0 %v11352_v12 }
0x2097   :  { %v10668_v9 = vpop.f32.mrf.mxu1  ;;  %10697 = vmatpush3.msra.mxu0 %v4486_v16 }
0x2098   :  { %10678 = vmatmul.mubr.msk.f32.gmra.mxu0 %vm329_vm4, %v5999_v26  ;;  %10732 = vmatprep.subr.mxu0 %v11352_v12 }
0x2099   :  { %v5982_v28 = vpop.f32.mrf.mxu1  ;;  %10680 = vmatprep.mubr.msk.f32.mxu0 %vm11353_vm3, %v11352_v12 }
0x209a   :  { %v6000_v13 = vmul.f32 %v11237_v38, %v5982_v28 }
0x209b   :  { %v10671_v46 = vpop.f32.mrf.mxu1 }
0x209c   :  { %10681 = vmatmul.mubr.msk.f32.gmra.mxu0 %vm329_vm4, %v6000_v13 }
0x209d   :  { %10698 = vmatprep.mubr.msk.f32.mxu0 %vm11353_vm3, %v11352_v12 }
0x211b   :  { %v6165_v19 = vpop.f32.mrf.mxu1 }
0x211d   :  { %v10687_v31 = vpop.f32.mrf.mxu1 }
0x211f   :  { %v6170_v32 = vpop.f32.mrf.mxu1 }
0x2121   :  { %v10690_v45 = vpop.f32.mrf.mxu1 }
0x2122   :  { %v9586_v45 = vld [vmem:[%s13612_s2 + $0x230] ss:$0 sm:$0xff] }
0x2150   :  { %v6175_v35 = vpop.f32.mrf.mxu1 }
0x2152   :  { %v10693_v59 = vpop.f32.mrf.mxu1 }
0x2153   :  { %v9587_v59 = vld [vmem:[%s13612_s2 + $0x238] ss:$0 sm:$0xff] }
0x2154   :  { %v6076_v41 = vpop.f32.mrf.mxu0 }
0x2155   :  { %v6166_v29 = vadd.f32 %v6165_v19, %v6076_v41 }
0x2156   :  { %v10676_v52 = vpop.f32.mrf.mxu0 }
0x2157   :  { %v6182_v30 = vrot.slane %v6166_v29, 4 }
0x2158   :  { %v6081_v18 = vpop.f32.mrf.mxu0 }
0x2159   :  { %v6171_v39 = vadd.f32 %v6170_v32, %v6081_v18  ;;  %v6190_v1 = vsel %vm1830_vm11, %v5459_v55, %v6182_v30  ;;  %v4489_v18 = vld [vmem:[%s13612_s2 + $0x218] sm:$0xff] }
0x215a   :  { %v10679_v54 = vpop.f32.mrf.mxu0  ;;  %v6193_v37 = vadd.f32 %v6190_v1, %v12391_v36  ;;  %v6221_v36 = vmul.f32 %v6216_v4, %v6216_v4  ;;  %10716 = vmatpush3.msra.mxu1 %v4489_v18 }
0x215b   :  { %v6183_v5 = vrot.slane %v6171_v39, 4  ;;  %10741 = vmatprep.subr.mxu1 %v11352_v12 }
0x215c   :  { %v6086_v60 = vpop.f32.mrf.mxu0  ;;  %v6202_v20 = vsel %vm143_vm2, %v6193_v37, 0.0  ;;  %v6226_v2 = vsel %vm143_vm2, %v6221_v36, 0.0 }
0x215d   :  { %v6176_v3 = vadd.f32 %v6175_v35, %v6086_v60  ;;  %6203 = vadd.xlane.f32.xlu0 %v6202_v20  ;;  %v6184_v63 = vsel %vm1830_vm11, %v6182_v30, %v6183_v5 }
0x215e   :  { %v10682_v24 = vpop.f32.mrf.mxu0  ;;  %v6194_v10 = vadd.f32 %v6184_v63, %v12398_v48  ;;  %v6229_v48 = vsel %vm143_vm2, %v6222_v27, 0.0 }
0x215f   :  { %v6185_v49 = vrot.slane %v6176_v3, 4 }
0x2160   :  { %v6205_v14 = vsel %vm143_vm2, %v6194_v10, 0.0 }
0x2161   :  { %6206 = vadd.xlane.f32.xlu1 %v6205_v14  ;;  %v6186_v61 = vsel %vm1830_vm11, %v6183_v5, %v6185_v49 }
0x2162   :  { %v6195_v44 = vadd.f32 %v6186_v61, %v12405_v43 }
0x2164   :  { %v6208_v21 = vsel %vm143_vm2, %v6195_v44, 0.0 }
0x2165   :  { %6227 = vadd.xlane.f32.xlu1 %v6226_v2  ;;  %6209 = vadd.xlane.f32.xlu0 %v6208_v21  ;;  %v9588_v21 = vld [vmem:[%s13612_s2 + $0x210] ss:$0 sm:$0xff] }
0x2169   :  { %6230 = vadd.xlane.f32.xlu0 %v6229_v48 }
0x21e6   :  { %v6204_v43 = vpop.xlane.xlu0 %6203 }
0x21e7   :  { %v6213_v6 = vmul.f32 0.0625, %v6204_v43 }
0x21e9   :  { %v6218_v0 = vsub.f32 %v6193_v37, %v6213_v6 }
0x21ea   :  { %v6207_v23 = vpop.xlane.xlu1 %6206 }
0x21eb   :  { %v6214_v58 = vmul.f32 0.0625, %v6207_v23  ;;  %v6223_v53 = vmul.f32 %v6218_v0, %v6218_v0 }
0x21ed   :  { %v6219_v22 = vsub.f32 %v6194_v10, %v6214_v58  ;;  %v6232_v62 = vsel %vm143_vm2, %v6223_v53, 0.0 }
0x21ee   :  { %6233 = vadd.xlane.f32.xlu1 %v6232_v62  ;;  %v6228_v25 = vpop.xlane.xlu1 %6227  ;;  %v6210_v33 = vpop.xlane.xlu0 %6209 }
0x21ef   :  { %v6241_v34 = vmul.f32 0.0625, %v6228_v25  ;;  %v6215_v42 = vmul.f32 0.0625, %v6210_v33  ;;  %v6224_v15 = vmul.f32 %v6219_v22, %v6219_v22 }
0x21f1   :  { %v6246_v26 = vadd.f32 1e-05, %v6241_v34  ;;  %v6220_v9 = vsub.f32 %v6195_v44, %v6215_v42  ;;  %v6235_v38 = vsel %vm143_vm2, %v6224_v15, 0.0 }
0x21f2   :  { %6236 = vadd.xlane.f32.xlu0 %v6235_v38  ;;  %v6231_v28 = vpop.xlane.xlu0 %6230 }
0x21f3   :  { %11238 = vrsqrt.f32 %v6246_v26  ;;  %v6242_v13 = vmul.f32 0.0625, %v6231_v28  ;;  %v6225_v46 = vmul.f32 %v6220_v9, %v6220_v9 }
0x21f5   :  { %v6247_v19 = vadd.f32 1e-05, %v6242_v13  ;;  %v6238_v31 = vsel %vm143_vm2, %v6225_v46, 0.0 }
0x21f6   :  { %6239 = vadd.xlane.f32.xlu1 %v6238_v31 }
0x21f7   :  { %11240 = vrsqrt.f32 %v6247_v19 }
0x2200   :  { %v11239_v32 = vpop.eup %11238 }
0x2201   :  { %v6256_v35 = vmul.f32 %v11239_v32, %v6216_v4 }
0x2203   :  { %v6265_v41 = vmul.f32 %v9586_v45, %v6256_v35 }
0x2204   :  { %v11241_v51 = vpop.eup %11240 }
0x2205   :  { %v12842_v29 = vadd.f32 %v9587_v59, %v6265_v41  ;;  %v6257_v52 = vmul.f32 %v11241_v51, %v6217_v17 }
0x2207   :  { %10699 = vmatmul.mubr.msk.f32.vlgmr.msra.gmra.mxu0 %vm143_vm2, %v12842_v29  ;;  %v6266_v55 = vmul.f32 %v9586_v45, %v6257_v52 }
0x2208   :  { %10701 = vmatprep.mubr.msk.f32.mxu0 %vm11353_vm3, %v11352_v12 }
0x2209   :  { %v12848_v30 = vadd.f32 %v9587_v59, %v6266_v55 }
0x220b   :  { %10702 = vmatmul.mubr.msk.f32.gmra.mxu0 %vm143_vm2, %v12848_v30 }
0x220c   :  { %10704 = vmatprep.mubr.msk.f32.mxu0 %vm11353_vm3, %v11352_v12 }
0x2277   :  { %v6234_v11 = vpop.xlane.xlu1 %6233 }
0x2278   :  { %v6243_v39 = vmul.f32 0.0625, %v6234_v11 }
0x227a   :  { %v6248_v1 = vadd.f32 1e-05, %v6243_v39 }
0x227b   :  { %v6237_v54 = vpop.xlane.xlu0 %6236 }
0x227c   :  { %11242 = vrsqrt.f32 %v6248_v1  ;;  %v6244_v37 = vmul.f32 0.0625, %v6237_v54 }
0x227e   :  { %v6249_v5 = vadd.f32 1e-05, %v6244_v37 }
0x227f   :  { %v6240_v4 = vpop.xlane.xlu1 %6239 }
0x2280   :  { %11244 = vrsqrt.f32 %v6249_v5  ;;  %v6245_v7 = vmul.f32 0.0625, %v6240_v4 }
0x2282   :  { %v6250_v60 = vadd.f32 1e-05, %v6245_v7 }
0x2284   :  { %11246 = vrsqrt.f32 %v6250_v60 }
0x2289   :  { %v11243_v20 = vpop.eup %11242 }
0x228a   :  { %v6258_v3 = vmul.f32 %v11243_v20, %v6218_v0 }
0x228c   :  { %v6267_v63 = vmul.f32 %v9586_v45, %v6258_v3 }
0x228d   :  { %v11245_v24 = vpop.eup %11244 }
0x228e   :  { %v12862_v10 = vadd.f32 %v9587_v59, %v6267_v63  ;;  %v6259_v49 = vmul.f32 %v11245_v24, %v6219_v22 }
0x2290   :  { %10705 = vmatmul.mubr.msk.f32.gmra.mxu0 %vm143_vm2, %v12862_v10  ;;  %v6268_v17 = vmul.f32 %v9586_v45, %v6259_v49 }
0x2291   :  { %v11247_v14 = vpop.eup %11246  ;;  %10707 = vmatprep.mubr.msk.f32.mxu0 %vm11353_vm3, %v11352_v12 }
0x2292   :  { %v6277_v36 = vadd.f32 %v9587_v59, %v6268_v17  ;;  %v6260_v61 = vmul.f32 %v11247_v14, %v6220_v9 }
0x2294   :  { %10708 = vmatmul.mubr.msk.f32.gmra.mxu0 %vm143_vm2, %v6277_v36  ;;  %v6269_v44 = vmul.f32 %v9586_v45, %v6260_v61  ;;  %v9594_v45 = vld [vmem:[%s13612_s2 + $0x228] ss:$0 sm:$0xff] }
0x2295   :  { %10710 = vmatprep.mubr.msk.f32.mxu0 %vm11353_vm3, %v11352_v12 }
0x2296   :  { %v6278_v2 = vadd.f32 %v9587_v59, %v6269_v44 }
0x2298   :  { %10711 = vmatmul.mubr.msk.f32.gmra.mxu0 %vm143_vm2, %v6278_v2 }
0x2299   :  { %10738 = vmatprep.mubr.msk.f32.mxu0 %vm11353_vm3, %v11352_v12 }
0x22c7   :  { %v6364_v27 = vpop.f32.mrf.mxu0 }
0x22c8   :  { %v6365_v48 = vadd.f32 %v9588_v21, %v6364_v27 }
0x22c9   :  { %v10700_v56 = vpop.f32.mrf.mxu0 }
0x22ca   :  { %v6388_v16 = vmax.f32 %v6365_v48, 0.0 }
0x22cb   :  { %v6369_v43 = vpop.f32.mrf.mxu0 }
0x22cc   :  { %v6370_v6 = vadd.f32 %v9588_v21, %v6369_v43  ;;  %10718 = vmatmul.mubr.msk.f32.vlgmr.msra.gmra.mxu1 %vm143_vm2, %v6388_v16 }
0x22cd   :  { %v10703_v0 = vpop.f32.mrf.mxu0  ;;  %10720 = vmatprep.mubr.msk.f32.mxu1 %vm11353_vm3, %v11352_v12 }
0x22ce   :  { %v6389_v23 = vmax.f32 %v6370_v6, 0.0 }
0x22d0   :  { %10721 = vmatmul.mubr.msk.f32.gmra.mxu1 %vm143_vm2, %v6389_v23 }
0x22d1   :  { %10723 = vmatprep.mubr.msk.f32.mxu1 %vm11353_vm3, %v11352_v12 }
0x2350   :  { %v6374_v58 = vpop.f32.mrf.mxu0 }
0x2351   :  { %v6375_v53 = vadd.f32 %v9588_v21, %v6374_v58 }
0x2352   :  { %v10706_v22 = vpop.f32.mrf.mxu0 }
0x2353   :  { %v6390_v62 = vmax.f32 %v6375_v53, 0.0 }
0x2354   :  { %v6379_v25 = vpop.f32.mrf.mxu0 }
0x2355   :  { %v6380_v33 = vadd.f32 %v9588_v21, %v6379_v25  ;;  %10724 = vmatmul.mubr.msk.f32.gmra.mxu1 %vm143_vm2, %v6390_v62  ;;  %v6591_v25 = vld [vmem:[%s13612_s2 + $0x258] sm:$0x3f] }
0x2356   :  { %v10709_v34 = vpop.f32.mrf.mxu0  ;;  %10726 = vmatprep.mubr.msk.f32.mxu1 %vm11353_vm3, %v11352_v12 }
0x2357   :  { %v6391_v42 = vmax.f32 %v6380_v33, 0.0 }
0x2358   :  { %v6384_v15 = vpop.f32.mrf.mxu0 }
0x2359   :  { %v6385_v26 = vadd.f32 %v9588_v21, %v6384_v15  ;;  %10727 = vmatmul.mubr.msk.f32.gmra.mxu1 %vm143_vm2, %v6391_v42 }
0x235a   :  { %v10712_v9 = vpop.f32.mrf.mxu0  ;;  %10729 = vmatprep.mubr.msk.f32.mxu1 %vm11353_vm3, %v11352_v12 }
0x235b   :  { %v6392_v38 = vmax.f32 %v6385_v26, 0.0 }
0x235d   :  { %10730 = vmatmul.mubr.msk.f32.gmra.mxu1 %vm143_vm2, %v6392_v38 }
0x235e   :  { %10747 = vmatprep.mubr.msk.f32.mxu1 %vm11353_vm3, %v11352_v12 }
0x238c   :  { %v6478_v28 = vpop.f32.mrf.mxu1 }
0x238d   :  { %v6479_v37 = vadd.f32 %v9594_v45, %v6478_v28 }
0x238e   :  { %v10719_v13 = vpop.f32.mrf.mxu1 }
0x238f   :  { %v6502_v60 = vadd.f32 %v6479_v37, %v12842_v29 }
0x2390   :  { %v6483_v46 = vpop.f32.mrf.mxu1 }
0x2391   :  { %v6484_v59 = vadd.f32 %v9594_v45, %v6483_v46  ;;  %v6507_v20 = vsel %vm143_vm2, %v6502_v60, 0.0 }
0x2392   :  { %v10722_v19 = vpop.f32.mrf.mxu1 }
0x2393   :  { %v6503_v57 = vadd.f32 %v6484_v59, %v12848_v30 }
0x2395   :  { %v6510_v4 = vsel %vm143_vm2, %v6503_v57, 0.0 }
0x2415   :  { %v6488_v31 = vpop.f32.mrf.mxu1 }
0x2416   :  { %v6489_v18 = vadd.f32 %v9594_v45, %v6488_v31 }
0x2417   :  { %v10725_v32 = vpop.f32.mrf.mxu1 }
0x2418   :  { %v6504_v5 = vadd.f32 %v6489_v18, %v12862_v10 }
0x2419   :  { %v6493_v35 = vpop.f32.mrf.mxu1 }
0x241a   :  { %v6494_v41 = vadd.f32 %v9594_v45, %v6493_v35  ;;  %v6513_v30 = vsel %vm143_vm2, %v6504_v5, 0.0 }
0x241b   :  { %v10728_v51 = vpop.f32.mrf.mxu1 }
0x241c   :  { %v6505_v52 = vadd.f32 %v6494_v41, %v6277_v36  ;;  %v9600_v41 = vld [vmem:[%s13612_s2 + $0x240] ss:$0 sm:$0xff] }
0x241d   :  { %v6498_v55 = vpop.f32.mrf.mxu1 }
0x241e   :  { %v6499_v11 = vadd.f32 %v9594_v45, %v6498_v55  ;;  %v6516_v39 = vsel %vm143_vm2, %v6505_v52, 0.0 }
0x241f   :  { %6517 = vadd.xlane.f32.xlu1 %v6516_v39  ;;  %v10731_v1 = vpop.f32.mrf.mxu1 }
0x2420   :  { %v6506_v54 = vadd.f32 %v6499_v11, %v6278_v2 }
0x2422   :  { %v6519_v7 = vsel %vm143_vm2, %v6506_v54, 0.0 }
0x2423   :  { %6511 = vadd.xlane.f32.xlu1 %v6510_v4  ;;  %6520 = vadd.xlane.f32.xlu0 %v6519_v7 }
0x2427   :  { %6514 = vadd.xlane.f32.xlu0 %v6513_v30 }
0x242b   :  { %6508 = vadd.xlane.f32.xlu0 %v6507_v20 }
0x24a8   :  { %v6518_v3 = vpop.xlane.xlu1 %6517 }
0x24a9   :  { %v6525_v63 = vmul.f32 0.0625, %v6518_v3 }
0x24ab   :  { %v6530_v24 = vsub.f32 %v6505_v52, %v6525_v63 }
0x24ac   :  { %v6512_v49 = vpop.xlane.xlu1 %6511  ;;  %v6521_v17 = vpop.xlane.xlu0 %6520 }
0x24ad   :  { %v6523_v10 = vmul.f32 0.0625, %v6512_v49  ;;  %v6526_v14 = vmul.f32 0.0625, %v6521_v17  ;;  %v6535_v36 = vmul.f32 %v6530_v24, %v6530_v24 }
0x24af   :  { %v6528_v61 = vsub.f32 %v6503_v57, %v6523_v10  ;;  %v6531_v44 = vsub.f32 %v6506_v54, %v6526_v14  ;;  %v6546_v2 = vsel %vm143_vm2, %v6535_v36, 0.0  ;;  %v9601_v57 = vld [vmem:[%s13612_s2 + $0x248] ss:$0 sm:$0xff]  ;;  %v6590_v36 = vld [vmem:[%s13612_s2 + $0x250] sm:$0x3f] }
0x24b0   :  { %6547 = vadd.xlane.f32.xlu0 %v6546_v2  ;;  %v6515_v29 = vpop.xlane.xlu0 %6514  ;;  %v6593_v2 = vld [vmem:[%s13612_s2 + $0x268] sm:$0xff] }
0x24b1   :  { %v6524_v21 = vmul.f32 0.0625, %v6515_v29  ;;  %v6533_v27 = vmul.f32 %v6528_v61, %v6528_v61  ;;  %v6536_v48 = vmul.f32 %v6531_v44, %v6531_v44  ;;  %v6592_v29 = vld [vmem:[%s13612_s2 + $0x260] sm:$0xff] }
0x24b3   :  { %v6529_v56 = vsub.f32 %v6504_v5, %v6524_v21  ;;  %v6540_v16 = vsel %vm143_vm2, %v6533_v27, 0.0  ;;  %v6549_v43 = vsel %vm143_vm2, %v6536_v48, 0.0 }
0x24b4   :  { %6541 = vadd.xlane.f32.xlu0 %v6540_v16  ;;  %6550 = vadd.xlane.f32.xlu1 %v6549_v43  ;;  %v6509_v6 = vpop.xlane.xlu0 %6508 }
0x24b5   :  { %v6522_v0 = vmul.f32 0.0625, %v6509_v6  ;;  %v6534_v23 = vmul.f32 %v6529_v56, %v6529_v56 }
0x24b7   :  { %v6527_v58 = vsub.f32 %v6502_v60, %v6522_v0  ;;  %v6543_v53 = vsel %vm143_vm2, %v6534_v23, 0.0 }
0x24b8   :  { %6544 = vadd.xlane.f32.xlu1 %v6543_v53  ;;  %v11349_v53 = vld [vmem:[%s13613_s0] sm:$0xff] }
0x24b9   :  { %v6532_v22 = vmul.f32 %v6527_v58, %v6527_v58 }
0x24bb   :  { %v6537_v62 = vsel %vm143_vm2, %v6532_v22, 0.0  ;;  %v6990_v22 = vld [vmem:[%s13612_s2 + $0x2a0] sm:$0xff] }
0x24bc   :  { %6538 = vadd.xlane.f32.xlu1 %v6537_v62  ;;  %v6989_v62 = vld [vmem:[%s13612_s2 + $0x298] sm:$0xff] }
0x24ca   :  { %6597 = vperm.xlu0 %11048, %v6591_v25   ;;  %v18_v25 = vld [vmem:[%s13614_s1 + $0x10] sm:$0xff] }
0x2539   :  { %v6548_v33 = vpop.xlane.xlu0 %6547 }
0x253a   :  { %v6555_v34 = vmul.f32 0.0625, %v6548_v33 }
0x253c   :  { %v6560_v42 = vadd.f32 1e-05, %v6555_v34  ;;  %v6848_v34 = vrot.slane %v18_v25, 6 }
0x253d   :  { %v6551_v15 = vpop.xlane.xlu1 %6550  ;;  %v6542_v26 = vpop.xlane.xlu0 %6541 }
0x253e   :  { %11248 = vrsqrt.f32 %v6560_v42  ;;  %v6556_v9 = vmul.f32 0.0625, %v6551_v15  ;;  %v6553_v38 = vmul.f32 0.0625, %v6542_v26  ;;  %v11350_v42 = vld [vmem:[%s13614_s1 + $0x8] sm:$0xff]  ;;  %v9606_v26 = vld [vmem:[%s13612_s2 + $0x270] ss:$0 sm:$0xff] }
0x253f   :  { %v6847_v15 = vrot.slane %v11350_v42, 6 }
0x2540   :  { %v6561_v28 = vadd.f32 1e-05, %v6556_v9  ;;  %v6558_v13 = vadd.f32 1e-05, %v6553_v38  ;;  %v6868_v38 = vld [vmem:[%s13612_s2 + $0x280] sm:$0xff] }
0x2541   :  { %v6545_v46 = vpop.xlane.xlu1 %6544 }
0x2542   :  { %11250 = vrsqrt.f32 %v6561_v28  ;;  %v6554_v19 = vmul.f32 0.0625, %v6545_v46 }
0x2543   :  { %11252 = vrsqrt.f32 %v6558_v13 }
0x2544   :  { %v6559_v31 = vadd.f32 1e-05, %v6554_v19  ;;  %v6849_v19 = vsel %vm1833_vm12, %v6847_v15, %v6848_v34 }
0x2545   :  { %v6539_v32 = vpop.xlane.xlu1 %6538  ;;  %v6598_v21 = vpop.permute.xlu0 %6597 }
0x2546   :  { %11254 = vrsqrt.f32 %v6559_v31  ;;  %v6552_v45 = vmul.f32 0.0625, %v6539_v32 }
0x2548   :  { %v6557_v35 = vadd.f32 1e-05, %v6552_v45 }
0x254a   :  { %11256 = vrsqrt.f32 %v6557_v35 }
0x254b   :  { %v11249_v59 = vpop.eup %11248 }
0x254c   :  { %v6570_v51 = vmul.f32 %v11249_v59, %v6530_v24  ;;  %v6865_v59 = vsel %vm1830_vm11, %v6849_v19, %v11667_v8 }
0x254e   :  { %v6579_v52 = vmul.f32 %v9600_v41, %v6570_v51 }
0x254f   :  { %v11251_v55 = vpop.eup %11250 }
0x2550   :  { %v11253_v18 = vpop.eup %11252  ;;  %v6571_v11 = vmul.f32 %v11251_v55, %v6531_v44  ;;  %v6588_v1 = vadd.f32 %v9601_v57, %v6579_v52  ;;  %v11351_v52 = vld [vmem:[%s13614_s1 + $0x20] sm:$0xff] }
0x2551   :  { %v6568_v54 = vmul.f32 %v11253_v18, %v6528_v61  ;;  %v6860_v55 = vrot.slane %v11351_v52, 2 }
0x2552   :  { %v6580_v39 = vmul.f32 %v9600_v41, %v6571_v11  ;;  %v6679_v30 = vrot.slane %v6588_v1, 4 }
0x2553   :  { %v11255_v37 = vpop.eup %11254  ;;  %v6577_v20 = vmul.f32 %v9600_v41, %v6568_v54  ;;  %v6993_v54 = vld [vmem:[%s13612_s2 + $0x2b8] sm:$0xff] }
0x2554   :  { %v6569_v5 = vmul.f32 %v11255_v37, %v6529_v56  ;;  %v6589_v4 = vadd.f32 %v9601_v57, %v6580_v39  ;;  %v6875_v37 = vrot.slane %v6868_v38, 4 }
0x2555   :  { %v6586_v17 = vadd.f32 %v9601_v57, %v6577_v20 }
0x2556   :  { %v6681_v7 = vrot.slane %v6589_v4, 4  ;;  %v6578_v60 = vmul.f32 %v9600_v41, %v6569_v5  ;;  %v6869_v5 = vld [vmem:[%s13612_s2 + $0x288] sm:$0xff] }
0x2557   :  { %v11257_v3 = vpop.eup %11256  ;;  %v9615_v4 = vld [vmem:[%s13612_s2 + $0x2a8] ss:$0 sm:$0xff] }
0x2558   :  { %10742 = vmatpush3.msk.msra.mxu1 %vm1830_vm11, %v6681_v7  ;;  %v6587_v63 = vadd.f32 %v9601_v57, %v6578_v60  ;;  %v6682_v24 = vsel %vm1830_vm11, %v6679_v30, %v6681_v7  ;;  %v6567_v49 = vmul.f32 %v11257_v3, %v6527_v58  ;;  %v6871_v58 = vld [vmem:[%s13612_s2 + $0x278] sm:$0x7f]  ;;  %v6870_v7 = vld [vmem:[%s13612_s2 + $0x290] sm:$0xf]  ;;  %v6876_v3 = vrot.slane %v6869_v5, 4 }
0x2559   :  { %10743 = vmatprep.subr.mxu1 %v11352_v12 }
0x255a   :  { %10733 = vmatpush3.msk.msra.mxu0 %vm1830_vm11, %v6587_v63  ;;  %10744 = vmatpush3.msra.mxu1 %v6682_v24  ;;  %v6678_v10 = vrot.slane %v6587_v63, 4  ;;  %v6576_v14 = vmul.f32 %v9600_v41, %v6567_v49  ;;  %v21_v41 = vld [vmem:[%s13614_s1 + $0x28] sm:$0xff]  ;;  %v6883_v49 = vsel %vm1830_vm11, %v6870_v7, %v6875_v37 }
0x255b   :  { %10734 = vmatprep.subr.mxu0 %v11352_v12  ;;  %10745 = vmatprep.subr.mxu1 %v11352_v12  ;;  %v6861_v18 = vrot.slane %v21_v41, 2 }
0x255c   :  { %10735 = vmatpush3.msra.mxu0 %v6586_v17  ;;  %v6680_v61 = vsel %vm1830_vm11, %v6678_v10, %v6679_v30  ;;  %v6585_v44 = vadd.f32 %v9601_v57, %v6576_v14 }
0x255d   :  { %10736 = vmatprep.subr.mxu0 %v11352_v12  ;;  %10746 = vmatpush3.msra.mxu1 %v6680_v61  ;;  %v6862_v39 = vsel %vm1728_vm10, %v6860_v55, %v6861_v18  ;;  %v6878_v61 = vrot.slane %v6870_v7, 4 }
0x255e   :  { %10737 = vmatpush3.msra.mxu0 %v6585_v44  ;;  %10748 = vmatmul.mubr.msk.f32.vlgmr.msra.gmra.mxu1 %vm2380_vm14, %v6590_v36 }
0x255f   :  { %10739 = vmatmul.mubr.msk.f32.vlgmr.msra.gmra.mxu0 %vm2380_vm14, %v6590_v36  ;;  %10774 = vmatprep.subr.mxu1 %v11352_v12 }
0x2560   :  { %10778 = vmatprep.mubr.msk.f32.mxu1 %vm11353_vm3, %v11352_v12  ;;  %10750 = vmatprep.subr.mxu0 %v6593_v2 }
0x2561   :  { %10751 = vmatpush3.msra.mxu0 %v6593_v2  ;;  %10775 = vmatpush3.msra.mxu1 %v6990_v22  ;;  %v6877_v2 = vsel %vm1830_vm11, %v6875_v37, %v6876_v3 }
0x2562   :  { %10752 = vmatprep.subr.mxu0 %v6592_v29  ;;  %10776 = vmatprep.subr.mxu1 %v11352_v12 }
0x2563   :  { %10753 = vmatpush3.msra.mxu0 %v6592_v29  ;;  %10777 = vmatpush3.msra.mxu1 %v6989_v62 }
0x2564   :  { %10757 = vmatprep.subr.mxu0 %v11352_v12  ;;  %10812 = vmatprep.subr.mxu1 %v11352_v12 }
0x261e   :  { %v6753_v27 = vpop.f32.mrf.mxu1 }
0x261f   :  { %v6754_v48 = vadd.f32 %v6753_v27, %v6598_v21  ;;  %v6672_v56 = vpop.f32.mrf.mxu0 }
0x2620   :  { %v6673_v16 = vadd.f32 %v6672_v56, %v6598_v21  ;;  %v10749_v43 = vpop.f32.mrf.mxu1 }
0x2621   :  { %v6758_v6 = vrot.slane %v6754_v48, 2  ;;  %v10740_v0 = vpop.f32.mrf.mxu0  ;;  %v6879_v48 = vsel %vm1830_vm11, %v6876_v3, %v6878_v61 }
0x2623   :  { %v6760_v23 = vsel %vm1728_vm10, %v6673_v16, %v6758_v6 }
0x2624   :  { %10754 = vmatprep.mubr.msk.f32.mxu0 %vm143_vm2, %v6760_v23  ;;  %v13073_v23 = vld [vmem:[%s13612_s2 + $0x2c0] ss:$0 sm:$0xff] }
0x2625   :  { %10755 = vmatmul.mubr.msk.f32.vlgmr.msra.gmra.mxu0 %vm143_vm2, %v6758_v6 }
0x2626   :  { %10758 = vmatpush3.msk.msra.mxu0 %vm42_vm0, %v6871_v58  ;;  %10759 = vmatprep.mubr.msk.f32.mxu0 %vm11353_vm3, %v11352_v12 }
0x2627   :  { %10793 = vmatprep.subr.mxu0 %v11352_v12 }
0x2629   :  { %10760 = vmatmul.mubr.msk.f32.vlgmr.msra.gmra.mxu0 %vm35_vm1, %v11349_v53 }
0x262a   :  { %10762 = vmatprep.mubr.msk.f32.mxu0 %vm11353_vm3, %v11352_v12  ;;  %10794 = vmatpush3.msra.mxu0 %v6993_v54 }
0x262b   :  { %10795 = vmatprep.subr.mxu0 %v11352_v12 }
0x26e5   :  { %v10756_v33 = vpop.f32.mrf.mxu0 }
0x26e6   :  { %v12976_v13 = vadd.f32 %v10756_v33, %v9606_v26 }
0x26e7   :  { %v6836_v9 = vpop.f32.mrf.mxu0 }
0x26e8   :  { %v6837_v28 = vadd.f32 %v9606_v26, %v6836_v9  ;;  %v6855_v51 = vrot.slane %v12976_v13, 2 }
0x26e9   :  { %v6965_v46 = vpop.f32.mrf.mxu0 }
0x26ea   :  { %v6864_v31 = vsel %vm1728_vm10, %v6837_v28, %v6847_v15  ;;  %9373 = vst.msk [vmem:[%s13615_s3 + $0x18] sm:$0xff] %vm35_vm1, %v6837_v28  ;;  %v12984_v32 = vadd.f32 %v6965_v46, %v6868_v38  ;;  %v6854_v45 = vrot.slane %v6837_v28, 2  ;;  %v6867_v1 = vsel %vm1833_vm12, %v6855_v51, %v6862_v39 }
0x26eb   :  { %10763 = vmatmul.mubr.msk.f32.gmra.mxu0 %vm35_vm1, %v6864_v31  ;;  %v10761_v35 = vpop.f32.mrf.mxu0 }
0x26ec   :  { %10779 = vmatmul.mubr.msk.f32.vlgmr.msra.gmra.mxu1 %vm143_vm2, %v12984_v32  ;;  %10765 = vmatprep.mubr.msk.f32.mxu0 %vm11353_vm3, %v11352_v12  ;;  %v6856_v57 = vsel %vm1728_vm10, %v6854_v45, %v6855_v51 }
0x26ed   :  { %10781 = vmatprep.mubr.msk.f32.mxu1 %vm11353_vm3, %v11352_v12  ;;  %v6866_v11 = vsel %vm1830_vm11, %v11667_v8, %v6856_v57  ;;  %v6992_v8 = vld [vmem:[%s13612_s2 + $0x2b0] sm:$0xff] }
0x26ee   :  { %10796 = vmatpush3.msra.mxu0 %v6992_v8 }
0x26ef   :  { %10766 = vmatmul.mubr.msk.f32.gmra.mxu0 %vm35_vm1, %v6865_v59  ;;  %10842 = vmatprep.subr.mxu0 %v11352_v12 }
0x26f0   :  { %10768 = vmatprep.mubr.msk.f32.mxu0 %vm11353_vm3, %v11352_v12 }
0x26f3   :  { %10769 = vmatmul.mubr.msk.f32.gmra.mxu0 %vm35_vm1, %v6866_v11 }
0x26f4   :  { %10771 = vmatprep.mubr.msk.f32.mxu0 %vm11353_vm3, %v11352_v12 }
0x26f7   :  { %10772 = vmatmul.mubr.msk.f32.gmra.mxu0 %vm35_vm1, %v6867_v1 }
0x26f8   :  { %10797 = vmatprep.mubr.msk.f32.mxu0 %vm11353_vm3, %v11352_v12 }
0x27ab   :  { %v6970_v60 = vpop.f32.mrf.mxu0 }
0x27ac   :  { %v13033_v30 = vadd.f32 %v6970_v60, %v6869_v5  ;;  %v7092_v20 = vpop.f32.mrf.mxu1 }
0x27ad   :  { %v13035_v63 = vadd.f32 %v9615_v4, %v7092_v20  ;;  %v10764_v24 = vpop.f32.mrf.mxu0 }
0x27ae   :  { %10782 = vmatmul.mubr.msk.f32.gmra.mxu1 %vm143_vm2, %v13033_v30  ;;  %v10780_v17 = vpop.f32.mrf.mxu1 }
0x27af   :  { %v6975_v10 = vpop.f32.mrf.mxu0  ;;  %10784 = vmatprep.mubr.msk.f32.mxu1 %vm11353_vm3, %v11352_v12  ;;  %v7116_v14 = vmax.f32 %v13035_v63, 0.0  ;;  %7269 = vrot.lane.b32.xlu0 %v13035_v63, %s11355_s4 }
0x27b0   :  { %v13045_v36 = vadd.f32 %v6975_v10, %v6883_v49 }
0x27b1   :  { %v10767_v44 = vpop.f32.mrf.mxu0  ;;  %10798 = vmatmul.mubr.msk.f32.vlgmr.msra.gmra.mxu0 %vm143_vm2, %v7116_v14 }
0x27b2   :  { %10785 = vmatmul.mubr.msk.f32.gmra.mxu1 %vm143_vm2, %v13045_v36  ;;  %10800 = vmatprep.mubr.msk.f32.mxu0 %vm11353_vm3, %v11352_v12 }
0x27b3   :  { %v6980_v29 = vpop.f32.mrf.mxu0  ;;  %10787 = vmatprep.mubr.msk.f32.mxu1 %vm11353_vm3, %v11352_v12 }
0x27b4   :  { %v13055_v21 = vadd.f32 %v6980_v29, %v6877_v2 }
0x27b5   :  { %v10770_v27 = vpop.f32.mrf.mxu0 }
0x27b6   :  { %10788 = vmatmul.mubr.msk.f32.gmra.mxu1 %vm143_vm2, %v13055_v21 }
0x27b7   :  { %v6985_v56 = vpop.f32.mrf.mxu0  ;;  %10790 = vmatprep.mubr.msk.f32.mxu1 %vm11353_vm3, %v11352_v12 }
0x27b8   :  { %v13062_v16 = vadd.f32 %v6985_v56, %v6879_v48 }
0x27b9   :  { %v10773_v43 = vpop.f32.mrf.mxu0 }
0x27ba   :  { %10791 = vmatmul.mubr.msk.f32.gmra.mxu1 %vm143_vm2, %v13062_v16 }
0x27bb   :  { %10818 = vmatprep.mubr.msk.f32.mxu1 %vm11353_vm3, %v11352_v12 }
0x2821   :  { %v7270_v18 = vpop.permute.xlu0 %7269 }
0x286e   :  { %v7097_v6 = vpop.f32.mrf.mxu1 }
0x286f   :  { %v13068_v0 = vadd.f32 %v9615_v4, %v7097_v6 }
0x2870   :  { %v10783_v58 = vpop.f32.mrf.mxu1 }
0x2871   :  { %v7206_v53 = vpop.f32.mrf.mxu0  ;;  %v7117_v22 = vmax.f32 %v13068_v0, 0.0 }
0x2872   :  { %v7207_v62 = vadd.f32 %v13073_v23, %v7206_v53  ;;  %v7102_v25 = vpop.f32.mrf.mxu1 }
0x2873   :  { %v13077_v33 = vadd.f32 %v9615_v4, %v7102_v25  ;;  %10801 = vmatmul.mubr.msk.f32.gmra.mxu0 %vm143_vm2, %v7117_v22  ;;  %v10799_v34 = vpop.f32.mrf.mxu0 }
0x2874   :  { %v7230_v42 = vsub.f32 0.0, %v7207_v62  ;;  %v10786_v15 = vpop.f32.mrf.mxu1  ;;  %10803 = vmatprep.mubr.msk.f32.mxu0 %vm11353_vm3, %v11352_v12 }
0x2875   :  { %7539 = vrot.lane.b32.xlu0 %v13077_v33, %s11354_s30  ;;  %7273 = vrot.lane.b32.xlu1 %v13077_v33, %s11355_s4  ;;  %v7118_v26 = vmax.f32 %v13077_v33, 0.0 }
0x2876   :  { %v7235_v9 = vmul.f32 1.442695, %v7230_v42  ;;  %v7107_v38 = vpop.f32.mrf.mxu1 }
0x2877   :  { %v13087_v28 = vadd.f32 %v9615_v4, %v7107_v38  ;;  %10804 = vmatmul.mubr.msk.f32.gmra.mxu0 %vm143_vm2, %v7118_v26 }
0x2878   :  { %11258 = vpow2.f32 %v7235_v9  ;;  %v10789_v46 = vpop.f32.mrf.mxu1  ;;  %10806 = vmatprep.mubr.msk.f32.mxu0 %vm11353_vm3, %v11352_v12 }
0x2879   :  { %v7119_v19 = vmax.f32 %v13087_v28, 0.0  ;;  %7537 = vrot.lane.b32.xlu0 %v13068_v0, %s11354_s30  ;;  %7271 = vrot.lane.b32.xlu1 %v13068_v0, %s11355_s4 }
0x287a   :  { %v7112_v31 = vpop.f32.mrf.mxu1 }
0x287b   :  { %v13097_v45 = vadd.f32 %v9615_v4, %v7112_v31  ;;  %10807 = vmatmul.mubr.msk.f32.gmra.mxu0 %vm143_vm2, %v7119_v19 }
0x287c   :  { %v10792_v35 = vpop.f32.mrf.mxu1  ;;  %10809 = vmatprep.mubr.msk.f32.mxu0 %vm11353_vm3, %v11352_v12 }
0x287d   :  { %v7120_v59 = vmax.f32 %v13097_v45, 0.0  ;;  %7535 = vrot.lane.b32.xlu0 %v13035_v63, %s11354_s30  ;;  %7263 = vrot.lane.b32.xlu1 %v13035_v63, %s11357_s6 }
0x287f   :  { %10810 = vmatmul.mubr.msk.f32.gmra.mxu0 %vm143_vm2, %v7120_v59 }
0x2880   :  { %10848 = vmatprep.mubr.msk.f32.mxu0 %vm11353_vm3, %v11352_v12 }
0x2881   :  { %7531 = vrot.lane.b32.xlu0 %v13068_v0, %s11356_s5  ;;  %7265 = vrot.lane.b32.xlu1 %v13068_v0, %s11357_s6 }
0x2885   :  { %v11259_v41 = vpop.eup %11258  ;;  %7267 = vrot.lane.b32.xlu1 %v13077_v33, %s11357_s6 }
0x2886   :  { %v7245_v51 = vadd.f32 1.0, %v11259_v41 }
0x2888   :  { %11260 = vrcp.f32 %v7245_v51 }
0x2889   :  { %7529 = vrot.lane.b32.xlu1 %v13035_v63, %s11356_s5 }
0x288d   :  { %7533 = vrot.lane.b32.xlu1 %v13077_v33, %s11356_s5 }
0x2895   :  { %v11261_v52 = vpop.eup %11260 }
0x2896   :  { %v13120_v55 = vmul.f32 20.0, %v11261_v52 }
0x2898   :  { %v7370_v57 = vadd.f32 2.0, %v13120_v55  ;;  %v7636_v26 = vadd.f32 4.0, %v13120_v55 }
0x289a   :  { %7375 = vperm.xlu0 %11048, %v7370_v57  }
0x28e7   :  { %v7540_v11 = vpop.permute.xlu0 %7539  ;;  %v7274_v39 = vpop.permute.xlu1 %7273 }
0x28e8   :  { %10813 = vmatpush3.xpose.msk.msra.mxu1 %vm329_vm4, %v7274_v39  ;;  %10843 = vmatpush3.xpose.msk.msra.mxu0 %vm329_vm4, %v7540_v11 }
0x28e9   :  { %10814 = vmatprep.subr.mxu1 %v11352_v12  ;;  %10844 = vmatprep.subr.mxu0 %v11352_v12 }
0x28eb   :  { %v7538_v1 = vpop.permute.xlu0 %7537  ;;  %v7272_v54 = vpop.permute.xlu1 %7271 }
0x28ec   :  { %10815 = vmatpush3.xpose.msk.msra.mxu1 %vm329_vm4, %v7272_v54  ;;  %10845 = vmatpush3.xpose.msk.msra.mxu0 %vm329_vm4, %v7538_v1 }
0x28ed   :  { %10816 = vmatprep.subr.mxu1 %v11352_v12  ;;  %10846 = vmatprep.subr.mxu0 %v11352_v12 }
0x28ef   :  { %v7536_v8 = vpop.permute.xlu0 %7535  ;;  %v7264_v37 = vpop.permute.xlu1 %7263 }
0x28f0   :  { %10817 = vmatpush3.xpose.msk.msra.mxu1 %vm329_vm4, %v7270_v18  ;;  %10847 = vmatpush3.xpose.msk.msra.mxu0 %vm329_vm4, %v7536_v8 }
0x28f1   :  { %10827 = vmatprep.subr.mxu1 %v11352_v12  ;;  %10872 = vmatprep.subr.mxu0 %v11352_v12 }
0x28f3   :  { %v7266_v5 = vpop.permute.xlu1 %7265  ;;  %10819 = vmatmul.mubr.msk.f32.vlgmr.msra.gmra.mxu1 %vm329_vm4, %v7264_v37  ;;  %v7532_v60 = vpop.permute.xlu0 %7531 }
0x28f4   :  { %10821 = vmatprep.mubr.msk.f32.mxu1 %vm11353_vm3, %v11352_v12 }
0x28f7   :  { %v7268_v4 = vpop.permute.xlu1 %7267  ;;  %10822 = vmatmul.mubr.msk.f32.gmra.mxu1 %vm329_vm4, %v7266_v5 }
0x28f8   :  { %10824 = vmatprep.mubr.msk.f32.mxu1 %vm11353_vm3, %v11352_v12 }
0x28fb   :  { %v7530_v7 = vpop.permute.xlu1 %7529  ;;  %10825 = vmatmul.mubr.msk.f32.gmra.mxu1 %vm329_vm4, %v7268_v4 }
0x28fc   :  { %10849 = vmatmul.mubr.msk.f32.vlgmr.msra.gmra.mxu0 %vm329_vm4, %v7530_v7  ;;  %10833 = vmatprep.mubr.msk.f32.mxu1 %vm11353_vm3, %v11352_v12 }
0x28fd   :  { %10851 = vmatprep.mubr.msk.f32.mxu0 %vm11353_vm3, %v11352_v12 }
0x28ff   :  { %v7534_v20 = vpop.permute.xlu1 %7533 }
0x2900   :  { %10852 = vmatmul.mubr.msk.f32.gmra.mxu0 %vm329_vm4, %v7532_v60 }
0x2901   :  { %10854 = vmatprep.mubr.msk.f32.mxu0 %vm11353_vm3, %v11352_v12 }
0x2904   :  { %10855 = vmatmul.mubr.msk.f32.gmra.mxu0 %vm329_vm4, %v7534_v20 }
0x2905   :  { %10874 = vmatprep.mubr.msk.f32.mxu0 %vm11353_vm3, %v11352_v12 }
0x2915   :  { %v7376_v19 = vpop.permute.xlu0 %7375 }
0x2916   :  { %vm7388_vm0 = vcmp.gt.f32.partialorder %v11469_v50, %v7376_v19 }
0x2933   :  { %v7211_v3 = vpop.f32.mrf.mxu0 }
0x2934   :  { %v7212_v24 = vadd.f32 %v13073_v23, %v7211_v3 }
0x2935   :  { %v10802_v49 = vpop.f32.mrf.mxu0 }
0x2936   :  { %v7231_v17 = vsub.f32 0.0, %v7212_v24 }
0x2937   :  { %v7216_v10 = vpop.f32.mrf.mxu0 }
0x2938   :  { %v7237_v14 = vmul.f32 1.442695, %v7231_v17  ;;  %v7217_v61 = vadd.f32 %v13073_v23, %v7216_v10 }
0x2939   :  { %v10805_v44 = vpop.f32.mrf.mxu0 }
0x293a   :  { %11262 = vpow2.f32 %v7237_v14  ;;  %v7232_v2 = vsub.f32 0.0, %v7217_v61 }
0x293b   :  { %v13155_v29 = vpop.f32.mrf.mxu0 }
0x293c   :  { %v7239_v27 = vmul.f32 1.442695, %v7232_v2 }
0x293d   :  { %v10808_v48 = vpop.f32.mrf.mxu0 }
0x293e   :  { %11264 = vpow2.f32 %v7239_v27 }
0x293f   :  { %v13157_v56 = vpop.f32.mrf.mxu0 }
0x2941   :  { %v10811_v43 = vpop.f32.mrf.mxu0 }
0x2947   :  { %v11263_v6 = vpop.eup %11262 }
0x2948   :  { %v7246_v58 = vadd.f32 1.0, %v11263_v6 }
0x294a   :  { %11266 = vrcp.f32 %v7246_v58 }
0x294b   :  { %v11265_v53 = vpop.eup %11264 }
0x294c   :  { %v7247_v22 = vadd.f32 1.0, %v11265_v53 }
0x294e   :  { %11268 = vrcp.f32 %v7247_v22 }
0x2957   :  { %v11267_v62 = vpop.eup %11266 }
0x2958   :  { %v7256_v25 = vmul.f32 20.0, %v11267_v62 }
0x295a   :  { %v7371_v34 = vadd.f32 2.0, %v7256_v25  ;;  %v7637_v46 = vadd.f32 4.0, %v7256_v25 }
0x295b   :  { %v11269_v42 = vpop.eup %11268 }
0x295c   :  { %7380 = vperm.xlu1 %11049, %v7371_v34   ;;  %v7257_v15 = vmul.f32 20.0, %v11269_v42 }
0x295e   :  { %v7372_v9 = vadd.f32 2.0, %v7257_v15  ;;  %v7638_v38 = vadd.f32 4.0, %v7257_v15 }
0x2960   :  { %7641 = vperm.xlu1 %11049, %v7636_v26   ;;  %7385 = vperm.xlu0 %11048, %v7372_v9  }
0x2964   :  { %7651 = vperm.xlu1 %11049, %v7638_v38   ;;  %7646 = vperm.xlu0 %11048, %v7637_v46  }
0x2968   :  { %7419 = vrot.lane.b32.xlu1 %v13077_v33, %s11360_s10  ;;  %7417 = vrot.lane.b32.xlu0 %v13068_v0, %s11360_s10 }
0x296c   :  { %7415 = vrot.lane.b32.xlu1 %v13035_v63, %s11360_s10 }
0x2970   :  { %7685 = vrot.lane.b32.xlu1 %v13077_v33, %s11359_s9 }
0x29b3   :  { %v7353_v31 = vpop.f32.mrf.mxu1 }
0x29b4   :  { %v7367_v35 = vmul.f32 0.2236068, %v7353_v31 }
0x29b5   :  { %v10820_v59 = vpop.f32.mrf.mxu1 }
0x29b6   :  { %v7391_v41 = vsel %vm7388_vm0, -1e+18, %v7367_v35 }
0x29b7   :  { %v7394_v51 = vadd.f32 %v7391_v41, %v7367_v35  ;;  %v7358_v52 = vpop.f32.mrf.mxu1 }
0x29b8   :  { %v7368_v4 = vmul.f32 0.2236068, %v7358_v52 }
0x29b9   :  { %v10823_v55 = vpop.f32.mrf.mxu1  ;;  %v7397_v57 = vsel %vm2380_vm14, %v7394_v51, -inf }
0x29ba   :  { %7398 = vmax.xlane.f32.xlu0 %v7397_v57 }
0x29bb   :  { %v7363_v18 = vpop.f32.mrf.mxu1 }
0x29bc   :  { %v7619_v11 = vpop.f32.mrf.mxu0  ;;  %v7369_v3 = vmul.f32 0.2236068, %v7363_v18 }
0x29bd   :  { %v10826_v39 = vpop.f32.mrf.mxu1  ;;  %v7633_v24 = vmul.f32 0.2236068, %v7619_v11 }
0x29be   :  { %v10850_v1 = vpop.f32.mrf.mxu0 }
0x29c0   :  { %v7624_v54 = vpop.f32.mrf.mxu0 }
0x29c1   :  { %v7634_v2 = vmul.f32 0.2236068, %v7624_v54 }
0x29c2   :  { %v10853_v8 = vpop.f32.mrf.mxu0 }
0x29c4   :  { %v7629_v37 = vpop.f32.mrf.mxu0 }
0x29c5   :  { %v7635_v27 = vmul.f32 0.2236068, %v7629_v37 }
0x29c6   :  { %v10856_v5 = vpop.f32.mrf.mxu0 }
0x29d7   :  { %v7381_v7 = vpop.permute.xlu1 %7380 }
0x29d8   :  { %vm7389_vm12 = vcmp.gt.f32.partialorder %v11855_v40, %v7381_v7 }
0x29d9   :  { %v7392_v60 = vsel %vm7389_vm12, -1e+18, %v7368_v4 }
0x29da   :  { %v7395_v20 = vadd.f32 %v7392_v60, %v7368_v4  ;;  %v7222_v4 = vadd.f32 %v13073_v23, %v13155_v29 }
0x29db   :  { %v7642_v49 = vpop.permute.xlu1 %7641  ;;  %v13171_v17 = vpop.permute.xlu0 %7385 }
0x29dc   :  { %vm7654_vm5 = vcmp.gt.f32.partialorder %v11469_v50, %v7642_v49  ;;  %vm7390_vm6 = vcmp.gt.f32.partialorder %v11859_v47, %v13171_v17  ;;  %v7400_v10 = vsel %vm2380_vm14, %v7395_v20, -inf }
0x29dd   :  { %v7657_v14 = vsel %vm7654_vm5, -1e+18, %v7633_v24  ;;  %v7393_v61 = vsel %vm7390_vm6, -1e+18, %v7369_v3  ;;  %7401 = vmax.xlane.f32.xlu1 %v7400_v10  ;;  %v7227_v10 = vadd.f32 %v13073_v23, %v13157_v56 }
0x29de   :  { %v7660_v44 = vadd.f32 %v7657_v14, %v7633_v24  ;;  %v7396_v58 = vadd.f32 %v7393_v61, %v7369_v3  ;;  %v7233_v3 = vsub.f32 0.0, %v7222_v4 }
0x29df   :  { %v13177_v48 = vpop.permute.xlu1 %7651  ;;  %v7647_v43 = vpop.permute.xlu0 %7646 }
0x29e0   :  { %vm7656_vm7 = vcmp.gt.f32.partialorder %v11859_v47, %v13177_v48  ;;  %vm7655_vm8 = vcmp.gt.f32.partialorder %v11855_v40, %v7647_v43  ;;  %v7663_v6 = vsel %vm2380_vm14, %v7660_v44, -inf  ;;  %v7403_v34 = vsel %vm2387_vm15, %v7396_v58, -inf }
0x29e1   :  { %v7659_v53 = vsel %vm7656_vm7, -1e+18, %v7635_v27  ;;  %v7658_v22 = vsel %vm7655_vm8, -1e+18, %v7634_v2  ;;  %7664 = vmax.xlane.f32.xlu0 %v7663_v6  ;;  %v7241_v49 = vmul.f32 1.442695, %v7233_v3 }
0x29e2   :  { %v7661_v62 = vadd.f32 %v7658_v22, %v7634_v2  ;;  %v7662_v15 = vadd.f32 %v7659_v53, %v7635_v27  ;;  %v7978_v6 = vrot.slane %v13097_v45, 4  ;;  %v7975_v22 = vrot.slane %v13077_v33, 4 }
0x29e3   :  { %v7420_v25 = vpop.permute.xlu1 %7419  ;;  %v7418_v26 = vpop.permute.xlu0 %7417 }
0x29e4   :  { %10828 = vmatpush3.msk.msra.mxu1 %vm1830_vm11, %v7420_v25  ;;  %v7666_v42 = vsel %vm2380_vm14, %v7661_v62, -inf  ;;  %v7669_v38 = vsel %vm2387_vm15, %v7662_v15, -inf }
0x29e5   :  { %10829 = vmatprep.subr.mxu1 %v11352_v12  ;;  %7404 = vmax.xlane.f32.xlu0 %v7403_v34 }
0x29e6   :  { %7667 = vmax.xlane.f32.xlu1 %v7666_v42  ;;  %10830 = vmatpush3.msra.mxu1 %v7418_v26 }
0x29e7   :  { %v7416_v9 = vpop.permute.xlu1 %7415  ;;  %10831 = vmatprep.subr.mxu1 %v11352_v12 }
0x29e8   :  { %10832 = vmatpush3.msra.mxu1 %v7416_v9 }
0x29e9   :  { %7670 = vmax.xlane.f32.xlu0 %v7669_v38  ;;  %10857 = vmatprep.subr.mxu1 %v11352_v12 }
0x29eb   :  { %v7686_v59 = vpop.permute.xlu1 %7685 }
0x29f7   :  { %7681 = vrot.lane.b32.xlu1 %v13035_v63, %s11359_s9 }
0x29ff   :  { %7683 = vrot.lane.b32.xlu0 %v13068_v0, %s11359_s9 }
0x2a43   :  { %v7399_v46 = vpop.xlane.xlu0 %7398 }
0x2a44   :  { %v7406_v19 = vsub.f32 %v7394_v51, %v7399_v46 }
0x2a46   :  { %v7409_v31 = vmul.f32 1.442695, %v7406_v19  ;;  %v13264_v19 = vld [vmem:[%s13612_s2 + $0x2d0] sm:$0xff] }
0x2a47   :  { %10873 = vmatpush3.msra.mxu0 %v13264_v19 }
0x2a48   :  { %11270 = vpow2.f32 %v7409_v31  ;;  %10894 = vmatprep.subr.mxu0 %v11352_v12 }
0x2a55   :  { %v13194_v35 = vpop.eup %11270 }
0x2a56   :  { %10834 = vmatmul.mubr.msk.f32.vlgmr.msra.gmra.mxu1 %vm2380_vm14, %v13194_v35  ;;  %v7514_v31 = vsel %vm2380_vm14, %v13194_v35, 0.0 }
0x2a57   :  { %10858 = vmatpush3.msk.msra.mxu1 %vm1830_vm11, %v7686_v59  ;;  %10836 = vmatprep.mubr.msk.f32.mxu1 %vm11353_vm3, %v11352_v12 }
0x2a58   :  { %10859 = vmatprep.subr.mxu1 %v11352_v12 }
0x2a66   :  { %v7402_v63 = vpop.xlane.xlu1 %7401 }
0x2a67   :  { %v7407_v41 = vsub.f32 %v7395_v20, %v7402_v63  ;;  %v13278_v63 = vld [vmem:[%s13612_s2 + $0x2c8] sm:$0xff] }
0x2a69   :  { %v7411_v0 = vmul.f32 1.442695, %v7407_v41 }
0x2a6a   :  { %v7665_v52 = vpop.xlane.xlu0 %7664 }
0x2a6b   :  { %11272 = vpow2.f32 %v7411_v0  ;;  %v7672_v51 = vsub.f32 %v7660_v44, %v7665_v52  ;;  %v7234_v44 = vsub.f32 0.0, %v7227_v10  ;;  %v8363_v10 = vrot.slane %v13177_v48, 4 }
0x2a6d   :  { %v7675_v55 = vmul.f32 1.442695, %v7672_v51  ;;  %v7243_v56 = vmul.f32 1.442695, %v7234_v44 }
0x2a6e   :  { %v7405_v57 = vpop.xlane.xlu0 %7404 }
0x2a6f   :  { %11274 = vpow2.f32 %v7675_v55  ;;  %v7408_v18 = vsub.f32 %v7396_v58, %v7405_v57  ;;  %v7668_v11 = vpop.xlane.xlu1 %7667  ;;  %v7976_v58 = vrot.slane %v13087_v28, 4 }
0x2a70   :  { %v7673_v39 = vsub.f32 %v7661_v62, %v7668_v11 }
0x2a71   :  { %v7413_v1 = vmul.f32 1.442695, %v7408_v18  ;;  %v13236_v62 = vsel %vm1830_vm11, %v7976_v58, %v7978_v6  ;;  %v13241_v34 = vsel %vm1830_vm11, %v7975_v22, %v7976_v58 }
0x2a72   :  { %v7677_v54 = vmul.f32 1.442695, %v7673_v39  ;;  %v7671_v8 = vpop.xlane.xlu0 %7670 }
0x2a73   :  { %11276 = vpow2.f32 %v7413_v1  ;;  %v7674_v37 = vsub.f32 %v7662_v15, %v7671_v8  ;;  %v7682_v20 = vpop.permute.xlu1 %7681 }
0x2a74   :  { %11278 = vpow2.f32 %v7677_v54 }
0x2a75   :  { %v7679_v5 = vmul.f32 1.442695, %v7674_v37 }
0x2a76   :  { %v7684_v7 = vpop.permute.xlu0 %7683 }
0x2a77   :  { %11280 = vpow2.f32 %v7679_v5  ;;  %10860 = vmatpush3.msra.mxu1 %v7684_v7 }
0x2a78   :  { %v13204_v60 = vpop.eup %11272  ;;  %10861 = vmatprep.subr.mxu1 %v11352_v12  ;;  %11282 = vpow2.f32 %v7241_v49 }
0x2a79   :  { %10837 = vmatmul.mubr.msk.f32.gmra.mxu1 %vm2380_vm14, %v13204_v60  ;;  %11284 = vpow2.f32 %v7243_v56  ;;  %v7517_v59 = vsel %vm2380_vm14, %v13204_v60, 0.0 }
0x2a7a   :  { %10862 = vmatpush3.msra.mxu1 %v7682_v20  ;;  %10839 = vmatprep.mubr.msk.f32.mxu1 %vm11353_vm3, %v11352_v12  ;;  %v8097_v20 = vrot.slane %v13171_v17, 4 }
0x2a7b   :  { %10883 = vmatprep.subr.mxu1 %v11352_v12 }
0x2a7c   :  { %v11275_v24 = vpop.eup %11274 }
0x2a7d   :  { %v7780_v29 = vsel %vm2380_vm14, %v11275_v24, 0.0 }
0x2a7e   :  { %7781 = vadd.xlane.f32.xlu0 %v7780_v29 }
0x2a80   :  { %v13215_v14 = vpop.eup %11276 }
0x2a81   :  { %v11279_v61 = vpop.eup %11278  ;;  %10840 = vmatmul.mubr.msk.f32.gmra.mxu1 %vm2380_vm14, %v13215_v14  ;;  %v7520_v41 = vsel %vm2387_vm15, %v13215_v14, 0.0 }
0x2a82   :  { %v7783_v2 = vsel %vm2380_vm14, %v11279_v61, 0.0  ;;  %10863 = vmatprep.mubr.msk.f32.mxu1 %vm11353_vm3, %v11352_v12 }
0x2a83   :  { %7784 = vadd.xlane.f32.xlu1 %v7783_v2 }
0x2a84   :  { %v11281_v27 = vpop.eup %11280 }
0x2a85   :  { %10864 = vmatmul.mubr.msk.f32.vlgmr.msra.gmra.mxu1 %vm2380_vm14, %v11275_v24  ;;  %v7786_v23 = vsel %vm2387_vm15, %v11281_v27, 0.0  ;;  %v11283_v43 = vpop.eup %11282 }
0x2a86   :  { %7787 = vadd.xlane.f32.xlu0 %v7786_v23  ;;  %10866 = vmatprep.mubr.msk.f32.mxu1 %vm11353_vm3, %v11352_v12  ;;  %v7248_v53 = vadd.f32 1.0, %v11283_v43  ;;  %v11285_v25 = vpop.eup %11284 }
0x2a87   :  { %v7249_v45 = vadd.f32 1.0, %v11285_v25  ;;  %10884 = vmatpush3.msra.mxu1 %v13278_v63 }
0x2a88   :  { %11286 = vrcp.f32 %v7248_v53  ;;  %10909 = vmatprep.subr.mxu1 %v11352_v12 }
0x2a89   :  { %10867 = vmatmul.mubr.msk.f32.gmra.mxu1 %vm2380_vm14, %v11279_v61  ;;  %11288 = vrcp.f32 %v7249_v45 }
0x2a8a   :  { %10869 = vmatprep.mubr.msk.f32.mxu1 %vm11353_vm3, %v11352_v12 }
0x2a8d   :  { %10870 = vmatmul.mubr.msk.f32.gmra.mxu1 %vm2380_vm14, %v11281_v27 }
0x2a8e   :  { %10885 = vmatprep.mubr.msk.f32.mxu1 %vm11353_vm3, %v11352_v12 }
0x2a94   :  { %7988 = vrot.lane.b32.xlu1 %v13236_v62, %s11355_s4 }
0x2a95   :  { %v11287_v33 = vpop.eup %11286 }
0x2a96   :  { %v7258_v28 = vmul.f32 20.0, %v11287_v33  ;;  %v11289_v15 = vpop.eup %11288 }
0x2a97   :  { %v7259_v9 = vmul.f32 20.0, %v11289_v15 }
0x2a98   :  { %7986 = vrot.lane.b32.xlu1 %v13241_v34, %s11355_s4  ;;  %v8087_v42 = vadd.f32 2.0, %v7258_v28  ;;  %v8353_v26 = vadd.f32 4.0, %v7258_v28 }
0x2a99   :  { %v8088_v38 = vadd.f32 2.0, %v7259_v9  ;;  %v8354_v46 = vadd.f32 4.0, %v7259_v9 }
0x2a9c   :  { %8256 = vrot.lane.b32.xlu1 %v7978_v6, %s11354_s30  ;;  %7990 = vrot.lane.b32.xlu0 %v7978_v6, %s11355_s4 }
0x2aa0   :  { %8254 = vrot.lane.b32.xlu1 %v13236_v62, %s11354_s30  ;;  %7980 = vrot.lane.b32.xlu0 %v13241_v34, %s11357_s6 }
0x2aa4   :  { %8252 = vrot.lane.b32.xlu1 %v13241_v34, %s11354_s30  ;;  %7982 = vrot.lane.b32.xlu0 %v13236_v62, %s11357_s6 }
0x2aa8   :  { %8248 = vrot.lane.b32.xlu1 %v13236_v62, %s11356_s5  ;;  %7984 = vrot.lane.b32.xlu0 %v7978_v6, %s11357_s6 }
0x2aac   :  { %8091 = vperm.xlu1 %11049, %v8087_v42   ;;  %8246 = vrot.lane.b32.xlu0 %v13241_v34, %s11356_s5 }
0x2ab0   :  { %8357 = vperm.xlu1 %11049, %v8353_v26   ;;  %8250 = vrot.lane.b32.xlu0 %v7978_v6, %s11356_s5 }
0x2ab4   :  { %8095 = vperm.xlu0 %11048, %v8088_v38  }
0x2ab8   :  { %8361 = vperm.xlu0 %11048, %v8354_v46  }
0x2ad4   :  { %7515 = vadd.xlane.f32.xlu1 %v7514_v31 }
0x2ad7   :  { %7518 = vadd.xlane.f32.xlu0 %v7517_v59 }
0x2ae5   :  { %8136 = vrot.lane.b32.xlu1 %v7978_v6, %s11360_s10 }
0x2ae9   :  { %8132 = vrot.lane.b32.xlu1 %v13241_v34, %s11360_s10 }
0x2aed   :  { %8402 = vrot.lane.b32.xlu1 %v7978_v6, %s11359_s9  ;;  %8134 = vrot.lane.b32.xlu0 %v13236_v62, %s11360_s10 }
0x2b07   :  { %v7782_v35 = vpop.xlane.xlu0 %7781 }
0x2b08   :  { %11290 = vrcp.f32 %v7782_v35 }
0x2b0c   :  { %v7785_v0 = vpop.xlane.xlu1 %7784  ;;  %7521 = vadd.xlane.f32.xlu0 %v7520_v41 }
0x2b0d   :  { %11292 = vrcp.f32 %v7785_v0 }
0x2b0f   :  { %v7788_v52 = vpop.xlane.xlu0 %7787 }
0x2b10   :  { %v7989_v51 = vpop.permute.xlu1 %7988  ;;  %11294 = vrcp.f32 %v7788_v52 }
0x2b13   :  { %v7991_v55 = vpop.permute.xlu0 %7990 }
0x2b14   :  { %v7987_v57 = vpop.permute.xlu1 %7986 }
0x2b15   :  { %v11291_v53 = vpop.eup %11290 }
0x2b16   :  { %v13287_v18 = vpop.f32.mrf.mxu1 }
0x2b17   :  { %v7981_v11 = vpop.permute.xlu0 %7980 }
0x2b18   :  { %v8257_v39 = vpop.permute.xlu1 %8256  ;;  %v10835_v1 = vpop.f32.mrf.mxu1 }
0x2b1a   :  { %v11293_v33 = vpop.eup %11292 }
0x2b1b   :  { %v7983_v54 = vpop.permute.xlu0 %7982 }
0x2b1c   :  { %v8255_v8 = vpop.permute.xlu1 %8254 }
0x2b1d   :  { %v11295_v26 = vpop.eup %11294 }
0x2b1f   :  { %v7985_v37 = vpop.permute.xlu0 %7984 }
0x2b20   :  { %v8253_v5 = vpop.permute.xlu1 %8252 }
0x2b23   :  { %v8247_v7 = vpop.permute.xlu0 %8246 }
0x2b24   :  { %v13289_v4 = vpop.permute.xlu1 %8248 }
0x2b27   :  { %v13292_v24 = vpop.permute.xlu0 %8250 }
0x2b28   :  { %v8092_v60 = vpop.permute.xlu1 %8091 }
0x2b29   :  { %v8098_v3 = vrot.slane %v8092_v60, 4 }
0x2b2b   :  { %v13295_v29 = vsel %vm1830_vm11, %v8097_v20, %v8098_v3 }
0x2b2c   :  { %v8358_v49 = vpop.permute.xlu1 %8357  ;;  %vm8105_vm9 = vcmp.gt.f32.partialorder %v11469_v50, %v13295_v29 }
0x2b2d   :  { %v8364_v14 = vrot.slane %v8358_v49, 4 }
0x2b2f   :  { %v13298_v61 = vpop.permute.xlu0 %8095  ;;  %v13301_v44 = vsel %vm1830_vm11, %v8363_v10, %v8364_v14 }
0x2b30   :  { %v8100_v2 = vrot.slane %v13298_v61, 4  ;;  %vm8371_vm12 = vcmp.gt.f32.partialorder %v11469_v50, %v13301_v44 }
0x2b32   :  { %v13307_v17 = vsel %vm1830_vm11, %v8098_v3, %v8100_v2  ;;  %vm8107_vm0 = vcmp.gt.f32.partialorder %v11859_v47, %v8100_v2 }
0x2b33   :  { %v13309_v27 = vpop.permute.xlu0 %8361  ;;  %vm8106_vm13 = vcmp.gt.f32.partialorder %v11855_v40, %v13307_v17 }
0x2b34   :  { %v8366_v23 = vrot.slane %v13309_v27, 4 }
0x2b36   :  { %v13315_v48 = vsel %vm1830_vm11, %v8364_v14, %v8366_v23  ;;  %vm8373_vm6 = vcmp.gt.f32.partialorder %v11859_v47, %v8366_v23 }
0x2b37   :  { %vm8372_vm5 = vcmp.gt.f32.partialorder %v11855_v40, %v13315_v48 }
0x2b39   :  { %v7505_v56 = vpop.f32.mrf.mxu1 }
0x2b3b   :  { %v10838_v43 = vpop.f32.mrf.mxu1 }
0x2b41   :  { %v13317_v6 = vpop.f32.mrf.mxu1 }
0x2b43   :  { %v10841_v58 = vpop.f32.mrf.mxu1 }
0x2b45   :  { %v7766_v22 = vpop.f32.mrf.mxu1 }
0x2b46   :  { %v7792_v25 = vmul.f32 %v11291_v53, %v7766_v22 }
0x2b47   :  { %v10865_v45 = vpop.f32.mrf.mxu1 }
0x2b48   :  { %10875 = vmatmul.mubr.msk.f32.vlgmr.msra.gmra.mxu0 %vm329_vm4, %v7792_v25 }
0x2b49   :  { %10895 = vmatpush3.xpose.msk.msra.mxu0 %vm329_vm4, %v7991_v55  ;;  %v7771_v28 = vpop.f32.mrf.mxu1  ;;  %10877 = vmatprep.mubr.msk.f32.mxu0 %vm11353_vm3, %v11352_v12 }
0x2b4a   :  { %v7793_v42 = vmul.f32 %v11293_v33, %v7771_v28  ;;  %10896 = vmatprep.subr.mxu0 %v11352_v12 }
0x2b4b   :  { %v10868_v15 = vpop.f32.mrf.mxu1 }
0x2b4c   :  { %10878 = vmatmul.mubr.msk.f32.gmra.mxu0 %vm329_vm4, %v7793_v42 }
0x2b4d   :  { %10897 = vmatpush3.xpose.msk.msra.mxu0 %vm329_vm4, %v7989_v51  ;;  %v7776_v9 = vpop.f32.mrf.mxu1  ;;  %10880 = vmatprep.mubr.msk.f32.mxu0 %vm11353_vm3, %v11352_v12 }
0x2b4e   :  { %v7794_v38 = vmul.f32 %v11295_v26, %v7776_v9  ;;  %10898 = vmatprep.subr.mxu0 %v11352_v12 }
0x2b4f   :  { %v10871_v46 = vpop.f32.mrf.mxu1 }
0x2b50   :  { %10881 = vmatmul.mubr.msk.f32.gmra.mxu0 %vm329_vm4, %v7794_v38 }
0x2b51   :  { %10899 = vmatpush3.xpose.msk.msra.mxu0 %vm329_vm4, %v7987_v57  ;;  %10900 = vmatprep.mubr.msk.f32.mxu0 %vm11353_vm3, %v11352_v12 }
0x2b52   :  { %10924 = vmatprep.subr.mxu0 %v11352_v12 }
0x2b54   :  { %10901 = vmatmul.mubr.msk.f32.vlgmr.msra.gmra.mxu0 %vm329_vm4, %v7981_v11 }
0x2b55   :  { %10925 = vmatpush3.xpose.msk.msra.mxu0 %vm329_vm4, %v8257_v39  ;;  %10903 = vmatprep.mubr.msk.f32.mxu0 %vm11353_vm3, %v11352_v12 }
0x2b56   :  { %10926 = vmatprep.subr.mxu0 %v11352_v12 }
0x2b58   :  { %10904 = vmatmul.mubr.msk.f32.gmra.mxu0 %vm329_vm4, %v7983_v54 }
0x2b59   :  { %10927 = vmatpush3.xpose.msk.msra.mxu0 %vm329_vm4, %v8255_v8  ;;  %10906 = vmatprep.mubr.msk.f32.mxu0 %vm11353_vm3, %v11352_v12 }
0x2b5a   :  { %10928 = vmatprep.subr.mxu0 %v11352_v12 }
0x2b5c   :  { %10907 = vmatmul.mubr.msk.f32.gmra.mxu0 %vm329_vm4, %v7985_v37 }
0x2b5d   :  { %v7516_v31 = vpop.xlane.xlu1 %7515  ;;  %10929 = vmatpush3.xpose.msk.msra.mxu0 %vm329_vm4, %v8253_v5  ;;  %10930 = vmatprep.mubr.msk.f32.mxu0 %vm11353_vm3, %v11352_v12 }
0x2b5e   :  { %11296 = vrcp.f32 %v7516_v31  ;;  %10954 = vmatprep.subr.mxu0 %v11352_v12 }
0x2b60   :  { %10931 = vmatmul.mubr.msk.f32.vlgmr.msra.gmra.mxu0 %vm329_vm4, %v8247_v7  ;;  %v7519_v59 = vpop.xlane.xlu0 %7518 }
0x2b61   :  { %11298 = vrcp.f32 %v7519_v59  ;;  %10933 = vmatprep.mubr.msk.f32.mxu0 %vm11353_vm3, %v11352_v12  ;;  %10955 = vmatpush3.msra.mxu0 %v13264_v19  ;;  %v8137_v0 = vpop.permute.xlu1 %8136 }
0x2b62   :  { %10976 = vmatprep.subr.mxu0 %v11352_v12 }
0x2b64   :  { %10934 = vmatmul.mubr.msk.f32.gmra.mxu0 %vm329_vm4, %v13289_v4  ;;  %v8135_v51 = vpop.permute.xlu0 %8134 }
0x2b65   :  { %10936 = vmatprep.mubr.msk.f32.mxu0 %vm11353_vm3, %v11352_v12  ;;  %v8133_v55 = vpop.permute.xlu1 %8132 }
0x2b68   :  { %10937 = vmatmul.mubr.msk.f32.gmra.mxu0 %vm329_vm4, %v13292_v24 }
0x2b69   :  { %10956 = vmatprep.mubr.msk.f32.mxu0 %vm11353_vm3, %v11352_v12  ;;  %v8403_v23 = vpop.permute.xlu1 %8402 }
0x2b6b   :  { %v11297_v35 = vpop.eup %11296 }
0x2b6c   :  { %v7526_v41 = vmul.f32 %v11297_v35, %v13287_v18 }
0x2b6e   :  { %v11299_v52 = vpop.eup %11298  ;;  %10886 = vmatmul.mubr.msk.f32.vlgmr.msra.gmra.mxu1 %vm329_vm4, %v7526_v41 }
0x2b6f   :  { %10910 = vmatpush3.msk.msra.mxu1 %vm1830_vm11, %v8137_v0  ;;  %10888 = vmatprep.mubr.msk.f32.mxu1 %vm11353_vm3, %v11352_v12  ;;  %v7527_v19 = vmul.f32 %v11299_v52, %v7505_v56 }
0x2b70   :  { %10911 = vmatprep.subr.mxu1 %v11352_v12 }
0x2b71   :  { %10912 = vmatpush3.msra.mxu1 %v8135_v51 }
0x2b72   :  { %10913 = vmatprep.subr.mxu1 %v11352_v12  ;;  %10889 = vmatmul.mubr.msk.f32.gmra.mxu1 %vm329_vm4, %v7527_v19 }
0x2b73   :  { %10914 = vmatpush3.msra.mxu1 %v8133_v55  ;;  %10891 = vmatprep.mubr.msk.f32.mxu1 %vm11353_vm3, %v11352_v12 }
0x2b74   :  { %10939 = vmatprep.subr.mxu1 %v11352_v12 }
0x2b95   :  { %v7522_v57 = vpop.xlane.xlu0 %7521 }
0x2b96   :  { %11300 = vrcp.f32 %v7522_v57 }
0x2ba3   :  { %v11301_v18 = vpop.eup %11300 }
0x2ba4   :  { %v7528_v11 = vmul.f32 %v11301_v18, %v13317_v6 }
0x2ba6   :  { %10892 = vmatmul.mubr.msk.f32.gmra.mxu1 %vm329_vm4, %v7528_v11 }
0x2ba7   :  { %10915 = vmatprep.mubr.msk.f32.mxu1 %vm11353_vm3, %v11352_v12 }
0x2c08   :  { %v7870_v39 = vpop.f32.mrf.mxu0 }
0x2c0a   :  { %v10876_v1 = vpop.f32.mrf.mxu0 }
0x2c0c   :  { %v7875_v54 = vpop.f32.mrf.mxu0 }
0x2c0e   :  { %v10879_v8 = vpop.f32.mrf.mxu0 }
0x2c10   :  { %v13377_v37 = vpop.f32.mrf.mxu0 }
0x2c12   :  { %v10882_v5 = vpop.f32.mrf.mxu0 }
0x2c14   :  { %v8070_v4 = vpop.f32.mrf.mxu0 }
0x2c15   :  { %v8084_v7 = vmul.f32 0.2236068, %v8070_v4 }
0x2c16   :  { %v10902_v60 = vpop.f32.mrf.mxu0 }
0x2c17   :  { %v8108_v20 = vsel %vm8105_vm9, -1e+18, %v8084_v7 }
0x2c18   :  { %v8111_v3 = vadd.f32 %v8108_v20, %v8084_v7  ;;  %v8075_v24 = vpop.f32.mrf.mxu0 }
0x2c19   :  { %v8085_v49 = vmul.f32 0.2236068, %v8075_v24 }
0x2c1a   :  { %v10905_v10 = vpop.f32.mrf.mxu0  ;;  %v8114_v14 = vsel %vm2380_vm14, %v8111_v3, -inf }
0x2c1b   :  { %v8109_v56 = vsel %vm8106_vm13, -1e+18, %v8085_v49  ;;  %8115 = vmax.xlane.f32.xlu1 %v8114_v14 }
0x2c1c   :  { %v8112_v43 = vadd.f32 %v8109_v56, %v8085_v49  ;;  %v8080_v6 = vpop.f32.mrf.mxu0 }
0x2c1d   :  { %v8086_v58 = vmul.f32 0.2236068, %v8080_v6 }
0x2c1e   :  { %v10908_v29 = vpop.f32.mrf.mxu0  ;;  %v8117_v53 = vsel %vm2380_vm14, %v8112_v43, -inf }
0x2c1f   :  { %v8110_v22 = vsel %vm8107_vm0, -1e+18, %v8086_v58  ;;  %8118 = vmax.xlane.f32.xlu0 %v8117_v53 }
0x2c20   :  { %v8113_v25 = vadd.f32 %v8110_v22, %v8086_v58  ;;  %v8336_v45 = vpop.f32.mrf.mxu0 }
0x2c21   :  { %v8350_v17 = vmul.f32 0.2236068, %v8336_v45 }
0x2c22   :  { %v10932_v33 = vpop.f32.mrf.mxu0  ;;  %v8120_v28 = vsel %vm2387_vm15, %v8113_v25, -inf }
0x2c23   :  { %v8374_v42 = vsel %vm8371_vm12, -1e+18, %v8350_v17  ;;  %8121 = vmax.xlane.f32.xlu1 %v8120_v28 }
0x2c24   :  { %v8377_v15 = vadd.f32 %v8374_v42, %v8350_v17  ;;  %v8341_v61 = vpop.f32.mrf.mxu0 }
0x2c25   :  { %v8351_v26 = vmul.f32 0.2236068, %v8341_v61 }
0x2c26   :  { %v10935_v2 = vpop.f32.mrf.mxu0  ;;  %v8380_v9 = vsel %vm2380_vm14, %v8377_v15, -inf }
0x2c27   :  { %v8375_v38 = vsel %vm8372_vm5, -1e+18, %v8351_v26  ;;  %8381 = vmax.xlane.f32.xlu0 %v8380_v9 }
0x2c28   :  { %v8378_v46 = vadd.f32 %v8375_v38, %v8351_v26  ;;  %v8346_v31 = vpop.f32.mrf.mxu0 }
0x2c29   :  { %v8352_v59 = vmul.f32 0.2236068, %v8346_v31 }
0x2c2a   :  { %v10938_v50 = vpop.f32.mrf.mxu0  ;;  %v8383_v44 = vsel %vm2380_vm14, %v8378_v46, -inf }
0x2c2b   :  { %v8376_v35 = vsel %vm8373_vm6, -1e+18, %v8352_v59  ;;  %8384 = vmax.xlane.f32.xlu1 %v8383_v44 }
0x2c2c   :  { %v8379_v41 = vadd.f32 %v8376_v35, %v8352_v59 }
0x2c2e   :  { %v7959_v0 = vpop.f32.mrf.mxu1  ;;  %v8386_v40 = vsel %vm2387_vm15, %v8379_v41, -inf }
0x2c2f   :  { %v13399_v48 = vadd.f32 %v7959_v0, %v7870_v39  ;;  %8387 = vmax.xlane.f32.xlu0 %v8386_v40 }
0x2c30   :  { %v10887_v52 = vpop.f32.mrf.mxu1 }
0x2c31   :  { %v13432_v17 = vadd.f32 %v13399_v48, %v12984_v32 }
0x2c32   :  { %v7964_v19 = vpop.f32.mrf.mxu1 }
0x2c33   :  { %v13401_v51 = vadd.f32 %v7964_v19, %v7875_v54  ;;  %v8707_v32 = vsel %vm143_vm2, %v13432_v17, 0.0 }
0x2c34   :  { %v10890_v55 = vpop.f32.mrf.mxu1 }
0x2c3c   :  { %8398 = vrot.lane.b32.xlu1 %v13241_v34, %s11359_s9 }
0x2c45   :  { %8400 = vrot.lane.b32.xlu0 %v13236_v62, %s11359_s9 }
0x2c66   :  { %v13407_v47 = vpop.f32.mrf.mxu1 }
0x2c68   :  { %v10893_v27 = vpop.f32.mrf.mxu1 }
0x2ca4   :  { %v8116_v57 = vpop.xlane.xlu1 %8115 }
0x2ca5   :  { %v8123_v18 = vsub.f32 %v8111_v3, %v8116_v57 }
0x2ca7   :  { %v8126_v11 = vmul.f32 1.442695, %v8123_v18 }
0x2ca8   :  { %v8119_v39 = vpop.xlane.xlu0 %8118 }
0x2ca9   :  { %11302 = vpow2.f32 %v8126_v11  ;;  %v8124_v1 = vsub.f32 %v8112_v43, %v8119_v39 }
0x2cab   :  { %v8128_v8 = vmul.f32 1.442695, %v8124_v1 }
0x2cac   :  { %v8122_v54 = vpop.xlane.xlu1 %8121 }
0x2cad   :  { %11304 = vpow2.f32 %v8128_v8  ;;  %v8125_v5 = vsub.f32 %v8113_v25, %v8122_v54 }
0x2caf   :  { %v8130_v4 = vmul.f32 1.442695, %v8125_v5 }
0x2cb0   :  { %v8382_v7 = vpop.xlane.xlu0 %8381 }
0x2cb1   :  { %11306 = vpow2.f32 %v8130_v4  ;;  %v8389_v34 = vsub.f32 %v8377_v15, %v8382_v7 }
0x2cb3   :  { %v8392_v60 = vmul.f32 1.442695, %v8389_v34 }
0x2cb4   :  { %v8385_v62 = vpop.xlane.xlu1 %8384 }
0x2cb5   :  { %11308 = vpow2.f32 %v8392_v60  ;;  %v8390_v20 = vsub.f32 %v8378_v46, %v8385_v62 }
0x2cb6   :  { %v11303_v24 = vpop.eup %11302 }
0x2cb7   :  { %v8394_v49 = vmul.f32 1.442695, %v8390_v20  ;;  %10916 = vmatmul.mubr.msk.f32.vlgmr.msra.gmra.mxu1 %vm2380_vm14, %v11303_v24  ;;  %v8231_v3 = vsel %vm2380_vm14, %v11303_v24, 0.0 }
0x2cb8   :  { %10940 = vmatpush3.msk.msra.mxu1 %vm1830_vm11, %v8403_v23  ;;  %8232 = vadd.xlane.f32.xlu0 %v8231_v3  ;;  %v8388_v10 = vpop.xlane.xlu0 %8387  ;;  %v8399_v53 = vpop.permute.xlu1 %8398 }
0x2cb9   :  { %11310 = vpow2.f32 %v8394_v49  ;;  %v8391_v14 = vsub.f32 %v8379_v41, %v8388_v10  ;;  %10918 = vmatprep.mubr.msk.f32.mxu1 %vm11353_vm3, %v11352_v12  ;;  %10941 = vmatprep.subr.mxu1 %v11352_v12 }
0x2cba   :  { %v11305_v56 = vpop.eup %11304 }
0x2cbb   :  { %v8396_v43 = vmul.f32 1.442695, %v8391_v14  ;;  %10919 = vmatmul.mubr.msk.f32.gmra.mxu1 %vm2380_vm14, %v11305_v56  ;;  %v8234_v6 = vsel %vm2380_vm14, %v11305_v56, 0.0  ;;  %v7970_v56 = vadd.f32 %v13407_v47, %v13377_v37 }
0x2cbc   :  { %8235 = vadd.xlane.f32.xlu0 %v8234_v6  ;;  %v8401_v58 = vpop.permute.xlu0 %8400  ;;  %10921 = vmatprep.mubr.msk.f32.mxu1 %vm11353_vm3, %v11352_v12 }
0x2cbd   :  { %11312 = vpow2.f32 %v8396_v43  ;;  %10942 = vmatpush3.msra.mxu1 %v8401_v58 }
0x2cbe   :  { %v11307_v29 = vpop.eup %11306  ;;  %10943 = vmatprep.subr.mxu1 %v11352_v12 }
0x2cbf   :  { %10922 = vmatmul.mubr.msk.f32.gmra.mxu1 %vm2380_vm14, %v11307_v29  ;;  %v8237_v33 = vsel %vm2387_vm15, %v11307_v29, 0.0 }
0x2cc0   :  { %10944 = vmatpush3.msra.mxu1 %v8399_v53  ;;  %10945 = vmatprep.mubr.msk.f32.mxu1 %vm11353_vm3, %v11352_v12 }
0x2cc1   :  { %10965 = vmatprep.subr.mxu1 %v11352_v12 }
0x2cc2   :  { %v11309_v22 = vpop.eup %11308 }
0x2cc3   :  { %10946 = vmatmul.mubr.msk.f32.vlgmr.msra.gmra.mxu1 %vm2380_vm14, %v11309_v22  ;;  %v8497_v25 = vsel %vm2380_vm14, %v11309_v22, 0.0 }
0x2cc4   :  { %8498 = vadd.xlane.f32.xlu1 %v8497_v25  ;;  %10948 = vmatprep.mubr.msk.f32.mxu1 %vm11353_vm3, %v11352_v12 }
0x2cc5   :  { %10966 = vmatpush3.msra.mxu1 %v13278_v63  ;;  %v13441_v63 = vadd.f32 %v13401_v51, %v13033_v30 }
0x2cc6   :  { %v11311_v45 = vpop.eup %11310  ;;  %10995 = vmatprep.subr.mxu1 %v11352_v12 }
0x2cc7   :  { %10949 = vmatmul.mubr.msk.f32.gmra.mxu1 %vm2380_vm14, %v11311_v45  ;;  %v8500_v28 = vsel %vm2380_vm14, %v11311_v45, 0.0  ;;  %v8710_v61 = vsel %vm143_vm2, %v13441_v63, 0.0 }
0x2cc8   :  { %8238 = vadd.xlane.f32.xlu1 %v8237_v33  ;;  %8501 = vadd.xlane.f32.xlu0 %v8500_v28 }
0x2cc9   :  { %10951 = vmatprep.mubr.msk.f32.mxu1 %vm11353_vm3, %v11352_v12 }
0x2cca   :  { %v11313_v42 = vpop.eup %11312 }
0x2ccb   :  { %10952 = vmatmul.mubr.msk.f32.gmra.mxu1 %vm2380_vm14, %v11313_v42  ;;  %v8503_v15 = vsel %vm2387_vm15, %v11313_v42, 0.0 }
0x2ccc   :  { %8708 = vadd.xlane.f32.xlu1 %v8707_v32  ;;  %8504 = vadd.xlane.f32.xlu0 %v8503_v15 }
0x2ccd   :  { %10967 = vmatprep.mubr.msk.f32.mxu1 %vm11353_vm3, %v11352_v12 }
0x2cd0   :  { %8711 = vadd.xlane.f32.xlu0 %v8710_v61 }
0x2d41   :  { %v8233_v26 = vpop.xlane.xlu0 %8232 }
0x2d42   :  { %11314 = vrcp.f32 %v8233_v26 }
0x2d45   :  { %v8236_v30 = vpop.xlane.xlu0 %8235 }
0x2d46   :  { %11316 = vrcp.f32 %v8236_v30 }
0x2d4d   :  { %v8499_v2 = vpop.xlane.xlu1 %8498 }
0x2d4f   :  { %v11315_v46 = vpop.eup %11314 }
0x2d51   :  { %v8239_v9 = vpop.xlane.xlu1 %8238  ;;  %v8502_v38 = vpop.xlane.xlu0 %8501 }
0x2d52   :  { %11318 = vrcp.f32 %v8239_v9 }
0x2d53   :  { %11320 = vrcp.f32 %v8499_v2  ;;  %v11317_v44 = vpop.eup %11316 }
0x2d54   :  { %11322 = vrcp.f32 %v8502_v38 }
0x2d55   :  { %v8505_v35 = vpop.xlane.xlu0 %8504  ;;  %v8709_v3 = vpop.xlane.xlu1 %8708 }
0x2d56   :  { %11324 = vrcp.f32 %v8505_v35  ;;  %v8722_v6 = vmul.f32 0.0625, %v8709_v3 }
0x2d58   :  { %v8727_v28 = vsub.f32 %v13432_v17, %v8722_v6 }
0x2d59   :  { %v8712_v29 = vpop.xlane.xlu0 %8711 }
0x2d5a   :  { %v8723_v42 = vmul.f32 0.0625, %v8712_v29 }
0x2d5c   :  { %v8728_v30 = vsub.f32 %v13441_v63, %v8723_v42  ;;  %v6998_v63 = vld [vmem:[%s13612_s2 + $0x2e0] sm:$0xff] }
0x2d5f   :  { %v11319_v48 = vpop.eup %11318 }
0x2d60   :  { %v11321_v55 = vpop.eup %11320 }
0x2d61   :  { %v11323_v18 = vpop.eup %11322 }
0x2d63   :  { %v11325_v8 = vpop.eup %11324 }
0x2d77   :  { %v8217_v31 = vpop.f32.mrf.mxu1 }
0x2d78   :  { %v8243_v59 = vmul.f32 %v11315_v46, %v8217_v31 }
0x2d79   :  { %v10917_v50 = vpop.f32.mrf.mxu1 }
0x2d7a   :  { %10968 = vmatmul.mubr.msk.f32.vlgmr.msra.gmra.mxu1 %vm329_vm4, %v8243_v59  ;;  %v8733_v59 = vmul.f32 %v8728_v30, %v8728_v30  ;;  %v6997_v50 = vld [vmem:[%s13612_s2 + $0x2d8] sm:$0xff] }
0x2d7b   :  { %v8222_v41 = vpop.f32.mrf.mxu1  ;;  %10970 = vmatprep.mubr.msk.f32.mxu1 %vm11353_vm3, %v11352_v12 }
0x2d7c   :  { %v8244_v0 = vmul.f32 %v11317_v44, %v8222_v41 }
0x2d7d   :  { %v10920_v40 = vpop.f32.mrf.mxu1 }
0x2d7e   :  { %10971 = vmatmul.mubr.msk.f32.gmra.mxu1 %vm329_vm4, %v8244_v0 }
0x2d7f   :  { %v8227_v52 = vpop.f32.mrf.mxu1  ;;  %10973 = vmatprep.mubr.msk.f32.mxu1 %vm11353_vm3, %v11352_v12 }
0x2d80   :  { %v8245_v19 = vmul.f32 %v11319_v48, %v8227_v52 }
0x2d81   :  { %v10923_v51 = vpop.f32.mrf.mxu1 }
0x2d82   :  { %10974 = vmatmul.mubr.msk.f32.gmra.mxu1 %vm329_vm4, %v8245_v19 }
0x2d83   :  { %v8483_v27 = vpop.f32.mrf.mxu1  ;;  %10999 = vmatprep.mubr.msk.f32.mxu1 %vm11353_vm3, %v11352_v12 }
0x2d84   :  { %v8509_v23 = vmul.f32 %v11321_v55, %v8483_v27 }
0x2d85   :  { %v10947_v57 = vpop.f32.mrf.mxu1 }
0x2d86   :  { %10957 = vmatmul.mubr.msk.f32.vlgmr.msra.gmra.mxu0 %vm329_vm4, %v8509_v23 }
0x2d87   :  { %v8488_v11 = vpop.f32.mrf.mxu1  ;;  %10959 = vmatprep.mubr.msk.f32.mxu0 %vm11353_vm3, %v11352_v12  ;;  %10977 = vmatpush3.msra.mxu0 %v6998_v63 }
0x2d88   :  { %v8510_v39 = vmul.f32 %v11323_v18, %v8488_v11  ;;  %10978 = vmatprep.subr.mxu0 %v11352_v12 }
0x2d89   :  { %v10950_v1 = vpop.f32.mrf.mxu1  ;;  %10979 = vmatpush3.msra.mxu0 %v6997_v50 }
0x2d8a   :  { %10960 = vmatmul.mubr.msk.f32.gmra.mxu0 %vm329_vm4, %v8510_v39  ;;  %11014 = vmatprep.subr.mxu0 %v11352_v12 }
0x2d8b   :  { %v8493_v54 = vpop.f32.mrf.mxu1  ;;  %10962 = vmatprep.mubr.msk.f32.mxu0 %vm11353_vm3, %v11352_v12 }
0x2d8c   :  { %v8511_v5 = vmul.f32 %v11325_v8, %v8493_v54 }
0x2d8d   :  { %v10953_v4 = vpop.f32.mrf.mxu1 }
0x2d8e   :  { %10963 = vmatmul.mubr.msk.f32.gmra.mxu0 %vm329_vm4, %v8511_v5 }
0x2d8f   :  { %10980 = vmatprep.mubr.msk.f32.mxu0 %vm11353_vm3, %v11352_v12 }
0x2e3a   :  { %v8676_v7 = vpop.f32.mrf.mxu1 }
0x2e3c   :  { %v10969_v34 = vpop.f32.mrf.mxu1 }
0x2e3e   :  { %v8681_v60 = vpop.f32.mrf.mxu1 }
0x2e40   :  { %v10972_v62 = vpop.f32.mrf.mxu1 }
0x2e42   :  { %v8686_v20 = vpop.f32.mrf.mxu1 }
0x2e44   :  { %v10975_v24 = vpop.f32.mrf.mxu1 }
0x2e46   :  { %v8587_v49 = vpop.f32.mrf.mxu0 }
0x2e47   :  { %v8677_v10 = vadd.f32 %v8676_v7, %v8587_v49  ;;  %v9679_v7 = vld [vmem:[%s13612_s2 + $0x308] ss:$0 sm:$0xff] }
0x2e48   :  { %v10958_v14 = vpop.f32.mrf.mxu0 }
0x2e49   :  { %v8693_v43 = vrot.slane %v8677_v10, 4  ;;  %v7001_v14 = vld [vmem:[%s13612_s2 + $0x2f8] sm:$0xff] }
0x2e4a   :  { %v8592_v58 = vpop.f32.mrf.mxu0  ;;  %10996 = vmatpush3.msra.mxu1 %v7001_v14 }
0x2e4b   :  { %v8682_v53 = vadd.f32 %v8681_v60, %v8592_v58  ;;  %v8701_v22 = vsel %vm1830_vm11, %v7970_v56, %v8693_v43  ;;  %v9680_v60 = vld [vmem:[%s13612_s2 + $0x310] ss:$0 sm:$0xff]  ;;  %10997 = vmatprep.subr.mxu1 %v11352_v12 }
0x2e4c   :  { %v10961_v25 = vpop.f32.mrf.mxu0  ;;  %v8704_v45 = vadd.f32 %v8701_v22, %v13045_v36  ;;  %v8732_v36 = vmul.f32 %v8727_v28, %v8727_v28  ;;  %v7000_v56 = vld [vmem:[%s13612_s2 + $0x2f0] sm:$0xff] }
0x2e4d   :  { %v8694_v33 = vrot.slane %v8682_v53, 4  ;;  %10998 = vmatpush3.msra.mxu1 %v7000_v56 }
0x2e4e   :  { %v8597_v32 = vpop.f32.mrf.mxu0  ;;  %v8713_v15 = vsel %vm143_vm2, %v8704_v45, 0.0  ;;  %v8737_v46 = vsel %vm143_vm2, %v8732_v36, 0.0  ;;  %11023 = vmatprep.subr.mxu1 %v11352_v12 }
0x2e4f   :  { %v8687_v61 = vadd.f32 %v8686_v20, %v8597_v32  ;;  %8714 = vadd.xlane.f32.xlu1 %v8713_v15  ;;  %v8695_v37 = vsel %vm1830_vm11, %v8693_v43, %v8694_v33 }
0x2e50   :  { %v10964_v47 = vpop.f32.mrf.mxu0  ;;  %v8705_v26 = vadd.f32 %v8695_v37, %v13055_v21  ;;  %v8740_v21 = vsel %vm143_vm2, %v8733_v59, 0.0 }
0x2e51   :  { %v8696_v2 = vrot.slane %v8687_v61, 4 }
0x2e52   :  { %v8716_v9 = vsel %vm143_vm2, %v8705_v26, 0.0 }
0x2e53   :  { %8717 = vadd.xlane.f32.xlu0 %v8716_v9  ;;  %v8697_v17 = vsel %vm1830_vm11, %v8694_v33, %v8696_v2 }
0x2e54   :  { %v8706_v38 = vadd.f32 %v8697_v17, %v13062_v16  ;;  %v9681_v17 = vld [vmem:[%s13612_s2 + $0x2e8] ss:$0 sm:$0xff] }
0x2e56   :  { %v8719_v31 = vsel %vm143_vm2, %v8706_v38, 0.0 }
0x2e57   :  { %8738 = vadd.xlane.f32.xlu0 %v8737_v46  ;;  %8720 = vadd.xlane.f32.xlu1 %v8719_v31 }
0x2e5b   :  { %8741 = vadd.xlane.f32.xlu1 %v8740_v21 }
0x2ed8   :  { %v8715_v16 = vpop.xlane.xlu1 %8714 }
0x2ed9   :  { %v8724_v44 = vmul.f32 0.0625, %v8715_v16 }
0x2edb   :  { %v8729_v35 = vsub.f32 %v8704_v45, %v8724_v44 }
0x2edc   :  { %v8718_v41 = vpop.xlane.xlu0 %8717 }
0x2edd   :  { %v8725_v0 = vmul.f32 0.0625, %v8718_v41  ;;  %v8734_v40 = vmul.f32 %v8729_v35, %v8729_v35 }
0x2edf   :  { %v8730_v48 = vsub.f32 %v8705_v26, %v8725_v0  ;;  %v8743_v52 = vsel %vm143_vm2, %v8734_v40, 0.0 }
0x2ee0   :  { %8744 = vadd.xlane.f32.xlu0 %v8743_v52  ;;  %v8739_v19 = vpop.xlane.xlu0 %8738  ;;  %v8721_v51 = vpop.xlane.xlu1 %8720 }
0x2ee1   :  { %v8752_v55 = vmul.f32 0.0625, %v8739_v19  ;;  %v8726_v27 = vmul.f32 0.0625, %v8721_v51  ;;  %v8735_v23 = vmul.f32 %v8730_v48, %v8730_v48 }
0x2ee3   :  { %v8757_v57 = vadd.f32 1e-05, %v8752_v55  ;;  %v8731_v18 = vsub.f32 %v8706_v38, %v8726_v27  ;;  %v8746_v11 = vsel %vm143_vm2, %v8735_v23, 0.0 }
0x2ee4   :  { %8747 = vadd.xlane.f32.xlu1 %v8746_v11  ;;  %v8742_v39 = vpop.xlane.xlu1 %8741 }
0x2ee5   :  { %11326 = vrsqrt.f32 %v8757_v57  ;;  %v8753_v1 = vmul.f32 0.0625, %v8742_v39  ;;  %v8736_v8 = vmul.f32 %v8731_v18, %v8731_v18 }
0x2ee7   :  { %v8758_v54 = vadd.f32 1e-05, %v8753_v1  ;;  %v8749_v5 = vsel %vm143_vm2, %v8736_v8, 0.0 }
0x2ee8   :  { %8750 = vadd.xlane.f32.xlu0 %v8749_v5 }
0x2ee9   :  { %11328 = vrsqrt.f32 %v8758_v54  ;;  %v9687_v54 = vld [vmem:[%s13612_s2 + $0x300] ss:$0 sm:$0xff] }
0x2ef2   :  { %v11327_v4 = vpop.eup %11326 }
0x2ef3   :  { %v8767_v34 = vmul.f32 %v11327_v4, %v8727_v28 }
0x2ef5   :  { %v8776_v62 = vmul.f32 %v9679_v7, %v8767_v34 }
0x2ef6   :  { %v11329_v20 = vpop.eup %11328 }
0x2ef7   :  { %v13501_v24 = vadd.f32 %v9680_v60, %v8776_v62  ;;  %v8768_v49 = vmul.f32 %v11329_v20, %v8728_v30 }
0x2ef9   :  { %10981 = vmatmul.mubr.msk.f32.vlgmr.msra.gmra.mxu0 %vm143_vm2, %v13501_v24  ;;  %v8777_v3 = vmul.f32 %v9679_v7, %v8768_v49 }
0x2efa   :  { %10983 = vmatprep.mubr.msk.f32.mxu0 %vm11353_vm3, %v11352_v12 }
0x2efb   :  { %v13507_v10 = vadd.f32 %v9680_v60, %v8777_v3 }
0x2efd   :  { %10984 = vmatmul.mubr.msk.f32.gmra.mxu0 %vm143_vm2, %v13507_v10 }
0x2efe   :  { %10986 = vmatprep.mubr.msk.f32.mxu0 %vm11353_vm3, %v11352_v12 }
0x2f69   :  { %v8745_v43 = vpop.xlane.xlu0 %8744 }
0x2f6a   :  { %v8754_v6 = vmul.f32 0.0625, %v8745_v43 }
0x2f6c   :  { %v8759_v58 = vadd.f32 1e-05, %v8754_v6 }
0x2f6d   :  { %v8748_v29 = vpop.xlane.xlu1 %8747 }
0x2f6e   :  { %11330 = vrsqrt.f32 %v8759_v58  ;;  %v8755_v53 = vmul.f32 0.0625, %v8748_v29 }
0x2f70   :  { %v8760_v22 = vadd.f32 1e-05, %v8755_v53 }
0x2f71   :  { %v8751_v25 = vpop.xlane.xlu0 %8750 }
0x2f72   :  { %11332 = vrsqrt.f32 %v8760_v22  ;;  %v8756_v45 = vmul.f32 0.0625, %v8751_v25 }
0x2f74   :  { %v8761_v33 = vadd.f32 1e-05, %v8756_v45 }
0x2f76   :  { %11334 = vrsqrt.f32 %v8761_v33 }
0x2f7b   :  { %v11331_v28 = vpop.eup %11330 }
0x2f7c   :  { %v8769_v42 = vmul.f32 %v11331_v28, %v8729_v35 }
0x2f7e   :  { %v8778_v32 = vmul.f32 %v9679_v7, %v8769_v42 }
0x2f7f   :  { %v11333_v15 = vpop.eup %11332 }
0x2f80   :  { %v8770_v61 = vmul.f32 %v11333_v15, %v8730_v48  ;;  %v13521_v37 = vadd.f32 %v9680_v60, %v8778_v32 }
0x2f82   :  { %10987 = vmatmul.mubr.msk.f32.gmra.mxu0 %vm143_vm2, %v13521_v37  ;;  %v8779_v47 = vmul.f32 %v9679_v7, %v8770_v61 }
0x2f83   :  { %v11335_v26 = vpop.eup %11334  ;;  %10989 = vmatprep.mubr.msk.f32.mxu0 %vm11353_vm3, %v11352_v12 }
0x2f84   :  { %v8771_v2 = vmul.f32 %v11335_v26, %v8731_v18  ;;  %v8788_v30 = vadd.f32 %v9680_v60, %v8779_v47 }
0x2f86   :  { %10990 = vmatmul.mubr.msk.f32.gmra.mxu0 %vm143_vm2, %v8788_v30  ;;  %v8780_v9 = vmul.f32 %v9679_v7, %v8771_v2 }
0x2f87   :  { %10992 = vmatprep.mubr.msk.f32.mxu0 %vm11353_vm3, %v11352_v12 }
0x2f88   :  { %v8789_v36 = vadd.f32 %v9680_v60, %v8780_v9 }
0x2f8a   :  { %10993 = vmatmul.mubr.msk.f32.gmra.mxu0 %vm143_vm2, %v8789_v36 }
0x2f8b   :  { %11020 = vmatprep.mubr.msk.f32.mxu0 %vm11353_vm3, %v11352_v12 }
0x2fb9   :  { %v8875_v38 = vpop.f32.mrf.mxu0 }
0x2fba   :  { %v8876_v46 = vadd.f32 %v9681_v17, %v8875_v38 }
0x2fbb   :  { %v10982_v31 = vpop.f32.mrf.mxu0 }
0x2fbc   :  { %v8899_v59 = vmax.f32 %v8876_v46, 0.0 }
0x2fbd   :  { %v8880_v21 = vpop.f32.mrf.mxu0 }
0x2fbe   :  { %v8881_v63 = vadd.f32 %v9681_v17, %v8880_v21  ;;  %11000 = vmatmul.mubr.msk.f32.vlgmr.msra.gmra.mxu1 %vm143_vm2, %v8899_v59 }
0x2fbf   :  { %v10985_v50 = vpop.f32.mrf.mxu0  ;;  %11002 = vmatprep.mubr.msk.f32.mxu1 %vm11353_vm3, %v11352_v12 }
0x2fc0   :  { %v8900_v16 = vmax.f32 %v8881_v63, 0.0 }
0x2fc2   :  { %11003 = vmatmul.mubr.msk.f32.gmra.mxu1 %vm143_vm2, %v8900_v16 }
0x2fc3   :  { %11005 = vmatprep.mubr.msk.f32.mxu1 %vm11353_vm3, %v11352_v12 }
0x3042   :  { %v8885_v44 = vpop.f32.mrf.mxu0 }
0x3043   :  { %v8886_v35 = vadd.f32 %v9681_v17, %v8885_v44 }
0x3044   :  { %v10988_v41 = vpop.f32.mrf.mxu0 }
0x3045   :  { %v8901_v0 = vmax.f32 %v8886_v35, 0.0  ;;  %v9102_v35 = vld [vmem:[%s13612_s2 + $0x330] sm:$0x3f] }
0x3046   :  { %v8890_v40 = vpop.f32.mrf.mxu0 }
0x3047   :  { %v8891_v48 = vadd.f32 %v9681_v17, %v8890_v40  ;;  %11006 = vmatmul.mubr.msk.f32.gmra.mxu1 %vm143_vm2, %v8901_v0 }
0x3048   :  { %v10991_v52 = vpop.f32.mrf.mxu0  ;;  %11008 = vmatprep.mubr.msk.f32.mxu1 %vm11353_vm3, %v11352_v12 }
0x3049   :  { %v8902_v19 = vmax.f32 %v8891_v48, 0.0 }
0x304a   :  { %v8895_v51 = vpop.f32.mrf.mxu0 }
0x304b   :  { %v8896_v55 = vadd.f32 %v9681_v17, %v8895_v51  ;;  %11009 = vmatmul.mubr.msk.f32.gmra.mxu1 %vm143_vm2, %v8902_v19 }
0x304c   :  { %v10994_v27 = vpop.f32.mrf.mxu0  ;;  %11011 = vmatprep.mubr.msk.f32.mxu1 %vm11353_vm3, %v11352_v12 }
0x304d   :  { %v8903_v23 = vmax.f32 %v8896_v55, 0.0 }
0x304f   :  { %11012 = vmatmul.mubr.msk.f32.gmra.mxu1 %vm143_vm2, %v8903_v23 }
0x3050   :  { %11029 = vmatprep.mubr.msk.f32.mxu1 %vm11353_vm3, %v11352_v12 }
0x307e   :  { %v8989_v57 = vpop.f32.mrf.mxu1 }
0x307f   :  { %v8990_v6 = vadd.f32 %v9687_v54, %v8989_v57 }
0x3080   :  { %v11001_v18 = vpop.f32.mrf.mxu1 }
0x3081   :  { %v9013_v22 = vadd.f32 %v8990_v6, %v13501_v24 }
0x3082   :  { %v8994_v11 = vpop.f32.mrf.mxu1 }
0x3083   :  { %v8995_v4 = vadd.f32 %v9687_v54, %v8994_v11  ;;  %v9018_v25 = vsel %vm143_vm2, %v9013_v22, 0.0 }
0x3084   :  { %v11004_v39 = vpop.f32.mrf.mxu1 }
0x3085   :  { %v9014_v20 = vadd.f32 %v8995_v4, %v13507_v10 }
0x3087   :  { %v9021_v29 = vsel %vm143_vm2, %v9014_v20, 0.0 }
0x3107   :  { %v8999_v1 = vpop.f32.mrf.mxu1 }
0x3108   :  { %v9000_v49 = vadd.f32 %v9687_v54, %v8999_v1 }
0x3109   :  { %v11007_v8 = vpop.f32.mrf.mxu1 }
0x310a   :  { %v9015_v58 = vadd.f32 %v9000_v49, %v13521_v37 }
0x310b   :  { %v9004_v5 = vpop.f32.mrf.mxu1 }
0x310c   :  { %v9005_v7 = vadd.f32 %v9687_v54, %v9004_v5  ;;  %v9024_v10 = vsel %vm143_vm2, %v9015_v58, 0.0 }
0x310d   :  { %v11010_v34 = vpop.f32.mrf.mxu1 }
0x310e   :  { %v9016_v60 = vadd.f32 %v9005_v7, %v8788_v30  ;;  %v9694_v34 = vld [vmem:[%s13612_s2 + $0x320] ss:$0 sm:$0xff] }
0x310f   :  { %v9009_v62 = vpop.f32.mrf.mxu1 }
0x3110   :  { %v9010_v3 = vadd.f32 %v9687_v54, %v9009_v62  ;;  %v9027_v14 = vsel %vm143_vm2, %v9016_v60, 0.0  ;;  %v9693_v54 = vld [vmem:[%s13612_s2 + $0x318] ss:$0 sm:$0xff] }
0x3111   :  { %9028 = vadd.xlane.f32.xlu0 %v9027_v14  ;;  %v11013_v56 = vpop.f32.mrf.mxu1 }
0x3112   :  { %v9017_v43 = vadd.f32 %v9010_v3, %v8789_v36 }
0x3114   :  { %v9030_v53 = vsel %vm143_vm2, %v9017_v43, 0.0 }
0x3115   :  { %9022 = vadd.xlane.f32.xlu0 %v9021_v29  ;;  %9031 = vadd.xlane.f32.xlu1 %v9030_v53 }
0x3119   :  { %9025 = vadd.xlane.f32.xlu1 %v9024_v10 }
0x311d   :  { %9019 = vadd.xlane.f32.xlu1 %v9018_v25 }
0x319a   :  { %v9029_v45 = vpop.xlane.xlu0 %9028 }
0x319b   :  { %v9036_v33 = vmul.f32 0.0625, %v9029_v45 }
0x319d   :  { %v9041_v28 = vsub.f32 %v9016_v60, %v9036_v33 }
0x319e   :  { %v9023_v42 = vpop.xlane.xlu0 %9022  ;;  %v9032_v32 = vpop.xlane.xlu1 %9031 }
0x319f   :  { %v9034_v15 = vmul.f32 0.0625, %v9023_v42  ;;  %v9037_v61 = vmul.f32 0.0625, %v9032_v32  ;;  %v9046_v37 = vmul.f32 %v9041_v28, %v9041_v28  ;;  %v9101_v32 = vld [vmem:[%s13612_s2 + $0x328] sm:$0x3f] }
0x31a1   :  { %v9039_v47 = vsub.f32 %v9014_v20, %v9034_v15  ;;  %v9042_v26 = vsub.f32 %v9017_v43, %v9037_v61  ;;  %v9057_v2 = vsel %vm143_vm2, %v9046_v37, 0.0  ;;  %v9104_v37 = vld [vmem:[%s13612_s2 + $0x340] sm:$0xff] }
0x31a2   :  { %9058 = vadd.xlane.f32.xlu1 %v9057_v2  ;;  %v9026_v24 = vpop.xlane.xlu1 %9025 }
0x31a3   :  { %v9035_v30 = vmul.f32 0.0625, %v9026_v24  ;;  %v9044_v9 = vmul.f32 %v9039_v47, %v9039_v47  ;;  %v9047_v36 = vmul.f32 %v9042_v26, %v9042_v26 }
0x31a5   :  { %v9040_v17 = vsub.f32 %v9015_v58, %v9035_v30  ;;  %v9051_v38 = vsel %vm143_vm2, %v9044_v9, 0.0  ;;  %v9060_v46 = vsel %vm143_vm2, %v9047_v36, 0.0 }
0x31a6   :  { %9052 = vadd.xlane.f32.xlu1 %v9051_v38  ;;  %9061 = vadd.xlane.f32.xlu0 %v9060_v46  ;;  %v9020_v31 = vpop.xlane.xlu1 %9019  ;;  %v9699_v46 = vld [vmem:[%s13612_s2 + $0x348] ss:$0 sm:$0xff] }
0x31a7   :  { %v9033_v59 = vmul.f32 0.0625, %v9020_v31  ;;  %v9045_v21 = vmul.f32 %v9040_v17, %v9040_v17 }
0x31a9   :  { %v9038_v63 = vsub.f32 %v9013_v22, %v9033_v59  ;;  %v9054_v50 = vsel %vm143_vm2, %v9045_v21, 0.0 }
0x31aa   :  { %9055 = vadd.xlane.f32.xlu0 %v9054_v50 }
0x31ab   :  { %v9043_v16 = vmul.f32 %v9038_v63, %v9038_v63 }
0x31ad   :  { %v9048_v44 = vsel %vm143_vm2, %v9043_v16, 0.0 }
0x31ae   :  { %9049 = vadd.xlane.f32.xlu0 %v9048_v44 }
0x31b7   :  { %9108 = vperm.xlu1 %11049, %v9102_v35  }
0x322b   :  { %v9059_v41 = vpop.xlane.xlu1 %9058 }
0x322c   :  { %v9066_v0 = vmul.f32 0.0625, %v9059_v41 }
0x322e   :  { %v9071_v40 = vadd.f32 1e-05, %v9066_v0 }
0x322f   :  { %v9062_v48 = vpop.xlane.xlu0 %9061  ;;  %v9053_v52 = vpop.xlane.xlu1 %9052 }
0x3230   :  { %11336 = vrsqrt.f32 %v9071_v40  ;;  %v9067_v19 = vmul.f32 0.0625, %v9062_v48  ;;  %v9064_v51 = vmul.f32 0.0625, %v9053_v52 }
0x3232   :  { %v9072_v55 = vadd.f32 1e-05, %v9067_v19  ;;  %v9069_v27 = vadd.f32 1e-05, %v9064_v51 }
0x3233   :  { %v9056_v23 = vpop.xlane.xlu0 %9055 }
0x3234   :  { %11338 = vrsqrt.f32 %v9072_v55  ;;  %v9065_v57 = vmul.f32 0.0625, %v9056_v23 }
0x3235   :  { %11340 = vrsqrt.f32 %v9069_v27 }
0x3236   :  { %v9070_v18 = vadd.f32 1e-05, %v9065_v57 }
0x3237   :  { %v9050_v11 = vpop.xlane.xlu0 %9049 }
0x3238   :  { %11342 = vrsqrt.f32 %v9070_v18  ;;  %v9063_v39 = vmul.f32 0.0625, %v9050_v11 }
0x323a   :  { %v9068_v1 = vadd.f32 1e-05, %v9063_v39 }
0x323c   :  { %11344 = vrsqrt.f32 %v9068_v1 }
0x323d   :  { %v11337_v8 = vpop.eup %11336 }
0x323e   :  { %v9081_v5 = vmul.f32 %v11337_v8, %v9041_v28 }
0x3240   :  { %v9090_v4 = vmul.f32 %v9693_v54, %v9081_v5 }
0x3241   :  { %v11339_v7 = vpop.eup %11338 }
0x3242   :  { %v11341_v60 = vpop.eup %11340  ;;  %v9082_v62 = vmul.f32 %v11339_v7, %v9042_v26  ;;  %v9099_v49 = vadd.f32 %v9694_v34, %v9090_v4  ;;  %v9109_v26 = vpop.permute.xlu1 %9108 }
0x3243   :  { %v9079_v3 = vmul.f32 %v11341_v60, %v9039_v47  ;;  %v9103_v47 = vld [vmem:[%s13612_s2 + $0x338] sm:$0xff] }
0x3244   :  { %v9091_v20 = vmul.f32 %v9693_v54, %v9082_v62  ;;  %v9190_v29 = vrot.slane %v9099_v49, 4 }
0x3245   :  { %v11343_v14 = vpop.eup %11342  ;;  %v9088_v53 = vmul.f32 %v9693_v54, %v9079_v3 }
0x3246   :  { %v9080_v56 = vmul.f32 %v11343_v14, %v9040_v17  ;;  %v9100_v43 = vadd.f32 %v9694_v34, %v9091_v20 }
0x3247   :  { %v9097_v33 = vadd.f32 %v9694_v34, %v9088_v53 }
0x3248   :  { %v9192_v6 = vrot.slane %v9100_v43, 4  ;;  %v9089_v58 = vmul.f32 %v9693_v54, %v9080_v56 }
0x3249   :  { %v11345_v22 = vpop.eup %11344 }
0x324a   :  { %11024 = vmatpush3.msk.msra.mxu1 %vm1830_vm11, %v9192_v6  ;;  %v9098_v10 = vadd.f32 %v9694_v34, %v9089_v58  ;;  %v9193_v25 = vsel %vm1830_vm11, %v9190_v29, %v9192_v6  ;;  %v9078_v45 = vmul.f32 %v11345_v22, %v9038_v63 }
0x324b   :  { %11025 = vmatprep.subr.mxu1 %v11352_v12 }
0x324c   :  { %11015 = vmatpush3.msk.msra.mxu0 %vm1830_vm11, %v9098_v10  ;;  %11026 = vmatpush3.msra.mxu1 %v9193_v25  ;;  %v9189_v28 = vrot.slane %v9098_v10, 4  ;;  %v9087_v42 = vmul.f32 %v9693_v54, %v9078_v45 }
0x324d   :  { %11016 = vmatprep.subr.mxu0 %v11352_v12  ;;  %11027 = vmatprep.subr.mxu1 %v11352_v12 }
0x324e   :  { %11017 = vmatpush3.msra.mxu0 %v9097_v33  ;;  %v9191_v15 = vsel %vm1830_vm11, %v9189_v28, %v9190_v29  ;;  %v9096_v61 = vadd.f32 %v9694_v34, %v9087_v42 }
0x324f   :  { %11018 = vmatprep.subr.mxu0 %v11352_v12  ;;  %11028 = vmatpush3.msra.mxu1 %v9191_v15 }
0x3250   :  { %11019 = vmatpush3.msra.mxu0 %v9096_v61  ;;  %11030 = vmatmul.mubr.msk.f32.vlgmr.msra.gmra.mxu1 %vm2380_vm14, %v9101_v32 }
0x3251   :  { %11021 = vmatmul.mubr.msk.f32.vlgmr.msra.gmra.mxu0 %vm2380_vm14, %v9101_v32  ;;  %11032 = vmatprep.subr.mxu0 %v9104_v37 }
0x3252   :  { %11033 = vmatpush3.msra.mxu0 %v9104_v37 }
0x3253   :  { %11034 = vmatprep.subr.mxu0 %v9103_v47 }
0x3254   :  { %11035 = vmatpush3.msra.mxu0 %v9103_v47 }
0x3310   :  { %v9264_v12 = vpop.f32.mrf.mxu1 }
0x3311   :  { %v9265_v2 = vadd.f32 %v9264_v12, %v9109_v26  ;;  %v9183_v24 = vpop.f32.mrf.mxu0 }
0x3312   :  { %v9184_v30 = vadd.f32 %v9183_v24, %v9109_v26  ;;  %v11031_v9 = vpop.f32.mrf.mxu1 }
0x3313   :  { %v9269_v36 = vrot.slane %v9265_v2, 2  ;;  %v11022_v17 = vpop.f32.mrf.mxu0 }
0x3315   :  { %v9271_v38 = vsel %vm1728_vm10, %v9184_v30, %v9269_v36 }
0x3316   :  { %11036 = vmatprep.mubr.msk.f32.mxu0 %vm143_vm2, %v9271_v38 }
0x3317   :  { %11037 = vmatmul.mubr.msk.f32.vlgmr.msra.gmra.mxu0 %vm143_vm2, %v9269_v36 }
0x33d7   :  { %v11038_v31 = vpop.f32.mrf.mxu0 }
0x33d8   :  { %v9353_v59 = vadd.f32 %v11038_v31, %v9699_v46 }
0x33d9   :  { %v9347_v21 = vpop.f32.mrf.mxu0 }
0x33da   :  { %v9348_v63 = vadd.f32 %v9699_v46, %v9347_v21  ;;  %v9364_v50 = vrot.slane %v9353_v59, 4 }
0x33dc   :  { %v9363_v16 = vrot.slane %v9348_v63, 4 }
0x33de   :  { %v9365_v44 = vsel %vm1830_vm11, %v9363_v16, %v9364_v50  ;;  %v9369_v35 = vsel %vm1830_vm11, %v12976_v13, %v9363_v16 }
0x33df   :  { %9374 = vst.msk [vmem:[%s13615_s3 + $0x20] sm:$0xff] %vm35_vm1, %v9369_v35  ;;  %9375 = vst.msk [vmem:[%s13615_s3 + $0x28] sm:$0xff] %vm35_vm1, %v9365_v44 }

</bundles_post_ra>
